<compile_context>
chip_gen: v7x
topology: tpu7x:2x2x1
jax: 0.10.0
libtpu: 0.0.40
codegen_flags: <defaults>
</compile_context>

<pallas_src>
import functools

import jax
import jax.numpy as jnp
from jax.experimental import pallas as pl
from jax.experimental.pallas import tpu as pltpu


FEAT = 100352                  # = 2048 * 7 * 7, fixed by fc1
H1, H2, H3, OUT = 512, 256, 128, 2
TK = 7168                      # 100352 / 7168 = 14 grid steps; bf16 W1 tile ~7 MB


# ----------------------------------------------------------------------------
# Single fused kernel: fc1 K-reduction over the grid, everything else in the
# last-step epilogue.
# ----------------------------------------------------------------------------
def _net_kernel(seed_ref,                                   # scalar prefetch
                x_ref, w1_ref, b1_ref,
                w2_ref, b2_ref, w3_ref, b3_ref, w4_ref, b4_ref,
                o_ref, acc_ref, *, training):
    k = pl.program_id(0)

    @pl.when(k == 0)
    def _():
        acc_ref[...] = jnp.zeros_like(acc_ref)

    # fc1 partial product: bf16 x bf16 -> f32 accumulate on the MXU.
    acc_ref[...] += jnp.dot(
        x_ref[...].astype(jnp.bfloat16), w1_ref[...],
        preferred_element_type=jnp.float32)

    # Epilogue (last K step): bias+ReLU, dropout, fc2/fc3/fc4, sigmoid.
    @pl.when(k == pl.num_programs(0) - 1)
    def _():
        h = jnp.maximum(acc_ref[...] + b1_ref[...], 0.0)            # fc1+ReLU

        if training:
            # Inverted Dropout(p=0.5): counter-based hash PRNG, keep decided
            # by a full 32-bit threshold compare (no pltpu.prng_* -> also
            # works under the CPU interpret fallback).
            seed = seed_ref[0].astype(jnp.uint32)
            r = jax.lax.broadcasted_iota(jnp.int32, h.shape, 0).astype(jnp.uint32)
            c = jax.lax.broadcasted_iota(jnp.int32, h.shape, 1).astype(jnp.uint32)
            z = seed ^ (r * jnp.uint32(0x9E3779B9)) ^ (c * jnp.uint32(0x85EBCA6B))
            z = (z ^ (z >> 16)) * jnp.uint32(0x7FEB352D)
            z = (z ^ (z >> 15)) * jnp.uint32(0x846CA68B)
            z = z ^ (z >> 16)
            keep = z < jnp.uint32(0x80000000)                        # P = 0.5
            h = jnp.where(keep, h * 2.0, 0.0)

        h = jnp.maximum(
            jnp.dot(h, w2_ref[...], preferred_element_type=jnp.float32)
            + b2_ref[...], 0.0)                                      # fc2+ReLU
        h = jnp.maximum(
            jnp.dot(h, w3_ref[...], preferred_element_type=jnp.float32)
            + b3_ref[...], 0.0)                                      # fc3+ReLU
        y = (jnp.dot(h, w4_ref[...], preferred_element_type=jnp.float32)
             + b4_ref[...])                                          # fc4
        o_ref[...] = jax.nn.sigmoid(y).astype(o_ref.dtype)


def net_forward(x_feat, params, *, dropout_seed=0, training=False, tk=TK):
    """Fused FC head: y = sigmoid(fc4(relu(fc3(relu(fc2(drop(relu(fc1(x)))))))))."""
    w1, b1, w2, b2, w3, b3, w4, b4 = params
    M, K = x_feat.shape
    assert K == FEAT and K % tk == 0, (K, tk)

    # Biggest win: fc1 is pure HBM-bandwidth bound -> stream W1 as bf16.
    w1 = w1.astype(jnp.bfloat16)

    const = lambda k, s: (0, 0)   # resident-block index map (ignores prefetch)
    kernel = functools.partial(_net_kernel, training=training)

    return pl.pallas_call(
        kernel,
        out_shape=jax.ShapeDtypeStruct((M, OUT), jnp.float32),
        grid_spec=pltpu.PrefetchScalarGridSpec(
            num_scalar_prefetch=1,
            grid=(K // tk,),
            in_specs=[
                pl.BlockSpec((M, tk), lambda k, s: (0, k)),    # x chunk
                pl.BlockSpec((tk, H1), lambda k, s: (k, 0)),   # W1 (bf16 stream)
                pl.BlockSpec((1, H1), const),                  # b1
                pl.BlockSpec((H1, H2), const),                 # W2 (resident)
                pl.BlockSpec((1, H2), const),                  # b2
                pl.BlockSpec((H2, H3), const),                 # W3 (resident)
                pl.BlockSpec((1, H3), const),                  # b3
                pl.BlockSpec((H3, OUT), const),                # W4 (resident)
                pl.BlockSpec((1, OUT), const),                 # b4
            ],
            out_specs=pl.BlockSpec((M, OUT), const),
            scratch_shapes=[pltpu.VMEM((M, H1), jnp.float32)],  # fc1 accumulator
        ),
        compiler_params=pltpu.CompilerParams(
            dimension_semantics=("arbitrary",),       # K is a reduction axis
            vmem_limit_bytes=40 * 1024 * 1024,        # ~16 MB of buffers; safe on v5e/v6e/v7x
        ),
    )(jnp.asarray([dropout_seed], jnp.int32),
      x_feat, w1, b1, w2, b2, w3, b3, w4, b4)


# ----------------------------------------------------------------------------
# Parameter init (PyTorch nn.Linear default: U(-1/sqrt(fan_in), 1/sqrt(fan_in)))
# Weights stored as (in_features, out_features) so the kernel computes x @ W + b.
# ----------------------------------------------------------------------------
def init_linear(key, fan_in, fan_out):
    kw, kb = jax.random.split(key)
    bound = 1.0 / jnp.sqrt(float(fan_in))
    w = jax.random.uniform(kw, (fan_in, fan_out), jnp.float32, -bound, bound)
    b = jax.random.uniform(kb, (1, fan_out), jnp.float32, -bound, bound)
    return w, b


if __name__ == "__main__":
    BATCH = 2

    key = jax.random.PRNGKey(0)
    kx, k1, k2, k3, k4 = jax.random.split(key, 5)

    # Synthetic "flattened prenet features" (stand-in for the ResNet-50 output).
    x_feat = jax.random.normal(kx, (BATCH, FEAT), jnp.float32)

    w1, b1 = init_linear(k1, FEAT, H1)
    w2, b2 = init_linear(k2, H1, H2)
    w3, b3 = init_linear(k3, H2, H3)
    w4, b4 = init_linear(k4, H3, OUT)
    params = (w1, b1, w2, b2, w3, b3, w4, b4)

    # Eval-mode forward (dropout disabled, PyTorch .eval() semantics).
    out_eval = jax.block_until_ready(net_forward(x_feat, params, training=False))
    # Train-mode forward (fused inverted dropout in the epilogue).
    out_train = jax.block_until_ready(
        net_forward(x_feat, params, dropout_seed=123, training=True))

    for out in (out_eval, out_train):
        assert out.shape == (BATCH, OUT) and out.dtype == jnp.float32
        assert bool(jnp.all((out >= 0.0) & (out <= 1.0)))   # sigmoid range
    print("KERNEL_OK")
</pallas_src>

<mosaic_0001>
module attributes {stable_mosaic.version = 11 : i64} {
  func.func @_net_kernel(%arg0: i32, %arg1: memref<1xi32, #tpu.memory_space<smem>>, %arg2: memref<2x7168xf32, #tpu.memory_space<vmem>>, %arg3: memref<7168x512xbf16, #tpu.memory_space<vmem>>, %arg4: memref<1x512xf32, #tpu.memory_space<vmem>>, %arg5: memref<512x256xf32, #tpu.memory_space<vmem>>, %arg6: memref<1x256xf32, #tpu.memory_space<vmem>>, %arg7: memref<256x128xf32, #tpu.memory_space<vmem>>, %arg8: memref<1x128xf32, #tpu.memory_space<vmem>>, %arg9: memref<128x2xf32, #tpu.memory_space<vmem>>, %arg10: memref<1x2xf32, #tpu.memory_space<vmem>>, %arg11: memref<2x2xf32, #tpu.memory_space<vmem>>, %arg12: memref<2x512xf32, #tpu.memory_space<vmem>>) attributes {dimension_semantics = [#tpu.dimension_semantics<arbitrary>], iteration_bounds = array<i64: 14>, scalar_prefetch = 1 : i64, scratch_operands = 1 : i64, tpu.core_type = #tpu.core_type<tc>, window_params = [{transform_indices = @transform_0, window_bounds = array<i64: 2, 7168>}, {transform_indices = @transform_1, window_bounds = array<i64: 7168, 512>}, {pipeline_mode = #tpu.pipeline_mode<synchronous>, transform_indices = @transform_2, window_bounds = array<i64: 1, 512>}, {pipeline_mode = #tpu.pipeline_mode<synchronous>, transform_indices = @transform_3, window_bounds = array<i64: 512, 256>}, {pipeline_mode = #tpu.pipeline_mode<synchronous>, transform_indices = @transform_4, window_bounds = array<i64: 1, 256>}, {pipeline_mode = #tpu.pipeline_mode<synchronous>, transform_indices = @transform_5, window_bounds = array<i64: 256, 128>}, {pipeline_mode = #tpu.pipeline_mode<synchronous>, transform_indices = @transform_6, window_bounds = array<i64: 1, 128>}, {pipeline_mode = #tpu.pipeline_mode<synchronous>, transform_indices = @transform_7, window_bounds = array<i64: 128, 2>}, {pipeline_mode = #tpu.pipeline_mode<synchronous>, transform_indices = @transform_8, window_bounds = array<i64: 1, 2>}, {pipeline_mode = #tpu.pipeline_mode<synchronous>, transform_indices = @transform_9, window_bounds = array<i64: 2, 2>}]} {
    %c0_i32 = arith.constant 0 : i32
    %0 = arith.cmpi eq, %arg0, %c0_i32 : i32
    %1 = arith.extui %0 : i1 to i32
    %c0_i32_0 = arith.constant 0 : i32
    %2 = arith.cmpi ne, %1, %c0_i32_0 : i32
    scf.if %2 {
      %cst_9 = arith.constant 0.000000e+00 : f32
      %13 = vector.broadcast %cst_9 : f32 to vector<2x512xf32>
      %c0_10 = arith.constant 0 : index
      %c0_11 = arith.constant 0 : index
      %14 = vector.load %arg12[%c0_10, %c0_11] : memref<2x512xf32, #tpu.memory_space<vmem>>, vector<2x512xf32>
      tpu.vector_store %arg12[%c0_10, %c0_11], %13 {strides = array<i32>} : memref<2x512xf32, #tpu.memory_space<vmem>>, vector<2x512xf32>,
    } else {
    }
    %c0 = arith.constant 0 : index
    %c0_1 = arith.constant 0 : index
    %3 = vector.load %arg12[%c0, %c0_1] : memref<2x512xf32, #tpu.memory_space<vmem>>, vector<2x512xf32>
    %c0_2 = arith.constant 0 : index
    %c0_3 = arith.constant 0 : index
    %4 = vector.load %arg2[%c0_2, %c0_3] : memref<2x7168xf32, #tpu.memory_space<vmem>>, vector<2x7168xf32>
    %5 = arith.truncf %4 : vector<2x7168xf32> to vector<2x7168xbf16>
    %c0_4 = arith.constant 0 : index
    %c0_5 = arith.constant 0 : index
    %6 = vector.load %arg3[%c0_4, %c0_5] : memref<7168x512xbf16, #tpu.memory_space<vmem>>, vector<7168x512xbf16>
    %cst = arith.constant dense<0.000000e+00> : vector<2x512xf32>
    %7 = tpu.matmul %5, %6, %cst {dimension_numbers = #tpu.dot_dimension_numbers<[1], [0], [0], [1], [0, 0, 1, 1], [], []>} : vector<2x7168xbf16>, vector<7168x512xbf16>, vector<2x512xf32> -> vector<2x512xf32>
    %8 = arith.addf %3, %7 : vector<2x512xf32>
    %c0_6 = arith.constant 0 : index
    %c0_7 = arith.constant 0 : index
    %9 = vector.load %arg12[%c0_6, %c0_7] : memref<2x512xf32, #tpu.memory_space<vmem>>, vector<2x512xf32>
    tpu.vector_store %arg12[%c0_6, %c0_7], %8 {strides = array<i32>} : memref<2x512xf32, #tpu.memory_space<vmem>>, vector<2x512xf32>,
    %c13_i32 = arith.constant 13 : i32
    %10 = arith.cmpi eq, %arg0, %c13_i32 : i32
    %11 = arith.extui %10 : i1 to i32
    %c0_i32_8 = arith.constant 0 : i32
    %12 = arith.cmpi ne, %11, %c0_i32_8 : i32
    scf.if %12 {
      %c0_9 = arith.constant 0 : index
      %c0_10 = arith.constant 0 : index
      %13 = vector.load %arg12[%c0_9, %c0_10] : memref<2x512xf32, #tpu.memory_space<vmem>>, vector<2x512xf32>
      %c0_11 = arith.constant 0 : index
      %c0_12 = arith.constant 0 : index
      %14 = vector.load %arg4[%c0_11, %c0_12] : memref<1x512xf32, #tpu.memory_space<vmem>>, vector<1x512xf32>
      %15 = vector.broadcast %14 : vector<1x512xf32> to vector<2x512xf32>
      %16 = arith.addf %13, %15 : vector<2x512xf32>
      %cst_13 = arith.constant 0.000000e+00 : f32
      %17 = vector.broadcast %cst_13 : f32 to vector<2x512xf32>
      %18 = arith.maximumf %16, %17 : vector<2x512xf32>
      %c0_14 = arith.constant 0 : index
      %c0_15 = arith.constant 0 : index
      %19 = vector.load %arg5[%c0_14, %c0_15] : memref<512x256xf32, #tpu.memory_space<vmem>>, vector<512x256xf32>
      %cst_16 = arith.constant dense<0.000000e+00> : vector<2x256xf32>
      %20 = tpu.matmul %18, %19, %cst_16 {dimension_numbers = #tpu.dot_dimension_numbers<[1], [0], [0], [1], [0, 0, 1, 1], [], []>} : vector<2x512xf32>, vector<512x256xf32>, vector<2x256xf32> -> vector<2x256xf32>
      %c0_17 = arith.constant 0 : index
      %c0_18 = arith.constant 0 : index
      %21 = vector.load %arg6[%c0_17, %c0_18] : memref<1x256xf32, #tpu.memory_space<vmem>>, vector<1x256xf32>
      %22 = vector.broadcast %21 : vector<1x256xf32> to vector<2x256xf32>
      %23 = arith.addf %20, %22 : vector<2x256xf32>
      %cst_19 = arith.constant 0.000000e+00 : f32
      %24 = vector.broadcast %cst_19 : f32 to vector<2x256xf32>
      %25 = arith.maximumf %23, %24 : vector<2x256xf32>
      %c0_20 = arith.constant 0 : index
      %c0_21 = arith.constant 0 : index
      %26 = vector.load %arg7[%c0_20, %c0_21] : memref<256x128xf32, #tpu.memory_space<vmem>>, vector<256x128xf32>
      %cst_22 = arith.constant dense<0.000000e+00> : vector<2x128xf32>
      %27 = tpu.matmul %25, %26, %cst_22 {dimension_numbers = #tpu.dot_dimension_numbers<[1], [0], [0], [1], [0, 0, 1, 1], [], []>} : vector<2x256xf32>, vector<256x128xf32>, vector<2x128xf32> -> vector<2x128xf32>
      %c0_23 = arith.constant 0 : index
      %c0_24 = arith.constant 0 : index
      %28 = vector.load %arg8[%c0_23, %c0_24] : memref<1x128xf32, #tpu.memory_space<vmem>>, vector<1x128xf32>
      %29 = vector.broadcast %28 : vector<1x128xf32> to vector<2x128xf32>
      %30 = arith.addf %27, %29 : vector<2x128xf32>
      %cst_25 = arith.constant 0.000000e+00 : f32
      %31 = vector.broadcast %cst_25 : f32 to vector<2x128xf32>
      %32 = arith.maximumf %30, %31 : vector<2x128xf32>
      %c0_26 = arith.constant 0 : index
      %c0_27 = arith.constant 0 : index
      %33 = vector.load %arg9[%c0_26, %c0_27] : memref<128x2xf32, #tpu.memory_space<vmem>>, vector<128x2xf32>
      %cst_28 = arith.constant dense<0.000000e+00> : vector<2x2xf32>
      %34 = tpu.matmul %32, %33, %cst_28 {dimension_numbers = #tpu.dot_dimension_numbers<[1], [0], [0], [1], [0, 0, 1, 1], [], []>} : vector<2x128xf32>, vector<128x2xf32>, vector<2x2xf32> -> vector<2x2xf32>
      %c0_29 = arith.constant 0 : index
      %c0_30 = arith.constant 0 : index
      %35 = vector.load %arg10[%c0_29, %c0_30] : memref<1x2xf32, #tpu.memory_space<vmem>>, vector<1x2xf32>
      %36 = vector.broadcast %35 : vector<1x2xf32> to vector<2x2xf32>
      %37 = arith.addf %34, %36 : vector<2x2xf32>
      %38 = arith.negf %37 : vector<2x2xf32>
      %39 = math.exp %38 : vector<2x2xf32>
      %cst_31 = arith.constant 1.000000e+00 : f32
      %40 = vector.broadcast %cst_31 : f32 to vector<2x2xf32>
      %41 = arith.addf %40, %39 : vector<2x2xf32>
      %42 = arith.divf %40, %41 : vector<2x2xf32>
      %c0_32 = arith.constant 0 : index
      %c0_33 = arith.constant 0 : index
      %43 = vector.load %arg11[%c0_32, %c0_33] : memref<2x2xf32, #tpu.memory_space<vmem>>, vector<2x2xf32>
      tpu.vector_store %arg11[%c0_32, %c0_33], %42 {strides = array<i32>} : memref<2x2xf32, #tpu.memory_space<vmem>>, vector<2x2xf32>,
    } else {
    }
    return
  }
  func.func @transform_0(%arg0: i32, %arg1: memref<1xi32, #tpu.memory_space<smem>>) -> (i32, i32) {
    %c0_i32 = arith.constant 0 : i32
    %c0_i32_0 = arith.constant 0 : i32
    return %c0_i32, %arg0 : i32, i32
  }
  func.func @transform_1(%arg0: i32, %arg1: memref<1xi32, #tpu.memory_space<smem>>) -> (i32, i32) {
    %c0_i32 = arith.constant 0 : i32
    %c0_i32_0 = arith.constant 0 : i32
    return %arg0, %c0_i32 : i32, i32
  }
  func.func @transform_2(%arg0: i32, %arg1: memref<1xi32, #tpu.memory_space<smem>>) -> (i32, i32) {
    %c0_i32 = arith.constant 0 : i32
    %c0_i32_0 = arith.constant 0 : i32
    %c0_i32_1 = arith.constant 0 : i32
    return %c0_i32, %c0_i32_0 : i32, i32
  }
  func.func @transform_3(%arg0: i32, %arg1: memref<1xi32, #tpu.memory_space<smem>>) -> (i32, i32) {
    %c0_i32 = arith.constant 0 : i32
    %c0_i32_0 = arith.constant 0 : i32
    %c0_i32_1 = arith.constant 0 : i32
    return %c0_i32, %c0_i32_0 : i32, i32
  }
  func.func @transform_4(%arg0: i32, %arg1: memref<1xi32, #tpu.memory_space<smem>>) -> (i32, i32) {
    %c0_i32 = arith.constant 0 : i32
    %c0_i32_0 = arith.constant 0 : i32
    %c0_i32_1 = arith.constant 0 : i32
    return %c0_i32, %c0_i32_0 : i32, i32
  }
  func.func @transform_5(%arg0: i32, %arg1: memref<1xi32, #tpu.memory_space<smem>>) -> (i32, i32) {
    %c0_i32 = arith.constant 0 : i32
    %c0_i32_0 = arith.constant 0 : i32
    %c0_i32_1 = arith.constant 0 : i32
    return %c0_i32, %c0_i32_0 : i32, i32
  }
  func.func @transform_6(%arg0: i32, %arg1: memref<1xi32, #tpu.memory_space<smem>>) -> (i32, i32) {
    %c0_i32 = arith.constant 0 : i32
    %c0_i32_0 = arith.constant 0 : i32
    %c0_i32_1 = arith.constant 0 : i32
    return %c0_i32, %c0_i32_0 : i32, i32
  }
  func.func @transform_7(%arg0: i32, %arg1: memref<1xi32, #tpu.memory_space<smem>>) -> (i32, i32) {
    %c0_i32 = arith.constant 0 : i32
    %c0_i32_0 = arith.constant 0 : i32
    %c0_i32_1 = arith.constant 0 : i32
    return %c0_i32, %c0_i32_0 : i32, i32
  }
  func.func @transform_8(%arg0: i32, %arg1: memref<1xi32, #tpu.memory_space<smem>>) -> (i32, i32) {
    %c0_i32 = arith.constant 0 : i32
    %c0_i32_0 = arith.constant 0 : i32
    %c0_i32_1 = arith.constant 0 : i32
    return %c0_i32, %c0_i32_0 : i32, i32
  }
  func.func @transform_9(%arg0: i32, %arg1: memref<1xi32, #tpu.memory_space<smem>>) -> (i32, i32) {
    %c0_i32 = arith.constant 0 : i32
    %c0_i32_0 = arith.constant 0 : i32
    %c0_i32_1 = arith.constant 0 : i32
    return %c0_i32, %c0_i32_0 : i32, i32
  }
}

</mosaic_0001>

<bundles_post_ra>
// kernel: tpu_custom_call.1
= control target key start
LH: loop header
LB: loop body
LE: loop exit
PB: predicated region body
PF: predicated region fallthrough
CT: control target
= control target key end

     0   :  { %s22639_s0 = inlined_call_operand.<no memory space> [shape: s32[1], index: 0, kind: input, shape index: {}]   ;;  %s22640_s1 = inlined_call_operand.hbm [shape: f32[2,100352], index: 1, kind: input, shape index: {}]   ;;  %s22641_s2 = inlined_call_operand.hbm [shape: bf16[100352,512], index: 2, kind: input, shape index: {}]   ;;  %s22642_s3 = inlined_call_operand.hbm [shape: f32[1,512], index: 3, kind: input, shape index: {}]   ;;  %s22643_s4 = inlined_call_operand.hbm [shape: f32[512,256], index: 4, kind: input, shape index: {}]   ;;  %s22644_s5 = inlined_call_operand.hbm [shape: f32[1,256], index: 5, kind: input, shape index: {}]   ;;  %s22645_s6 = inlined_call_operand.hbm [shape: f32[256,128], index: 6, kind: input, shape index: {}]   ;;  %s22646_s7 = inlined_call_operand.hbm [shape: f32[1,128], index: 7, kind: input, shape index: {}]   ;;  %s22647_s8 = inlined_call_operand.vmem [shape: f32[128,2], index: 8, kind: input, shape index: {}]   ;;  %s22648_s9 = inlined_call_operand.hbm [shape: f32[1,2], index: 9, kind: input, shape index: {}]   ;;  %s22649_s10 = inlined_call_operand.hbm [shape: f32[2,2], index: 10, kind: output, shape index: {}]  }
   0x1   :  { %22655 = sst [smem:[#allocation27_spill]] %s22642_s3 }
   0x2   :  { %22656 = sst [smem:[#allocation28_spill]] %s22643_s4 }
   0x3   :  { %22657 = sst [smem:[#allocation29_spill]] %s22649_s10 }
   0x4   :  { %16 = vsyncpa [#allocation6], 0 }
   0x5   :  { %18 = vsyncpa [#allocation6 + $0x1], 0 }
   0x6   :  { %19 = vsyncpa [#allocation9], 0 }
   0x7   :  { %21 = vsyncpa [#allocation9 + $0x1], 0 }
   0x8   :  { %22 = vsyncpa [#allocation12], 0 }
   0x9   :  { %23 = vsyncpa [#allocation15], 0 }
   0xa   :  { %24 = vsyncpa [#allocation18], 0 }
   0xb   :  { %25 = vsyncpa [#allocation7], 0  ;;  %s20147_s12 = smov 0   ;;  %s20149_s13 = smov 0  }
   0xc   :  { %s20151_s14 = smov 0   ;;  %s20153_s15 = smov 0  }
   0xd LB: > { %s20074_s16 = smov [#allocation10]   ;;  %s20168_s18 = sadd.s32 4294967295, %s20072_s15   ;;  %s20072_s15 = sphi %s20153_s15, %s22682_s15   ;;  %s20068_s14 = sphi %s20151_s14, %s22681_s14   ;;  %s20064_s13 = sphi %s20149_s13, %s22680_s13   ;;  %s20060_s12 = sphi %s20147_s12, %s22679_s12  }
   0xe   : > { %s269_s17 = sshll.u32 %s20074_s16, 4  ;;  %p14615_p0 = scmp.ge.s32.totalorder %s20072_s15, 1  ;;  %s270_s17 = int_to_ptr.vmem [resolvable:$true] %s269_s17 }
   0xf   : > { %p22650_p1 = scmp.eq.s32.totalorder %s20168_s18, 0  ;;  %p256_p2 = scmp.lt.s32.totalorder %s20072_s15, 15 }
  0x10   : > { %s20075_s20 = smov [#allocation11]   ;;  %s20076_s23 = smov [#allocation14]  }
  0x11   : > { %p20174_p4 = pnand %p14615_p0, %p256_p2  ;;  %s279_s21 = sshll.u32 %s20075_s20, 4  ;;  %s20180_s21 = int_to_ptr.vmem [resolvable:$true] %s279_s21 }
  0x12   : > { %s303_s24 = sshll.u32 %s20076_s23, 4  ;;  %s22660_s3 = sld [smem:[#allocation27_spill]]  ;;  %s20188_s24 = int_to_ptr.vmem [resolvable:$true] %s303_s24 }
  0x13   : > { %s22658_s19 = scalar_select %p20174_p4, 1, 0 }
  0x14   : > { %p16965_p5 = pneg %p20174_p4 }
  0x16   : > { %p20184_p6 = pnand %p16965_p5, %p22650_p1 }
  0x18   : > { %s19760_s26 = scalar_lea.hbm %s22660_s3, 64  ;;  %p20198_p8 = pneg %p20184_p6 }
  0x19   : > { %p19761_p7 = scmp.ne.s32.totalorder %s22660_s3, %s19760_s26  ;;  %p19767_p11 = scmp.lt.u32.totalorder %s19760_s26, %s22660_s3 }
  0x1b   : > { %p19763_p9 = pnand %p20198_p8, %p19761_p7 }
  0x1d   : > { %p19764_p10 = pneg %p19763_p9 }
  0x1f   : > { %p19769_p12 = pnand %p19767_p11, %p19764_p10 }
  0x21   : > { %19772 = shalt.err (!%p19769_p12)
}
  0x22   : > { %s19773_s16 = scalar_lea.vmem %s270_s17, 64  ;;  %p19781_p5 = scmp.lt.s32.totalorder %s270_s17, %s270_s17 }
  0x23   : > { %p19774_p13 = scmp.ne.s32.totalorder %s270_s17, %s19773_s16  ;;  %p19782_p3 = scmp.lt.s32.totalorder %s19773_s16, %s19773_s16 }
  0x25   : > { %p19776_p0 = pnand %p19774_p13, %p20198_p8  ;;  %p19783_p1 = por %p19782_p3, %p19781_p5 }
  0x27   : > { %p19777_p2 = pneg %p19776_p0 }
  0x29   : > { %p19784_p4 = pnand %p19783_p1, %p19777_p2 }
  0x2b   : > { %19787 = shalt.err (!%p19784_p4)
}
  0x2c   : > { %16968 = dma.hbm_to_vmem [thread:$0]  (!%p20184_p6), %s22660_s3, 64, %s270_s17, [#allocation9]  }
  0x2d   : > { %s22662_s4 = sld [smem:[#allocation28_spill]] }
  0x33   : > { %s19788_s26 = scalar_lea.hbm %s22662_s4, 16384 }
  0x34   : > { %p19789_p7 = scmp.ne.s32.totalorder %s22662_s4, %s19788_s26  ;;  %p19795_p1 = scmp.lt.u32.totalorder %s19788_s26, %s22662_s4 }
  0x36   : > { %p19791_p9 = pnand %p19789_p7, %p20198_p8 }
  0x38   : > { %p19792_p3 = pneg %p19791_p9 }
  0x3a   : > { %p19797_p4 = pnand %p19795_p1, %p19792_p3 }
  0x3c   : > { %19800 = shalt.err (!%p19797_p4)
}
  0x3d   : > { %s19801_s17 = scalar_lea.vmem %s20180_s21, 16384  ;;  %p19809_p13 = scmp.lt.s32.totalorder %s20180_s21, %s20180_s21 }
  0x3e   : > { %p19802_p10 = scmp.ne.s32.totalorder %s20180_s21, %s19801_s17  ;;  %p19810_p0 = scmp.lt.s32.totalorder %s19801_s17, %s19801_s17 }
  0x40   : > { %p19804_p11 = pnand %p19802_p10, %p20198_p8  ;;  %p19811_p2 = por %p19810_p0, %p19809_p13 }
  0x42   : > { %p19805_p12 = pneg %p19804_p11 }
  0x44   : > { %p19812_p5 = pnand %p19811_p2, %p19805_p12 }
  0x46   : > { %19815 = shalt.err (!%p19812_p5)
}
  0x47   : > { %s22652_s16 = smov 256   ;;  %s22653_s20 = smov 16  }
  0x48   : > { %16971 = dma.hbm_to_vmem [thread:$0]  (!%p20184_p6), %s22662_s4, 16384, %s20180_s21, [#allocation12], %s22652_s16, %s22652_s16, %s22653_s20  }
  0x49   : > { %s19816_s27 = scalar_lea.hbm %s22645_s6, 4096 }
  0x4a   : > { %p19817_p7 = scmp.ne.s32.totalorder %s22645_s6, %s19816_s27  ;;  %p19823_p1 = scmp.lt.u32.totalorder %s19816_s27, %s22645_s6 }
  0x4c   : > { %p19819_p9 = pnand %p19817_p7, %p20198_p8 }
  0x4e   : > { %p19820_p3 = pneg %p19819_p9 }
  0x50   : > { %p19825_p4 = pnand %p19823_p1, %p19820_p3 }
  0x52   : > { %19828 = shalt.err (!%p19825_p4)
}
  0x53   : > { %s19829_s21 = scalar_lea.vmem %s20188_s24, 4096  ;;  %p19837_p13 = scmp.lt.s32.totalorder %s20188_s24, %s20188_s24 }
  0x54   : > { %p19830_p10 = scmp.ne.s32.totalorder %s20188_s24, %s19829_s21  ;;  %p19838_p0 = scmp.lt.s32.totalorder %s19829_s21, %s19829_s21 }
  0x56   : > { %p19832_p11 = pnand %p19830_p10, %p20198_p8  ;;  %p19839_p2 = por %p19838_p0, %p19837_p13 }
  0x58   : > { %p19833_p12 = pneg %p19832_p11 }
  0x5a   : > { %p19840_p5 = pnand %p19839_p2, %p19833_p12 }
  0x5c   : > { %19843 = shalt.err (!%p19840_p5)
}
  0x5d   : > { %s20079_s23 = smov 128   ;;  %s20080_s25 = smov 8  }
  0x5e   : > { %16977 = dma.hbm_to_vmem [thread:$0]  (!%p20184_p6), %s22645_s6, 4096, %s20188_s24, [#allocation15], %s20079_s23, %s20079_s23, %s20080_s25  }
  0x5f   : > { %s20081_s27 = smov [#allocation13]   ;;  %s20082_s30 = smov [#allocation16]  }
  0x60   : > { %s293_s28 = sshll.u32 %s20081_s27, 4  ;;  %s317_s11 = sshll.u32 %s20082_s30, 4  ;;  %s294_s28 = int_to_ptr.vmem [resolvable:$true] %s293_s28  ;;  %s318_s11 = int_to_ptr.vmem [resolvable:$true] %s317_s11 }
  0x61   : > { %s19844_s16 = scalar_lea.hbm %s22644_s5, 32 }
  0x62   : > { %p19845_p7 = scmp.ne.s32.totalorder %s22644_s5, %s19844_s16  ;;  %p19851_p1 = scmp.lt.u32.totalorder %s19844_s16, %s22644_s5 }
  0x64   : > { %p19847_p9 = pnand %p19845_p7, %p20198_p8 }
  0x66   : > { %p19848_p3 = pneg %p19847_p9 }
  0x68   : > { %p19853_p4 = pnand %p19851_p1, %p19848_p3 }
  0x6a   : > { %19856 = shalt.err (!%p19853_p4)
}
  0x6b   : > { %s19857_s24 = scalar_lea.vmem %s294_s28, 32  ;;  %p19865_p13 = scmp.lt.s32.totalorder %s294_s28, %s294_s28 }
  0x6c   : > { %p19858_p10 = scmp.ne.s32.totalorder %s294_s28, %s19857_s24  ;;  %p19866_p0 = scmp.lt.s32.totalorder %s19857_s24, %s19857_s24 }
  0x6e   : > { %p19860_p11 = pnand %p19858_p10, %p20198_p8  ;;  %p19867_p2 = por %p19866_p0, %p19865_p13 }
  0x70   : > { %p19861_p12 = pneg %p19860_p11 }
  0x72   : > { %p19868_p5 = pnand %p19867_p2, %p19861_p12 }
  0x74   : > { %19871 = shalt.err (!%p19868_p5)
}
  0x75   : > { %16974 = dma.hbm_to_vmem [thread:$0]  (!%p20184_p6), %s22644_s5, 32, %s294_s28, [#allocation12]  }
  0x76   : > { %s19872_s16 = scalar_lea.hbm %s22646_s7, 16 }
  0x77   : > { %p19873_p7 = scmp.ne.s32.totalorder %s22646_s7, %s19872_s16  ;;  %p19879_p1 = scmp.lt.u32.totalorder %s19872_s16, %s22646_s7 }
  0x79   : > { %p19875_p9 = pnand %p19873_p7, %p20198_p8 }
  0x7b   : > { %p19876_p3 = pneg %p19875_p9 }
  0x7d   : > { %p19881_p4 = pnand %p19879_p1, %p19876_p3 }
  0x7f   : > { %19884 = shalt.err (!%p19881_p4)
}
  0x80   : > { %s19885_s27 = scalar_lea.vmem %s318_s11, 16  ;;  %s19892_s28 = scalar_lea.vmem %s318_s11, 32 }
  0x81   : > { %p19886_p10 = scmp.ne.s32.totalorder %s318_s11, %s19885_s27  ;;  %p19893_p13 = scmp.lt.s32.totalorder %s318_s11, %s318_s11 }
  0x82   : > { %p19894_p0 = scmp.lt.s32.totalorder %s19892_s28, %s19885_s27 }
  0x83   : > { %p19888_p11 = pnand %p19886_p10, %p20198_p8 }
  0x84   : > { %p19895_p2 = por %p19894_p0, %p19893_p13 }
  0x85   : > { %p19889_p12 = pneg %p19888_p11 }
  0x87   : > { %p19896_p5 = pnand %p19895_p2, %p19889_p12 }
  0x89   : > { %19899 = shalt.err (!%p19896_p5)
}
  0x8a   : > { %16980 = dma.hbm_to_vmem [thread:$0]  (!%p20184_p6), %s22646_s7, 16, %s318_s11, [#allocation15]  }
  0x8b   : > { %s20083_s21 = smov [#allocation17]   ;;  %s19900_s4 = scalar_lea.hbm %s22648_s9, 16 }
  0x8c   : > { %s331_s24 = sshll.u32 %s20083_s21, 4  ;;  %p19901_p7 = scmp.ne.s32.totalorder %s22648_s9, %s19900_s4  ;;  %s332_s24 = int_to_ptr.vmem [resolvable:$true] %s331_s24 }
  0x8d   : > { %p19907_p1 = scmp.lt.u32.totalorder %s19900_s4, %s22648_s9 }
  0x8e   : > { %p19903_p9 = pnand %p19901_p7, %p20198_p8 }
  0x90   : > { %p19904_p3 = pneg %p19903_p9 }
  0x92   : > { %p19909_p4 = pnand %p19907_p1, %p19904_p3 }
  0x94   : > { %19912 = shalt.err (!%p19909_p4)
}
  0x95   : > { %s19913_s11 = scalar_lea.vmem %s332_s24, 16  ;;  %s19920_s0 = scalar_lea.vmem %s332_s24, 32 }
  0x96   : > { %p19914_p10 = scmp.ne.s32.totalorder %s332_s24, %s19913_s11  ;;  %p19921_p13 = scmp.lt.s32.totalorder %s332_s24, %s332_s24 }
  0x97   : > { %p19922_p0 = scmp.lt.s32.totalorder %s19920_s0, %s19913_s11 }
  0x98   : > { %p19916_p11 = pnand %p19914_p10, %p20198_p8 }
  0x99   : > { %p19923_p2 = por %p19922_p0, %p19921_p13 }
  0x9a   : > { %p19917_p12 = pneg %p19916_p11 }
  0x9c   : > { %p19924_p5 = pnand %p19923_p2, %p19917_p12 }
  0x9e   : > { %19927 = shalt.err (!%p19924_p5)
}
  0x9f   : > { %16983 = dma.hbm_to_vmem [thread:$0]  (!%p20184_p6), %s22648_s9, 16, %s332_s24, [#allocation18]  }
  0xa0   : > { %s20318_s29 = sadd.s32 1, %s20072_s15   ;;  %s38_s22 = sadd.s32 1, %s20068_s14 }
  0xa1   : > { %s35_s28 = ssub.s32 %s20072_s15, %s20318_s29  ;;  %p45_p8 = scmp.ne.s32.totalorder %s20068_s14, %s20064_s13 }
  0xa2   : > { %p36_p7 = scmp.eq.s32.totalorder %s35_s28, 0  ;;  %p46_p9 = scmp.eq.s32.totalorder %s20072_s15, 0 }
  0xa3   : > { %p51_p3 = scmp.ne.s32.totalorder %s20064_s13, %s20060_s12  ;;  %p16997_p1 = scmp.lt.s32.totalorder %s20072_s15, 14 }
  0xa4   : > { %s20330_s30 = scalar_select %p36_p7, %s20068_s14, %s38_s22  }
  0xa5   : > { %p47_p4 = por %p46_p9, %p45_p8  ;;  %p22663_p10 = scmp.eq.s32.totalorder %s20168_s18, 0 }
  0xa6   : > { %s20339_s21 = sand.u32 1, %s20068_s14   ;;  %s16434_s24 = smul.u32 1792, %s20072_s15 }
  0xa7   : > { %p20334_p11 = por %p22663_p10, %p51_p3  ;;  %s16929_s3 = smul.u32 112, %s20339_s21 }
  0xa8   : > { %s20346_s12 = scalar_lea.hbm %s22640_s1, %s16434_s24  ;;  %p20348_p6 = pnand %p16997_p1, %p47_p4 }
  0xa9   : > { %s16930_s16 = smul.u32 14336, %s20339_s21  ;;  %s346_s23 = scalar_lea.vmem [#allocation5], %s16929_s3 }
  0xaa   : > { %s354_s25 = sshll.u32 %s346_s23, 4  ;;  %s343_s11 = scalar_lea.sflag [#allocation6], %s20339_s21  ;;  %s20353_s25 = int_to_ptr.vmem [resolvable:$true] %s354_s25 }
  0xab   : > { %s19928_s0 = scalar_lea.hbm %s20346_s12, 1792  ;;  %p19930_p13 = pneg %p20348_p6 }
  0xac   : > { %p19929_p12 = scmp.ne.s32.totalorder %s20346_s12, %s19928_s0  ;;  %s19933_s22 = scalar_lea.hbm %s22640_s1, 25088 }
  0xad   : > { %p19934_p5 = scmp.lt.u32.totalorder %s20346_s12, %s22640_s1  ;;  %p19935_p8 = scmp.lt.u32.totalorder %s19933_s22, %s19928_s0 }
  0xae   : > { %p19931_p0 = pnand %p19930_p13, %p19929_p12  ;;  %p19937_p9 = scmp.lt.u32.totalorder %s19928_s0, %s20346_s12 }
  0xaf   : > { %p19936_p7 = por %p19935_p8, %p19934_p5 }
  0xb0   : > { %p19932_p2 = pneg %p19931_p0 }
  0xb1   : > { %p19938_p3 = por %p19937_p9, %p19936_p7 }
  0xb3   : > { %p19939_p1 = pnand %p19938_p3, %p19932_p2 }
  0xb5   : > { %19942 = shalt.err (!%p19939_p1)
}
  0xb6   : > { %s19943_s3 = scalar_lea.vmem %s20353_s25, 1792  ;;  %s20084_s20 = smov [#allocation5]  }
  0xb7   : > { %p19944_p4 = scmp.ne.s32.totalorder %s20353_s25, %s19943_s3  ;;  %s19948_s4 = sshll.u32 %s20084_s20, 4  ;;  %s19949_s4 = int_to_ptr.vmem [resolvable:$false] %s19948_s4 }
  0xb8   : > { %s19950_s23 = scalar_lea.vmem %s19949_s4, 3584  ;;  %p19951_p0 = scmp.lt.s32.totalorder %s20353_s25, %s19949_s4 }
  0xb9   : > { %p19946_p10 = pnand %p19944_p4, %p19930_p13  ;;  %p19952_p5 = scmp.lt.s32.totalorder %s19950_s23, %s19943_s3 }
  0xbb   : > { %p19947_p12 = pneg %p19946_p10  ;;  %p19953_p8 = por %p19952_p5, %p19951_p0 }
  0xbd   : > { %p19954_p7 = pnand %p19953_p8, %p19947_p12 }
  0xbf   : > { %19957 = shalt.err (!%p19954_p7)
}
  0xc0   : > { %16987 = dma.hbm_to_vmem [thread:$0]  (!%p20348_p6), %s20346_s12, 1792, %s20353_s25, %s343_s11  }
  0xc1   : > { %s365_s0 = scalar_lea.vmem [#allocation8], %s16930_s16  ;;  %s361_s27 = sand.u32 1, %s20072_s15  }
  0xc2   : > { %s373_s26 = sshll.u32 %s365_s0, 4  ;;  %s16437_s22 = smul.u32 229376, %s20072_s15  ;;  %s20384_s26 = int_to_ptr.vmem [resolvable:$true] %s373_s26 }
  0xc3   : > { %s20392_s20 = scalar_lea.sflag [#allocation9], %s361_s27  ;;  %s19963_s15 = scalar_lea.hbm %s22641_s2, 3211264 }
  0xc4   : > { %s20390_s3 = scalar_lea.hbm %s22641_s2, %s16437_s22 }
  0xc5   : > { %s19958_s4 = scalar_lea.hbm %s20390_s3, 229376  ;;  %p19964_p1 = scmp.lt.u32.totalorder %s20390_s3, %s22641_s2 }
  0xc6   : > { %p19959_p2 = scmp.ne.s32.totalorder %s20390_s3, %s19958_s4  ;;  %p19965_p4 = scmp.lt.u32.totalorder %s19963_s15, %s19958_s4 }
  0xc7   : > { %p19967_p12 = scmp.lt.u32.totalorder %s19958_s4, %s20390_s3 }
  0xc8   : > { %p19961_p9 = pnand %p19959_p2, %p19930_p13  ;;  %p19966_p10 = por %p19965_p4, %p19964_p1 }
  0xca   : > { %p19962_p3 = pneg %p19961_p9  ;;  %p19968_p0 = por %p19967_p12, %p19966_p10 }
  0xcc   : > { %p19969_p5 = pnand %p19968_p0, %p19962_p3 }
  0xce   : > { %19972 = shalt.err (!%p19969_p5)
}
  0xcf   : > { %s19973_s11 = scalar_lea.vmem %s20384_s26, 229376  ;;  %s20085_s23 = smov [#allocation8]  }
  0xd0   : > { %p19974_p8 = scmp.ne.s32.totalorder %s20384_s26, %s19973_s11  ;;  %s19978_s0 = sshll.u32 %s20085_s23, 4  ;;  %s19979_s0 = int_to_ptr.vmem [resolvable:$false] %s19978_s0 }
  0xd1   : > { %s19980_s27 = scalar_lea.vmem %s19979_s0, 458752  ;;  %p19981_p9 = scmp.lt.s32.totalorder %s20384_s26, %s19979_s0 }
  0xd2   : > { %p19976_p7 = pnand %p19974_p8, %p19930_p13  ;;  %p19982_p1 = scmp.lt.s32.totalorder %s19980_s27, %s19973_s11 }
  0xd4   : > { %p19977_p2 = pneg %p19976_p7  ;;  %p19983_p4 = por %p19982_p1, %p19981_p9 }
  0xd6   : > { %p19984_p10 = pnand %p19983_p4, %p19977_p2 }
  0xd8   : > { %19987 = shalt.err (!%p19984_p10)
}
  0xd9   : > { %s22666_s22 = smov 16   ;;  %s22667_s28 = smov 256  }
  0xda   : > { %16990 = dma.hbm_to_vmem [thread:$0]  (!%p20348_p6), %s20390_s3, 229376, %s20384_s26, %s20392_s20, %s22667_s28, %s22667_s28, %s22666_s22  }
  0xdb   : > { %p22668_p13 = scmp.ne.s32.totalorder %s22658_s19, 0 }
  0xdc   : > { %s387_s24 = sand.u32 (!%p22668_p13), 1, %s20064_s13  }
  0xdd   : > { %385 = sbr.rel (%p22668_p13) target bundleno = 3077 (0xc05), region = 56  ;;  %s388_s21 = scalar_lea.sflag (!%p22668_p13), [#allocation6], %s387_s24 }
  0xde   : > { %s16931_s4 = smul.u32 (!%p22668_p13), 112, %s387_s24 }
  0xe0   : > { %s20424_s12 = scalar_lea.vmem (!%p22668_p13), [#allocation5], %s16931_s4 }
  0xe4   : > { %20031 = dma.done.wait (%p20334_p11), %s388_s21, 1792  }
  0xe5   : > { %20033 = vsyncadd (%p20334_p11), %s388_s21, 4294965504  ;;  %s396_s10 = sand.u32 1, %s20168_s18   ;;  %s16932_s15 = smul.u32 14336, %s387_s24 }
  0xe6   : > { %s397_s26 = scalar_lea.sflag [#allocation9], %s396_s10 }
  0xe7   : > { %s20431_s3 = scalar_lea.vmem [#allocation8], %s16932_s15 }
  0xe8   : > { %20035 = dma.done.wait (%p20334_p11), %s397_s26, 229376  }
  0xe9   : > { %20037 = vsyncadd (%p20334_p11), %s397_s26, 4294737920  ;;  %p22669_p6 = scmp.eq.s32.totalorder %s20168_s18, 0 }
  0xeb   : > { %20039 = dma.done.wait (%p22669_p6), [#allocation9], 64   ;;  %p22670_p3 = pmov %p22669_p6 }
  0xed   : > { %20041 = vsyncadd (%p22670_p3), [#allocation9], 4294967232  ;;  %p22671_p12 = pmov %p22670_p3 }
  0xee   : > { %p22672_p0 = pmov %p22670_p3 }
  0xef   : > { %20043 = dma.done.wait (%p22671_p12), [#allocation12], 16416  }
  0xf0   : > { %20045 = vsyncadd (%p22672_p0), [#allocation12], 4294950880  ;;  %p22673_p5 = pmov %p22672_p0 }
  0xf1   : > { %p22674_p8 = pmov %p22672_p0 }
  0xf2   : > { %20047 = dma.done.wait (%p22673_p5), [#allocation15], 4112  }
  0xf3   : > { %20049 = vsyncadd (%p22674_p8), [#allocation15], 4294963184  ;;  %p22675_p11 = pmov %p22672_p0 }
  0xf4   : > { %p22676_p7 = pmov %p22672_p0 }
  0xf5   : > { %20051 = dma.done.wait (%p22675_p11), [#allocation18], 16  }
  0xf6   : > { %20053 = vsyncadd (%p22676_p7), [#allocation18], 4294967280  ;;  %p22677_p2 = scmp.ne.s32.totalorder %s20168_s18, 0 }
  0xf7   : > { %v20086_v0 = vmov (!%p22677_p2), 0.0  }
  0xf8   : > { %464 = sbr.rel (%p22677_p2) target bundleno = 255 (0xff), region = 92  ;;  %465 = vst [vmem:[#allocation2] sm:$0xff] (!%p22677_p2), %v20086_v0 }
  0xff PF: > { %v17054_v1 = vld [vmem:[%s20431_s3 + $0x4] ss:$16 sps:$4 sm:$0xff]   ;;  %v17056_v2 = vld [vmem:[%s20431_s3 + $0xc] ss:$16 sps:$4 sm:$0xff]   ;;  %v17058_v3 = vld [vmem:[%s20431_s3] ss:$16 sps:$4 sm:$0xff]   ;;  %v499_v39 = vlaneseq }
 0x100   : > { %11597 = vmatprep.subr.bf16.mxu0 %v17054_v1  ;;  %v17059_v4 = vld [vmem:[%s20431_s3 + $0x8] ss:$16 sps:$4 sm:$0xff]   ;;  %12745 = vmatprep.subr.bf16.mxu1 %v17056_v2  ;;  %v17060_v5 = vld [vmem:[%s20431_s3 + $0x24] ss:$16 sps:$4 sm:$0xff]   ;;  %v17062_v6 = vld [vmem:[%s20431_s3 + $0x2c] ss:$16 sps:$4 sm:$0xff]  }
 0x101   : > { %11598 = vmatpush1.bf16.msra.mxu0 %v17058_v3  ;;  %12746 = vmatpush1.bf16.msra.mxu1 %v17059_v4  ;;  %v17064_v7 = vld [vmem:[%s20431_s3 + $0x20] ss:$16 sps:$4 sm:$0xff]   ;;  %v17065_v8 = vld [vmem:[%s20431_s3 + $0x28] ss:$16 sps:$4 sm:$0xff]   ;;  %v17066_v9 = vld [vmem:[%s20431_s3 + $0x44] ss:$16 sps:$4 sm:$0xff]  }
 0x102   : > { %11599 = vmatprep.subr.bf16.mxu0 %v17060_v5  ;;  %12747 = vmatprep.subr.bf16.mxu1 %v17062_v6  ;;  %v17068_v10 = vld [vmem:[%s20431_s3 + $0x4c] ss:$16 sps:$4 sm:$0xff]   ;;  %v17070_v11 = vld [vmem:[%s20431_s3 + $0x40] ss:$16 sps:$4 sm:$0xff]   ;;  %v17071_v12 = vld [vmem:[%s20431_s3 + $0x48] ss:$16 sps:$4 sm:$0xff]  }
 0x103   : > { %v17072_v13 = vld [vmem:[%s20431_s3 + $0x64] ss:$16 sps:$4 sm:$0xff]   ;;  %v17074_v14 = vld [vmem:[%s20431_s3 + $0x6c] ss:$16 sps:$4 sm:$0xff]   ;;  %v17076_v15 = vld [vmem:[%s20431_s3 + $0x60] ss:$16 sps:$4 sm:$0xff]  }
 0x104   : > { %v17077_v16 = vld [vmem:[%s20431_s3 + $0x68] ss:$16 sps:$4 sm:$0xff]   ;;  %v17078_v17 = vld [vmem:[%s20431_s3 + $0x84] ss:$16 sps:$4 sm:$0xff]   ;;  %v17080_v18 = vld [vmem:[%s20431_s3 + $0x8c] ss:$16 sps:$4 sm:$0xff]  }
 0x105   : > { %11600 = vmatpush1.bf16.msra.mxu0 %v17064_v7  ;;  %12748 = vmatpush1.bf16.msra.mxu1 %v17065_v8  ;;  %v17082_v19 = vld [vmem:[%s20431_s3 + $0x80] ss:$16 sps:$4 sm:$0xff]   ;;  %v17083_v20 = vld [vmem:[%s20431_s3 + $0x88] ss:$16 sps:$4 sm:$0xff]   ;;  %v17084_v21 = vld [vmem:[%s20431_s3 + $0xa4] ss:$16 sps:$4 sm:$0xff]  }
 0x106   : > { %11601 = vmatprep.subr.bf16.mxu0 %v17066_v9  ;;  %12749 = vmatprep.subr.bf16.mxu1 %v17068_v10  ;;  %v17086_v22 = vld [vmem:[%s20431_s3 + $0xac] ss:$16 sps:$4 sm:$0xff]   ;;  %v17088_v23 = vld [vmem:[%s20431_s3 + $0xa0] ss:$16 sps:$4 sm:$0xff]   ;;  %v17089_v24 = vld [vmem:[%s20431_s3 + $0xa8] ss:$16 sps:$4 sm:$0xff]  }
 0x107   : > { %v17090_v25 = vld [vmem:[%s20431_s3 + $0xc4] ss:$16 sps:$4 sm:$0xff]   ;;  %v17092_v26 = vld [vmem:[%s20431_s3 + $0xcc] ss:$16 sps:$4 sm:$0xff]   ;;  %v17094_v27 = vld [vmem:[%s20431_s3 + $0xc0] ss:$16 sps:$4 sm:$0xff]  }
 0x108   : > { %v17095_v28 = vld [vmem:[%s20431_s3 + $0xc8] ss:$16 sps:$4 sm:$0xff]   ;;  %v17096_v29 = vld [vmem:[%s20431_s3 + $0xe4] ss:$16 sps:$4 sm:$0xff]   ;;  %v17098_v30 = vld [vmem:[%s20431_s3 + $0xec] ss:$16 sps:$4 sm:$0xff]  }
 0x109   : > { %11602 = vmatpush1.bf16.msra.mxu0 %v17070_v11  ;;  %12750 = vmatpush1.bf16.msra.mxu1 %v17071_v12  ;;  %v17100_v31 = vld [vmem:[%s20431_s3 + $0xe0] ss:$16 sps:$4 sm:$0xff]   ;;  %v17101_v32 = vld [vmem:[%s20431_s3 + $0xe8] ss:$16 sps:$4 sm:$0xff]   ;;  %v17102_v33 = vld [vmem:[%s20431_s3 + $0x104] ss:$16 sps:$4 sm:$0xff]  }
 0x10a   : > { %11603 = vmatprep.subr.bf16.mxu0 %v17072_v13  ;;  %12751 = vmatprep.subr.bf16.mxu1 %v17074_v14  ;;  %v17104_v34 = vld [vmem:[%s20431_s3 + $0x10c] ss:$16 sps:$4 sm:$0xff]   ;;  %v17106_v35 = vld [vmem:[%s20431_s3 + $0x100] ss:$16 sps:$4 sm:$0xff]   ;;  %v17107_v36 = vld [vmem:[%s20431_s3 + $0x108] ss:$16 sps:$4 sm:$0xff]  }
 0x10b   : > { %v20087_v37 = vmov 1983009808   ;;  %v17108_v40 = vld [vmem:[%s20431_s3 + $0x124] ss:$16 sps:$4 sm:$0xff]   ;;  %v17110_v41 = vld [vmem:[%s20431_s3 + $0x12c] ss:$16 sps:$4 sm:$0xff]  }
 0x10c   : > { %v497_v38 = vunpack.c.l.s4 %v20087_v37  ;;  %v17112_v42 = vld [vmem:[%s20431_s3 + $0x120] ss:$16 sps:$4 sm:$0xff]   ;;  %v20494_v44 = vshrl.u32 %v499_v39, 7  ;;  %v17113_v45 = vld [vmem:[%s20431_s3 + $0x128] ss:$16 sps:$4 sm:$0xff]   ;;  %p16426_p9 = scmp.ne.s32.totalorder %s20168_s18, 13 }
 0x10d   : > { %11604 = vmatpush1.bf16.msra.mxu0 %v17076_v15  ;;  %12752 = vmatpush1.bf16.msra.mxu1 %v17077_v16  ;;  %v17114_v46 = vld [vmem:[%s20431_s3 + $0x144] ss:$16 sps:$4 sm:$0xff]   ;;  %v17116_v47 = vld [vmem:[%s20431_s3 + $0x14c] ss:$16 sps:$4 sm:$0xff]   ;;  %v17118_v48 = vld [vmem:[%s20431_s3 + $0x140] ss:$16 sps:$4 sm:$0xff]  }
 0x10e   : > { %11605 = vmatprep.subr.bf16.mxu0 %v17078_v17  ;;  %12753 = vmatprep.subr.bf16.mxu1 %v17080_v18  ;;  %v498_v43 = vunpack.c.0.s8 %v497_v38  ;;  %v17119_v49 = vld [vmem:[%s20431_s3 + $0x148] ss:$16 sps:$4 sm:$0xff]   ;;  %v17120_v51 = vld [vmem:[%s20431_s3 + $0x164] ss:$16 sps:$4 sm:$0xff]   ;;  %v17122_v52 = vld [vmem:[%s20431_s3 + $0x16c] ss:$16 sps:$4 sm:$0xff]  }
 0x10f   : > { %v467_v53 = vld [vmem:[%s20424_s12] sm:$0xff]  ;;  %v17125_v56 = vld [vmem:[%s20431_s3 + $0x168] ss:$16 sps:$4 sm:$0xff]   ;;  %v17128_v58 = vld [vmem:[%s20431_s3 + $0x18c] ss:$16 sps:$4 sm:$0xff]   ;;  %vm20089_vm0 = vmmov (!%p16426_p9), 0  }
 0x110   : > { %v20502_v50 = vsub.s32 %v498_v43, %v20494_v44  ;;  %v17124_v54 = vld [vmem:[%s20431_s3 + $0x160] ss:$16 sps:$4 sm:$0xff]   ;;  %v17126_v57 = vld [vmem:[%s20431_s3 + $0x184] ss:$16 sps:$4 sm:$0xff]   ;;  %v17131_v62 = vld [vmem:[%s20431_s3 + $0x188] ss:$16 sps:$4 sm:$0xff]   ;;  %v495_v5 = vcombine.high %v467_v53, %v467_v53 }
 0x111   : > { %11606 = vmatpush1.bf16.msra.mxu0 %v17082_v19  ;;  %12754 = vmatpush1.bf16.msra.mxu1 %v17083_v20  ;;  %v17130_v60 = vld [vmem:[%s20431_s3 + $0x180] ss:$16 sps:$4 sm:$0xff]   ;;  %v17132_v63 = vld [vmem:[%s20431_s3 + $0x1a4] ss:$16 sps:$4 sm:$0xff]   ;;  %v17134_v0 = vld [vmem:[%s20431_s3 + $0x1ac] ss:$16 sps:$4 sm:$0xff]  }
 0x112   : > { %11607 = vmatprep.subr.bf16.mxu0 %v17084_v21  ;;  %12755 = vmatprep.subr.bf16.mxu1 %v17086_v22  ;;  %v502_v55 = vrot.slane %v467_v53, %v20502_v50  ;;  %v17136_v1 = vld [vmem:[%s20431_s3 + $0x1a0] ss:$16 sps:$4 sm:$0xff]   ;;  %v17137_v2 = vld [vmem:[%s20431_s3 + $0x1a8] ss:$16 sps:$4 sm:$0xff]   ;;  %v17138_v3 = vld [vmem:[%s20431_s3 + $0x1c4] ss:$16 sps:$4 sm:$0xff]   ;;  %v20525_v10 = vrot.slane %v495_v5, %v20502_v50 }
 0x113   : > { %v17140_v4 = vld [vmem:[%s20431_s3 + $0x1cc] ss:$16 sps:$4 sm:$0xff]   ;;  %v17142_v6 = vld [vmem:[%s20431_s3 + $0x1c0] ss:$16 sps:$4 sm:$0xff]   ;;  %v17143_v7 = vld [vmem:[%s20431_s3 + $0x1c8] ss:$16 sps:$4 sm:$0xff]  }
 0x114   : > { %v510_v59 = vcombine.high %v502_v55, %v502_v55  ;;  %v17144_v8 = vld [vmem:[%s20431_s3 + $0x1e4] ss:$16 sps:$4 sm:$0xff]   ;;  %v17146_v9 = vld [vmem:[%s20431_s3 + $0x1ec] ss:$16 sps:$4 sm:$0xff]   ;;  %v17148_v11 = vld [vmem:[%s20431_s3 + $0x1e0] ss:$16 sps:$4 sm:$0xff]   ;;  %v511_v15 = vcombine.high %v20525_v10, %v20525_v10  ;;  %v789_v17 = vpack.c.bf16 %v502_v55, %v502_v55 }
 0x115   : > { %11608 = vmatpush1.bf16.msra.mxu0 %v17088_v23  ;;  %12756 = vmatpush1.bf16.msra.mxu1 %v17089_v24  ;;  %v17149_v12 = vld [vmem:[%s20431_s3 + $0x1e8] ss:$16 sps:$4 sm:$0xff]   ;;  %v17153_v13 = vld [vmem:[%s20431_s3 + $0x204] ss:$16 sps:$4 sm:$0xff]   ;;  %v17156_v14 = vld [vmem:[%s20431_s3 + $0x20c] ss:$16 sps:$4 sm:$0xff]  }
 0x116   : > { %11609 = vmatprep.subr.bf16.mxu0 %v17090_v25  ;;  %12757 = vmatprep.subr.bf16.mxu1 %v17092_v26  ;;  %v790_v61 = vpack.c.bf16 %v510_v59, %v510_v59  ;;  %v17151_v16 = vld [vmem:[%s20431_s3 + $0x200] ss:$16 sps:$4 sm:$0xff]   ;;  %v17154_v18 = vld [vmem:[%s20431_s3 + $0x208] ss:$16 sps:$4 sm:$0xff]   ;;  %v17159_v19 = vld [vmem:[%s20431_s3 + $0x224] ss:$16 sps:$4 sm:$0xff]   ;;  %v792_v21 = vpack.c.bf16 %v511_v15, %v511_v15 }
 0x117   : > { %v17162_v20 = vld [vmem:[%s20431_s3 + $0x22c] ss:$16 sps:$4 sm:$0xff]   ;;  %v17157_v22 = vld [vmem:[%s20431_s3 + $0x220] ss:$16 sps:$4 sm:$0xff]   ;;  %v17160_v23 = vld [vmem:[%s20431_s3 + $0x228] ss:$16 sps:$4 sm:$0xff]  }
 0x118   : > { %11629 = vmatprep.mubr.bf16.mxu0 %v790_v61  ;;  %12777 = vmatprep.mubr.bf16.mxu1 %v790_v61  ;;  %v17165_v24 = vld [vmem:[%s20431_s3 + $0x244] ss:$16 sps:$4 sm:$0xff]   ;;  %v17168_v25 = vld [vmem:[%s20431_s3 + $0x24c] ss:$16 sps:$4 sm:$0xff]   ;;  %v17163_v26 = vld [vmem:[%s20431_s3 + $0x240] ss:$16 sps:$4 sm:$0xff]  }
 0x119   : > { %11610 = vmatpush1.bf16.msra.mxu0 %v17094_v27  ;;  %12758 = vmatpush1.bf16.msra.mxu1 %v17095_v28  ;;  %v17166_v27 = vld [vmem:[%s20431_s3 + $0x248] ss:$16 sps:$4 sm:$0xff]   ;;  %v17171_v28 = vld [vmem:[%s20431_s3 + $0x264] ss:$16 sps:$4 sm:$0xff]   ;;  %v17186_v37 = vld [vmem:[%s20431_s3 + $0x2ac] ss:$16 sps:$4 sm:$0xff]  }
 0x11a   : > { %11611 = vmatprep.subr.bf16.mxu0 %v17096_v29  ;;  %12759 = vmatprep.subr.bf16.mxu1 %v17098_v30  ;;  %v17174_v29 = vld [vmem:[%s20431_s3 + $0x26c] ss:$16 sps:$4 sm:$0xff]   ;;  %v17169_v30 = vld [vmem:[%s20431_s3 + $0x260] ss:$16 sps:$4 sm:$0xff]   ;;  %v17184_v39 = vld [vmem:[%s20431_s3 + $0x2a8] ss:$16 sps:$4 sm:$0xff]  }
 0x11b   : > { %v17181_v38 = vld [vmem:[%s20431_s3 + $0x2a0] ss:$16 sps:$4 sm:$0xff]   ;;  %v17190_v43 = vld [vmem:[%s20431_s3 + $0x2c8] ss:$16 sps:$4 sm:$0xff]   ;;  %v17210_v55 = vld [vmem:[%s20431_s3 + $0x32c] ss:$16 sps:$4 sm:$0xff]  }
 0x11c   : > { %v17202_v53 = vld [vmem:[%s20431_s3 + $0x308] ss:$16 sps:$4 sm:$0xff]   ;;  %v17216_v59 = vld [vmem:[%s20431_s3 + $0x34c] ss:$16 sps:$4 sm:$0xff]   ;;  %v17243_v15 = vld [vmem:[%s20431_s3 + $0x3e4] ss:$16 sps:$4 sm:$0xff]  }
 0x11d   : > { %11612 = vmatpush1.bf16.msra.mxu0 %v17100_v31  ;;  %12760 = vmatpush1.bf16.msra.mxu1 %v17101_v32  ;;  %v17172_v31 = vld [vmem:[%s20431_s3 + $0x268] ss:$16 sps:$4 sm:$0xff]   ;;  %v17177_v32 = vld [vmem:[%s20431_s3 + $0x284] ss:$16 sps:$4 sm:$0xff]   ;;  %vm14475_vm1 = vcmask (!%p16426_p9), 9216  }
 0x11e   : > { %11613 = vmatprep.subr.bf16.mxu0 %v17102_v33  ;;  %12761 = vmatprep.subr.bf16.mxu1 %v17104_v34  ;;  %v17180_v33 = vld [vmem:[%s20431_s3 + $0x28c] ss:$16 sps:$4 sm:$0xff]   ;;  %v17175_v34 = vld [vmem:[%s20431_s3 + $0x280] ss:$16 sps:$4 sm:$0xff]   ;;  %v17214_v61 = vld [vmem:[%s20431_s3 + $0x348] ss:$16 sps:$4 sm:$0xff]  }
 0x11f   : > { %v17226_v5 = vld [vmem:[%s20431_s3 + $0x388] ss:$16 sps:$4 sm:$0xff]  }
 0x121   : > { %11614 = vmatpush1.bf16.msra.mxu0 %v17106_v35  ;;  %12762 = vmatpush1.bf16.msra.mxu1 %v17107_v36  ;;  %v17178_v35 = vld [vmem:[%s20431_s3 + $0x288] ss:$16 sps:$4 sm:$0xff]   ;;  %v17183_v36 = vld [vmem:[%s20431_s3 + $0x2a4] ss:$16 sps:$4 sm:$0xff]  }
 0x122   : > { %11615 = vmatprep.subr.bf16.mxu0 %v17108_v40  ;;  %12763 = vmatprep.subr.bf16.mxu1 %v17110_v41  ;;  %v17189_v40 = vld [vmem:[%s20431_s3 + $0x2c4] ss:$16 sps:$4 sm:$0xff]   ;;  %v17192_v41 = vld [vmem:[%s20431_s3 + $0x2cc] ss:$16 sps:$4 sm:$0xff]  }
 0x125   : > { %11616 = vmatpush1.bf16.msra.mxu0 %v17112_v42  ;;  %12764 = vmatpush1.bf16.msra.mxu1 %v17113_v45  ;;  %v17187_v42 = vld [vmem:[%s20431_s3 + $0x2c0] ss:$16 sps:$4 sm:$0xff]   ;;  %v17195_v45 = vld [vmem:[%s20431_s3 + $0x2e4] ss:$16 sps:$4 sm:$0xff]  }
 0x126   : > { %11617 = vmatprep.subr.bf16.mxu0 %v17114_v46  ;;  %12765 = vmatprep.subr.bf16.mxu1 %v17116_v47  ;;  %v17198_v46 = vld [vmem:[%s20431_s3 + $0x2ec] ss:$16 sps:$4 sm:$0xff]   ;;  %v17193_v47 = vld [vmem:[%s20431_s3 + $0x2e0] ss:$16 sps:$4 sm:$0xff]  }
 0x129   : > { %11618 = vmatpush1.bf16.msra.mxu0 %v17118_v48  ;;  %12766 = vmatpush1.bf16.msra.mxu1 %v17119_v49  ;;  %v17196_v48 = vld [vmem:[%s20431_s3 + $0x2e8] ss:$16 sps:$4 sm:$0xff]   ;;  %v17201_v49 = vld [vmem:[%s20431_s3 + $0x304] ss:$16 sps:$4 sm:$0xff]  }
 0x12a   : > { %11619 = vmatprep.subr.bf16.mxu0 %v17120_v51  ;;  %12767 = vmatprep.subr.bf16.mxu1 %v17122_v52  ;;  %v17204_v51 = vld [vmem:[%s20431_s3 + $0x30c] ss:$16 sps:$4 sm:$0xff]   ;;  %v17199_v52 = vld [vmem:[%s20431_s3 + $0x300] ss:$16 sps:$4 sm:$0xff]  }
 0x12d   : > { %11620 = vmatpush1.bf16.msra.mxu0 %v17124_v54  ;;  %12768 = vmatpush1.bf16.msra.mxu1 %v17125_v56  ;;  %v17207_v54 = vld [vmem:[%s20431_s3 + $0x324] ss:$16 sps:$4 sm:$0xff]   ;;  %v17205_v56 = vld [vmem:[%s20431_s3 + $0x320] ss:$16 sps:$4 sm:$0xff]  }
 0x12e   : > { %11621 = vmatprep.subr.bf16.mxu0 %v17126_v57  ;;  %12769 = vmatprep.subr.bf16.mxu1 %v17128_v58  ;;  %v17208_v57 = vld [vmem:[%s20431_s3 + $0x328] ss:$16 sps:$4 sm:$0xff]   ;;  %v17213_v58 = vld [vmem:[%s20431_s3 + $0x344] ss:$16 sps:$4 sm:$0xff]  }
 0x131   : > { %11622 = vmatpush1.bf16.msra.mxu0 %v17130_v60  ;;  %12770 = vmatpush1.bf16.msra.mxu1 %v17131_v62  ;;  %v17211_v60 = vld [vmem:[%s20431_s3 + $0x340] ss:$16 sps:$4 sm:$0xff]   ;;  %v17219_v62 = vld [vmem:[%s20431_s3 + $0x364] ss:$16 sps:$4 sm:$0xff]  }
 0x132   : > { %11623 = vmatprep.subr.bf16.mxu0 %v17132_v63  ;;  %12771 = vmatprep.subr.bf16.mxu1 %v17134_v0  ;;  %v17222_v63 = vld [vmem:[%s20431_s3 + $0x36c] ss:$16 sps:$4 sm:$0xff]   ;;  %v17217_v0 = vld [vmem:[%s20431_s3 + $0x360] ss:$16 sps:$4 sm:$0xff]  }
 0x135   : > { %11624 = vmatpush1.bf16.msra.mxu0 %v17136_v1  ;;  %12772 = vmatpush1.bf16.msra.mxu1 %v17137_v2  ;;  %v17220_v1 = vld [vmem:[%s20431_s3 + $0x368] ss:$16 sps:$4 sm:$0xff]   ;;  %v17225_v2 = vld [vmem:[%s20431_s3 + $0x384] ss:$16 sps:$4 sm:$0xff]  }
 0x136   : > { %11625 = vmatprep.subr.bf16.mxu0 %v17138_v3  ;;  %12773 = vmatprep.subr.bf16.mxu1 %v17140_v4  ;;  %v17228_v3 = vld [vmem:[%s20431_s3 + $0x38c] ss:$16 sps:$4 sm:$0xff]   ;;  %v17223_v4 = vld [vmem:[%s20431_s3 + $0x380] ss:$16 sps:$4 sm:$0xff]  }
 0x139   : > { %11626 = vmatpush1.bf16.msra.mxu0 %v17142_v6  ;;  %12774 = vmatpush1.bf16.msra.mxu1 %v17143_v7  ;;  %v17231_v6 = vld [vmem:[%s20431_s3 + $0x3a4] ss:$16 sps:$4 sm:$0xff]   ;;  %v17234_v7 = vld [vmem:[%s20431_s3 + $0x3ac] ss:$16 sps:$4 sm:$0xff]  }
 0x13a   : > { %11627 = vmatprep.subr.bf16.mxu0 %v17144_v8  ;;  %12775 = vmatprep.subr.bf16.mxu1 %v17146_v9  ;;  %v17229_v8 = vld [vmem:[%s20431_s3 + $0x3a0] ss:$16 sps:$4 sm:$0xff]   ;;  %v17232_v9 = vld [vmem:[%s20431_s3 + $0x3a8] ss:$16 sps:$4 sm:$0xff]  }
 0x13d   : > { %11628 = vmatpush1.bf16.msra.mxu0 %v17148_v11  ;;  %12776 = vmatpush1.bf16.msra.mxu1 %v17149_v12  ;;  %v17237_v11 = vld [vmem:[%s20431_s3 + $0x3c4] ss:$16 sps:$4 sm:$0xff]   ;;  %v17240_v12 = vld [vmem:[%s20431_s3 + $0x3cc] ss:$16 sps:$4 sm:$0xff]  }
 0x13e   : > { %11638 = vmatprep.subr.bf16.mxu0 %v17153_v13  ;;  %12786 = vmatprep.subr.bf16.mxu1 %v17156_v14  ;;  %v17235_v13 = vld [vmem:[%s20431_s3 + $0x3c0] ss:$16 sps:$4 sm:$0xff]   ;;  %v17238_v14 = vld [vmem:[%s20431_s3 + $0x3c8] ss:$16 sps:$4 sm:$0xff]  }
 0x140   : > { %11630 = vmatmul.mubr.bf16.vlgmr.msra.gmra.mrb[0].mxu0 %v789_v17  ;;  %12778 = vmatmul.mubr.bf16.vlgmr.msra.gmra.mrb[0].mxu1 %v789_v17  ;;  %v17241_v17 = vld [vmem:[%s20431_s3 + $0x3e0] ss:$16 sps:$4 sm:$0xff]  }
 0x141   : > { %11639 = vmatpush1.bf16.msra.mxu0 %v17151_v16  ;;  %12787 = vmatpush1.bf16.msra.mxu1 %v17154_v18  ;;  %v17246_v16 = vld [vmem:[%s20431_s3 + $0x3ec] ss:$16 sps:$4 sm:$0xff]   ;;  %v17244_v18 = vld [vmem:[%s20431_s3 + $0x3e8] ss:$16 sps:$4 sm:$0xff]  }
 0x142   : > { %11640 = vmatprep.subr.bf16.mxu0 %v17159_v19  ;;  %12788 = vmatprep.subr.bf16.mxu1 %v17162_v20  ;;  %v17249_v19 = vld [vmem:[%s20431_s3 + $0x404] ss:$16 sps:$4 sm:$0xff]   ;;  %v17252_v20 = vld [vmem:[%s20431_s3 + $0x40c] ss:$16 sps:$4 sm:$0xff]  }
 0x143   : > { %11670 = vmatprep.mubr.bf16.mxu0 %v792_v21  ;;  %12818 = vmatprep.mubr.bf16.mxu1 %v792_v21  ;;  %v17247_v21 = vld [vmem:[%s20431_s3 + $0x400] ss:$16 sps:$4 sm:$0xff]  }
 0x145   : > { %11641 = vmatpush1.bf16.msra.mxu0 %v17157_v22  ;;  %12789 = vmatpush1.bf16.msra.mxu1 %v17160_v23  ;;  %v791_v22 = vpack.c.bf16 %v20525_v10, %v20525_v10  ;;  %v17250_v23 = vld [vmem:[%s20431_s3 + $0x408] ss:$16 sps:$4 sm:$0xff]  }
 0x146   : > { %11642 = vmatprep.subr.bf16.mxu0 %v17165_v24  ;;  %12790 = vmatprep.subr.bf16.mxu1 %v17168_v25  ;;  %v20602_v24 = vld [vmem:[%s20424_s12 + $0x8] sm:$0xff]  ;;  %v17255_v25 = vld [vmem:[%s20431_s3 + $0x424] ss:$16 sps:$4 sm:$0xff]  }
 0x149   : > { %11643 = vmatpush1.bf16.msra.mxu0 %v17163_v26  ;;  %12791 = vmatpush1.bf16.msra.mxu1 %v17166_v27  ;;  %v17258_v26 = vld [vmem:[%s20431_s3 + $0x42c] ss:$16 sps:$4 sm:$0xff]   ;;  %v20608_v27 = vrot.slane %v20602_v24, %v20502_v50 }
 0x14a   : > { %11644 = vmatprep.subr.bf16.mxu0 %v17171_v28  ;;  %12792 = vmatprep.subr.bf16.mxu1 %v17174_v29  ;;  %v17253_v28 = vld [vmem:[%s20431_s3 + $0x420] ss:$16 sps:$4 sm:$0xff]   ;;  %v17256_v29 = vld [vmem:[%s20431_s3 + $0x428] ss:$16 sps:$4 sm:$0xff]  }
 0x14b   : > { %v527_v10 = vcombine.high %v20608_v27, %v20608_v27 }
 0x14d   : > { %11645 = vmatpush1.bf16.msra.mxu0 %v17169_v30  ;;  %12793 = vmatpush1.bf16.msra.mxu1 %v17172_v31  ;;  %v17261_v30 = vld [vmem:[%s20431_s3 + $0x444] ss:$16 sps:$4 sm:$0xff]   ;;  %v17264_v31 = vld [vmem:[%s20431_s3 + $0x44c] ss:$16 sps:$4 sm:$0xff]  }
 0x14e   : > { %11646 = vmatprep.subr.bf16.mxu0 %v17177_v32  ;;  %12794 = vmatprep.subr.bf16.mxu1 %v17180_v33  ;;  %v794_v32 = vpack.c.bf16 %v527_v10, %v527_v10  ;;  %v17259_v33 = vld [vmem:[%s20431_s3 + $0x440] ss:$16 sps:$4 sm:$0xff]   ;;  %v17340_v10 = vld [vmem:[%s20431_s3 + $0x5e8] ss:$16 sps:$4 sm:$0xff]  }
 0x151   : > { %11647 = vmatpush1.bf16.msra.mxu0 %v17175_v34  ;;  %12795 = vmatpush1.bf16.msra.mxu1 %v17178_v35  ;;  %v17262_v34 = vld [vmem:[%s20431_s3 + $0x448] ss:$16 sps:$4 sm:$0xff]   ;;  %v17267_v35 = vld [vmem:[%s20431_s3 + $0x464] ss:$16 sps:$4 sm:$0xff]  }
 0x152   : > { %11648 = vmatprep.subr.bf16.mxu0 %v17183_v36  ;;  %12796 = vmatprep.subr.bf16.mxu1 %v17186_v37  ;;  %v17270_v36 = vld [vmem:[%s20431_s3 + $0x46c] ss:$16 sps:$4 sm:$0xff]   ;;  %v17265_v37 = vld [vmem:[%s20431_s3 + $0x460] ss:$16 sps:$4 sm:$0xff]  }
 0x155   : > { %11649 = vmatpush1.bf16.msra.mxu0 %v17181_v38  ;;  %12797 = vmatpush1.bf16.msra.mxu1 %v17184_v39  ;;  %v17268_v38 = vld [vmem:[%s20431_s3 + $0x468] ss:$16 sps:$4 sm:$0xff]   ;;  %v17273_v39 = vld [vmem:[%s20431_s3 + $0x484] ss:$16 sps:$4 sm:$0xff]  }
 0x156   : > { %11650 = vmatprep.subr.bf16.mxu0 %v17189_v40  ;;  %12798 = vmatprep.subr.bf16.mxu1 %v17192_v41  ;;  %v17276_v40 = vld [vmem:[%s20431_s3 + $0x48c] ss:$16 sps:$4 sm:$0xff]   ;;  %v17271_v41 = vld [vmem:[%s20431_s3 + $0x480] ss:$16 sps:$4 sm:$0xff]  }
 0x159   : > { %11651 = vmatpush1.bf16.msra.mxu0 %v17187_v42  ;;  %12799 = vmatpush1.bf16.msra.mxu1 %v17190_v43  ;;  %v17274_v42 = vld [vmem:[%s20431_s3 + $0x488] ss:$16 sps:$4 sm:$0xff]   ;;  %v17279_v43 = vld [vmem:[%s20431_s3 + $0x4a4] ss:$16 sps:$4 sm:$0xff]  }
 0x15a   : > { %11652 = vmatprep.subr.bf16.mxu0 %v17195_v45  ;;  %12800 = vmatprep.subr.bf16.mxu1 %v17198_v46  ;;  %v17282_v45 = vld [vmem:[%s20431_s3 + $0x4ac] ss:$16 sps:$4 sm:$0xff]   ;;  %v17277_v46 = vld [vmem:[%s20431_s3 + $0x4a0] ss:$16 sps:$4 sm:$0xff]  }
 0x15d   : > { %11653 = vmatpush1.bf16.msra.mxu0 %v17193_v47  ;;  %12801 = vmatpush1.bf16.msra.mxu1 %v17196_v48  ;;  %v17280_v47 = vld [vmem:[%s20431_s3 + $0x4a8] ss:$16 sps:$4 sm:$0xff]   ;;  %v17285_v48 = vld [vmem:[%s20431_s3 + $0x4c4] ss:$16 sps:$4 sm:$0xff]  }
 0x15e   : > { %11654 = vmatprep.subr.bf16.mxu0 %v17201_v49  ;;  %12802 = vmatprep.subr.bf16.mxu1 %v17204_v51  ;;  %v17288_v49 = vld [vmem:[%s20431_s3 + $0x4cc] ss:$16 sps:$4 sm:$0xff]   ;;  %v17283_v51 = vld [vmem:[%s20431_s3 + $0x4c0] ss:$16 sps:$4 sm:$0xff]  }
 0x161   : > { %11655 = vmatpush1.bf16.msra.mxu0 %v17199_v52  ;;  %12803 = vmatpush1.bf16.msra.mxu1 %v17202_v53  ;;  %v17286_v52 = vld [vmem:[%s20431_s3 + $0x4c8] ss:$16 sps:$4 sm:$0xff]   ;;  %v17291_v53 = vld [vmem:[%s20431_s3 + $0x4e4] ss:$16 sps:$4 sm:$0xff]  }
 0x162   : > { %11656 = vmatprep.subr.bf16.mxu0 %v17207_v54  ;;  %12804 = vmatprep.subr.bf16.mxu1 %v17210_v55  ;;  %v17294_v54 = vld [vmem:[%s20431_s3 + $0x4ec] ss:$16 sps:$4 sm:$0xff]   ;;  %v17289_v55 = vld [vmem:[%s20431_s3 + $0x4e0] ss:$16 sps:$4 sm:$0xff]  }
 0x165   : > { %11657 = vmatpush1.bf16.msra.mxu0 %v17205_v56  ;;  %12805 = vmatpush1.bf16.msra.mxu1 %v17208_v57  ;;  %v17292_v56 = vld [vmem:[%s20431_s3 + $0x4e8] ss:$16 sps:$4 sm:$0xff]   ;;  %v17297_v57 = vld [vmem:[%s20431_s3 + $0x504] ss:$16 sps:$4 sm:$0xff]  }
 0x166   : > { %11658 = vmatprep.subr.bf16.mxu0 %v17213_v58  ;;  %12806 = vmatprep.subr.bf16.mxu1 %v17216_v59  ;;  %v17300_v58 = vld [vmem:[%s20431_s3 + $0x50c] ss:$16 sps:$4 sm:$0xff]   ;;  %v17295_v59 = vld [vmem:[%s20431_s3 + $0x500] ss:$16 sps:$4 sm:$0xff]  }
 0x169   : > { %11659 = vmatpush1.bf16.msra.mxu0 %v17211_v60  ;;  %12807 = vmatpush1.bf16.msra.mxu1 %v17214_v61  ;;  %v17298_v60 = vld [vmem:[%s20431_s3 + $0x508] ss:$16 sps:$4 sm:$0xff]   ;;  %v17303_v61 = vld [vmem:[%s20431_s3 + $0x524] ss:$16 sps:$4 sm:$0xff]  }
 0x16a   : > { %11660 = vmatprep.subr.bf16.mxu0 %v17219_v62  ;;  %12808 = vmatprep.subr.bf16.mxu1 %v17222_v63  ;;  %v17306_v62 = vld [vmem:[%s20431_s3 + $0x52c] ss:$16 sps:$4 sm:$0xff]   ;;  %v17301_v63 = vld [vmem:[%s20431_s3 + $0x520] ss:$16 sps:$4 sm:$0xff]  }
 0x16d   : > { %11661 = vmatpush1.bf16.msra.mxu0 %v17217_v0  ;;  %12809 = vmatpush1.bf16.msra.mxu1 %v17220_v1  ;;  %v17304_v0 = vld [vmem:[%s20431_s3 + $0x528] ss:$16 sps:$4 sm:$0xff]   ;;  %v17309_v1 = vld [vmem:[%s20431_s3 + $0x544] ss:$16 sps:$4 sm:$0xff]  }
 0x16e   : > { %11662 = vmatprep.subr.bf16.mxu0 %v17225_v2  ;;  %12810 = vmatprep.subr.bf16.mxu1 %v17228_v3  ;;  %v17312_v2 = vld [vmem:[%s20431_s3 + $0x54c] ss:$16 sps:$4 sm:$0xff]   ;;  %v17307_v3 = vld [vmem:[%s20431_s3 + $0x540] ss:$16 sps:$4 sm:$0xff]  }
 0x171   : > { %11663 = vmatpush1.bf16.msra.mxu0 %v17223_v4  ;;  %12811 = vmatpush1.bf16.msra.mxu1 %v17226_v5  ;;  %v17310_v4 = vld [vmem:[%s20431_s3 + $0x548] ss:$16 sps:$4 sm:$0xff]   ;;  %v17315_v5 = vld [vmem:[%s20431_s3 + $0x564] ss:$16 sps:$4 sm:$0xff]  }
 0x172   : > { %11664 = vmatprep.subr.bf16.mxu0 %v17231_v6  ;;  %12812 = vmatprep.subr.bf16.mxu1 %v17234_v7  ;;  %v17318_v6 = vld [vmem:[%s20431_s3 + $0x56c] ss:$16 sps:$4 sm:$0xff]   ;;  %v17313_v7 = vld [vmem:[%s20431_s3 + $0x560] ss:$16 sps:$4 sm:$0xff]  }
 0x175   : > { %11665 = vmatpush1.bf16.msra.mxu0 %v17229_v8  ;;  %12813 = vmatpush1.bf16.msra.mxu1 %v17232_v9  ;;  %v17316_v8 = vld [vmem:[%s20431_s3 + $0x568] ss:$16 sps:$4 sm:$0xff]   ;;  %v17321_v9 = vld [vmem:[%s20431_s3 + $0x584] ss:$16 sps:$4 sm:$0xff]  }
 0x176   : > { %11666 = vmatprep.subr.bf16.mxu0 %v17237_v11  ;;  %12814 = vmatprep.subr.bf16.mxu1 %v17240_v12  ;;  %v17324_v11 = vld [vmem:[%s20431_s3 + $0x58c] ss:$16 sps:$4 sm:$0xff]   ;;  %v17319_v12 = vld [vmem:[%s20431_s3 + $0x580] ss:$16 sps:$4 sm:$0xff]  }
 0x179   : > { %11667 = vmatpush1.bf16.msra.mxu0 %v17235_v13  ;;  %12815 = vmatpush1.bf16.msra.mxu1 %v17238_v14  ;;  %v17322_v13 = vld [vmem:[%s20431_s3 + $0x588] ss:$16 sps:$4 sm:$0xff]   ;;  %v17327_v14 = vld [vmem:[%s20431_s3 + $0x5a4] ss:$16 sps:$4 sm:$0xff]  }
 0x17a   : > { %11668 = vmatprep.subr.bf16.mxu0 %v17243_v15  ;;  %12816 = vmatprep.subr.bf16.mxu1 %v17246_v16  ;;  %v17330_v15 = vld [vmem:[%s20431_s3 + $0x5ac] ss:$16 sps:$4 sm:$0xff]   ;;  %v17325_v16 = vld [vmem:[%s20431_s3 + $0x5a0] ss:$16 sps:$4 sm:$0xff]  }
 0x17d   : > { %11669 = vmatpush1.bf16.msra.mxu0 %v17241_v17  ;;  %12817 = vmatpush1.bf16.msra.mxu1 %v17244_v18  ;;  %v17328_v17 = vld [vmem:[%s20431_s3 + $0x5a8] ss:$16 sps:$4 sm:$0xff]   ;;  %v17333_v18 = vld [vmem:[%s20431_s3 + $0x5c4] ss:$16 sps:$4 sm:$0xff]  }
 0x17e   : > { %11679 = vmatprep.subr.bf16.mxu0 %v17249_v19  ;;  %12827 = vmatprep.subr.bf16.mxu1 %v17252_v20  ;;  %v17336_v19 = vld [vmem:[%s20431_s3 + $0x5cc] ss:$16 sps:$4 sm:$0xff]   ;;  %v512_v20 = vcombine.high %v20602_v24, %v20602_v24  ;;  %v17337_v24 = vld [vmem:[%s20431_s3 + $0x5e0] ss:$16 sps:$4 sm:$0xff]  }
 0x180   : > { %11671 = vmatmul.mubr.bf16.vlgmr.msra.gmra.mrb[0].mxu0 %v791_v22  ;;  %12819 = vmatmul.mubr.bf16.vlgmr.msra.gmra.mrb[0].mxu1 %v791_v22  ;;  %v17334_v22 = vld [vmem:[%s20431_s3 + $0x5c8] ss:$16 sps:$4 sm:$0xff]  }
 0x181   : > { %11680 = vmatpush1.bf16.msra.mxu0 %v17247_v21  ;;  %12828 = vmatpush1.bf16.msra.mxu1 %v17250_v23  ;;  %v17331_v21 = vld [vmem:[%s20431_s3 + $0x5c0] ss:$16 sps:$4 sm:$0xff]   ;;  %v17339_v23 = vld [vmem:[%s20431_s3 + $0x5e4] ss:$16 sps:$4 sm:$0xff]  }
 0x182   : > { %11681 = vmatprep.subr.bf16.mxu0 %v17255_v25  ;;  %12829 = vmatprep.subr.bf16.mxu1 %v17258_v26  ;;  %v17342_v25 = vld [vmem:[%s20431_s3 + $0x5ec] ss:$16 sps:$4 sm:$0xff]   ;;  %v20671_v26 = vrot.slane %v512_v20, %v20502_v50  ;;  %v17418_v20 = vld [vmem:[%s20431_s3 + $0x788] ss:$16 sps:$4 sm:$0xff]  }
 0x183   : > { %11711 = vmatprep.mubr.bf16.mxu0 %v794_v32  ;;  %12859 = vmatprep.mubr.bf16.mxu1 %v794_v32  ;;  %v17343_v32 = vld [vmem:[%s20431_s3 + $0x600] ss:$16 sps:$4 sm:$0xff]  }
 0x185   : > { %11682 = vmatpush1.bf16.msra.mxu0 %v17253_v28  ;;  %12830 = vmatpush1.bf16.msra.mxu1 %v17256_v29  ;;  %v17345_v28 = vld [vmem:[%s20431_s3 + $0x604] ss:$16 sps:$4 sm:$0xff]   ;;  %v17348_v29 = vld [vmem:[%s20431_s3 + $0x60c] ss:$16 sps:$4 sm:$0xff]  }
 0x186   : > { %11683 = vmatprep.subr.bf16.mxu0 %v17261_v30  ;;  %12831 = vmatprep.subr.bf16.mxu1 %v17264_v31  ;;  %v528_v30 = vcombine.high %v20671_v26, %v20671_v26  ;;  %v793_v31 = vpack.c.bf16 %v20608_v27, %v20608_v27  ;;  %v17349_v27 = vld [vmem:[%s20431_s3 + $0x620] ss:$16 sps:$4 sm:$0xff]  }
 0x189   : > { %11684 = vmatpush1.bf16.msra.mxu0 %v17259_v33  ;;  %12832 = vmatpush1.bf16.msra.mxu1 %v17262_v34  ;;  %v17346_v33 = vld [vmem:[%s20431_s3 + $0x608] ss:$16 sps:$4 sm:$0xff]   ;;  %v17351_v34 = vld [vmem:[%s20431_s3 + $0x624] ss:$16 sps:$4 sm:$0xff]  }
 0x18a   : > { %11685 = vmatprep.subr.bf16.mxu0 %v17267_v35  ;;  %12833 = vmatprep.subr.bf16.mxu1 %v17270_v36  ;;  %v17354_v35 = vld [vmem:[%s20431_s3 + $0x62c] ss:$16 sps:$4 sm:$0xff]   ;;  %v796_v36 = vpack.c.bf16 %v528_v30, %v528_v30  ;;  %v17430_v30 = vld [vmem:[%s20431_s3 + $0x7c8] ss:$16 sps:$4 sm:$0xff]  }
 0x18d   : > { %11686 = vmatpush1.bf16.msra.mxu0 %v17265_v37  ;;  %12834 = vmatpush1.bf16.msra.mxu1 %v17268_v38  ;;  %v17352_v37 = vld [vmem:[%s20431_s3 + $0x628] ss:$16 sps:$4 sm:$0xff]   ;;  %v17357_v38 = vld [vmem:[%s20431_s3 + $0x644] ss:$16 sps:$4 sm:$0xff]  }
 0x18e   : > { %11687 = vmatprep.subr.bf16.mxu0 %v17273_v39  ;;  %12835 = vmatprep.subr.bf16.mxu1 %v17276_v40  ;;  %v17360_v39 = vld [vmem:[%s20431_s3 + $0x64c] ss:$16 sps:$4 sm:$0xff]   ;;  %v17355_v40 = vld [vmem:[%s20431_s3 + $0x640] ss:$16 sps:$4 sm:$0xff]  }
 0x191   : > { %11688 = vmatpush1.bf16.msra.mxu0 %v17271_v41  ;;  %12836 = vmatpush1.bf16.msra.mxu1 %v17274_v42  ;;  %v17358_v41 = vld [vmem:[%s20431_s3 + $0x648] ss:$16 sps:$4 sm:$0xff]   ;;  %v17363_v42 = vld [vmem:[%s20431_s3 + $0x664] ss:$16 sps:$4 sm:$0xff]  }
 0x192   : > { %11689 = vmatprep.subr.bf16.mxu0 %v17279_v43  ;;  %12837 = vmatprep.subr.bf16.mxu1 %v17282_v45  ;;  %v17366_v43 = vld [vmem:[%s20431_s3 + $0x66c] ss:$16 sps:$4 sm:$0xff]   ;;  %v17361_v45 = vld [vmem:[%s20431_s3 + $0x660] ss:$16 sps:$4 sm:$0xff]  }
 0x195   : > { %11690 = vmatpush1.bf16.msra.mxu0 %v17277_v46  ;;  %12838 = vmatpush1.bf16.msra.mxu1 %v17280_v47  ;;  %v17364_v46 = vld [vmem:[%s20431_s3 + $0x668] ss:$16 sps:$4 sm:$0xff]   ;;  %v17369_v47 = vld [vmem:[%s20431_s3 + $0x684] ss:$16 sps:$4 sm:$0xff]  }
 0x196   : > { %11691 = vmatprep.subr.bf16.mxu0 %v17285_v48  ;;  %12839 = vmatprep.subr.bf16.mxu1 %v17288_v49  ;;  %v17372_v48 = vld [vmem:[%s20431_s3 + $0x68c] ss:$16 sps:$4 sm:$0xff]   ;;  %v17367_v49 = vld [vmem:[%s20431_s3 + $0x680] ss:$16 sps:$4 sm:$0xff]  }
 0x199   : > { %11692 = vmatpush1.bf16.msra.mxu0 %v17283_v51  ;;  %12840 = vmatpush1.bf16.msra.mxu1 %v17286_v52  ;;  %v17370_v51 = vld [vmem:[%s20431_s3 + $0x688] ss:$16 sps:$4 sm:$0xff]   ;;  %v17375_v52 = vld [vmem:[%s20431_s3 + $0x6a4] ss:$16 sps:$4 sm:$0xff]  }
 0x19a   : > { %11693 = vmatprep.subr.bf16.mxu0 %v17291_v53  ;;  %12841 = vmatprep.subr.bf16.mxu1 %v17294_v54  ;;  %v17378_v53 = vld [vmem:[%s20431_s3 + $0x6ac] ss:$16 sps:$4 sm:$0xff]   ;;  %v17373_v54 = vld [vmem:[%s20431_s3 + $0x6a0] ss:$16 sps:$4 sm:$0xff]  }
 0x19d   : > { %11694 = vmatpush1.bf16.msra.mxu0 %v17289_v55  ;;  %12842 = vmatpush1.bf16.msra.mxu1 %v17292_v56  ;;  %v17376_v55 = vld [vmem:[%s20431_s3 + $0x6a8] ss:$16 sps:$4 sm:$0xff]   ;;  %v17381_v56 = vld [vmem:[%s20431_s3 + $0x6c4] ss:$16 sps:$4 sm:$0xff]  }
 0x19e   : > { %11695 = vmatprep.subr.bf16.mxu0 %v17297_v57  ;;  %12843 = vmatprep.subr.bf16.mxu1 %v17300_v58  ;;  %v17384_v57 = vld [vmem:[%s20431_s3 + $0x6cc] ss:$16 sps:$4 sm:$0xff]   ;;  %v17379_v58 = vld [vmem:[%s20431_s3 + $0x6c0] ss:$16 sps:$4 sm:$0xff]  }
 0x1a1   : > { %11696 = vmatpush1.bf16.msra.mxu0 %v17295_v59  ;;  %12844 = vmatpush1.bf16.msra.mxu1 %v17298_v60  ;;  %v17382_v59 = vld [vmem:[%s20431_s3 + $0x6c8] ss:$16 sps:$4 sm:$0xff]   ;;  %v17387_v60 = vld [vmem:[%s20431_s3 + $0x6e4] ss:$16 sps:$4 sm:$0xff]  }
 0x1a2   : > { %11697 = vmatprep.subr.bf16.mxu0 %v17303_v61  ;;  %12845 = vmatprep.subr.bf16.mxu1 %v17306_v62  ;;  %v17390_v61 = vld [vmem:[%s20431_s3 + $0x6ec] ss:$16 sps:$4 sm:$0xff]   ;;  %v17385_v62 = vld [vmem:[%s20431_s3 + $0x6e0] ss:$16 sps:$4 sm:$0xff]  }
 0x1a5   : > { %11698 = vmatpush1.bf16.msra.mxu0 %v17301_v63  ;;  %12846 = vmatpush1.bf16.msra.mxu1 %v17304_v0  ;;  %v17388_v63 = vld [vmem:[%s20431_s3 + $0x6e8] ss:$16 sps:$4 sm:$0xff]   ;;  %v17393_v0 = vld [vmem:[%s20431_s3 + $0x704] ss:$16 sps:$4 sm:$0xff]  }
 0x1a6   : > { %11699 = vmatprep.subr.bf16.mxu0 %v17309_v1  ;;  %12847 = vmatprep.subr.bf16.mxu1 %v17312_v2  ;;  %v17396_v1 = vld [vmem:[%s20431_s3 + $0x70c] ss:$16 sps:$4 sm:$0xff]   ;;  %v17391_v2 = vld [vmem:[%s20431_s3 + $0x700] ss:$16 sps:$4 sm:$0xff]  }
 0x1a9   : > { %11700 = vmatpush1.bf16.msra.mxu0 %v17307_v3  ;;  %12848 = vmatpush1.bf16.msra.mxu1 %v17310_v4  ;;  %v17394_v3 = vld [vmem:[%s20431_s3 + $0x708] ss:$16 sps:$4 sm:$0xff]   ;;  %v17399_v4 = vld [vmem:[%s20431_s3 + $0x724] ss:$16 sps:$4 sm:$0xff]  }
 0x1aa   : > { %11701 = vmatprep.subr.bf16.mxu0 %v17315_v5  ;;  %12849 = vmatprep.subr.bf16.mxu1 %v17318_v6  ;;  %v17402_v5 = vld [vmem:[%s20431_s3 + $0x72c] ss:$16 sps:$4 sm:$0xff]   ;;  %v17397_v6 = vld [vmem:[%s20431_s3 + $0x720] ss:$16 sps:$4 sm:$0xff]  }
 0x1ad   : > { %11702 = vmatpush1.bf16.msra.mxu0 %v17313_v7  ;;  %12850 = vmatpush1.bf16.msra.mxu1 %v17316_v8  ;;  %v17400_v7 = vld [vmem:[%s20431_s3 + $0x728] ss:$16 sps:$4 sm:$0xff]   ;;  %v17405_v8 = vld [vmem:[%s20431_s3 + $0x744] ss:$16 sps:$4 sm:$0xff]  }
 0x1ae   : > { %11703 = vmatprep.subr.bf16.mxu0 %v17321_v9  ;;  %12851 = vmatprep.subr.bf16.mxu1 %v17324_v11  ;;  %v17408_v9 = vld [vmem:[%s20431_s3 + $0x74c] ss:$16 sps:$4 sm:$0xff]   ;;  %v17403_v11 = vld [vmem:[%s20431_s3 + $0x740] ss:$16 sps:$4 sm:$0xff]  }
 0x1b1   : > { %11704 = vmatpush1.bf16.msra.mxu0 %v17319_v12  ;;  %12852 = vmatpush1.bf16.msra.mxu1 %v17322_v13  ;;  %v17406_v12 = vld [vmem:[%s20431_s3 + $0x748] ss:$16 sps:$4 sm:$0xff]   ;;  %v17411_v13 = vld [vmem:[%s20431_s3 + $0x764] ss:$16 sps:$4 sm:$0xff]  }
 0x1b2   : > { %11705 = vmatprep.subr.bf16.mxu0 %v17327_v14  ;;  %12853 = vmatprep.subr.bf16.mxu1 %v17330_v15  ;;  %v17414_v14 = vld [vmem:[%s20431_s3 + $0x76c] ss:$16 sps:$4 sm:$0xff]   ;;  %v17409_v15 = vld [vmem:[%s20431_s3 + $0x760] ss:$16 sps:$4 sm:$0xff]  }
 0x1b5   : > { %11706 = vmatpush1.bf16.msra.mxu0 %v17325_v16  ;;  %12854 = vmatpush1.bf16.msra.mxu1 %v17328_v17  ;;  %v17412_v16 = vld [vmem:[%s20431_s3 + $0x768] ss:$16 sps:$4 sm:$0xff]   ;;  %v17417_v17 = vld [vmem:[%s20431_s3 + $0x784] ss:$16 sps:$4 sm:$0xff]  }
 0x1b6   : > { %11707 = vmatprep.subr.bf16.mxu0 %v17333_v18  ;;  %12855 = vmatprep.subr.bf16.mxu1 %v17336_v19  ;;  %v17420_v18 = vld [vmem:[%s20431_s3 + $0x78c] ss:$16 sps:$4 sm:$0xff]   ;;  %v17415_v19 = vld [vmem:[%s20431_s3 + $0x780] ss:$16 sps:$4 sm:$0xff]  }
 0x1b9   : > { %11708 = vmatpush1.bf16.msra.mxu0 %v17331_v21  ;;  %12856 = vmatpush1.bf16.msra.mxu1 %v17334_v22  ;;  %v17423_v21 = vld [vmem:[%s20431_s3 + $0x7a4] ss:$16 sps:$4 sm:$0xff]   ;;  %v17426_v22 = vld [vmem:[%s20431_s3 + $0x7ac] ss:$16 sps:$4 sm:$0xff]  }
 0x1ba   : > { %11709 = vmatprep.subr.bf16.mxu0 %v17339_v23  ;;  %12857 = vmatprep.subr.bf16.mxu1 %v17342_v25  ;;  %v17421_v23 = vld [vmem:[%s20431_s3 + $0x7a0] ss:$16 sps:$4 sm:$0xff]   ;;  %v17424_v25 = vld [vmem:[%s20431_s3 + $0x7a8] ss:$16 sps:$4 sm:$0xff]  }
 0x1bd   : > { %11710 = vmatpush1.bf16.msra.mxu0 %v17337_v24  ;;  %12858 = vmatpush1.bf16.msra.mxu1 %v17340_v10  ;;  %v17429_v24 = vld [vmem:[%s20431_s3 + $0x7c4] ss:$16 sps:$4 sm:$0xff]   ;;  %v17432_v10 = vld [vmem:[%s20431_s3 + $0x7cc] ss:$16 sps:$4 sm:$0xff]  }
 0x1be   : > { %11720 = vmatprep.subr.bf16.mxu0 %v17345_v28  ;;  %12868 = vmatprep.subr.bf16.mxu1 %v17348_v29  ;;  %v17427_v28 = vld [vmem:[%s20431_s3 + $0x7c0] ss:$16 sps:$4 sm:$0xff]  }
 0x1bf   : > { %v20739_v29 = vld [vmem:[%s20424_s12 + $0x10] sm:$0xff] }
 0x1c0   : > { %11712 = vmatmul.mubr.bf16.vlgmr.msra.gmra.mrb[0].mxu0 %v793_v31  ;;  %12860 = vmatmul.mubr.bf16.vlgmr.msra.gmra.mrb[0].mxu1 %v793_v31  ;;  %v17435_v31 = vld [vmem:[%s20431_s3 + $0x7e4] ss:$16 sps:$4 sm:$0xff]  }
 0x1c1   : > { %11721 = vmatpush1.bf16.msra.mxu0 %v17343_v32  ;;  %12869 = vmatpush1.bf16.msra.mxu1 %v17346_v33  ;;  %v17438_v32 = vld [vmem:[%s20431_s3 + $0x7ec] ss:$16 sps:$4 sm:$0xff]   ;;  %v20746_v33 = vrot.slane %v20739_v29, %v20502_v50 }
 0x1c2   : > { %11722 = vmatprep.subr.bf16.mxu0 %v17351_v34  ;;  %12870 = vmatprep.subr.bf16.mxu1 %v17354_v35  ;;  %v17433_v34 = vld [vmem:[%s20431_s3 + $0x7e0] ss:$16 sps:$4 sm:$0xff]   ;;  %v17436_v35 = vld [vmem:[%s20431_s3 + $0x7e8] ss:$16 sps:$4 sm:$0xff]  }
 0x1c3   : > { %11752 = vmatprep.mubr.bf16.mxu0 %v796_v36  ;;  %12900 = vmatprep.mubr.bf16.mxu1 %v796_v36  ;;  %v17442_v36 = vld [vmem:[%s20431_s3 + $0x804] ss:$16 sps:$4 sm:$0xff]  }
 0x1c5   : > { %11723 = vmatpush1.bf16.msra.mxu0 %v17349_v27  ;;  %12871 = vmatpush1.bf16.msra.mxu1 %v17352_v37  ;;  %v17445_v27 = vld [vmem:[%s20431_s3 + $0x80c] ss:$16 sps:$4 sm:$0xff]   ;;  %v544_v37 = vcombine.high %v20746_v33, %v20746_v33 }
 0x1c6   : > { %11724 = vmatprep.subr.bf16.mxu0 %v17357_v38  ;;  %12872 = vmatprep.subr.bf16.mxu1 %v17360_v39  ;;  %v17440_v38 = vld [vmem:[%s20431_s3 + $0x800] ss:$16 sps:$4 sm:$0xff]   ;;  %v795_v39 = vpack.c.bf16 %v20671_v26, %v20671_v26  ;;  %v17454_v26 = vld [vmem:[%s20431_s3 + $0x844] ss:$16 sps:$4 sm:$0xff]  }
 0x1c9   : > { %11725 = vmatpush1.bf16.msra.mxu0 %v17355_v40  ;;  %12873 = vmatpush1.bf16.msra.mxu1 %v17358_v41  ;;  %v17443_v40 = vld [vmem:[%s20431_s3 + $0x808] ss:$16 sps:$4 sm:$0xff]   ;;  %v17448_v41 = vld [vmem:[%s20431_s3 + $0x824] ss:$16 sps:$4 sm:$0xff]  }
 0x1ca   : > { %11726 = vmatprep.subr.bf16.mxu0 %v17363_v42  ;;  %12874 = vmatprep.subr.bf16.mxu1 %v17366_v43  ;;  %v17451_v42 = vld [vmem:[%s20431_s3 + $0x82c] ss:$16 sps:$4 sm:$0xff]   ;;  %v798_v43 = vpack.c.bf16 %v544_v37, %v544_v37  ;;  %v17524_v37 = vld [vmem:[%s20431_s3 + $0x9c0] ss:$16 sps:$4 sm:$0xff]  }
 0x1cd   : > { %11727 = vmatpush1.bf16.msra.mxu0 %v17361_v45  ;;  %12875 = vmatpush1.bf16.msra.mxu1 %v17364_v46  ;;  %v17446_v45 = vld [vmem:[%s20431_s3 + $0x820] ss:$16 sps:$4 sm:$0xff]   ;;  %v17449_v46 = vld [vmem:[%s20431_s3 + $0x828] ss:$16 sps:$4 sm:$0xff]  }
 0x1ce   : > { %11728 = vmatprep.subr.bf16.mxu0 %v17369_v47  ;;  %12876 = vmatprep.subr.bf16.mxu1 %v17372_v48  ;;  %v17457_v47 = vld [vmem:[%s20431_s3 + $0x84c] ss:$16 sps:$4 sm:$0xff]   ;;  %v17452_v48 = vld [vmem:[%s20431_s3 + $0x840] ss:$16 sps:$4 sm:$0xff]  }
 0x1d1   : > { %11729 = vmatpush1.bf16.msra.mxu0 %v17367_v49  ;;  %12877 = vmatpush1.bf16.msra.mxu1 %v17370_v51  ;;  %v17455_v49 = vld [vmem:[%s20431_s3 + $0x848] ss:$16 sps:$4 sm:$0xff]   ;;  %v17460_v51 = vld [vmem:[%s20431_s3 + $0x864] ss:$16 sps:$4 sm:$0xff]  }
 0x1d2   : > { %11730 = vmatprep.subr.bf16.mxu0 %v17375_v52  ;;  %12878 = vmatprep.subr.bf16.mxu1 %v17378_v53  ;;  %v17463_v52 = vld [vmem:[%s20431_s3 + $0x86c] ss:$16 sps:$4 sm:$0xff]   ;;  %v17458_v53 = vld [vmem:[%s20431_s3 + $0x860] ss:$16 sps:$4 sm:$0xff]  }
 0x1d5   : > { %11731 = vmatpush1.bf16.msra.mxu0 %v17373_v54  ;;  %12879 = vmatpush1.bf16.msra.mxu1 %v17376_v55  ;;  %v17461_v54 = vld [vmem:[%s20431_s3 + $0x868] ss:$16 sps:$4 sm:$0xff]   ;;  %v17466_v55 = vld [vmem:[%s20431_s3 + $0x884] ss:$16 sps:$4 sm:$0xff]  }
 0x1d6   : > { %11732 = vmatprep.subr.bf16.mxu0 %v17381_v56  ;;  %12880 = vmatprep.subr.bf16.mxu1 %v17384_v57  ;;  %v17469_v56 = vld [vmem:[%s20431_s3 + $0x88c] ss:$16 sps:$4 sm:$0xff]   ;;  %v17464_v57 = vld [vmem:[%s20431_s3 + $0x880] ss:$16 sps:$4 sm:$0xff]  }
 0x1d9   : > { %11733 = vmatpush1.bf16.msra.mxu0 %v17379_v58  ;;  %12881 = vmatpush1.bf16.msra.mxu1 %v17382_v59  ;;  %v17467_v58 = vld [vmem:[%s20431_s3 + $0x888] ss:$16 sps:$4 sm:$0xff]   ;;  %v17472_v59 = vld [vmem:[%s20431_s3 + $0x8a4] ss:$16 sps:$4 sm:$0xff]  }
 0x1da   : > { %11734 = vmatprep.subr.bf16.mxu0 %v17387_v60  ;;  %12882 = vmatprep.subr.bf16.mxu1 %v17390_v61  ;;  %v17475_v60 = vld [vmem:[%s20431_s3 + $0x8ac] ss:$16 sps:$4 sm:$0xff]   ;;  %v17470_v61 = vld [vmem:[%s20431_s3 + $0x8a0] ss:$16 sps:$4 sm:$0xff]  }
 0x1dd   : > { %11735 = vmatpush1.bf16.msra.mxu0 %v17385_v62  ;;  %12883 = vmatpush1.bf16.msra.mxu1 %v17388_v63  ;;  %v17473_v62 = vld [vmem:[%s20431_s3 + $0x8a8] ss:$16 sps:$4 sm:$0xff]   ;;  %v17478_v63 = vld [vmem:[%s20431_s3 + $0x8c4] ss:$16 sps:$4 sm:$0xff]  }
 0x1de   : > { %11736 = vmatprep.subr.bf16.mxu0 %v17393_v0  ;;  %12884 = vmatprep.subr.bf16.mxu1 %v17396_v1  ;;  %v17481_v0 = vld [vmem:[%s20431_s3 + $0x8cc] ss:$16 sps:$4 sm:$0xff]   ;;  %v17476_v1 = vld [vmem:[%s20431_s3 + $0x8c0] ss:$16 sps:$4 sm:$0xff]  }
 0x1e1   : > { %11737 = vmatpush1.bf16.msra.mxu0 %v17391_v2  ;;  %12885 = vmatpush1.bf16.msra.mxu1 %v17394_v3  ;;  %v17479_v2 = vld [vmem:[%s20431_s3 + $0x8c8] ss:$16 sps:$4 sm:$0xff]   ;;  %v17484_v3 = vld [vmem:[%s20431_s3 + $0x8e4] ss:$16 sps:$4 sm:$0xff]  }
 0x1e2   : > { %11738 = vmatprep.subr.bf16.mxu0 %v17399_v4  ;;  %12886 = vmatprep.subr.bf16.mxu1 %v17402_v5  ;;  %v17487_v4 = vld [vmem:[%s20431_s3 + $0x8ec] ss:$16 sps:$4 sm:$0xff]   ;;  %v17482_v5 = vld [vmem:[%s20431_s3 + $0x8e0] ss:$16 sps:$4 sm:$0xff]  }
 0x1e5   : > { %11739 = vmatpush1.bf16.msra.mxu0 %v17397_v6  ;;  %12887 = vmatpush1.bf16.msra.mxu1 %v17400_v7  ;;  %v17485_v6 = vld [vmem:[%s20431_s3 + $0x8e8] ss:$16 sps:$4 sm:$0xff]   ;;  %v17490_v7 = vld [vmem:[%s20431_s3 + $0x904] ss:$16 sps:$4 sm:$0xff]  }
 0x1e6   : > { %11740 = vmatprep.subr.bf16.mxu0 %v17405_v8  ;;  %12888 = vmatprep.subr.bf16.mxu1 %v17408_v9  ;;  %v17493_v8 = vld [vmem:[%s20431_s3 + $0x90c] ss:$16 sps:$4 sm:$0xff]   ;;  %v17488_v9 = vld [vmem:[%s20431_s3 + $0x900] ss:$16 sps:$4 sm:$0xff]  }
 0x1e9   : > { %11741 = vmatpush1.bf16.msra.mxu0 %v17403_v11  ;;  %12889 = vmatpush1.bf16.msra.mxu1 %v17406_v12  ;;  %v17491_v11 = vld [vmem:[%s20431_s3 + $0x908] ss:$16 sps:$4 sm:$0xff]   ;;  %v17496_v12 = vld [vmem:[%s20431_s3 + $0x924] ss:$16 sps:$4 sm:$0xff]  }
 0x1ea   : > { %11742 = vmatprep.subr.bf16.mxu0 %v17411_v13  ;;  %12890 = vmatprep.subr.bf16.mxu1 %v17414_v14  ;;  %v17499_v13 = vld [vmem:[%s20431_s3 + $0x92c] ss:$16 sps:$4 sm:$0xff]   ;;  %v17494_v14 = vld [vmem:[%s20431_s3 + $0x920] ss:$16 sps:$4 sm:$0xff]  }
 0x1ed   : > { %11743 = vmatpush1.bf16.msra.mxu0 %v17409_v15  ;;  %12891 = vmatpush1.bf16.msra.mxu1 %v17412_v16  ;;  %v17497_v15 = vld [vmem:[%s20431_s3 + $0x928] ss:$16 sps:$4 sm:$0xff]   ;;  %v17502_v16 = vld [vmem:[%s20431_s3 + $0x944] ss:$16 sps:$4 sm:$0xff]  }
 0x1ee   : > { %11744 = vmatprep.subr.bf16.mxu0 %v17417_v17  ;;  %12892 = vmatprep.subr.bf16.mxu1 %v17420_v18  ;;  %v17505_v17 = vld [vmem:[%s20431_s3 + $0x94c] ss:$16 sps:$4 sm:$0xff]   ;;  %v17500_v18 = vld [vmem:[%s20431_s3 + $0x940] ss:$16 sps:$4 sm:$0xff]  }
 0x1f1   : > { %11745 = vmatpush1.bf16.msra.mxu0 %v17415_v19  ;;  %12893 = vmatpush1.bf16.msra.mxu1 %v17418_v20  ;;  %v17503_v19 = vld [vmem:[%s20431_s3 + $0x948] ss:$16 sps:$4 sm:$0xff]   ;;  %v17508_v20 = vld [vmem:[%s20431_s3 + $0x964] ss:$16 sps:$4 sm:$0xff]  }
 0x1f2   : > { %11746 = vmatprep.subr.bf16.mxu0 %v17423_v21  ;;  %12894 = vmatprep.subr.bf16.mxu1 %v17426_v22  ;;  %v17511_v21 = vld [vmem:[%s20431_s3 + $0x96c] ss:$16 sps:$4 sm:$0xff]   ;;  %v17506_v22 = vld [vmem:[%s20431_s3 + $0x960] ss:$16 sps:$4 sm:$0xff]  }
 0x1f5   : > { %11747 = vmatpush1.bf16.msra.mxu0 %v17421_v23  ;;  %12895 = vmatpush1.bf16.msra.mxu1 %v17424_v25  ;;  %v17509_v23 = vld [vmem:[%s20431_s3 + $0x968] ss:$16 sps:$4 sm:$0xff]   ;;  %v17514_v25 = vld [vmem:[%s20431_s3 + $0x984] ss:$16 sps:$4 sm:$0xff]  }
 0x1f6   : > { %11748 = vmatprep.subr.bf16.mxu0 %v17429_v24  ;;  %12896 = vmatprep.subr.bf16.mxu1 %v17432_v10  ;;  %v17517_v24 = vld [vmem:[%s20431_s3 + $0x98c] ss:$16 sps:$4 sm:$0xff]   ;;  %v17512_v10 = vld [vmem:[%s20431_s3 + $0x980] ss:$16 sps:$4 sm:$0xff]  }
 0x1f9   : > { %11749 = vmatpush1.bf16.msra.mxu0 %v17427_v28  ;;  %12897 = vmatpush1.bf16.msra.mxu1 %v17430_v30  ;;  %v17515_v28 = vld [vmem:[%s20431_s3 + $0x988] ss:$16 sps:$4 sm:$0xff]   ;;  %v17520_v30 = vld [vmem:[%s20431_s3 + $0x9a4] ss:$16 sps:$4 sm:$0xff]  }
 0x1fa   : > { %11750 = vmatprep.subr.bf16.mxu0 %v17435_v31  ;;  %12898 = vmatprep.subr.bf16.mxu1 %v17438_v32  ;;  %v17523_v31 = vld [vmem:[%s20431_s3 + $0x9ac] ss:$16 sps:$4 sm:$0xff]   ;;  %v17518_v32 = vld [vmem:[%s20431_s3 + $0x9a0] ss:$16 sps:$4 sm:$0xff]  }
 0x1fd   : > { %11751 = vmatpush1.bf16.msra.mxu0 %v17433_v34  ;;  %12899 = vmatpush1.bf16.msra.mxu1 %v17436_v35  ;;  %v17521_v34 = vld [vmem:[%s20431_s3 + $0x9a8] ss:$16 sps:$4 sm:$0xff]   ;;  %v17526_v35 = vld [vmem:[%s20431_s3 + $0x9c4] ss:$16 sps:$4 sm:$0xff]  }
 0x1fe   : > { %11761 = vmatprep.subr.bf16.mxu0 %v17442_v36  ;;  %12909 = vmatprep.subr.bf16.mxu1 %v17445_v27  ;;  %v17529_v36 = vld [vmem:[%s20431_s3 + $0x9cc] ss:$16 sps:$4 sm:$0xff]   ;;  %v529_v27 = vcombine.high %v20739_v29, %v20739_v29  ;;  %v17530_v29 = vld [vmem:[%s20431_s3 + $0x9e0] ss:$16 sps:$4 sm:$0xff]  }
 0x200   : > { %11753 = vmatmul.mubr.bf16.vlgmr.msra.gmra.mrb[0].mxu0 %v795_v39  ;;  %12901 = vmatmul.mubr.bf16.vlgmr.msra.gmra.mrb[0].mxu1 %v795_v39  ;;  %v17532_v39 = vld [vmem:[%s20431_s3 + $0x9e4] ss:$16 sps:$4 sm:$0xff]  }
 0x201   : > { %11762 = vmatpush1.bf16.msra.mxu0 %v17440_v38  ;;  %12910 = vmatpush1.bf16.msra.mxu1 %v17443_v40  ;;  %v17527_v38 = vld [vmem:[%s20431_s3 + $0x9c8] ss:$16 sps:$4 sm:$0xff]   ;;  %v17535_v40 = vld [vmem:[%s20431_s3 + $0x9ec] ss:$16 sps:$4 sm:$0xff]  }
 0x202   : > { %11763 = vmatprep.subr.bf16.mxu0 %v17448_v41  ;;  %12911 = vmatprep.subr.bf16.mxu1 %v17451_v42  ;;  %v20819_v41 = vrot.slane %v529_v27, %v20502_v50  ;;  %v17533_v42 = vld [vmem:[%s20431_s3 + $0x9e8] ss:$16 sps:$4 sm:$0xff]  }
 0x203   : > { %11793 = vmatprep.mubr.bf16.mxu0 %v798_v43  ;;  %12941 = vmatprep.mubr.bf16.mxu1 %v798_v43  ;;  %v17538_v43 = vld [vmem:[%s20431_s3 + $0xa04] ss:$16 sps:$4 sm:$0xff]   ;;  %v17611_v27 = vld [vmem:[%s20431_s3 + $0xb88] ss:$16 sps:$4 sm:$0xff]  }
 0x205   : > { %11764 = vmatpush1.bf16.msra.mxu0 %v17446_v45  ;;  %12912 = vmatpush1.bf16.msra.mxu1 %v17449_v46  ;;  %v17541_v45 = vld [vmem:[%s20431_s3 + $0xa0c] ss:$16 sps:$4 sm:$0xff]   ;;  %v545_v46 = vcombine.high %v20819_v41, %v20819_v41 }
 0x206   : > { %11765 = vmatprep.subr.bf16.mxu0 %v17454_v26  ;;  %12913 = vmatprep.subr.bf16.mxu1 %v17457_v47  ;;  %v797_v26 = vpack.c.bf16 %v20746_v33, %v20746_v33  ;;  %v17536_v47 = vld [vmem:[%s20431_s3 + $0xa00] ss:$16 sps:$4 sm:$0xff]  }
 0x207   : > { %v17542_v33 = vld [vmem:[%s20431_s3 + $0xa20] ss:$16 sps:$4 sm:$0xff]  }
 0x209   : > { %11766 = vmatpush1.bf16.msra.mxu0 %v17452_v48  ;;  %12914 = vmatpush1.bf16.msra.mxu1 %v17455_v49  ;;  %v17539_v48 = vld [vmem:[%s20431_s3 + $0xa08] ss:$16 sps:$4 sm:$0xff]   ;;  %v17544_v49 = vld [vmem:[%s20431_s3 + $0xa24] ss:$16 sps:$4 sm:$0xff]  }
 0x20a   : > { %11767 = vmatprep.subr.bf16.mxu0 %v17460_v51  ;;  %12915 = vmatprep.subr.bf16.mxu1 %v17463_v52  ;;  %v17547_v51 = vld [vmem:[%s20431_s3 + $0xa2c] ss:$16 sps:$4 sm:$0xff]   ;;  %v800_v52 = vpack.c.bf16 %v545_v46, %v545_v46  ;;  %v17623_v46 = vld [vmem:[%s20431_s3 + $0xbc8] ss:$16 sps:$4 sm:$0xff]  }
 0x20d   : > { %11768 = vmatpush1.bf16.msra.mxu0 %v17458_v53  ;;  %12916 = vmatpush1.bf16.msra.mxu1 %v17461_v54  ;;  %v17545_v53 = vld [vmem:[%s20431_s3 + $0xa28] ss:$16 sps:$4 sm:$0xff]   ;;  %v17550_v54 = vld [vmem:[%s20431_s3 + $0xa44] ss:$16 sps:$4 sm:$0xff]  }
 0x20e   : > { %11769 = vmatprep.subr.bf16.mxu0 %v17466_v55  ;;  %12917 = vmatprep.subr.bf16.mxu1 %v17469_v56  ;;  %v17553_v55 = vld [vmem:[%s20431_s3 + $0xa4c] ss:$16 sps:$4 sm:$0xff]   ;;  %v17548_v56 = vld [vmem:[%s20431_s3 + $0xa40] ss:$16 sps:$4 sm:$0xff]  }
 0x211   : > { %11770 = vmatpush1.bf16.msra.mxu0 %v17464_v57  ;;  %12918 = vmatpush1.bf16.msra.mxu1 %v17467_v58  ;;  %v17551_v57 = vld [vmem:[%s20431_s3 + $0xa48] ss:$16 sps:$4 sm:$0xff]   ;;  %v17556_v58 = vld [vmem:[%s20431_s3 + $0xa64] ss:$16 sps:$4 sm:$0xff]  }
 0x212   : > { %11771 = vmatprep.subr.bf16.mxu0 %v17472_v59  ;;  %12919 = vmatprep.subr.bf16.mxu1 %v17475_v60  ;;  %v17559_v59 = vld [vmem:[%s20431_s3 + $0xa6c] ss:$16 sps:$4 sm:$0xff]   ;;  %v17554_v60 = vld [vmem:[%s20431_s3 + $0xa60] ss:$16 sps:$4 sm:$0xff]  }
 0x215   : > { %11772 = vmatpush1.bf16.msra.mxu0 %v17470_v61  ;;  %12920 = vmatpush1.bf16.msra.mxu1 %v17473_v62  ;;  %v17557_v61 = vld [vmem:[%s20431_s3 + $0xa68] ss:$16 sps:$4 sm:$0xff]   ;;  %v17562_v62 = vld [vmem:[%s20431_s3 + $0xa84] ss:$16 sps:$4 sm:$0xff]  }
 0x216   : > { %11773 = vmatprep.subr.bf16.mxu0 %v17478_v63  ;;  %12921 = vmatprep.subr.bf16.mxu1 %v17481_v0  ;;  %v17565_v63 = vld [vmem:[%s20431_s3 + $0xa8c] ss:$16 sps:$4 sm:$0xff]   ;;  %v17560_v0 = vld [vmem:[%s20431_s3 + $0xa80] ss:$16 sps:$4 sm:$0xff]  }
 0x219   : > { %11774 = vmatpush1.bf16.msra.mxu0 %v17476_v1  ;;  %12922 = vmatpush1.bf16.msra.mxu1 %v17479_v2  ;;  %v17563_v1 = vld [vmem:[%s20431_s3 + $0xa88] ss:$16 sps:$4 sm:$0xff]   ;;  %v17568_v2 = vld [vmem:[%s20431_s3 + $0xaa4] ss:$16 sps:$4 sm:$0xff]  }
 0x21a   : > { %11775 = vmatprep.subr.bf16.mxu0 %v17484_v3  ;;  %12923 = vmatprep.subr.bf16.mxu1 %v17487_v4  ;;  %v17571_v3 = vld [vmem:[%s20431_s3 + $0xaac] ss:$16 sps:$4 sm:$0xff]   ;;  %v17566_v4 = vld [vmem:[%s20431_s3 + $0xaa0] ss:$16 sps:$4 sm:$0xff]  }
 0x21d   : > { %11776 = vmatpush1.bf16.msra.mxu0 %v17482_v5  ;;  %12924 = vmatpush1.bf16.msra.mxu1 %v17485_v6  ;;  %v17569_v5 = vld [vmem:[%s20431_s3 + $0xaa8] ss:$16 sps:$4 sm:$0xff]   ;;  %v17574_v6 = vld [vmem:[%s20431_s3 + $0xac4] ss:$16 sps:$4 sm:$0xff]  }
 0x21e   : > { %11777 = vmatprep.subr.bf16.mxu0 %v17490_v7  ;;  %12925 = vmatprep.subr.bf16.mxu1 %v17493_v8  ;;  %v17577_v7 = vld [vmem:[%s20431_s3 + $0xacc] ss:$16 sps:$4 sm:$0xff]   ;;  %v17572_v8 = vld [vmem:[%s20431_s3 + $0xac0] ss:$16 sps:$4 sm:$0xff]  }
 0x221   : > { %11778 = vmatpush1.bf16.msra.mxu0 %v17488_v9  ;;  %12926 = vmatpush1.bf16.msra.mxu1 %v17491_v11  ;;  %v17575_v9 = vld [vmem:[%s20431_s3 + $0xac8] ss:$16 sps:$4 sm:$0xff]   ;;  %v17580_v11 = vld [vmem:[%s20431_s3 + $0xae4] ss:$16 sps:$4 sm:$0xff]  }
 0x222   : > { %11779 = vmatprep.subr.bf16.mxu0 %v17496_v12  ;;  %12927 = vmatprep.subr.bf16.mxu1 %v17499_v13  ;;  %v17583_v12 = vld [vmem:[%s20431_s3 + $0xaec] ss:$16 sps:$4 sm:$0xff]   ;;  %v17578_v13 = vld [vmem:[%s20431_s3 + $0xae0] ss:$16 sps:$4 sm:$0xff]  }
 0x225   : > { %11780 = vmatpush1.bf16.msra.mxu0 %v17494_v14  ;;  %12928 = vmatpush1.bf16.msra.mxu1 %v17497_v15  ;;  %v17581_v14 = vld [vmem:[%s20431_s3 + $0xae8] ss:$16 sps:$4 sm:$0xff]   ;;  %v17586_v15 = vld [vmem:[%s20431_s3 + $0xb04] ss:$16 sps:$4 sm:$0xff]  }
 0x226   : > { %11781 = vmatprep.subr.bf16.mxu0 %v17502_v16  ;;  %12929 = vmatprep.subr.bf16.mxu1 %v17505_v17  ;;  %v17589_v16 = vld [vmem:[%s20431_s3 + $0xb0c] ss:$16 sps:$4 sm:$0xff]   ;;  %v17584_v17 = vld [vmem:[%s20431_s3 + $0xb00] ss:$16 sps:$4 sm:$0xff]  }
 0x229   : > { %11782 = vmatpush1.bf16.msra.mxu0 %v17500_v18  ;;  %12930 = vmatpush1.bf16.msra.mxu1 %v17503_v19  ;;  %v17587_v18 = vld [vmem:[%s20431_s3 + $0xb08] ss:$16 sps:$4 sm:$0xff]   ;;  %v17592_v19 = vld [vmem:[%s20431_s3 + $0xb24] ss:$16 sps:$4 sm:$0xff]  }
 0x22a   : > { %11783 = vmatprep.subr.bf16.mxu0 %v17508_v20  ;;  %12931 = vmatprep.subr.bf16.mxu1 %v17511_v21  ;;  %v17595_v20 = vld [vmem:[%s20431_s3 + $0xb2c] ss:$16 sps:$4 sm:$0xff]   ;;  %v17590_v21 = vld [vmem:[%s20431_s3 + $0xb20] ss:$16 sps:$4 sm:$0xff]  }
 0x22d   : > { %11784 = vmatpush1.bf16.msra.mxu0 %v17506_v22  ;;  %12932 = vmatpush1.bf16.msra.mxu1 %v17509_v23  ;;  %v17593_v22 = vld [vmem:[%s20431_s3 + $0xb28] ss:$16 sps:$4 sm:$0xff]   ;;  %v17598_v23 = vld [vmem:[%s20431_s3 + $0xb44] ss:$16 sps:$4 sm:$0xff]  }
 0x22e   : > { %11785 = vmatprep.subr.bf16.mxu0 %v17514_v25  ;;  %12933 = vmatprep.subr.bf16.mxu1 %v17517_v24  ;;  %v17601_v25 = vld [vmem:[%s20431_s3 + $0xb4c] ss:$16 sps:$4 sm:$0xff]   ;;  %v17596_v24 = vld [vmem:[%s20431_s3 + $0xb40] ss:$16 sps:$4 sm:$0xff]  }
 0x231   : > { %11786 = vmatpush1.bf16.msra.mxu0 %v17512_v10  ;;  %12934 = vmatpush1.bf16.msra.mxu1 %v17515_v28  ;;  %v17599_v10 = vld [vmem:[%s20431_s3 + $0xb48] ss:$16 sps:$4 sm:$0xff]   ;;  %v17604_v28 = vld [vmem:[%s20431_s3 + $0xb64] ss:$16 sps:$4 sm:$0xff]  }
 0x232   : > { %11787 = vmatprep.subr.bf16.mxu0 %v17520_v30  ;;  %12935 = vmatprep.subr.bf16.mxu1 %v17523_v31  ;;  %v17607_v30 = vld [vmem:[%s20431_s3 + $0xb6c] ss:$16 sps:$4 sm:$0xff]   ;;  %v17602_v31 = vld [vmem:[%s20431_s3 + $0xb60] ss:$16 sps:$4 sm:$0xff]  }
 0x235   : > { %11788 = vmatpush1.bf16.msra.mxu0 %v17518_v32  ;;  %12936 = vmatpush1.bf16.msra.mxu1 %v17521_v34  ;;  %v17605_v32 = vld [vmem:[%s20431_s3 + $0xb68] ss:$16 sps:$4 sm:$0xff]   ;;  %v17610_v34 = vld [vmem:[%s20431_s3 + $0xb84] ss:$16 sps:$4 sm:$0xff]  }
 0x236   : > { %11789 = vmatprep.subr.bf16.mxu0 %v17526_v35  ;;  %12937 = vmatprep.subr.bf16.mxu1 %v17529_v36  ;;  %v17613_v35 = vld [vmem:[%s20431_s3 + $0xb8c] ss:$16 sps:$4 sm:$0xff]   ;;  %v17608_v36 = vld [vmem:[%s20431_s3 + $0xb80] ss:$16 sps:$4 sm:$0xff]  }
 0x239   : > { %11790 = vmatpush1.bf16.msra.mxu0 %v17524_v37  ;;  %12938 = vmatpush1.bf16.msra.mxu1 %v17527_v38  ;;  %v17616_v37 = vld [vmem:[%s20431_s3 + $0xba4] ss:$16 sps:$4 sm:$0xff]   ;;  %v17619_v38 = vld [vmem:[%s20431_s3 + $0xbac] ss:$16 sps:$4 sm:$0xff]  }
 0x23a   : > { %11791 = vmatprep.subr.bf16.mxu0 %v17532_v39  ;;  %12939 = vmatprep.subr.bf16.mxu1 %v17535_v40  ;;  %v17614_v39 = vld [vmem:[%s20431_s3 + $0xba0] ss:$16 sps:$4 sm:$0xff]   ;;  %v17617_v40 = vld [vmem:[%s20431_s3 + $0xba8] ss:$16 sps:$4 sm:$0xff]  }
 0x23d   : > { %11792 = vmatpush1.bf16.msra.mxu0 %v17530_v29  ;;  %12940 = vmatpush1.bf16.msra.mxu1 %v17533_v42  ;;  %v17622_v29 = vld [vmem:[%s20431_s3 + $0xbc4] ss:$16 sps:$4 sm:$0xff]   ;;  %v17625_v42 = vld [vmem:[%s20431_s3 + $0xbcc] ss:$16 sps:$4 sm:$0xff]  }
 0x23e   : > { %11802 = vmatprep.subr.bf16.mxu0 %v17538_v43  ;;  %12950 = vmatprep.subr.bf16.mxu1 %v17541_v45  ;;  %v20886_v43 = vld [vmem:[%s20424_s12 + $0x18] sm:$0xff]  ;;  %v17620_v45 = vld [vmem:[%s20431_s3 + $0xbc0] ss:$16 sps:$4 sm:$0xff]  }
 0x240   : > { %11794 = vmatmul.mubr.bf16.vlgmr.msra.gmra.mrb[0].mxu0 %v797_v26  ;;  %12942 = vmatmul.mubr.bf16.vlgmr.msra.gmra.mrb[0].mxu1 %v797_v26  ;;  %v17628_v26 = vld [vmem:[%s20431_s3 + $0xbe4] ss:$16 sps:$4 sm:$0xff]  }
 0x241   : > { %11803 = vmatpush1.bf16.msra.mxu0 %v17536_v47  ;;  %12951 = vmatpush1.bf16.msra.mxu1 %v17539_v48  ;;  %v17631_v47 = vld [vmem:[%s20431_s3 + $0xbec] ss:$16 sps:$4 sm:$0xff]   ;;  %v20894_v48 = vrot.slane %v20886_v43, %v20502_v50 }
 0x242   : > { %11804 = vmatprep.subr.bf16.mxu0 %v17544_v49  ;;  %12952 = vmatprep.subr.bf16.mxu1 %v17547_v51  ;;  %v17626_v49 = vld [vmem:[%s20431_s3 + $0xbe0] ss:$16 sps:$4 sm:$0xff]   ;;  %v17629_v51 = vld [vmem:[%s20431_s3 + $0xbe8] ss:$16 sps:$4 sm:$0xff]  }
 0x243   : > { %11834 = vmatprep.mubr.bf16.mxu0 %v800_v52  ;;  %12982 = vmatprep.mubr.bf16.mxu1 %v800_v52  ;;  %v17635_v52 = vld [vmem:[%s20431_s3 + $0xc04] ss:$16 sps:$4 sm:$0xff]  }
 0x245   : > { %11805 = vmatpush1.bf16.msra.mxu0 %v17542_v33  ;;  %12953 = vmatpush1.bf16.msra.mxu1 %v17545_v53  ;;  %v17638_v33 = vld [vmem:[%s20431_s3 + $0xc0c] ss:$16 sps:$4 sm:$0xff]   ;;  %v561_v53 = vcombine.high %v20894_v48, %v20894_v48 }
 0x246   : > { %11806 = vmatprep.subr.bf16.mxu0 %v17550_v54  ;;  %12954 = vmatprep.subr.bf16.mxu1 %v17553_v55  ;;  %v799_v54 = vpack.c.bf16 %v20819_v41, %v20819_v41  ;;  %v17633_v55 = vld [vmem:[%s20431_s3 + $0xc00] ss:$16 sps:$4 sm:$0xff]  }
 0x247   : > { %v17639_v41 = vld [vmem:[%s20431_s3 + $0xc20] ss:$16 sps:$4 sm:$0xff]  }
 0x249   : > { %11807 = vmatpush1.bf16.msra.mxu0 %v17548_v56  ;;  %12955 = vmatpush1.bf16.msra.mxu1 %v17551_v57  ;;  %v17636_v56 = vld [vmem:[%s20431_s3 + $0xc08] ss:$16 sps:$4 sm:$0xff]   ;;  %v17641_v57 = vld [vmem:[%s20431_s3 + $0xc24] ss:$16 sps:$4 sm:$0xff]  }
 0x24a   : > { %11808 = vmatprep.subr.bf16.mxu0 %v17556_v58  ;;  %12956 = vmatprep.subr.bf16.mxu1 %v17559_v59  ;;  %v17644_v58 = vld [vmem:[%s20431_s3 + $0xc2c] ss:$16 sps:$4 sm:$0xff]   ;;  %v802_v59 = vpack.c.bf16 %v561_v53, %v561_v53  ;;  %v17717_v53 = vld [vmem:[%s20431_s3 + $0xdc0] ss:$16 sps:$4 sm:$0xff]  }
 0x24d   : > { %11809 = vmatpush1.bf16.msra.mxu0 %v17554_v60  ;;  %12957 = vmatpush1.bf16.msra.mxu1 %v17557_v61  ;;  %v17642_v60 = vld [vmem:[%s20431_s3 + $0xc28] ss:$16 sps:$4 sm:$0xff]   ;;  %v17647_v61 = vld [vmem:[%s20431_s3 + $0xc44] ss:$16 sps:$4 sm:$0xff]  }
 0x24e   : > { %11810 = vmatprep.subr.bf16.mxu0 %v17562_v62  ;;  %12958 = vmatprep.subr.bf16.mxu1 %v17565_v63  ;;  %v17650_v62 = vld [vmem:[%s20431_s3 + $0xc4c] ss:$16 sps:$4 sm:$0xff]   ;;  %v17645_v63 = vld [vmem:[%s20431_s3 + $0xc40] ss:$16 sps:$4 sm:$0xff]  }
 0x251   : > { %11811 = vmatpush1.bf16.msra.mxu0 %v17560_v0  ;;  %12959 = vmatpush1.bf16.msra.mxu1 %v17563_v1  ;;  %v17648_v0 = vld [vmem:[%s20431_s3 + $0xc48] ss:$16 sps:$4 sm:$0xff]   ;;  %v17653_v1 = vld [vmem:[%s20431_s3 + $0xc64] ss:$16 sps:$4 sm:$0xff]  }
 0x252   : > { %11812 = vmatprep.subr.bf16.mxu0 %v17568_v2  ;;  %12960 = vmatprep.subr.bf16.mxu1 %v17571_v3  ;;  %v17656_v2 = vld [vmem:[%s20431_s3 + $0xc6c] ss:$16 sps:$4 sm:$0xff]   ;;  %v17651_v3 = vld [vmem:[%s20431_s3 + $0xc60] ss:$16 sps:$4 sm:$0xff]  }
 0x255   : > { %11813 = vmatpush1.bf16.msra.mxu0 %v17566_v4  ;;  %12961 = vmatpush1.bf16.msra.mxu1 %v17569_v5  ;;  %v17654_v4 = vld [vmem:[%s20431_s3 + $0xc68] ss:$16 sps:$4 sm:$0xff]   ;;  %v17659_v5 = vld [vmem:[%s20431_s3 + $0xc84] ss:$16 sps:$4 sm:$0xff]  }
 0x256   : > { %11814 = vmatprep.subr.bf16.mxu0 %v17574_v6  ;;  %12962 = vmatprep.subr.bf16.mxu1 %v17577_v7  ;;  %v17662_v6 = vld [vmem:[%s20431_s3 + $0xc8c] ss:$16 sps:$4 sm:$0xff]   ;;  %v17657_v7 = vld [vmem:[%s20431_s3 + $0xc80] ss:$16 sps:$4 sm:$0xff]  }
 0x259   : > { %11815 = vmatpush1.bf16.msra.mxu0 %v17572_v8  ;;  %12963 = vmatpush1.bf16.msra.mxu1 %v17575_v9  ;;  %v17660_v8 = vld [vmem:[%s20431_s3 + $0xc88] ss:$16 sps:$4 sm:$0xff]   ;;  %v17665_v9 = vld [vmem:[%s20431_s3 + $0xca4] ss:$16 sps:$4 sm:$0xff]  }
 0x25a   : > { %11816 = vmatprep.subr.bf16.mxu0 %v17580_v11  ;;  %12964 = vmatprep.subr.bf16.mxu1 %v17583_v12  ;;  %v17668_v11 = vld [vmem:[%s20431_s3 + $0xcac] ss:$16 sps:$4 sm:$0xff]   ;;  %v17663_v12 = vld [vmem:[%s20431_s3 + $0xca0] ss:$16 sps:$4 sm:$0xff]  }
 0x25d   : > { %11817 = vmatpush1.bf16.msra.mxu0 %v17578_v13  ;;  %12965 = vmatpush1.bf16.msra.mxu1 %v17581_v14  ;;  %v17666_v13 = vld [vmem:[%s20431_s3 + $0xca8] ss:$16 sps:$4 sm:$0xff]   ;;  %v17671_v14 = vld [vmem:[%s20431_s3 + $0xcc4] ss:$16 sps:$4 sm:$0xff]  }
 0x25e   : > { %11818 = vmatprep.subr.bf16.mxu0 %v17586_v15  ;;  %12966 = vmatprep.subr.bf16.mxu1 %v17589_v16  ;;  %v17674_v15 = vld [vmem:[%s20431_s3 + $0xccc] ss:$16 sps:$4 sm:$0xff]   ;;  %v17669_v16 = vld [vmem:[%s20431_s3 + $0xcc0] ss:$16 sps:$4 sm:$0xff]  }
 0x261   : > { %11819 = vmatpush1.bf16.msra.mxu0 %v17584_v17  ;;  %12967 = vmatpush1.bf16.msra.mxu1 %v17587_v18  ;;  %v17672_v17 = vld [vmem:[%s20431_s3 + $0xcc8] ss:$16 sps:$4 sm:$0xff]   ;;  %v17677_v18 = vld [vmem:[%s20431_s3 + $0xce4] ss:$16 sps:$4 sm:$0xff]  }
 0x262   : > { %11820 = vmatprep.subr.bf16.mxu0 %v17592_v19  ;;  %12968 = vmatprep.subr.bf16.mxu1 %v17595_v20  ;;  %v17680_v19 = vld [vmem:[%s20431_s3 + $0xcec] ss:$16 sps:$4 sm:$0xff]   ;;  %v17675_v20 = vld [vmem:[%s20431_s3 + $0xce0] ss:$16 sps:$4 sm:$0xff]  }
 0x265   : > { %11821 = vmatpush1.bf16.msra.mxu0 %v17590_v21  ;;  %12969 = vmatpush1.bf16.msra.mxu1 %v17593_v22  ;;  %v17678_v21 = vld [vmem:[%s20431_s3 + $0xce8] ss:$16 sps:$4 sm:$0xff]   ;;  %v17683_v22 = vld [vmem:[%s20431_s3 + $0xd04] ss:$16 sps:$4 sm:$0xff]  }
 0x266   : > { %11822 = vmatprep.subr.bf16.mxu0 %v17598_v23  ;;  %12970 = vmatprep.subr.bf16.mxu1 %v17601_v25  ;;  %v17686_v23 = vld [vmem:[%s20431_s3 + $0xd0c] ss:$16 sps:$4 sm:$0xff]   ;;  %v17681_v25 = vld [vmem:[%s20431_s3 + $0xd00] ss:$16 sps:$4 sm:$0xff]  }
 0x269   : > { %11823 = vmatpush1.bf16.msra.mxu0 %v17596_v24  ;;  %12971 = vmatpush1.bf16.msra.mxu1 %v17599_v10  ;;  %v17684_v24 = vld [vmem:[%s20431_s3 + $0xd08] ss:$16 sps:$4 sm:$0xff]   ;;  %v17689_v10 = vld [vmem:[%s20431_s3 + $0xd24] ss:$16 sps:$4 sm:$0xff]  }
 0x26a   : > { %11824 = vmatprep.subr.bf16.mxu0 %v17604_v28  ;;  %12972 = vmatprep.subr.bf16.mxu1 %v17607_v30  ;;  %v17692_v28 = vld [vmem:[%s20431_s3 + $0xd2c] ss:$16 sps:$4 sm:$0xff]   ;;  %v17687_v30 = vld [vmem:[%s20431_s3 + $0xd20] ss:$16 sps:$4 sm:$0xff]  }
 0x26d   : > { %11825 = vmatpush1.bf16.msra.mxu0 %v17602_v31  ;;  %12973 = vmatpush1.bf16.msra.mxu1 %v17605_v32  ;;  %v17690_v31 = vld [vmem:[%s20431_s3 + $0xd28] ss:$16 sps:$4 sm:$0xff]   ;;  %v17695_v32 = vld [vmem:[%s20431_s3 + $0xd44] ss:$16 sps:$4 sm:$0xff]  }
 0x26e   : > { %11826 = vmatprep.subr.bf16.mxu0 %v17610_v34  ;;  %12974 = vmatprep.subr.bf16.mxu1 %v17613_v35  ;;  %v17698_v34 = vld [vmem:[%s20431_s3 + $0xd4c] ss:$16 sps:$4 sm:$0xff]   ;;  %v17693_v35 = vld [vmem:[%s20431_s3 + $0xd40] ss:$16 sps:$4 sm:$0xff]  }
 0x271   : > { %11827 = vmatpush1.bf16.msra.mxu0 %v17608_v36  ;;  %12975 = vmatpush1.bf16.msra.mxu1 %v17611_v27  ;;  %v17696_v36 = vld [vmem:[%s20431_s3 + $0xd48] ss:$16 sps:$4 sm:$0xff]   ;;  %v17701_v27 = vld [vmem:[%s20431_s3 + $0xd64] ss:$16 sps:$4 sm:$0xff]  }
 0x272   : > { %11828 = vmatprep.subr.bf16.mxu0 %v17616_v37  ;;  %12976 = vmatprep.subr.bf16.mxu1 %v17619_v38  ;;  %v17704_v37 = vld [vmem:[%s20431_s3 + $0xd6c] ss:$16 sps:$4 sm:$0xff]   ;;  %v17699_v38 = vld [vmem:[%s20431_s3 + $0xd60] ss:$16 sps:$4 sm:$0xff]  }
 0x275   : > { %11829 = vmatpush1.bf16.msra.mxu0 %v17614_v39  ;;  %12977 = vmatpush1.bf16.msra.mxu1 %v17617_v40  ;;  %v17702_v39 = vld [vmem:[%s20431_s3 + $0xd68] ss:$16 sps:$4 sm:$0xff]   ;;  %v17707_v40 = vld [vmem:[%s20431_s3 + $0xd84] ss:$16 sps:$4 sm:$0xff]  }
 0x276   : > { %11830 = vmatprep.subr.bf16.mxu0 %v17622_v29  ;;  %12978 = vmatprep.subr.bf16.mxu1 %v17625_v42  ;;  %v17710_v29 = vld [vmem:[%s20431_s3 + $0xd8c] ss:$16 sps:$4 sm:$0xff]   ;;  %v17705_v42 = vld [vmem:[%s20431_s3 + $0xd80] ss:$16 sps:$4 sm:$0xff]  }
 0x279   : > { %11831 = vmatpush1.bf16.msra.mxu0 %v17620_v45  ;;  %12979 = vmatpush1.bf16.msra.mxu1 %v17623_v46  ;;  %v17708_v45 = vld [vmem:[%s20431_s3 + $0xd88] ss:$16 sps:$4 sm:$0xff]   ;;  %v17713_v46 = vld [vmem:[%s20431_s3 + $0xda4] ss:$16 sps:$4 sm:$0xff]  }
 0x27a   : > { %11832 = vmatprep.subr.bf16.mxu0 %v17628_v26  ;;  %12980 = vmatprep.subr.bf16.mxu1 %v17631_v47  ;;  %v17716_v26 = vld [vmem:[%s20431_s3 + $0xdac] ss:$16 sps:$4 sm:$0xff]   ;;  %v17711_v47 = vld [vmem:[%s20431_s3 + $0xda0] ss:$16 sps:$4 sm:$0xff]  }
 0x27d   : > { %11833 = vmatpush1.bf16.msra.mxu0 %v17626_v49  ;;  %12981 = vmatpush1.bf16.msra.mxu1 %v17629_v51  ;;  %v17714_v49 = vld [vmem:[%s20431_s3 + $0xda8] ss:$16 sps:$4 sm:$0xff]   ;;  %v17719_v51 = vld [vmem:[%s20431_s3 + $0xdc4] ss:$16 sps:$4 sm:$0xff]  }
 0x27e   : > { %11843 = vmatprep.subr.bf16.mxu0 %v17635_v52  ;;  %12991 = vmatprep.subr.bf16.mxu1 %v17638_v33  ;;  %v17722_v52 = vld [vmem:[%s20431_s3 + $0xdcc] ss:$16 sps:$4 sm:$0xff]   ;;  %v546_v33 = vcombine.high %v20886_v43, %v20886_v43  ;;  %v17723_v43 = vld [vmem:[%s20431_s3 + $0xde0] ss:$16 sps:$4 sm:$0xff]  }
 0x280   : > { %11835 = vmatmul.mubr.bf16.vlgmr.msra.gmra.mrb[0].mxu0 %v799_v54  ;;  %12983 = vmatmul.mubr.bf16.vlgmr.msra.gmra.mrb[0].mxu1 %v799_v54  ;;  %v17720_v54 = vld [vmem:[%s20431_s3 + $0xdc8] ss:$16 sps:$4 sm:$0xff]  }
 0x281   : > { %11844 = vmatpush1.bf16.msra.mxu0 %v17633_v55  ;;  %12992 = vmatpush1.bf16.msra.mxu1 %v17636_v56  ;;  %v17725_v55 = vld [vmem:[%s20431_s3 + $0xde4] ss:$16 sps:$4 sm:$0xff]   ;;  %v17728_v56 = vld [vmem:[%s20431_s3 + $0xdec] ss:$16 sps:$4 sm:$0xff]  }
 0x282   : > { %11845 = vmatprep.subr.bf16.mxu0 %v17641_v57  ;;  %12993 = vmatprep.subr.bf16.mxu1 %v17644_v58  ;;  %v20967_v57 = vrot.slane %v546_v33, %v20502_v50  ;;  %v17726_v58 = vld [vmem:[%s20431_s3 + $0xde8] ss:$16 sps:$4 sm:$0xff]  }
 0x283   : > { %11875 = vmatprep.mubr.bf16.mxu0 %v802_v59  ;;  %13023 = vmatprep.mubr.bf16.mxu1 %v802_v59  ;;  %v17731_v59 = vld [vmem:[%s20431_s3 + $0xe04] ss:$16 sps:$4 sm:$0xff]   ;;  %v17804_v33 = vld [vmem:[%s20431_s3 + $0xf88] ss:$16 sps:$4 sm:$0xff]  }
 0x285   : > { %11846 = vmatpush1.bf16.msra.mxu0 %v17639_v41  ;;  %12994 = vmatpush1.bf16.msra.mxu1 %v17642_v60  ;;  %v17734_v41 = vld [vmem:[%s20431_s3 + $0xe0c] ss:$16 sps:$4 sm:$0xff]   ;;  %v562_v60 = vcombine.high %v20967_v57, %v20967_v57 }
 0x286   : > { %11847 = vmatprep.subr.bf16.mxu0 %v17647_v61  ;;  %12995 = vmatprep.subr.bf16.mxu1 %v17650_v62  ;;  %v801_v61 = vpack.c.bf16 %v20894_v48, %v20894_v48  ;;  %v17729_v62 = vld [vmem:[%s20431_s3 + $0xe00] ss:$16 sps:$4 sm:$0xff]  }
 0x287   : > { %v17735_v48 = vld [vmem:[%s20431_s3 + $0xe20] ss:$16 sps:$4 sm:$0xff]  }
 0x289   : > { %11848 = vmatpush1.bf16.msra.mxu0 %v17645_v63  ;;  %12996 = vmatpush1.bf16.msra.mxu1 %v17648_v0  ;;  %v17732_v63 = vld [vmem:[%s20431_s3 + $0xe08] ss:$16 sps:$4 sm:$0xff]   ;;  %v17737_v0 = vld [vmem:[%s20431_s3 + $0xe24] ss:$16 sps:$4 sm:$0xff]  }
 0x28a   : > { %11849 = vmatprep.subr.bf16.mxu0 %v17653_v1  ;;  %12997 = vmatprep.subr.bf16.mxu1 %v17656_v2  ;;  %v17740_v1 = vld [vmem:[%s20431_s3 + $0xe2c] ss:$16 sps:$4 sm:$0xff]   ;;  %v804_v2 = vpack.c.bf16 %v562_v60, %v562_v60  ;;  %v17816_v60 = vld [vmem:[%s20431_s3 + $0xfc8] ss:$16 sps:$4 sm:$0xff]  }
 0x28d   : > { %11850 = vmatpush1.bf16.msra.mxu0 %v17651_v3  ;;  %12998 = vmatpush1.bf16.msra.mxu1 %v17654_v4  ;;  %v17738_v3 = vld [vmem:[%s20431_s3 + $0xe28] ss:$16 sps:$4 sm:$0xff]   ;;  %v17743_v4 = vld [vmem:[%s20431_s3 + $0xe44] ss:$16 sps:$4 sm:$0xff]  }
 0x28e   : > { %11851 = vmatprep.subr.bf16.mxu0 %v17659_v5  ;;  %12999 = vmatprep.subr.bf16.mxu1 %v17662_v6  ;;  %v17746_v5 = vld [vmem:[%s20431_s3 + $0xe4c] ss:$16 sps:$4 sm:$0xff]   ;;  %v17741_v6 = vld [vmem:[%s20431_s3 + $0xe40] ss:$16 sps:$4 sm:$0xff]  }
 0x291   : > { %11852 = vmatpush1.bf16.msra.mxu0 %v17657_v7  ;;  %13000 = vmatpush1.bf16.msra.mxu1 %v17660_v8  ;;  %v17744_v7 = vld [vmem:[%s20431_s3 + $0xe48] ss:$16 sps:$4 sm:$0xff]   ;;  %v17749_v8 = vld [vmem:[%s20431_s3 + $0xe64] ss:$16 sps:$4 sm:$0xff]  }
 0x292   : > { %11853 = vmatprep.subr.bf16.mxu0 %v17665_v9  ;;  %13001 = vmatprep.subr.bf16.mxu1 %v17668_v11  ;;  %v17752_v9 = vld [vmem:[%s20431_s3 + $0xe6c] ss:$16 sps:$4 sm:$0xff]   ;;  %v17747_v11 = vld [vmem:[%s20431_s3 + $0xe60] ss:$16 sps:$4 sm:$0xff]  }
 0x295   : > { %11854 = vmatpush1.bf16.msra.mxu0 %v17663_v12  ;;  %13002 = vmatpush1.bf16.msra.mxu1 %v17666_v13  ;;  %v17750_v12 = vld [vmem:[%s20431_s3 + $0xe68] ss:$16 sps:$4 sm:$0xff]   ;;  %v17755_v13 = vld [vmem:[%s20431_s3 + $0xe84] ss:$16 sps:$4 sm:$0xff]  }
 0x296   : > { %11855 = vmatprep.subr.bf16.mxu0 %v17671_v14  ;;  %13003 = vmatprep.subr.bf16.mxu1 %v17674_v15  ;;  %v17758_v14 = vld [vmem:[%s20431_s3 + $0xe8c] ss:$16 sps:$4 sm:$0xff]   ;;  %v17753_v15 = vld [vmem:[%s20431_s3 + $0xe80] ss:$16 sps:$4 sm:$0xff]  }
 0x299   : > { %11856 = vmatpush1.bf16.msra.mxu0 %v17669_v16  ;;  %13004 = vmatpush1.bf16.msra.mxu1 %v17672_v17  ;;  %v17756_v16 = vld [vmem:[%s20431_s3 + $0xe88] ss:$16 sps:$4 sm:$0xff]   ;;  %v17761_v17 = vld [vmem:[%s20431_s3 + $0xea4] ss:$16 sps:$4 sm:$0xff]  }
 0x29a   : > { %11857 = vmatprep.subr.bf16.mxu0 %v17677_v18  ;;  %13005 = vmatprep.subr.bf16.mxu1 %v17680_v19  ;;  %v17764_v18 = vld [vmem:[%s20431_s3 + $0xeac] ss:$16 sps:$4 sm:$0xff]   ;;  %v17759_v19 = vld [vmem:[%s20431_s3 + $0xea0] ss:$16 sps:$4 sm:$0xff]  }
 0x29d   : > { %11858 = vmatpush1.bf16.msra.mxu0 %v17675_v20  ;;  %13006 = vmatpush1.bf16.msra.mxu1 %v17678_v21  ;;  %v17762_v20 = vld [vmem:[%s20431_s3 + $0xea8] ss:$16 sps:$4 sm:$0xff]   ;;  %v17767_v21 = vld [vmem:[%s20431_s3 + $0xec4] ss:$16 sps:$4 sm:$0xff]  }
 0x29e   : > { %11859 = vmatprep.subr.bf16.mxu0 %v17683_v22  ;;  %13007 = vmatprep.subr.bf16.mxu1 %v17686_v23  ;;  %v17770_v22 = vld [vmem:[%s20431_s3 + $0xecc] ss:$16 sps:$4 sm:$0xff]   ;;  %v17765_v23 = vld [vmem:[%s20431_s3 + $0xec0] ss:$16 sps:$4 sm:$0xff]  }
 0x2a1   : > { %11860 = vmatpush1.bf16.msra.mxu0 %v17681_v25  ;;  %13008 = vmatpush1.bf16.msra.mxu1 %v17684_v24  ;;  %v17768_v25 = vld [vmem:[%s20431_s3 + $0xec8] ss:$16 sps:$4 sm:$0xff]   ;;  %v17773_v24 = vld [vmem:[%s20431_s3 + $0xee4] ss:$16 sps:$4 sm:$0xff]  }
 0x2a2   : > { %11861 = vmatprep.subr.bf16.mxu0 %v17689_v10  ;;  %13009 = vmatprep.subr.bf16.mxu1 %v17692_v28  ;;  %v17776_v10 = vld [vmem:[%s20431_s3 + $0xeec] ss:$16 sps:$4 sm:$0xff]   ;;  %v17771_v28 = vld [vmem:[%s20431_s3 + $0xee0] ss:$16 sps:$4 sm:$0xff]  }
 0x2a5   : > { %11862 = vmatpush1.bf16.msra.mxu0 %v17687_v30  ;;  %13010 = vmatpush1.bf16.msra.mxu1 %v17690_v31  ;;  %v17774_v30 = vld [vmem:[%s20431_s3 + $0xee8] ss:$16 sps:$4 sm:$0xff]   ;;  %v17779_v31 = vld [vmem:[%s20431_s3 + $0xf04] ss:$16 sps:$4 sm:$0xff]  }
 0x2a6   : > { %11863 = vmatprep.subr.bf16.mxu0 %v17695_v32  ;;  %13011 = vmatprep.subr.bf16.mxu1 %v17698_v34  ;;  %v17782_v32 = vld [vmem:[%s20431_s3 + $0xf0c] ss:$16 sps:$4 sm:$0xff]   ;;  %v17777_v34 = vld [vmem:[%s20431_s3 + $0xf00] ss:$16 sps:$4 sm:$0xff]  }
 0x2a9   : > { %11864 = vmatpush1.bf16.msra.mxu0 %v17693_v35  ;;  %13012 = vmatpush1.bf16.msra.mxu1 %v17696_v36  ;;  %v17780_v35 = vld [vmem:[%s20431_s3 + $0xf08] ss:$16 sps:$4 sm:$0xff]   ;;  %v17785_v36 = vld [vmem:[%s20431_s3 + $0xf24] ss:$16 sps:$4 sm:$0xff]  }
 0x2aa   : > { %11865 = vmatprep.subr.bf16.mxu0 %v17701_v27  ;;  %13013 = vmatprep.subr.bf16.mxu1 %v17704_v37  ;;  %v17788_v27 = vld [vmem:[%s20431_s3 + $0xf2c] ss:$16 sps:$4 sm:$0xff]   ;;  %v17783_v37 = vld [vmem:[%s20431_s3 + $0xf20] ss:$16 sps:$4 sm:$0xff]  }
 0x2ad   : > { %11866 = vmatpush1.bf16.msra.mxu0 %v17699_v38  ;;  %13014 = vmatpush1.bf16.msra.mxu1 %v17702_v39  ;;  %v17786_v38 = vld [vmem:[%s20431_s3 + $0xf28] ss:$16 sps:$4 sm:$0xff]   ;;  %v17791_v39 = vld [vmem:[%s20431_s3 + $0xf44] ss:$16 sps:$4 sm:$0xff]  }
 0x2ae   : > { %11867 = vmatprep.subr.bf16.mxu0 %v17707_v40  ;;  %13015 = vmatprep.subr.bf16.mxu1 %v17710_v29  ;;  %v17794_v40 = vld [vmem:[%s20431_s3 + $0xf4c] ss:$16 sps:$4 sm:$0xff]   ;;  %v17789_v29 = vld [vmem:[%s20431_s3 + $0xf40] ss:$16 sps:$4 sm:$0xff]  }
 0x2b1   : > { %11868 = vmatpush1.bf16.msra.mxu0 %v17705_v42  ;;  %13016 = vmatpush1.bf16.msra.mxu1 %v17708_v45  ;;  %v17792_v42 = vld [vmem:[%s20431_s3 + $0xf48] ss:$16 sps:$4 sm:$0xff]   ;;  %v17797_v45 = vld [vmem:[%s20431_s3 + $0xf64] ss:$16 sps:$4 sm:$0xff]  }
 0x2b2   : > { %11869 = vmatprep.subr.bf16.mxu0 %v17713_v46  ;;  %13017 = vmatprep.subr.bf16.mxu1 %v17716_v26  ;;  %v17800_v46 = vld [vmem:[%s20431_s3 + $0xf6c] ss:$16 sps:$4 sm:$0xff]   ;;  %v17795_v26 = vld [vmem:[%s20431_s3 + $0xf60] ss:$16 sps:$4 sm:$0xff]  }
 0x2b5   : > { %11870 = vmatpush1.bf16.msra.mxu0 %v17711_v47  ;;  %13018 = vmatpush1.bf16.msra.mxu1 %v17714_v49  ;;  %v17798_v47 = vld [vmem:[%s20431_s3 + $0xf68] ss:$16 sps:$4 sm:$0xff]   ;;  %v17803_v49 = vld [vmem:[%s20431_s3 + $0xf84] ss:$16 sps:$4 sm:$0xff]  }
 0x2b6   : > { %11871 = vmatprep.subr.bf16.mxu0 %v17719_v51  ;;  %13019 = vmatprep.subr.bf16.mxu1 %v17722_v52  ;;  %v17806_v51 = vld [vmem:[%s20431_s3 + $0xf8c] ss:$16 sps:$4 sm:$0xff]   ;;  %v17801_v52 = vld [vmem:[%s20431_s3 + $0xf80] ss:$16 sps:$4 sm:$0xff]  }
 0x2b9   : > { %11872 = vmatpush1.bf16.msra.mxu0 %v17717_v53  ;;  %13020 = vmatpush1.bf16.msra.mxu1 %v17720_v54  ;;  %v17809_v53 = vld [vmem:[%s20431_s3 + $0xfa4] ss:$16 sps:$4 sm:$0xff]   ;;  %v17812_v54 = vld [vmem:[%s20431_s3 + $0xfac] ss:$16 sps:$4 sm:$0xff]  }
 0x2ba   : > { %11873 = vmatprep.subr.bf16.mxu0 %v17725_v55  ;;  %13021 = vmatprep.subr.bf16.mxu1 %v17728_v56  ;;  %v17807_v55 = vld [vmem:[%s20431_s3 + $0xfa0] ss:$16 sps:$4 sm:$0xff]   ;;  %v17810_v56 = vld [vmem:[%s20431_s3 + $0xfa8] ss:$16 sps:$4 sm:$0xff]  }
 0x2bd   : > { %11874 = vmatpush1.bf16.msra.mxu0 %v17723_v43  ;;  %13022 = vmatpush1.bf16.msra.mxu1 %v17726_v58  ;;  %v17815_v43 = vld [vmem:[%s20431_s3 + $0xfc4] ss:$16 sps:$4 sm:$0xff]   ;;  %v17818_v58 = vld [vmem:[%s20431_s3 + $0xfcc] ss:$16 sps:$4 sm:$0xff]  }
 0x2be   : > { %11884 = vmatprep.subr.bf16.mxu0 %v17731_v59  ;;  %13032 = vmatprep.subr.bf16.mxu1 %v17734_v41  ;;  %v21034_v59 = vld [vmem:[%s20424_s12 + $0x20] sm:$0xff] }
 0x2bf   : > { %v17813_v41 = vld [vmem:[%s20431_s3 + $0xfc0] ss:$16 sps:$4 sm:$0xff]  }
 0x2c0   : > { %11876 = vmatmul.mubr.bf16.vlgmr.msra.gmra.mrb[0].mxu0 %v801_v61  ;;  %13024 = vmatmul.mubr.bf16.vlgmr.msra.gmra.mrb[0].mxu1 %v801_v61  ;;  %v17821_v61 = vld [vmem:[%s20431_s3 + $0xfe4] ss:$16 sps:$4 sm:$0xff]  }
 0x2c1   : > { %11885 = vmatpush1.bf16.msra.mxu0 %v17729_v62  ;;  %13033 = vmatpush1.bf16.msra.mxu1 %v17732_v63  ;;  %v17824_v62 = vld [vmem:[%s20431_s3 + $0xfec] ss:$16 sps:$4 sm:$0xff]   ;;  %v21042_v63 = vrot.slane %v21034_v59, %v20502_v50 }
 0x2c2   : > { %11886 = vmatprep.subr.bf16.mxu0 %v17737_v0  ;;  %13034 = vmatprep.subr.bf16.mxu1 %v17740_v1  ;;  %v17819_v0 = vld [vmem:[%s20431_s3 + $0xfe0] ss:$16 sps:$4 sm:$0xff]   ;;  %v17822_v1 = vld [vmem:[%s20431_s3 + $0xfe8] ss:$16 sps:$4 sm:$0xff]  }
 0x2c3   : > { %11916 = vmatprep.mubr.bf16.mxu0 %v804_v2  ;;  %13064 = vmatprep.mubr.bf16.mxu1 %v804_v2  ;;  %v17828_v2 = vld [vmem:[%s20431_s3 + $0x1004] ss:$16 sps:$4 sm:$0xff]  }
 0x2c5   : > { %11887 = vmatpush1.bf16.msra.mxu0 %v17735_v48  ;;  %13035 = vmatpush1.bf16.msra.mxu1 %v17738_v3  ;;  %v17831_v48 = vld [vmem:[%s20431_s3 + $0x100c] ss:$16 sps:$4 sm:$0xff]   ;;  %v578_v3 = vcombine.high %v21042_v63, %v21042_v63 }
 0x2c6   : > { %11888 = vmatprep.subr.bf16.mxu0 %v17743_v4  ;;  %13036 = vmatprep.subr.bf16.mxu1 %v17746_v5  ;;  %v803_v4 = vpack.c.bf16 %v20967_v57, %v20967_v57  ;;  %v17826_v5 = vld [vmem:[%s20431_s3 + $0x1000] ss:$16 sps:$4 sm:$0xff]  }
 0x2c7   : > { %v17832_v57 = vld [vmem:[%s20431_s3 + $0x1020] ss:$16 sps:$4 sm:$0xff]  }
 0x2c9   : > { %11889 = vmatpush1.bf16.msra.mxu0 %v17741_v6  ;;  %13037 = vmatpush1.bf16.msra.mxu1 %v17744_v7  ;;  %v17829_v6 = vld [vmem:[%s20431_s3 + $0x1008] ss:$16 sps:$4 sm:$0xff]   ;;  %v17834_v7 = vld [vmem:[%s20431_s3 + $0x1024] ss:$16 sps:$4 sm:$0xff]  }
 0x2ca   : > { %11890 = vmatprep.subr.bf16.mxu0 %v17749_v8  ;;  %13038 = vmatprep.subr.bf16.mxu1 %v17752_v9  ;;  %v17837_v8 = vld [vmem:[%s20431_s3 + $0x102c] ss:$16 sps:$4 sm:$0xff]   ;;  %v806_v9 = vpack.c.bf16 %v578_v3, %v578_v3  ;;  %v17910_v3 = vld [vmem:[%s20431_s3 + $0x11c0] ss:$16 sps:$4 sm:$0xff]  }
 0x2cd   : > { %11891 = vmatpush1.bf16.msra.mxu0 %v17747_v11  ;;  %13039 = vmatpush1.bf16.msra.mxu1 %v17750_v12  ;;  %v17835_v11 = vld [vmem:[%s20431_s3 + $0x1028] ss:$16 sps:$4 sm:$0xff]   ;;  %v17840_v12 = vld [vmem:[%s20431_s3 + $0x1044] ss:$16 sps:$4 sm:$0xff]  }
 0x2ce   : > { %11892 = vmatprep.subr.bf16.mxu0 %v17755_v13  ;;  %13040 = vmatprep.subr.bf16.mxu1 %v17758_v14  ;;  %v17843_v13 = vld [vmem:[%s20431_s3 + $0x104c] ss:$16 sps:$4 sm:$0xff]   ;;  %v17838_v14 = vld [vmem:[%s20431_s3 + $0x1040] ss:$16 sps:$4 sm:$0xff]  }
 0x2d1   : > { %11893 = vmatpush1.bf16.msra.mxu0 %v17753_v15  ;;  %13041 = vmatpush1.bf16.msra.mxu1 %v17756_v16  ;;  %v17841_v15 = vld [vmem:[%s20431_s3 + $0x1048] ss:$16 sps:$4 sm:$0xff]   ;;  %v17846_v16 = vld [vmem:[%s20431_s3 + $0x1064] ss:$16 sps:$4 sm:$0xff]  }
 0x2d2   : > { %11894 = vmatprep.subr.bf16.mxu0 %v17761_v17  ;;  %13042 = vmatprep.subr.bf16.mxu1 %v17764_v18  ;;  %v17849_v17 = vld [vmem:[%s20431_s3 + $0x106c] ss:$16 sps:$4 sm:$0xff]   ;;  %v17844_v18 = vld [vmem:[%s20431_s3 + $0x1060] ss:$16 sps:$4 sm:$0xff]  }
 0x2d5   : > { %11895 = vmatpush1.bf16.msra.mxu0 %v17759_v19  ;;  %13043 = vmatpush1.bf16.msra.mxu1 %v17762_v20  ;;  %v17847_v19 = vld [vmem:[%s20431_s3 + $0x1068] ss:$16 sps:$4 sm:$0xff]   ;;  %v17852_v20 = vld [vmem:[%s20431_s3 + $0x1084] ss:$16 sps:$4 sm:$0xff]  }
 0x2d6   : > { %11896 = vmatprep.subr.bf16.mxu0 %v17767_v21  ;;  %13044 = vmatprep.subr.bf16.mxu1 %v17770_v22  ;;  %v17855_v21 = vld [vmem:[%s20431_s3 + $0x108c] ss:$16 sps:$4 sm:$0xff]   ;;  %v17850_v22 = vld [vmem:[%s20431_s3 + $0x1080] ss:$16 sps:$4 sm:$0xff]  }
 0x2d9   : > { %11897 = vmatpush1.bf16.msra.mxu0 %v17765_v23  ;;  %13045 = vmatpush1.bf16.msra.mxu1 %v17768_v25  ;;  %v17853_v23 = vld [vmem:[%s20431_s3 + $0x1088] ss:$16 sps:$4 sm:$0xff]   ;;  %v17858_v25 = vld [vmem:[%s20431_s3 + $0x10a4] ss:$16 sps:$4 sm:$0xff]  }
 0x2da   : > { %11898 = vmatprep.subr.bf16.mxu0 %v17773_v24  ;;  %13046 = vmatprep.subr.bf16.mxu1 %v17776_v10  ;;  %v17861_v24 = vld [vmem:[%s20431_s3 + $0x10ac] ss:$16 sps:$4 sm:$0xff]   ;;  %v17856_v10 = vld [vmem:[%s20431_s3 + $0x10a0] ss:$16 sps:$4 sm:$0xff]  }
 0x2dd   : > { %11899 = vmatpush1.bf16.msra.mxu0 %v17771_v28  ;;  %13047 = vmatpush1.bf16.msra.mxu1 %v17774_v30  ;;  %v17859_v28 = vld [vmem:[%s20431_s3 + $0x10a8] ss:$16 sps:$4 sm:$0xff]   ;;  %v17864_v30 = vld [vmem:[%s20431_s3 + $0x10c4] ss:$16 sps:$4 sm:$0xff]  }
 0x2de   : > { %11900 = vmatprep.subr.bf16.mxu0 %v17779_v31  ;;  %13048 = vmatprep.subr.bf16.mxu1 %v17782_v32  ;;  %v17867_v31 = vld [vmem:[%s20431_s3 + $0x10cc] ss:$16 sps:$4 sm:$0xff]   ;;  %v17862_v32 = vld [vmem:[%s20431_s3 + $0x10c0] ss:$16 sps:$4 sm:$0xff]  }
 0x2e1   : > { %11901 = vmatpush1.bf16.msra.mxu0 %v17777_v34  ;;  %13049 = vmatpush1.bf16.msra.mxu1 %v17780_v35  ;;  %v17865_v34 = vld [vmem:[%s20431_s3 + $0x10c8] ss:$16 sps:$4 sm:$0xff]   ;;  %v17870_v35 = vld [vmem:[%s20431_s3 + $0x10e4] ss:$16 sps:$4 sm:$0xff]  }
 0x2e2   : > { %11902 = vmatprep.subr.bf16.mxu0 %v17785_v36  ;;  %13050 = vmatprep.subr.bf16.mxu1 %v17788_v27  ;;  %v17873_v36 = vld [vmem:[%s20431_s3 + $0x10ec] ss:$16 sps:$4 sm:$0xff]   ;;  %v17868_v27 = vld [vmem:[%s20431_s3 + $0x10e0] ss:$16 sps:$4 sm:$0xff]  }
 0x2e5   : > { %11903 = vmatpush1.bf16.msra.mxu0 %v17783_v37  ;;  %13051 = vmatpush1.bf16.msra.mxu1 %v17786_v38  ;;  %v17871_v37 = vld [vmem:[%s20431_s3 + $0x10e8] ss:$16 sps:$4 sm:$0xff]   ;;  %v17876_v38 = vld [vmem:[%s20431_s3 + $0x1104] ss:$16 sps:$4 sm:$0xff]  }
 0x2e6   : > { %11904 = vmatprep.subr.bf16.mxu0 %v17791_v39  ;;  %13052 = vmatprep.subr.bf16.mxu1 %v17794_v40  ;;  %v17879_v39 = vld [vmem:[%s20431_s3 + $0x110c] ss:$16 sps:$4 sm:$0xff]   ;;  %v17874_v40 = vld [vmem:[%s20431_s3 + $0x1100] ss:$16 sps:$4 sm:$0xff]  }
 0x2e9   : > { %11905 = vmatpush1.bf16.msra.mxu0 %v17789_v29  ;;  %13053 = vmatpush1.bf16.msra.mxu1 %v17792_v42  ;;  %v17877_v29 = vld [vmem:[%s20431_s3 + $0x1108] ss:$16 sps:$4 sm:$0xff]   ;;  %v17882_v42 = vld [vmem:[%s20431_s3 + $0x1124] ss:$16 sps:$4 sm:$0xff]  }
 0x2ea   : > { %11906 = vmatprep.subr.bf16.mxu0 %v17797_v45  ;;  %13054 = vmatprep.subr.bf16.mxu1 %v17800_v46  ;;  %v17885_v45 = vld [vmem:[%s20431_s3 + $0x112c] ss:$16 sps:$4 sm:$0xff]   ;;  %v17880_v46 = vld [vmem:[%s20431_s3 + $0x1120] ss:$16 sps:$4 sm:$0xff]  }
 0x2ed   : > { %11907 = vmatpush1.bf16.msra.mxu0 %v17795_v26  ;;  %13055 = vmatpush1.bf16.msra.mxu1 %v17798_v47  ;;  %v17883_v26 = vld [vmem:[%s20431_s3 + $0x1128] ss:$16 sps:$4 sm:$0xff]   ;;  %v17888_v47 = vld [vmem:[%s20431_s3 + $0x1144] ss:$16 sps:$4 sm:$0xff]  }
 0x2ee   : > { %11908 = vmatprep.subr.bf16.mxu0 %v17803_v49  ;;  %13056 = vmatprep.subr.bf16.mxu1 %v17806_v51  ;;  %v17891_v49 = vld [vmem:[%s20431_s3 + $0x114c] ss:$16 sps:$4 sm:$0xff]   ;;  %v17886_v51 = vld [vmem:[%s20431_s3 + $0x1140] ss:$16 sps:$4 sm:$0xff]  }
 0x2f1   : > { %11909 = vmatpush1.bf16.msra.mxu0 %v17801_v52  ;;  %13057 = vmatpush1.bf16.msra.mxu1 %v17804_v33  ;;  %v17889_v52 = vld [vmem:[%s20431_s3 + $0x1148] ss:$16 sps:$4 sm:$0xff]   ;;  %v17894_v33 = vld [vmem:[%s20431_s3 + $0x1164] ss:$16 sps:$4 sm:$0xff]  }
 0x2f2   : > { %11910 = vmatprep.subr.bf16.mxu0 %v17809_v53  ;;  %13058 = vmatprep.subr.bf16.mxu1 %v17812_v54  ;;  %v17897_v53 = vld [vmem:[%s20431_s3 + $0x116c] ss:$16 sps:$4 sm:$0xff]   ;;  %v17892_v54 = vld [vmem:[%s20431_s3 + $0x1160] ss:$16 sps:$4 sm:$0xff]  }
 0x2f5   : > { %11911 = vmatpush1.bf16.msra.mxu0 %v17807_v55  ;;  %13059 = vmatpush1.bf16.msra.mxu1 %v17810_v56  ;;  %v17895_v55 = vld [vmem:[%s20431_s3 + $0x1168] ss:$16 sps:$4 sm:$0xff]   ;;  %v17900_v56 = vld [vmem:[%s20431_s3 + $0x1184] ss:$16 sps:$4 sm:$0xff]  }
 0x2f6   : > { %11912 = vmatprep.subr.bf16.mxu0 %v17815_v43  ;;  %13060 = vmatprep.subr.bf16.mxu1 %v17818_v58  ;;  %v17903_v43 = vld [vmem:[%s20431_s3 + $0x118c] ss:$16 sps:$4 sm:$0xff]   ;;  %v17898_v58 = vld [vmem:[%s20431_s3 + $0x1180] ss:$16 sps:$4 sm:$0xff]  }
 0x2f9   : > { %11913 = vmatpush1.bf16.msra.mxu0 %v17813_v41  ;;  %13061 = vmatpush1.bf16.msra.mxu1 %v17816_v60  ;;  %v17901_v41 = vld [vmem:[%s20431_s3 + $0x1188] ss:$16 sps:$4 sm:$0xff]   ;;  %v17906_v60 = vld [vmem:[%s20431_s3 + $0x11a4] ss:$16 sps:$4 sm:$0xff]  }
 0x2fa   : > { %11914 = vmatprep.subr.bf16.mxu0 %v17821_v61  ;;  %13062 = vmatprep.subr.bf16.mxu1 %v17824_v62  ;;  %v17909_v61 = vld [vmem:[%s20431_s3 + $0x11ac] ss:$16 sps:$4 sm:$0xff]   ;;  %v17904_v62 = vld [vmem:[%s20431_s3 + $0x11a0] ss:$16 sps:$4 sm:$0xff]  }
 0x2fd   : > { %11915 = vmatpush1.bf16.msra.mxu0 %v17819_v0  ;;  %13063 = vmatpush1.bf16.msra.mxu1 %v17822_v1  ;;  %v17907_v0 = vld [vmem:[%s20431_s3 + $0x11a8] ss:$16 sps:$4 sm:$0xff]   ;;  %v17912_v1 = vld [vmem:[%s20431_s3 + $0x11c4] ss:$16 sps:$4 sm:$0xff]  }
 0x2fe   : > { %11925 = vmatprep.subr.bf16.mxu0 %v17828_v2  ;;  %13073 = vmatprep.subr.bf16.mxu1 %v17831_v48  ;;  %v17915_v2 = vld [vmem:[%s20431_s3 + $0x11cc] ss:$16 sps:$4 sm:$0xff]   ;;  %v563_v48 = vcombine.high %v21034_v59, %v21034_v59  ;;  %v17916_v59 = vld [vmem:[%s20431_s3 + $0x11e0] ss:$16 sps:$4 sm:$0xff]  }
 0x300   : > { %11917 = vmatmul.mubr.bf16.vlgmr.msra.gmra.mrb[0].mxu0 %v803_v4  ;;  %13065 = vmatmul.mubr.bf16.vlgmr.msra.gmra.mrb[0].mxu1 %v803_v4  ;;  %v17913_v4 = vld [vmem:[%s20431_s3 + $0x11c8] ss:$16 sps:$4 sm:$0xff]  }
 0x301   : > { %11926 = vmatpush1.bf16.msra.mxu0 %v17826_v5  ;;  %13074 = vmatpush1.bf16.msra.mxu1 %v17829_v6  ;;  %v17918_v5 = vld [vmem:[%s20431_s3 + $0x11e4] ss:$16 sps:$4 sm:$0xff]   ;;  %v17921_v6 = vld [vmem:[%s20431_s3 + $0x11ec] ss:$16 sps:$4 sm:$0xff]  }
 0x302   : > { %11927 = vmatprep.subr.bf16.mxu0 %v17834_v7  ;;  %13075 = vmatprep.subr.bf16.mxu1 %v17837_v8  ;;  %v21115_v7 = vrot.slane %v563_v48, %v20502_v50  ;;  %v17919_v8 = vld [vmem:[%s20431_s3 + $0x11e8] ss:$16 sps:$4 sm:$0xff]  }
 0x303   : > { %11957 = vmatprep.mubr.bf16.mxu0 %v806_v9  ;;  %13105 = vmatprep.mubr.bf16.mxu1 %v806_v9  ;;  %v17924_v9 = vld [vmem:[%s20431_s3 + $0x1204] ss:$16 sps:$4 sm:$0xff]   ;;  %v17997_v48 = vld [vmem:[%s20431_s3 + $0x1388] ss:$16 sps:$4 sm:$0xff]  }
 0x305   : > { %11928 = vmatpush1.bf16.msra.mxu0 %v17832_v57  ;;  %13076 = vmatpush1.bf16.msra.mxu1 %v17835_v11  ;;  %v17927_v57 = vld [vmem:[%s20431_s3 + $0x120c] ss:$16 sps:$4 sm:$0xff]   ;;  %v579_v11 = vcombine.high %v21115_v7, %v21115_v7 }
 0x306   : > { %11929 = vmatprep.subr.bf16.mxu0 %v17840_v12  ;;  %13077 = vmatprep.subr.bf16.mxu1 %v17843_v13  ;;  %v805_v12 = vpack.c.bf16 %v21042_v63, %v21042_v63  ;;  %v17922_v13 = vld [vmem:[%s20431_s3 + $0x1200] ss:$16 sps:$4 sm:$0xff]  }
 0x307   : > { %v17928_v63 = vld [vmem:[%s20431_s3 + $0x1220] ss:$16 sps:$4 sm:$0xff]  }
 0x309   : > { %11930 = vmatpush1.bf16.msra.mxu0 %v17838_v14  ;;  %13078 = vmatpush1.bf16.msra.mxu1 %v17841_v15  ;;  %v17925_v14 = vld [vmem:[%s20431_s3 + $0x1208] ss:$16 sps:$4 sm:$0xff]   ;;  %v17930_v15 = vld [vmem:[%s20431_s3 + $0x1224] ss:$16 sps:$4 sm:$0xff]  }
 0x30a   : > { %11931 = vmatprep.subr.bf16.mxu0 %v17846_v16  ;;  %13079 = vmatprep.subr.bf16.mxu1 %v17849_v17  ;;  %v17933_v16 = vld [vmem:[%s20431_s3 + $0x122c] ss:$16 sps:$4 sm:$0xff]   ;;  %v808_v17 = vpack.c.bf16 %v579_v11, %v579_v11  ;;  %v18009_v11 = vld [vmem:[%s20431_s3 + $0x13c8] ss:$16 sps:$4 sm:$0xff]  }
 0x30d   : > { %11932 = vmatpush1.bf16.msra.mxu0 %v17844_v18  ;;  %13080 = vmatpush1.bf16.msra.mxu1 %v17847_v19  ;;  %v17931_v18 = vld [vmem:[%s20431_s3 + $0x1228] ss:$16 sps:$4 sm:$0xff]   ;;  %v17936_v19 = vld [vmem:[%s20431_s3 + $0x1244] ss:$16 sps:$4 sm:$0xff]  }
 0x30e   : > { %11933 = vmatprep.subr.bf16.mxu0 %v17852_v20  ;;  %13081 = vmatprep.subr.bf16.mxu1 %v17855_v21  ;;  %v17939_v20 = vld [vmem:[%s20431_s3 + $0x124c] ss:$16 sps:$4 sm:$0xff]   ;;  %v17934_v21 = vld [vmem:[%s20431_s3 + $0x1240] ss:$16 sps:$4 sm:$0xff]  }
 0x311   : > { %11934 = vmatpush1.bf16.msra.mxu0 %v17850_v22  ;;  %13082 = vmatpush1.bf16.msra.mxu1 %v17853_v23  ;;  %v17937_v22 = vld [vmem:[%s20431_s3 + $0x1248] ss:$16 sps:$4 sm:$0xff]   ;;  %v17942_v23 = vld [vmem:[%s20431_s3 + $0x1264] ss:$16 sps:$4 sm:$0xff]  }
 0x312   : > { %11935 = vmatprep.subr.bf16.mxu0 %v17858_v25  ;;  %13083 = vmatprep.subr.bf16.mxu1 %v17861_v24  ;;  %v17945_v25 = vld [vmem:[%s20431_s3 + $0x126c] ss:$16 sps:$4 sm:$0xff]   ;;  %v17940_v24 = vld [vmem:[%s20431_s3 + $0x1260] ss:$16 sps:$4 sm:$0xff]  }
 0x315   : > { %11936 = vmatpush1.bf16.msra.mxu0 %v17856_v10  ;;  %13084 = vmatpush1.bf16.msra.mxu1 %v17859_v28  ;;  %v17943_v10 = vld [vmem:[%s20431_s3 + $0x1268] ss:$16 sps:$4 sm:$0xff]   ;;  %v17948_v28 = vld [vmem:[%s20431_s3 + $0x1284] ss:$16 sps:$4 sm:$0xff]  }
 0x316   : > { %11937 = vmatprep.subr.bf16.mxu0 %v17864_v30  ;;  %13085 = vmatprep.subr.bf16.mxu1 %v17867_v31  ;;  %v17951_v30 = vld [vmem:[%s20431_s3 + $0x128c] ss:$16 sps:$4 sm:$0xff]   ;;  %v17946_v31 = vld [vmem:[%s20431_s3 + $0x1280] ss:$16 sps:$4 sm:$0xff]  }
 0x319   : > { %11938 = vmatpush1.bf16.msra.mxu0 %v17862_v32  ;;  %13086 = vmatpush1.bf16.msra.mxu1 %v17865_v34  ;;  %v17949_v32 = vld [vmem:[%s20431_s3 + $0x1288] ss:$16 sps:$4 sm:$0xff]   ;;  %v17954_v34 = vld [vmem:[%s20431_s3 + $0x12a4] ss:$16 sps:$4 sm:$0xff]  }
 0x31a   : > { %11939 = vmatprep.subr.bf16.mxu0 %v17870_v35  ;;  %13087 = vmatprep.subr.bf16.mxu1 %v17873_v36  ;;  %v17957_v35 = vld [vmem:[%s20431_s3 + $0x12ac] ss:$16 sps:$4 sm:$0xff]   ;;  %v17952_v36 = vld [vmem:[%s20431_s3 + $0x12a0] ss:$16 sps:$4 sm:$0xff]  }
 0x31d   : > { %11940 = vmatpush1.bf16.msra.mxu0 %v17868_v27  ;;  %13088 = vmatpush1.bf16.msra.mxu1 %v17871_v37  ;;  %v17955_v27 = vld [vmem:[%s20431_s3 + $0x12a8] ss:$16 sps:$4 sm:$0xff]   ;;  %v17960_v37 = vld [vmem:[%s20431_s3 + $0x12c4] ss:$16 sps:$4 sm:$0xff]  }
 0x31e   : > { %11941 = vmatprep.subr.bf16.mxu0 %v17876_v38  ;;  %13089 = vmatprep.subr.bf16.mxu1 %v17879_v39  ;;  %v17963_v38 = vld [vmem:[%s20431_s3 + $0x12cc] ss:$16 sps:$4 sm:$0xff]   ;;  %v17958_v39 = vld [vmem:[%s20431_s3 + $0x12c0] ss:$16 sps:$4 sm:$0xff]  }
 0x321   : > { %11942 = vmatpush1.bf16.msra.mxu0 %v17874_v40  ;;  %13090 = vmatpush1.bf16.msra.mxu1 %v17877_v29  ;;  %v17961_v40 = vld [vmem:[%s20431_s3 + $0x12c8] ss:$16 sps:$4 sm:$0xff]   ;;  %v17966_v29 = vld [vmem:[%s20431_s3 + $0x12e4] ss:$16 sps:$4 sm:$0xff]  }
 0x322   : > { %11943 = vmatprep.subr.bf16.mxu0 %v17882_v42  ;;  %13091 = vmatprep.subr.bf16.mxu1 %v17885_v45  ;;  %v17969_v42 = vld [vmem:[%s20431_s3 + $0x12ec] ss:$16 sps:$4 sm:$0xff]   ;;  %v17964_v45 = vld [vmem:[%s20431_s3 + $0x12e0] ss:$16 sps:$4 sm:$0xff]  }
 0x325   : > { %11944 = vmatpush1.bf16.msra.mxu0 %v17880_v46  ;;  %13092 = vmatpush1.bf16.msra.mxu1 %v17883_v26  ;;  %v17967_v46 = vld [vmem:[%s20431_s3 + $0x12e8] ss:$16 sps:$4 sm:$0xff]   ;;  %v17972_v26 = vld [vmem:[%s20431_s3 + $0x1304] ss:$16 sps:$4 sm:$0xff]  }
 0x326   : > { %11945 = vmatprep.subr.bf16.mxu0 %v17888_v47  ;;  %13093 = vmatprep.subr.bf16.mxu1 %v17891_v49  ;;  %v17975_v47 = vld [vmem:[%s20431_s3 + $0x130c] ss:$16 sps:$4 sm:$0xff]   ;;  %v17970_v49 = vld [vmem:[%s20431_s3 + $0x1300] ss:$16 sps:$4 sm:$0xff]  }
 0x329   : > { %11946 = vmatpush1.bf16.msra.mxu0 %v17886_v51  ;;  %13094 = vmatpush1.bf16.msra.mxu1 %v17889_v52  ;;  %v17973_v51 = vld [vmem:[%s20431_s3 + $0x1308] ss:$16 sps:$4 sm:$0xff]   ;;  %v17978_v52 = vld [vmem:[%s20431_s3 + $0x1324] ss:$16 sps:$4 sm:$0xff]  }
 0x32a   : > { %11947 = vmatprep.subr.bf16.mxu0 %v17894_v33  ;;  %13095 = vmatprep.subr.bf16.mxu1 %v17897_v53  ;;  %v17981_v33 = vld [vmem:[%s20431_s3 + $0x132c] ss:$16 sps:$4 sm:$0xff]   ;;  %v17976_v53 = vld [vmem:[%s20431_s3 + $0x1320] ss:$16 sps:$4 sm:$0xff]  }
 0x32d   : > { %11948 = vmatpush1.bf16.msra.mxu0 %v17892_v54  ;;  %13096 = vmatpush1.bf16.msra.mxu1 %v17895_v55  ;;  %v17979_v54 = vld [vmem:[%s20431_s3 + $0x1328] ss:$16 sps:$4 sm:$0xff]   ;;  %v17984_v55 = vld [vmem:[%s20431_s3 + $0x1344] ss:$16 sps:$4 sm:$0xff]  }
 0x32e   : > { %11949 = vmatprep.subr.bf16.mxu0 %v17900_v56  ;;  %13097 = vmatprep.subr.bf16.mxu1 %v17903_v43  ;;  %v17987_v56 = vld [vmem:[%s20431_s3 + $0x134c] ss:$16 sps:$4 sm:$0xff]   ;;  %v17982_v43 = vld [vmem:[%s20431_s3 + $0x1340] ss:$16 sps:$4 sm:$0xff]  }
 0x331   : > { %11950 = vmatpush1.bf16.msra.mxu0 %v17898_v58  ;;  %13098 = vmatpush1.bf16.msra.mxu1 %v17901_v41  ;;  %v17985_v58 = vld [vmem:[%s20431_s3 + $0x1348] ss:$16 sps:$4 sm:$0xff]   ;;  %v17990_v41 = vld [vmem:[%s20431_s3 + $0x1364] ss:$16 sps:$4 sm:$0xff]  }
 0x332   : > { %11951 = vmatprep.subr.bf16.mxu0 %v17906_v60  ;;  %13099 = vmatprep.subr.bf16.mxu1 %v17909_v61  ;;  %v17993_v60 = vld [vmem:[%s20431_s3 + $0x136c] ss:$16 sps:$4 sm:$0xff]   ;;  %v17988_v61 = vld [vmem:[%s20431_s3 + $0x1360] ss:$16 sps:$4 sm:$0xff]  }
 0x335   : > { %11952 = vmatpush1.bf16.msra.mxu0 %v17904_v62  ;;  %13100 = vmatpush1.bf16.msra.mxu1 %v17907_v0  ;;  %v17991_v62 = vld [vmem:[%s20431_s3 + $0x1368] ss:$16 sps:$4 sm:$0xff]   ;;  %v17996_v0 = vld [vmem:[%s20431_s3 + $0x1384] ss:$16 sps:$4 sm:$0xff]  }
 0x336   : > { %11953 = vmatprep.subr.bf16.mxu0 %v17912_v1  ;;  %13101 = vmatprep.subr.bf16.mxu1 %v17915_v2  ;;  %v17999_v1 = vld [vmem:[%s20431_s3 + $0x138c] ss:$16 sps:$4 sm:$0xff]   ;;  %v17994_v2 = vld [vmem:[%s20431_s3 + $0x1380] ss:$16 sps:$4 sm:$0xff]  }
 0x339   : > { %11954 = vmatpush1.bf16.msra.mxu0 %v17910_v3  ;;  %13102 = vmatpush1.bf16.msra.mxu1 %v17913_v4  ;;  %v18002_v3 = vld [vmem:[%s20431_s3 + $0x13a4] ss:$16 sps:$4 sm:$0xff]   ;;  %v18005_v4 = vld [vmem:[%s20431_s3 + $0x13ac] ss:$16 sps:$4 sm:$0xff]  }
 0x33a   : > { %11955 = vmatprep.subr.bf16.mxu0 %v17918_v5  ;;  %13103 = vmatprep.subr.bf16.mxu1 %v17921_v6  ;;  %v18000_v5 = vld [vmem:[%s20431_s3 + $0x13a0] ss:$16 sps:$4 sm:$0xff]   ;;  %v18003_v6 = vld [vmem:[%s20431_s3 + $0x13a8] ss:$16 sps:$4 sm:$0xff]  }
 0x33d   : > { %11956 = vmatpush1.bf16.msra.mxu0 %v17916_v59  ;;  %13104 = vmatpush1.bf16.msra.mxu1 %v17919_v8  ;;  %v18008_v59 = vld [vmem:[%s20431_s3 + $0x13c4] ss:$16 sps:$4 sm:$0xff]   ;;  %v18011_v8 = vld [vmem:[%s20431_s3 + $0x13cc] ss:$16 sps:$4 sm:$0xff]  }
 0x33e   : > { %11966 = vmatprep.subr.bf16.mxu0 %v17924_v9  ;;  %13114 = vmatprep.subr.bf16.mxu1 %v17927_v57  ;;  %v21182_v9 = vld [vmem:[%s20424_s12 + $0x28] sm:$0xff]  ;;  %v18006_v57 = vld [vmem:[%s20431_s3 + $0x13c0] ss:$16 sps:$4 sm:$0xff]  }
 0x340   : > { %11958 = vmatmul.mubr.bf16.vlgmr.msra.gmra.mrb[0].mxu0 %v805_v12  ;;  %13106 = vmatmul.mubr.bf16.vlgmr.msra.gmra.mrb[0].mxu1 %v805_v12  ;;  %v18014_v12 = vld [vmem:[%s20431_s3 + $0x13e4] ss:$16 sps:$4 sm:$0xff]  }
 0x341   : > { %11967 = vmatpush1.bf16.msra.mxu0 %v17922_v13  ;;  %13115 = vmatpush1.bf16.msra.mxu1 %v17925_v14  ;;  %v18017_v13 = vld [vmem:[%s20431_s3 + $0x13ec] ss:$16 sps:$4 sm:$0xff]   ;;  %v21190_v14 = vrot.slane %v21182_v9, %v20502_v50 }
 0x342   : > { %11968 = vmatprep.subr.bf16.mxu0 %v17930_v15  ;;  %13116 = vmatprep.subr.bf16.mxu1 %v17933_v16  ;;  %v18012_v15 = vld [vmem:[%s20431_s3 + $0x13e0] ss:$16 sps:$4 sm:$0xff]   ;;  %v18015_v16 = vld [vmem:[%s20431_s3 + $0x13e8] ss:$16 sps:$4 sm:$0xff]  }
 0x343   : > { %11998 = vmatprep.mubr.bf16.mxu0 %v808_v17  ;;  %13146 = vmatprep.mubr.bf16.mxu1 %v808_v17  ;;  %v18021_v17 = vld [vmem:[%s20431_s3 + $0x1404] ss:$16 sps:$4 sm:$0xff]  }
 0x345   : > { %11969 = vmatpush1.bf16.msra.mxu0 %v17928_v63  ;;  %13117 = vmatpush1.bf16.msra.mxu1 %v17931_v18  ;;  %v18024_v63 = vld [vmem:[%s20431_s3 + $0x140c] ss:$16 sps:$4 sm:$0xff]   ;;  %v595_v18 = vcombine.high %v21190_v14, %v21190_v14 }
 0x346   : > { %11970 = vmatprep.subr.bf16.mxu0 %v17936_v19  ;;  %13118 = vmatprep.subr.bf16.mxu1 %v17939_v20  ;;  %v807_v19 = vpack.c.bf16 %v21115_v7, %v21115_v7  ;;  %v18019_v20 = vld [vmem:[%s20431_s3 + $0x1400] ss:$16 sps:$4 sm:$0xff]  }
 0x347   : > { %v18025_v7 = vld [vmem:[%s20431_s3 + $0x1420] ss:$16 sps:$4 sm:$0xff]  }
 0x349   : > { %11971 = vmatpush1.bf16.msra.mxu0 %v17934_v21  ;;  %13119 = vmatpush1.bf16.msra.mxu1 %v17937_v22  ;;  %v18022_v21 = vld [vmem:[%s20431_s3 + $0x1408] ss:$16 sps:$4 sm:$0xff]   ;;  %v18027_v22 = vld [vmem:[%s20431_s3 + $0x1424] ss:$16 sps:$4 sm:$0xff]  }
 0x34a   : > { %11972 = vmatprep.subr.bf16.mxu0 %v17942_v23  ;;  %13120 = vmatprep.subr.bf16.mxu1 %v17945_v25  ;;  %v18030_v23 = vld [vmem:[%s20431_s3 + $0x142c] ss:$16 sps:$4 sm:$0xff]   ;;  %v810_v25 = vpack.c.bf16 %v595_v18, %v595_v18  ;;  %v18103_v18 = vld [vmem:[%s20431_s3 + $0x15c0] ss:$16 sps:$4 sm:$0xff]  }
 0x34d   : > { %11973 = vmatpush1.bf16.msra.mxu0 %v17940_v24  ;;  %13121 = vmatpush1.bf16.msra.mxu1 %v17943_v10  ;;  %v18028_v24 = vld [vmem:[%s20431_s3 + $0x1428] ss:$16 sps:$4 sm:$0xff]   ;;  %v18033_v10 = vld [vmem:[%s20431_s3 + $0x1444] ss:$16 sps:$4 sm:$0xff]  }
 0x34e   : > { %11974 = vmatprep.subr.bf16.mxu0 %v17948_v28  ;;  %13122 = vmatprep.subr.bf16.mxu1 %v17951_v30  ;;  %v18036_v28 = vld [vmem:[%s20431_s3 + $0x144c] ss:$16 sps:$4 sm:$0xff]   ;;  %v18031_v30 = vld [vmem:[%s20431_s3 + $0x1440] ss:$16 sps:$4 sm:$0xff]  }
 0x351   : > { %11975 = vmatpush1.bf16.msra.mxu0 %v17946_v31  ;;  %13123 = vmatpush1.bf16.msra.mxu1 %v17949_v32  ;;  %v18034_v31 = vld [vmem:[%s20431_s3 + $0x1448] ss:$16 sps:$4 sm:$0xff]   ;;  %v18039_v32 = vld [vmem:[%s20431_s3 + $0x1464] ss:$16 sps:$4 sm:$0xff]  }
 0x352   : > { %11976 = vmatprep.subr.bf16.mxu0 %v17954_v34  ;;  %13124 = vmatprep.subr.bf16.mxu1 %v17957_v35  ;;  %v18042_v34 = vld [vmem:[%s20431_s3 + $0x146c] ss:$16 sps:$4 sm:$0xff]   ;;  %v18037_v35 = vld [vmem:[%s20431_s3 + $0x1460] ss:$16 sps:$4 sm:$0xff]  }
 0x355   : > { %11977 = vmatpush1.bf16.msra.mxu0 %v17952_v36  ;;  %13125 = vmatpush1.bf16.msra.mxu1 %v17955_v27  ;;  %v18040_v36 = vld [vmem:[%s20431_s3 + $0x1468] ss:$16 sps:$4 sm:$0xff]   ;;  %v18045_v27 = vld [vmem:[%s20431_s3 + $0x1484] ss:$16 sps:$4 sm:$0xff]  }
 0x356   : > { %11978 = vmatprep.subr.bf16.mxu0 %v17960_v37  ;;  %13126 = vmatprep.subr.bf16.mxu1 %v17963_v38  ;;  %v18048_v37 = vld [vmem:[%s20431_s3 + $0x148c] ss:$16 sps:$4 sm:$0xff]   ;;  %v18043_v38 = vld [vmem:[%s20431_s3 + $0x1480] ss:$16 sps:$4 sm:$0xff]  }
 0x359   : > { %11979 = vmatpush1.bf16.msra.mxu0 %v17958_v39  ;;  %13127 = vmatpush1.bf16.msra.mxu1 %v17961_v40  ;;  %v18046_v39 = vld [vmem:[%s20431_s3 + $0x1488] ss:$16 sps:$4 sm:$0xff]   ;;  %v18051_v40 = vld [vmem:[%s20431_s3 + $0x14a4] ss:$16 sps:$4 sm:$0xff]  }
 0x35a   : > { %11980 = vmatprep.subr.bf16.mxu0 %v17966_v29  ;;  %13128 = vmatprep.subr.bf16.mxu1 %v17969_v42  ;;  %v18054_v29 = vld [vmem:[%s20431_s3 + $0x14ac] ss:$16 sps:$4 sm:$0xff]   ;;  %v18049_v42 = vld [vmem:[%s20431_s3 + $0x14a0] ss:$16 sps:$4 sm:$0xff]  }
 0x35d   : > { %11981 = vmatpush1.bf16.msra.mxu0 %v17964_v45  ;;  %13129 = vmatpush1.bf16.msra.mxu1 %v17967_v46  ;;  %v18052_v45 = vld [vmem:[%s20431_s3 + $0x14a8] ss:$16 sps:$4 sm:$0xff]   ;;  %v18057_v46 = vld [vmem:[%s20431_s3 + $0x14c4] ss:$16 sps:$4 sm:$0xff]  }
 0x35e   : > { %11982 = vmatprep.subr.bf16.mxu0 %v17972_v26  ;;  %13130 = vmatprep.subr.bf16.mxu1 %v17975_v47  ;;  %v18060_v26 = vld [vmem:[%s20431_s3 + $0x14cc] ss:$16 sps:$4 sm:$0xff]   ;;  %v18055_v47 = vld [vmem:[%s20431_s3 + $0x14c0] ss:$16 sps:$4 sm:$0xff]  }
 0x361   : > { %11983 = vmatpush1.bf16.msra.mxu0 %v17970_v49  ;;  %13131 = vmatpush1.bf16.msra.mxu1 %v17973_v51  ;;  %v18058_v49 = vld [vmem:[%s20431_s3 + $0x14c8] ss:$16 sps:$4 sm:$0xff]   ;;  %v18063_v51 = vld [vmem:[%s20431_s3 + $0x14e4] ss:$16 sps:$4 sm:$0xff]  }
 0x362   : > { %11984 = vmatprep.subr.bf16.mxu0 %v17978_v52  ;;  %13132 = vmatprep.subr.bf16.mxu1 %v17981_v33  ;;  %v18066_v52 = vld [vmem:[%s20431_s3 + $0x14ec] ss:$16 sps:$4 sm:$0xff]   ;;  %v18061_v33 = vld [vmem:[%s20431_s3 + $0x14e0] ss:$16 sps:$4 sm:$0xff]  }
 0x365   : > { %11985 = vmatpush1.bf16.msra.mxu0 %v17976_v53  ;;  %13133 = vmatpush1.bf16.msra.mxu1 %v17979_v54  ;;  %v18064_v53 = vld [vmem:[%s20431_s3 + $0x14e8] ss:$16 sps:$4 sm:$0xff]   ;;  %v18069_v54 = vld [vmem:[%s20431_s3 + $0x1504] ss:$16 sps:$4 sm:$0xff]  }
 0x366   : > { %11986 = vmatprep.subr.bf16.mxu0 %v17984_v55  ;;  %13134 = vmatprep.subr.bf16.mxu1 %v17987_v56  ;;  %v18072_v55 = vld [vmem:[%s20431_s3 + $0x150c] ss:$16 sps:$4 sm:$0xff]   ;;  %v18067_v56 = vld [vmem:[%s20431_s3 + $0x1500] ss:$16 sps:$4 sm:$0xff]  }
 0x369   : > { %11987 = vmatpush1.bf16.msra.mxu0 %v17982_v43  ;;  %13135 = vmatpush1.bf16.msra.mxu1 %v17985_v58  ;;  %v18070_v43 = vld [vmem:[%s20431_s3 + $0x1508] ss:$16 sps:$4 sm:$0xff]   ;;  %v18075_v58 = vld [vmem:[%s20431_s3 + $0x1524] ss:$16 sps:$4 sm:$0xff]  }
 0x36a   : > { %11988 = vmatprep.subr.bf16.mxu0 %v17990_v41  ;;  %13136 = vmatprep.subr.bf16.mxu1 %v17993_v60  ;;  %v18078_v41 = vld [vmem:[%s20431_s3 + $0x152c] ss:$16 sps:$4 sm:$0xff]   ;;  %v18073_v60 = vld [vmem:[%s20431_s3 + $0x1520] ss:$16 sps:$4 sm:$0xff]  }
 0x36d   : > { %11989 = vmatpush1.bf16.msra.mxu0 %v17988_v61  ;;  %13137 = vmatpush1.bf16.msra.mxu1 %v17991_v62  ;;  %v18076_v61 = vld [vmem:[%s20431_s3 + $0x1528] ss:$16 sps:$4 sm:$0xff]   ;;  %v18081_v62 = vld [vmem:[%s20431_s3 + $0x1544] ss:$16 sps:$4 sm:$0xff]  }
 0x36e   : > { %11990 = vmatprep.subr.bf16.mxu0 %v17996_v0  ;;  %13138 = vmatprep.subr.bf16.mxu1 %v17999_v1  ;;  %v18084_v0 = vld [vmem:[%s20431_s3 + $0x154c] ss:$16 sps:$4 sm:$0xff]   ;;  %v18079_v1 = vld [vmem:[%s20431_s3 + $0x1540] ss:$16 sps:$4 sm:$0xff]  }
 0x371   : > { %11991 = vmatpush1.bf16.msra.mxu0 %v17994_v2  ;;  %13139 = vmatpush1.bf16.msra.mxu1 %v17997_v48  ;;  %v18082_v2 = vld [vmem:[%s20431_s3 + $0x1548] ss:$16 sps:$4 sm:$0xff]   ;;  %v18087_v48 = vld [vmem:[%s20431_s3 + $0x1564] ss:$16 sps:$4 sm:$0xff]  }
 0x372   : > { %11992 = vmatprep.subr.bf16.mxu0 %v18002_v3  ;;  %13140 = vmatprep.subr.bf16.mxu1 %v18005_v4  ;;  %v18090_v3 = vld [vmem:[%s20431_s3 + $0x156c] ss:$16 sps:$4 sm:$0xff]   ;;  %v18085_v4 = vld [vmem:[%s20431_s3 + $0x1560] ss:$16 sps:$4 sm:$0xff]  }
 0x375   : > { %11993 = vmatpush1.bf16.msra.mxu0 %v18000_v5  ;;  %13141 = vmatpush1.bf16.msra.mxu1 %v18003_v6  ;;  %v18088_v5 = vld [vmem:[%s20431_s3 + $0x1568] ss:$16 sps:$4 sm:$0xff]   ;;  %v18093_v6 = vld [vmem:[%s20431_s3 + $0x1584] ss:$16 sps:$4 sm:$0xff]  }
 0x376   : > { %11994 = vmatprep.subr.bf16.mxu0 %v18008_v59  ;;  %13142 = vmatprep.subr.bf16.mxu1 %v18011_v8  ;;  %v18096_v59 = vld [vmem:[%s20431_s3 + $0x158c] ss:$16 sps:$4 sm:$0xff]   ;;  %v18091_v8 = vld [vmem:[%s20431_s3 + $0x1580] ss:$16 sps:$4 sm:$0xff]  }
 0x379   : > { %11995 = vmatpush1.bf16.msra.mxu0 %v18006_v57  ;;  %13143 = vmatpush1.bf16.msra.mxu1 %v18009_v11  ;;  %v18094_v57 = vld [vmem:[%s20431_s3 + $0x1588] ss:$16 sps:$4 sm:$0xff]   ;;  %v18099_v11 = vld [vmem:[%s20431_s3 + $0x15a4] ss:$16 sps:$4 sm:$0xff]  }
 0x37a   : > { %11996 = vmatprep.subr.bf16.mxu0 %v18014_v12  ;;  %13144 = vmatprep.subr.bf16.mxu1 %v18017_v13  ;;  %v18102_v12 = vld [vmem:[%s20431_s3 + $0x15ac] ss:$16 sps:$4 sm:$0xff]   ;;  %v18097_v13 = vld [vmem:[%s20431_s3 + $0x15a0] ss:$16 sps:$4 sm:$0xff]  }
 0x37d   : > { %11997 = vmatpush1.bf16.msra.mxu0 %v18012_v15  ;;  %13145 = vmatpush1.bf16.msra.mxu1 %v18015_v16  ;;  %v18100_v15 = vld [vmem:[%s20431_s3 + $0x15a8] ss:$16 sps:$4 sm:$0xff]   ;;  %v18105_v16 = vld [vmem:[%s20431_s3 + $0x15c4] ss:$16 sps:$4 sm:$0xff]  }
 0x37e   : > { %12007 = vmatprep.subr.bf16.mxu0 %v18021_v17  ;;  %13155 = vmatprep.subr.bf16.mxu1 %v18024_v63  ;;  %v18108_v17 = vld [vmem:[%s20431_s3 + $0x15cc] ss:$16 sps:$4 sm:$0xff]   ;;  %v580_v63 = vcombine.high %v21182_v9, %v21182_v9  ;;  %v18109_v9 = vld [vmem:[%s20431_s3 + $0x15e0] ss:$16 sps:$4 sm:$0xff]  }
 0x380   : > { %11999 = vmatmul.mubr.bf16.vlgmr.msra.gmra.mrb[0].mxu0 %v807_v19  ;;  %13147 = vmatmul.mubr.bf16.vlgmr.msra.gmra.mrb[0].mxu1 %v807_v19  ;;  %v18106_v19 = vld [vmem:[%s20431_s3 + $0x15c8] ss:$16 sps:$4 sm:$0xff]  }
 0x381   : > { %12008 = vmatpush1.bf16.msra.mxu0 %v18019_v20  ;;  %13156 = vmatpush1.bf16.msra.mxu1 %v18022_v21  ;;  %v18111_v20 = vld [vmem:[%s20431_s3 + $0x15e4] ss:$16 sps:$4 sm:$0xff]   ;;  %v18114_v21 = vld [vmem:[%s20431_s3 + $0x15ec] ss:$16 sps:$4 sm:$0xff]  }
 0x382   : > { %12009 = vmatprep.subr.bf16.mxu0 %v18027_v22  ;;  %13157 = vmatprep.subr.bf16.mxu1 %v18030_v23  ;;  %v21263_v22 = vrot.slane %v580_v63, %v20502_v50  ;;  %v18112_v23 = vld [vmem:[%s20431_s3 + $0x15e8] ss:$16 sps:$4 sm:$0xff]  }
 0x383   : > { %12039 = vmatprep.mubr.bf16.mxu0 %v810_v25  ;;  %13187 = vmatprep.mubr.bf16.mxu1 %v810_v25  ;;  %v18117_v25 = vld [vmem:[%s20431_s3 + $0x1604] ss:$16 sps:$4 sm:$0xff]   ;;  %v18190_v63 = vld [vmem:[%s20431_s3 + $0x1788] ss:$16 sps:$4 sm:$0xff]  }
 0x385   : > { %12010 = vmatpush1.bf16.msra.mxu0 %v18025_v7  ;;  %13158 = vmatpush1.bf16.msra.mxu1 %v18028_v24  ;;  %v18120_v7 = vld [vmem:[%s20431_s3 + $0x160c] ss:$16 sps:$4 sm:$0xff]   ;;  %v596_v24 = vcombine.high %v21263_v22, %v21263_v22 }
 0x386   : > { %12011 = vmatprep.subr.bf16.mxu0 %v18033_v10  ;;  %13159 = vmatprep.subr.bf16.mxu1 %v18036_v28  ;;  %v809_v10 = vpack.c.bf16 %v21190_v14, %v21190_v14  ;;  %v18115_v28 = vld [vmem:[%s20431_s3 + $0x1600] ss:$16 sps:$4 sm:$0xff]  }
 0x387   : > { %v18121_v14 = vld [vmem:[%s20431_s3 + $0x1620] ss:$16 sps:$4 sm:$0xff]  }
 0x389   : > { %12012 = vmatpush1.bf16.msra.mxu0 %v18031_v30  ;;  %13160 = vmatpush1.bf16.msra.mxu1 %v18034_v31  ;;  %v18118_v30 = vld [vmem:[%s20431_s3 + $0x1608] ss:$16 sps:$4 sm:$0xff]   ;;  %v18123_v31 = vld [vmem:[%s20431_s3 + $0x1624] ss:$16 sps:$4 sm:$0xff]  }
 0x38a   : > { %12013 = vmatprep.subr.bf16.mxu0 %v18039_v32  ;;  %13161 = vmatprep.subr.bf16.mxu1 %v18042_v34  ;;  %v18126_v32 = vld [vmem:[%s20431_s3 + $0x162c] ss:$16 sps:$4 sm:$0xff]   ;;  %v812_v34 = vpack.c.bf16 %v596_v24, %v596_v24  ;;  %v18202_v24 = vld [vmem:[%s20431_s3 + $0x17c8] ss:$16 sps:$4 sm:$0xff]  }
 0x38d   : > { %12014 = vmatpush1.bf16.msra.mxu0 %v18037_v35  ;;  %13162 = vmatpush1.bf16.msra.mxu1 %v18040_v36  ;;  %v18124_v35 = vld [vmem:[%s20431_s3 + $0x1628] ss:$16 sps:$4 sm:$0xff]   ;;  %v18129_v36 = vld [vmem:[%s20431_s3 + $0x1644] ss:$16 sps:$4 sm:$0xff]  }
 0x38e   : > { %12015 = vmatprep.subr.bf16.mxu0 %v18045_v27  ;;  %13163 = vmatprep.subr.bf16.mxu1 %v18048_v37  ;;  %v18132_v27 = vld [vmem:[%s20431_s3 + $0x164c] ss:$16 sps:$4 sm:$0xff]   ;;  %v18127_v37 = vld [vmem:[%s20431_s3 + $0x1640] ss:$16 sps:$4 sm:$0xff]  }
 0x391   : > { %12016 = vmatpush1.bf16.msra.mxu0 %v18043_v38  ;;  %13164 = vmatpush1.bf16.msra.mxu1 %v18046_v39  ;;  %v18130_v38 = vld [vmem:[%s20431_s3 + $0x1648] ss:$16 sps:$4 sm:$0xff]   ;;  %v18135_v39 = vld [vmem:[%s20431_s3 + $0x1664] ss:$16 sps:$4 sm:$0xff]  }
 0x392   : > { %12017 = vmatprep.subr.bf16.mxu0 %v18051_v40  ;;  %13165 = vmatprep.subr.bf16.mxu1 %v18054_v29  ;;  %v18138_v40 = vld [vmem:[%s20431_s3 + $0x166c] ss:$16 sps:$4 sm:$0xff]   ;;  %v18133_v29 = vld [vmem:[%s20431_s3 + $0x1660] ss:$16 sps:$4 sm:$0xff]  }
 0x395   : > { %12018 = vmatpush1.bf16.msra.mxu0 %v18049_v42  ;;  %13166 = vmatpush1.bf16.msra.mxu1 %v18052_v45  ;;  %v18136_v42 = vld [vmem:[%s20431_s3 + $0x1668] ss:$16 sps:$4 sm:$0xff]   ;;  %v18141_v45 = vld [vmem:[%s20431_s3 + $0x1684] ss:$16 sps:$4 sm:$0xff]  }
 0x396   : > { %12019 = vmatprep.subr.bf16.mxu0 %v18057_v46  ;;  %13167 = vmatprep.subr.bf16.mxu1 %v18060_v26  ;;  %v18144_v46 = vld [vmem:[%s20431_s3 + $0x168c] ss:$16 sps:$4 sm:$0xff]   ;;  %v18139_v26 = vld [vmem:[%s20431_s3 + $0x1680] ss:$16 sps:$4 sm:$0xff]  }
 0x399   : > { %12020 = vmatpush1.bf16.msra.mxu0 %v18055_v47  ;;  %13168 = vmatpush1.bf16.msra.mxu1 %v18058_v49  ;;  %v18142_v47 = vld [vmem:[%s20431_s3 + $0x1688] ss:$16 sps:$4 sm:$0xff]   ;;  %v18147_v49 = vld [vmem:[%s20431_s3 + $0x16a4] ss:$16 sps:$4 sm:$0xff]  }
 0x39a   : > { %12021 = vmatprep.subr.bf16.mxu0 %v18063_v51  ;;  %13169 = vmatprep.subr.bf16.mxu1 %v18066_v52  ;;  %v18150_v51 = vld [vmem:[%s20431_s3 + $0x16ac] ss:$16 sps:$4 sm:$0xff]   ;;  %v18145_v52 = vld [vmem:[%s20431_s3 + $0x16a0] ss:$16 sps:$4 sm:$0xff]  }
 0x39d   : > { %12022 = vmatpush1.bf16.msra.mxu0 %v18061_v33  ;;  %13170 = vmatpush1.bf16.msra.mxu1 %v18064_v53  ;;  %v18148_v33 = vld [vmem:[%s20431_s3 + $0x16a8] ss:$16 sps:$4 sm:$0xff]   ;;  %v18153_v53 = vld [vmem:[%s20431_s3 + $0x16c4] ss:$16 sps:$4 sm:$0xff]  }
 0x39e   : > { %12023 = vmatprep.subr.bf16.mxu0 %v18069_v54  ;;  %13171 = vmatprep.subr.bf16.mxu1 %v18072_v55  ;;  %v18156_v54 = vld [vmem:[%s20431_s3 + $0x16cc] ss:$16 sps:$4 sm:$0xff]   ;;  %v18151_v55 = vld [vmem:[%s20431_s3 + $0x16c0] ss:$16 sps:$4 sm:$0xff]  }
 0x3a1   : > { %12024 = vmatpush1.bf16.msra.mxu0 %v18067_v56  ;;  %13172 = vmatpush1.bf16.msra.mxu1 %v18070_v43  ;;  %v18154_v56 = vld [vmem:[%s20431_s3 + $0x16c8] ss:$16 sps:$4 sm:$0xff]   ;;  %v18159_v43 = vld [vmem:[%s20431_s3 + $0x16e4] ss:$16 sps:$4 sm:$0xff]  }
 0x3a2   : > { %12025 = vmatprep.subr.bf16.mxu0 %v18075_v58  ;;  %13173 = vmatprep.subr.bf16.mxu1 %v18078_v41  ;;  %v18162_v58 = vld [vmem:[%s20431_s3 + $0x16ec] ss:$16 sps:$4 sm:$0xff]   ;;  %v18157_v41 = vld [vmem:[%s20431_s3 + $0x16e0] ss:$16 sps:$4 sm:$0xff]  }
 0x3a5   : > { %12026 = vmatpush1.bf16.msra.mxu0 %v18073_v60  ;;  %13174 = vmatpush1.bf16.msra.mxu1 %v18076_v61  ;;  %v18160_v60 = vld [vmem:[%s20431_s3 + $0x16e8] ss:$16 sps:$4 sm:$0xff]   ;;  %v18165_v61 = vld [vmem:[%s20431_s3 + $0x1704] ss:$16 sps:$4 sm:$0xff]  }
 0x3a6   : > { %12027 = vmatprep.subr.bf16.mxu0 %v18081_v62  ;;  %13175 = vmatprep.subr.bf16.mxu1 %v18084_v0  ;;  %v18168_v62 = vld [vmem:[%s20431_s3 + $0x170c] ss:$16 sps:$4 sm:$0xff]   ;;  %v18163_v0 = vld [vmem:[%s20431_s3 + $0x1700] ss:$16 sps:$4 sm:$0xff]  }
 0x3a9   : > { %12028 = vmatpush1.bf16.msra.mxu0 %v18079_v1  ;;  %13176 = vmatpush1.bf16.msra.mxu1 %v18082_v2  ;;  %v18166_v1 = vld [vmem:[%s20431_s3 + $0x1708] ss:$16 sps:$4 sm:$0xff]   ;;  %v18171_v2 = vld [vmem:[%s20431_s3 + $0x1724] ss:$16 sps:$4 sm:$0xff]  }
 0x3aa   : > { %12029 = vmatprep.subr.bf16.mxu0 %v18087_v48  ;;  %13177 = vmatprep.subr.bf16.mxu1 %v18090_v3  ;;  %v18174_v48 = vld [vmem:[%s20431_s3 + $0x172c] ss:$16 sps:$4 sm:$0xff]   ;;  %v18169_v3 = vld [vmem:[%s20431_s3 + $0x1720] ss:$16 sps:$4 sm:$0xff]  }
 0x3ad   : > { %12030 = vmatpush1.bf16.msra.mxu0 %v18085_v4  ;;  %13178 = vmatpush1.bf16.msra.mxu1 %v18088_v5  ;;  %v18172_v4 = vld [vmem:[%s20431_s3 + $0x1728] ss:$16 sps:$4 sm:$0xff]   ;;  %v18177_v5 = vld [vmem:[%s20431_s3 + $0x1744] ss:$16 sps:$4 sm:$0xff]  }
 0x3ae   : > { %12031 = vmatprep.subr.bf16.mxu0 %v18093_v6  ;;  %13179 = vmatprep.subr.bf16.mxu1 %v18096_v59  ;;  %v18180_v6 = vld [vmem:[%s20431_s3 + $0x174c] ss:$16 sps:$4 sm:$0xff]   ;;  %v18175_v59 = vld [vmem:[%s20431_s3 + $0x1740] ss:$16 sps:$4 sm:$0xff]  }
 0x3b1   : > { %12032 = vmatpush1.bf16.msra.mxu0 %v18091_v8  ;;  %13180 = vmatpush1.bf16.msra.mxu1 %v18094_v57  ;;  %v18178_v8 = vld [vmem:[%s20431_s3 + $0x1748] ss:$16 sps:$4 sm:$0xff]   ;;  %v18183_v57 = vld [vmem:[%s20431_s3 + $0x1764] ss:$16 sps:$4 sm:$0xff]  }
 0x3b2   : > { %12033 = vmatprep.subr.bf16.mxu0 %v18099_v11  ;;  %13181 = vmatprep.subr.bf16.mxu1 %v18102_v12  ;;  %v18186_v11 = vld [vmem:[%s20431_s3 + $0x176c] ss:$16 sps:$4 sm:$0xff]   ;;  %v18181_v12 = vld [vmem:[%s20431_s3 + $0x1760] ss:$16 sps:$4 sm:$0xff]  }
 0x3b5   : > { %12034 = vmatpush1.bf16.msra.mxu0 %v18097_v13  ;;  %13182 = vmatpush1.bf16.msra.mxu1 %v18100_v15  ;;  %v18184_v13 = vld [vmem:[%s20431_s3 + $0x1768] ss:$16 sps:$4 sm:$0xff]   ;;  %v18189_v15 = vld [vmem:[%s20431_s3 + $0x1784] ss:$16 sps:$4 sm:$0xff]  }
 0x3b6   : > { %12035 = vmatprep.subr.bf16.mxu0 %v18105_v16  ;;  %13183 = vmatprep.subr.bf16.mxu1 %v18108_v17  ;;  %v18192_v16 = vld [vmem:[%s20431_s3 + $0x178c] ss:$16 sps:$4 sm:$0xff]   ;;  %v18187_v17 = vld [vmem:[%s20431_s3 + $0x1780] ss:$16 sps:$4 sm:$0xff]  }
 0x3b9   : > { %12036 = vmatpush1.bf16.msra.mxu0 %v18103_v18  ;;  %13184 = vmatpush1.bf16.msra.mxu1 %v18106_v19  ;;  %v18195_v18 = vld [vmem:[%s20431_s3 + $0x17a4] ss:$16 sps:$4 sm:$0xff]   ;;  %v18198_v19 = vld [vmem:[%s20431_s3 + $0x17ac] ss:$16 sps:$4 sm:$0xff]  }
 0x3ba   : > { %12037 = vmatprep.subr.bf16.mxu0 %v18111_v20  ;;  %13185 = vmatprep.subr.bf16.mxu1 %v18114_v21  ;;  %v18193_v20 = vld [vmem:[%s20431_s3 + $0x17a0] ss:$16 sps:$4 sm:$0xff]   ;;  %v18196_v21 = vld [vmem:[%s20431_s3 + $0x17a8] ss:$16 sps:$4 sm:$0xff]  }
 0x3bd   : > { %12038 = vmatpush1.bf16.msra.mxu0 %v18109_v9  ;;  %13186 = vmatpush1.bf16.msra.mxu1 %v18112_v23  ;;  %v18201_v9 = vld [vmem:[%s20431_s3 + $0x17c4] ss:$16 sps:$4 sm:$0xff]   ;;  %v18204_v23 = vld [vmem:[%s20431_s3 + $0x17cc] ss:$16 sps:$4 sm:$0xff]  }
 0x3be   : > { %12048 = vmatprep.subr.bf16.mxu0 %v18117_v25  ;;  %13196 = vmatprep.subr.bf16.mxu1 %v18120_v7  ;;  %v21330_v25 = vld [vmem:[%s20424_s12 + $0x30] sm:$0xff] }
 0x3bf   : > { %v18199_v7 = vld [vmem:[%s20431_s3 + $0x17c0] ss:$16 sps:$4 sm:$0xff]  }
 0x3c0   : > { %12040 = vmatmul.mubr.bf16.vlgmr.msra.gmra.mrb[0].mxu0 %v809_v10  ;;  %13188 = vmatmul.mubr.bf16.vlgmr.msra.gmra.mrb[0].mxu1 %v809_v10  ;;  %v18207_v10 = vld [vmem:[%s20431_s3 + $0x17e4] ss:$16 sps:$4 sm:$0xff]  }
 0x3c1   : > { %12049 = vmatpush1.bf16.msra.mxu0 %v18115_v28  ;;  %13197 = vmatpush1.bf16.msra.mxu1 %v18118_v30  ;;  %v18210_v28 = vld [vmem:[%s20431_s3 + $0x17ec] ss:$16 sps:$4 sm:$0xff]   ;;  %v21338_v30 = vrot.slane %v21330_v25, %v20502_v50 }
 0x3c2   : > { %12050 = vmatprep.subr.bf16.mxu0 %v18123_v31  ;;  %13198 = vmatprep.subr.bf16.mxu1 %v18126_v32  ;;  %v18205_v31 = vld [vmem:[%s20431_s3 + $0x17e0] ss:$16 sps:$4 sm:$0xff]   ;;  %v18208_v32 = vld [vmem:[%s20431_s3 + $0x17e8] ss:$16 sps:$4 sm:$0xff]  }
 0x3c3   : > { %12080 = vmatprep.mubr.bf16.mxu0 %v812_v34  ;;  %13228 = vmatprep.mubr.bf16.mxu1 %v812_v34  ;;  %v18214_v34 = vld [vmem:[%s20431_s3 + $0x1804] ss:$16 sps:$4 sm:$0xff]  }
 0x3c5   : > { %12051 = vmatpush1.bf16.msra.mxu0 %v18121_v14  ;;  %13199 = vmatpush1.bf16.msra.mxu1 %v18124_v35  ;;  %v18217_v14 = vld [vmem:[%s20431_s3 + $0x180c] ss:$16 sps:$4 sm:$0xff]   ;;  %v612_v35 = vcombine.high %v21338_v30, %v21338_v30 }
 0x3c6   : > { %12052 = vmatprep.subr.bf16.mxu0 %v18129_v36  ;;  %13200 = vmatprep.subr.bf16.mxu1 %v18132_v27  ;;  %v811_v36 = vpack.c.bf16 %v21263_v22, %v21263_v22  ;;  %v18212_v27 = vld [vmem:[%s20431_s3 + $0x1800] ss:$16 sps:$4 sm:$0xff]  }
 0x3c7   : > { %v18218_v22 = vld [vmem:[%s20431_s3 + $0x1820] ss:$16 sps:$4 sm:$0xff]  }
 0x3c9   : > { %12053 = vmatpush1.bf16.msra.mxu0 %v18127_v37  ;;  %13201 = vmatpush1.bf16.msra.mxu1 %v18130_v38  ;;  %v18215_v37 = vld [vmem:[%s20431_s3 + $0x1808] ss:$16 sps:$4 sm:$0xff]   ;;  %v18220_v38 = vld [vmem:[%s20431_s3 + $0x1824] ss:$16 sps:$4 sm:$0xff]  }
 0x3ca   : > { %12054 = vmatprep.subr.bf16.mxu0 %v18135_v39  ;;  %13202 = vmatprep.subr.bf16.mxu1 %v18138_v40  ;;  %v18223_v39 = vld [vmem:[%s20431_s3 + $0x182c] ss:$16 sps:$4 sm:$0xff]   ;;  %v814_v40 = vpack.c.bf16 %v612_v35, %v612_v35  ;;  %v18296_v35 = vld [vmem:[%s20431_s3 + $0x19c0] ss:$16 sps:$4 sm:$0xff]  }
 0x3cd   : > { %12055 = vmatpush1.bf16.msra.mxu0 %v18133_v29  ;;  %13203 = vmatpush1.bf16.msra.mxu1 %v18136_v42  ;;  %v18221_v29 = vld [vmem:[%s20431_s3 + $0x1828] ss:$16 sps:$4 sm:$0xff]   ;;  %v18226_v42 = vld [vmem:[%s20431_s3 + $0x1844] ss:$16 sps:$4 sm:$0xff]  }
 0x3ce   : > { %12056 = vmatprep.subr.bf16.mxu0 %v18141_v45  ;;  %13204 = vmatprep.subr.bf16.mxu1 %v18144_v46  ;;  %v18229_v45 = vld [vmem:[%s20431_s3 + $0x184c] ss:$16 sps:$4 sm:$0xff]   ;;  %v18224_v46 = vld [vmem:[%s20431_s3 + $0x1840] ss:$16 sps:$4 sm:$0xff]  }
 0x3d1   : > { %12057 = vmatpush1.bf16.msra.mxu0 %v18139_v26  ;;  %13205 = vmatpush1.bf16.msra.mxu1 %v18142_v47  ;;  %v18227_v26 = vld [vmem:[%s20431_s3 + $0x1848] ss:$16 sps:$4 sm:$0xff]   ;;  %v18232_v47 = vld [vmem:[%s20431_s3 + $0x1864] ss:$16 sps:$4 sm:$0xff]  }
 0x3d2   : > { %12058 = vmatprep.subr.bf16.mxu0 %v18147_v49  ;;  %13206 = vmatprep.subr.bf16.mxu1 %v18150_v51  ;;  %v18235_v49 = vld [vmem:[%s20431_s3 + $0x186c] ss:$16 sps:$4 sm:$0xff]   ;;  %v18230_v51 = vld [vmem:[%s20431_s3 + $0x1860] ss:$16 sps:$4 sm:$0xff]  }
 0x3d5   : > { %12059 = vmatpush1.bf16.msra.mxu0 %v18145_v52  ;;  %13207 = vmatpush1.bf16.msra.mxu1 %v18148_v33  ;;  %v18233_v52 = vld [vmem:[%s20431_s3 + $0x1868] ss:$16 sps:$4 sm:$0xff]   ;;  %v18238_v33 = vld [vmem:[%s20431_s3 + $0x1884] ss:$16 sps:$4 sm:$0xff]  }
 0x3d6   : > { %12060 = vmatprep.subr.bf16.mxu0 %v18153_v53  ;;  %13208 = vmatprep.subr.bf16.mxu1 %v18156_v54  ;;  %v18241_v53 = vld [vmem:[%s20431_s3 + $0x188c] ss:$16 sps:$4 sm:$0xff]   ;;  %v18236_v54 = vld [vmem:[%s20431_s3 + $0x1880] ss:$16 sps:$4 sm:$0xff]  }
 0x3d9   : > { %12061 = vmatpush1.bf16.msra.mxu0 %v18151_v55  ;;  %13209 = vmatpush1.bf16.msra.mxu1 %v18154_v56  ;;  %v18239_v55 = vld [vmem:[%s20431_s3 + $0x1888] ss:$16 sps:$4 sm:$0xff]   ;;  %v18244_v56 = vld [vmem:[%s20431_s3 + $0x18a4] ss:$16 sps:$4 sm:$0xff]  }
 0x3da   : > { %12062 = vmatprep.subr.bf16.mxu0 %v18159_v43  ;;  %13210 = vmatprep.subr.bf16.mxu1 %v18162_v58  ;;  %v18247_v43 = vld [vmem:[%s20431_s3 + $0x18ac] ss:$16 sps:$4 sm:$0xff]   ;;  %v18242_v58 = vld [vmem:[%s20431_s3 + $0x18a0] ss:$16 sps:$4 sm:$0xff]  }
 0x3dd   : > { %12063 = vmatpush1.bf16.msra.mxu0 %v18157_v41  ;;  %13211 = vmatpush1.bf16.msra.mxu1 %v18160_v60  ;;  %v18245_v41 = vld [vmem:[%s20431_s3 + $0x18a8] ss:$16 sps:$4 sm:$0xff]   ;;  %v18250_v60 = vld [vmem:[%s20431_s3 + $0x18c4] ss:$16 sps:$4 sm:$0xff]  }
 0x3de   : > { %12064 = vmatprep.subr.bf16.mxu0 %v18165_v61  ;;  %13212 = vmatprep.subr.bf16.mxu1 %v18168_v62  ;;  %v18253_v61 = vld [vmem:[%s20431_s3 + $0x18cc] ss:$16 sps:$4 sm:$0xff]   ;;  %v18248_v62 = vld [vmem:[%s20431_s3 + $0x18c0] ss:$16 sps:$4 sm:$0xff]  }
 0x3e1   : > { %12065 = vmatpush1.bf16.msra.mxu0 %v18163_v0  ;;  %13213 = vmatpush1.bf16.msra.mxu1 %v18166_v1  ;;  %v18251_v0 = vld [vmem:[%s20431_s3 + $0x18c8] ss:$16 sps:$4 sm:$0xff]   ;;  %v18256_v1 = vld [vmem:[%s20431_s3 + $0x18e4] ss:$16 sps:$4 sm:$0xff]  }
 0x3e2   : > { %12066 = vmatprep.subr.bf16.mxu0 %v18171_v2  ;;  %13214 = vmatprep.subr.bf16.mxu1 %v18174_v48  ;;  %v18259_v2 = vld [vmem:[%s20431_s3 + $0x18ec] ss:$16 sps:$4 sm:$0xff]   ;;  %v18254_v48 = vld [vmem:[%s20431_s3 + $0x18e0] ss:$16 sps:$4 sm:$0xff]  }
 0x3e5   : > { %12067 = vmatpush1.bf16.msra.mxu0 %v18169_v3  ;;  %13215 = vmatpush1.bf16.msra.mxu1 %v18172_v4  ;;  %v18257_v3 = vld [vmem:[%s20431_s3 + $0x18e8] ss:$16 sps:$4 sm:$0xff]   ;;  %v18262_v4 = vld [vmem:[%s20431_s3 + $0x1904] ss:$16 sps:$4 sm:$0xff]  }
 0x3e6   : > { %12068 = vmatprep.subr.bf16.mxu0 %v18177_v5  ;;  %13216 = vmatprep.subr.bf16.mxu1 %v18180_v6  ;;  %v18265_v5 = vld [vmem:[%s20431_s3 + $0x190c] ss:$16 sps:$4 sm:$0xff]   ;;  %v18260_v6 = vld [vmem:[%s20431_s3 + $0x1900] ss:$16 sps:$4 sm:$0xff]  }
 0x3e9   : > { %12069 = vmatpush1.bf16.msra.mxu0 %v18175_v59  ;;  %13217 = vmatpush1.bf16.msra.mxu1 %v18178_v8  ;;  %v18263_v59 = vld [vmem:[%s20431_s3 + $0x1908] ss:$16 sps:$4 sm:$0xff]   ;;  %v18268_v8 = vld [vmem:[%s20431_s3 + $0x1924] ss:$16 sps:$4 sm:$0xff]  }
 0x3ea   : > { %12070 = vmatprep.subr.bf16.mxu0 %v18183_v57  ;;  %13218 = vmatprep.subr.bf16.mxu1 %v18186_v11  ;;  %v18271_v57 = vld [vmem:[%s20431_s3 + $0x192c] ss:$16 sps:$4 sm:$0xff]   ;;  %v18266_v11 = vld [vmem:[%s20431_s3 + $0x1920] ss:$16 sps:$4 sm:$0xff]  }
 0x3ed   : > { %12071 = vmatpush1.bf16.msra.mxu0 %v18181_v12  ;;  %13219 = vmatpush1.bf16.msra.mxu1 %v18184_v13  ;;  %v18269_v12 = vld [vmem:[%s20431_s3 + $0x1928] ss:$16 sps:$4 sm:$0xff]   ;;  %v18274_v13 = vld [vmem:[%s20431_s3 + $0x1944] ss:$16 sps:$4 sm:$0xff]  }
 0x3ee   : > { %12072 = vmatprep.subr.bf16.mxu0 %v18189_v15  ;;  %13220 = vmatprep.subr.bf16.mxu1 %v18192_v16  ;;  %v18277_v15 = vld [vmem:[%s20431_s3 + $0x194c] ss:$16 sps:$4 sm:$0xff]   ;;  %v18272_v16 = vld [vmem:[%s20431_s3 + $0x1940] ss:$16 sps:$4 sm:$0xff]  }
 0x3f1   : > { %12073 = vmatpush1.bf16.msra.mxu0 %v18187_v17  ;;  %13221 = vmatpush1.bf16.msra.mxu1 %v18190_v63  ;;  %v18275_v17 = vld [vmem:[%s20431_s3 + $0x1948] ss:$16 sps:$4 sm:$0xff]   ;;  %v18280_v63 = vld [vmem:[%s20431_s3 + $0x1964] ss:$16 sps:$4 sm:$0xff]  }
 0x3f2   : > { %12074 = vmatprep.subr.bf16.mxu0 %v18195_v18  ;;  %13222 = vmatprep.subr.bf16.mxu1 %v18198_v19  ;;  %v18283_v18 = vld [vmem:[%s20431_s3 + $0x196c] ss:$16 sps:$4 sm:$0xff]   ;;  %v18278_v19 = vld [vmem:[%s20431_s3 + $0x1960] ss:$16 sps:$4 sm:$0xff]  }
 0x3f5   : > { %12075 = vmatpush1.bf16.msra.mxu0 %v18193_v20  ;;  %13223 = vmatpush1.bf16.msra.mxu1 %v18196_v21  ;;  %v18281_v20 = vld [vmem:[%s20431_s3 + $0x1968] ss:$16 sps:$4 sm:$0xff]   ;;  %v18286_v21 = vld [vmem:[%s20431_s3 + $0x1984] ss:$16 sps:$4 sm:$0xff]  }
 0x3f6   : > { %12076 = vmatprep.subr.bf16.mxu0 %v18201_v9  ;;  %13224 = vmatprep.subr.bf16.mxu1 %v18204_v23  ;;  %v18289_v9 = vld [vmem:[%s20431_s3 + $0x198c] ss:$16 sps:$4 sm:$0xff]   ;;  %v18284_v23 = vld [vmem:[%s20431_s3 + $0x1980] ss:$16 sps:$4 sm:$0xff]  }
 0x3f9   : > { %12077 = vmatpush1.bf16.msra.mxu0 %v18199_v7  ;;  %13225 = vmatpush1.bf16.msra.mxu1 %v18202_v24  ;;  %v18287_v7 = vld [vmem:[%s20431_s3 + $0x1988] ss:$16 sps:$4 sm:$0xff]   ;;  %v18292_v24 = vld [vmem:[%s20431_s3 + $0x19a4] ss:$16 sps:$4 sm:$0xff]  }
 0x3fa   : > { %12078 = vmatprep.subr.bf16.mxu0 %v18207_v10  ;;  %13226 = vmatprep.subr.bf16.mxu1 %v18210_v28  ;;  %v18295_v10 = vld [vmem:[%s20431_s3 + $0x19ac] ss:$16 sps:$4 sm:$0xff]   ;;  %v18290_v28 = vld [vmem:[%s20431_s3 + $0x19a0] ss:$16 sps:$4 sm:$0xff]  }
 0x3fd   : > { %12079 = vmatpush1.bf16.msra.mxu0 %v18205_v31  ;;  %13227 = vmatpush1.bf16.msra.mxu1 %v18208_v32  ;;  %v18293_v31 = vld [vmem:[%s20431_s3 + $0x19a8] ss:$16 sps:$4 sm:$0xff]   ;;  %v18298_v32 = vld [vmem:[%s20431_s3 + $0x19c4] ss:$16 sps:$4 sm:$0xff]  }
 0x3fe   : > { %12089 = vmatprep.subr.bf16.mxu0 %v18214_v34  ;;  %13237 = vmatprep.subr.bf16.mxu1 %v18217_v14  ;;  %v18301_v34 = vld [vmem:[%s20431_s3 + $0x19cc] ss:$16 sps:$4 sm:$0xff]   ;;  %v597_v14 = vcombine.high %v21330_v25, %v21330_v25  ;;  %v18302_v25 = vld [vmem:[%s20431_s3 + $0x19e0] ss:$16 sps:$4 sm:$0xff]  }
 0x400   : > { %12081 = vmatmul.mubr.bf16.vlgmr.msra.gmra.mrb[0].mxu0 %v811_v36  ;;  %13229 = vmatmul.mubr.bf16.vlgmr.msra.gmra.mrb[0].mxu1 %v811_v36  ;;  %v18299_v36 = vld [vmem:[%s20431_s3 + $0x19c8] ss:$16 sps:$4 sm:$0xff]  }
 0x401   : > { %12090 = vmatpush1.bf16.msra.mxu0 %v18212_v27  ;;  %13238 = vmatpush1.bf16.msra.mxu1 %v18215_v37  ;;  %v18304_v27 = vld [vmem:[%s20431_s3 + $0x19e4] ss:$16 sps:$4 sm:$0xff]   ;;  %v18307_v37 = vld [vmem:[%s20431_s3 + $0x19ec] ss:$16 sps:$4 sm:$0xff]  }
 0x402   : > { %12091 = vmatprep.subr.bf16.mxu0 %v18220_v38  ;;  %13239 = vmatprep.subr.bf16.mxu1 %v18223_v39  ;;  %v21411_v38 = vrot.slane %v597_v14, %v20502_v50  ;;  %v18305_v39 = vld [vmem:[%s20431_s3 + $0x19e8] ss:$16 sps:$4 sm:$0xff]  }
 0x403   : > { %12121 = vmatprep.mubr.bf16.mxu0 %v814_v40  ;;  %13269 = vmatprep.mubr.bf16.mxu1 %v814_v40  ;;  %v18310_v40 = vld [vmem:[%s20431_s3 + $0x1a04] ss:$16 sps:$4 sm:$0xff]   ;;  %v18383_v14 = vld [vmem:[%s20431_s3 + $0x1b88] ss:$16 sps:$4 sm:$0xff]  }
 0x405   : > { %12092 = vmatpush1.bf16.msra.mxu0 %v18218_v22  ;;  %13240 = vmatpush1.bf16.msra.mxu1 %v18221_v29  ;;  %v18313_v22 = vld [vmem:[%s20431_s3 + $0x1a0c] ss:$16 sps:$4 sm:$0xff]   ;;  %v613_v29 = vcombine.high %v21411_v38, %v21411_v38 }
 0x406   : > { %12093 = vmatprep.subr.bf16.mxu0 %v18226_v42  ;;  %13241 = vmatprep.subr.bf16.mxu1 %v18229_v45  ;;  %v813_v42 = vpack.c.bf16 %v21338_v30, %v21338_v30  ;;  %v18308_v45 = vld [vmem:[%s20431_s3 + $0x1a00] ss:$16 sps:$4 sm:$0xff]  }
 0x407   : > { %v18314_v30 = vld [vmem:[%s20431_s3 + $0x1a20] ss:$16 sps:$4 sm:$0xff]  }
 0x409   : > { %12094 = vmatpush1.bf16.msra.mxu0 %v18224_v46  ;;  %13242 = vmatpush1.bf16.msra.mxu1 %v18227_v26  ;;  %v18311_v46 = vld [vmem:[%s20431_s3 + $0x1a08] ss:$16 sps:$4 sm:$0xff]   ;;  %v18316_v26 = vld [vmem:[%s20431_s3 + $0x1a24] ss:$16 sps:$4 sm:$0xff]  }
 0x40a   : > { %12095 = vmatprep.subr.bf16.mxu0 %v18232_v47  ;;  %13243 = vmatprep.subr.bf16.mxu1 %v18235_v49  ;;  %v18319_v47 = vld [vmem:[%s20431_s3 + $0x1a2c] ss:$16 sps:$4 sm:$0xff]   ;;  %v816_v49 = vpack.c.bf16 %v613_v29, %v613_v29  ;;  %v18395_v29 = vld [vmem:[%s20431_s3 + $0x1bc8] ss:$16 sps:$4 sm:$0xff]  }
 0x40d   : > { %12096 = vmatpush1.bf16.msra.mxu0 %v18230_v51  ;;  %13244 = vmatpush1.bf16.msra.mxu1 %v18233_v52  ;;  %v18317_v51 = vld [vmem:[%s20431_s3 + $0x1a28] ss:$16 sps:$4 sm:$0xff]   ;;  %v18322_v52 = vld [vmem:[%s20431_s3 + $0x1a44] ss:$16 sps:$4 sm:$0xff]  }
 0x40e   : > { %12097 = vmatprep.subr.bf16.mxu0 %v18238_v33  ;;  %13245 = vmatprep.subr.bf16.mxu1 %v18241_v53  ;;  %v18325_v33 = vld [vmem:[%s20431_s3 + $0x1a4c] ss:$16 sps:$4 sm:$0xff]   ;;  %v18320_v53 = vld [vmem:[%s20431_s3 + $0x1a40] ss:$16 sps:$4 sm:$0xff]  }
 0x411   : > { %12098 = vmatpush1.bf16.msra.mxu0 %v18236_v54  ;;  %13246 = vmatpush1.bf16.msra.mxu1 %v18239_v55  ;;  %v18323_v54 = vld [vmem:[%s20431_s3 + $0x1a48] ss:$16 sps:$4 sm:$0xff]   ;;  %v18328_v55 = vld [vmem:[%s20431_s3 + $0x1a64] ss:$16 sps:$4 sm:$0xff]  }
 0x412   : > { %12099 = vmatprep.subr.bf16.mxu0 %v18244_v56  ;;  %13247 = vmatprep.subr.bf16.mxu1 %v18247_v43  ;;  %v18331_v56 = vld [vmem:[%s20431_s3 + $0x1a6c] ss:$16 sps:$4 sm:$0xff]   ;;  %v18326_v43 = vld [vmem:[%s20431_s3 + $0x1a60] ss:$16 sps:$4 sm:$0xff]  }
 0x415   : > { %12100 = vmatpush1.bf16.msra.mxu0 %v18242_v58  ;;  %13248 = vmatpush1.bf16.msra.mxu1 %v18245_v41  ;;  %v18329_v58 = vld [vmem:[%s20431_s3 + $0x1a68] ss:$16 sps:$4 sm:$0xff]   ;;  %v18334_v41 = vld [vmem:[%s20431_s3 + $0x1a84] ss:$16 sps:$4 sm:$0xff]  }
 0x416   : > { %12101 = vmatprep.subr.bf16.mxu0 %v18250_v60  ;;  %13249 = vmatprep.subr.bf16.mxu1 %v18253_v61  ;;  %v18337_v60 = vld [vmem:[%s20431_s3 + $0x1a8c] ss:$16 sps:$4 sm:$0xff]   ;;  %v18332_v61 = vld [vmem:[%s20431_s3 + $0x1a80] ss:$16 sps:$4 sm:$0xff]  }
 0x419   : > { %12102 = vmatpush1.bf16.msra.mxu0 %v18248_v62  ;;  %13250 = vmatpush1.bf16.msra.mxu1 %v18251_v0  ;;  %v18335_v62 = vld [vmem:[%s20431_s3 + $0x1a88] ss:$16 sps:$4 sm:$0xff]   ;;  %v18340_v0 = vld [vmem:[%s20431_s3 + $0x1aa4] ss:$16 sps:$4 sm:$0xff]  }
 0x41a   : > { %12103 = vmatprep.subr.bf16.mxu0 %v18256_v1  ;;  %13251 = vmatprep.subr.bf16.mxu1 %v18259_v2  ;;  %v18343_v1 = vld [vmem:[%s20431_s3 + $0x1aac] ss:$16 sps:$4 sm:$0xff]   ;;  %v18338_v2 = vld [vmem:[%s20431_s3 + $0x1aa0] ss:$16 sps:$4 sm:$0xff]  }
 0x41d   : > { %12104 = vmatpush1.bf16.msra.mxu0 %v18254_v48  ;;  %13252 = vmatpush1.bf16.msra.mxu1 %v18257_v3  ;;  %v18341_v48 = vld [vmem:[%s20431_s3 + $0x1aa8] ss:$16 sps:$4 sm:$0xff]   ;;  %v18346_v3 = vld [vmem:[%s20431_s3 + $0x1ac4] ss:$16 sps:$4 sm:$0xff]  }
 0x41e   : > { %12105 = vmatprep.subr.bf16.mxu0 %v18262_v4  ;;  %13253 = vmatprep.subr.bf16.mxu1 %v18265_v5  ;;  %v18349_v4 = vld [vmem:[%s20431_s3 + $0x1acc] ss:$16 sps:$4 sm:$0xff]   ;;  %v18344_v5 = vld [vmem:[%s20431_s3 + $0x1ac0] ss:$16 sps:$4 sm:$0xff]  }
 0x421   : > { %12106 = vmatpush1.bf16.msra.mxu0 %v18260_v6  ;;  %13254 = vmatpush1.bf16.msra.mxu1 %v18263_v59  ;;  %v18347_v6 = vld [vmem:[%s20431_s3 + $0x1ac8] ss:$16 sps:$4 sm:$0xff]   ;;  %v18352_v59 = vld [vmem:[%s20431_s3 + $0x1ae4] ss:$16 sps:$4 sm:$0xff]  }
 0x422   : > { %12107 = vmatprep.subr.bf16.mxu0 %v18268_v8  ;;  %13255 = vmatprep.subr.bf16.mxu1 %v18271_v57  ;;  %v18355_v8 = vld [vmem:[%s20431_s3 + $0x1aec] ss:$16 sps:$4 sm:$0xff]   ;;  %v18350_v57 = vld [vmem:[%s20431_s3 + $0x1ae0] ss:$16 sps:$4 sm:$0xff]  }
 0x425   : > { %12108 = vmatpush1.bf16.msra.mxu0 %v18266_v11  ;;  %13256 = vmatpush1.bf16.msra.mxu1 %v18269_v12  ;;  %v18353_v11 = vld [vmem:[%s20431_s3 + $0x1ae8] ss:$16 sps:$4 sm:$0xff]   ;;  %v18358_v12 = vld [vmem:[%s20431_s3 + $0x1b04] ss:$16 sps:$4 sm:$0xff]  }
 0x426   : > { %12109 = vmatprep.subr.bf16.mxu0 %v18274_v13  ;;  %13257 = vmatprep.subr.bf16.mxu1 %v18277_v15  ;;  %v18361_v13 = vld [vmem:[%s20431_s3 + $0x1b0c] ss:$16 sps:$4 sm:$0xff]   ;;  %v18356_v15 = vld [vmem:[%s20431_s3 + $0x1b00] ss:$16 sps:$4 sm:$0xff]  }
 0x429   : > { %12110 = vmatpush1.bf16.msra.mxu0 %v18272_v16  ;;  %13258 = vmatpush1.bf16.msra.mxu1 %v18275_v17  ;;  %v18359_v16 = vld [vmem:[%s20431_s3 + $0x1b08] ss:$16 sps:$4 sm:$0xff]   ;;  %v18364_v17 = vld [vmem:[%s20431_s3 + $0x1b24] ss:$16 sps:$4 sm:$0xff]  }
 0x42a   : > { %12111 = vmatprep.subr.bf16.mxu0 %v18280_v63  ;;  %13259 = vmatprep.subr.bf16.mxu1 %v18283_v18  ;;  %v18367_v63 = vld [vmem:[%s20431_s3 + $0x1b2c] ss:$16 sps:$4 sm:$0xff]   ;;  %v18362_v18 = vld [vmem:[%s20431_s3 + $0x1b20] ss:$16 sps:$4 sm:$0xff]  }
 0x42d   : > { %12112 = vmatpush1.bf16.msra.mxu0 %v18278_v19  ;;  %13260 = vmatpush1.bf16.msra.mxu1 %v18281_v20  ;;  %v18365_v19 = vld [vmem:[%s20431_s3 + $0x1b28] ss:$16 sps:$4 sm:$0xff]   ;;  %v18370_v20 = vld [vmem:[%s20431_s3 + $0x1b44] ss:$16 sps:$4 sm:$0xff]  }
 0x42e   : > { %12113 = vmatprep.subr.bf16.mxu0 %v18286_v21  ;;  %13261 = vmatprep.subr.bf16.mxu1 %v18289_v9  ;;  %v18373_v21 = vld [vmem:[%s20431_s3 + $0x1b4c] ss:$16 sps:$4 sm:$0xff]   ;;  %v18368_v9 = vld [vmem:[%s20431_s3 + $0x1b40] ss:$16 sps:$4 sm:$0xff]  }
 0x431   : > { %12114 = vmatpush1.bf16.msra.mxu0 %v18284_v23  ;;  %13262 = vmatpush1.bf16.msra.mxu1 %v18287_v7  ;;  %v18371_v23 = vld [vmem:[%s20431_s3 + $0x1b48] ss:$16 sps:$4 sm:$0xff]   ;;  %v18376_v7 = vld [vmem:[%s20431_s3 + $0x1b64] ss:$16 sps:$4 sm:$0xff]  }
 0x432   : > { %12115 = vmatprep.subr.bf16.mxu0 %v18292_v24  ;;  %13263 = vmatprep.subr.bf16.mxu1 %v18295_v10  ;;  %v18379_v24 = vld [vmem:[%s20431_s3 + $0x1b6c] ss:$16 sps:$4 sm:$0xff]   ;;  %v18374_v10 = vld [vmem:[%s20431_s3 + $0x1b60] ss:$16 sps:$4 sm:$0xff]  }
 0x435   : > { %12116 = vmatpush1.bf16.msra.mxu0 %v18290_v28  ;;  %13264 = vmatpush1.bf16.msra.mxu1 %v18293_v31  ;;  %v18377_v28 = vld [vmem:[%s20431_s3 + $0x1b68] ss:$16 sps:$4 sm:$0xff]   ;;  %v18382_v31 = vld [vmem:[%s20431_s3 + $0x1b84] ss:$16 sps:$4 sm:$0xff]  }
 0x436   : > { %12117 = vmatprep.subr.bf16.mxu0 %v18298_v32  ;;  %13265 = vmatprep.subr.bf16.mxu1 %v18301_v34  ;;  %v18385_v32 = vld [vmem:[%s20431_s3 + $0x1b8c] ss:$16 sps:$4 sm:$0xff]   ;;  %v18380_v34 = vld [vmem:[%s20431_s3 + $0x1b80] ss:$16 sps:$4 sm:$0xff]  }
 0x439   : > { %12118 = vmatpush1.bf16.msra.mxu0 %v18296_v35  ;;  %13266 = vmatpush1.bf16.msra.mxu1 %v18299_v36  ;;  %v18388_v35 = vld [vmem:[%s20431_s3 + $0x1ba4] ss:$16 sps:$4 sm:$0xff]   ;;  %v18391_v36 = vld [vmem:[%s20431_s3 + $0x1bac] ss:$16 sps:$4 sm:$0xff]  }
 0x43a   : > { %12119 = vmatprep.subr.bf16.mxu0 %v18304_v27  ;;  %13267 = vmatprep.subr.bf16.mxu1 %v18307_v37  ;;  %v18386_v27 = vld [vmem:[%s20431_s3 + $0x1ba0] ss:$16 sps:$4 sm:$0xff]   ;;  %v18389_v37 = vld [vmem:[%s20431_s3 + $0x1ba8] ss:$16 sps:$4 sm:$0xff]  }
 0x43d   : > { %12120 = vmatpush1.bf16.msra.mxu0 %v18302_v25  ;;  %13268 = vmatpush1.bf16.msra.mxu1 %v18305_v39  ;;  %v18394_v25 = vld [vmem:[%s20431_s3 + $0x1bc4] ss:$16 sps:$4 sm:$0xff]   ;;  %v18397_v39 = vld [vmem:[%s20431_s3 + $0x1bcc] ss:$16 sps:$4 sm:$0xff]  }
 0x43e   : > { %12130 = vmatprep.subr.bf16.mxu0 %v18310_v40  ;;  %13278 = vmatprep.subr.bf16.mxu1 %v18313_v22  ;;  %v21478_v40 = vld [vmem:[%s20424_s12 + $0x38] sm:$0xff]  ;;  %v18392_v22 = vld [vmem:[%s20431_s3 + $0x1bc0] ss:$16 sps:$4 sm:$0xff]  }
 0x440   : > { %12122 = vmatmul.mubr.bf16.vlgmr.msra.gmra.mrb[0].mxu0 %v813_v42  ;;  %13270 = vmatmul.mubr.bf16.vlgmr.msra.gmra.mrb[0].mxu1 %v813_v42  ;;  %v18400_v42 = vld [vmem:[%s20431_s3 + $0x1be4] ss:$16 sps:$4 sm:$0xff]  }
 0x441   : > { %12131 = vmatpush1.bf16.msra.mxu0 %v18308_v45  ;;  %13279 = vmatpush1.bf16.msra.mxu1 %v18311_v46  ;;  %v18403_v45 = vld [vmem:[%s20431_s3 + $0x1bec] ss:$16 sps:$4 sm:$0xff]   ;;  %v21486_v46 = vrot.slane %v21478_v40, %v20502_v50 }
 0x442   : > { %12132 = vmatprep.subr.bf16.mxu0 %v18316_v26  ;;  %13280 = vmatprep.subr.bf16.mxu1 %v18319_v47  ;;  %v18398_v26 = vld [vmem:[%s20431_s3 + $0x1be0] ss:$16 sps:$4 sm:$0xff]   ;;  %v18401_v47 = vld [vmem:[%s20431_s3 + $0x1be8] ss:$16 sps:$4 sm:$0xff]  }
 0x443   : > { %12162 = vmatprep.mubr.bf16.mxu0 %v816_v49  ;;  %13310 = vmatprep.mubr.bf16.mxu1 %v816_v49  ;;  %v18407_v49 = vld [vmem:[%s20431_s3 + $0x1c04] ss:$16 sps:$4 sm:$0xff]  }
 0x445   : > { %12133 = vmatpush1.bf16.msra.mxu0 %v18314_v30  ;;  %13281 = vmatpush1.bf16.msra.mxu1 %v18317_v51  ;;  %v18410_v30 = vld [vmem:[%s20431_s3 + $0x1c0c] ss:$16 sps:$4 sm:$0xff]   ;;  %v629_v51 = vcombine.high %v21486_v46, %v21486_v46 }
 0x446   : > { %12134 = vmatprep.subr.bf16.mxu0 %v18322_v52  ;;  %13282 = vmatprep.subr.bf16.mxu1 %v18325_v33  ;;  %v815_v52 = vpack.c.bf16 %v21411_v38, %v21411_v38  ;;  %v18405_v33 = vld [vmem:[%s20431_s3 + $0x1c00] ss:$16 sps:$4 sm:$0xff]  }
 0x447   : > { %v18411_v38 = vld [vmem:[%s20431_s3 + $0x1c20] ss:$16 sps:$4 sm:$0xff]  }
 0x449   : > { %12135 = vmatpush1.bf16.msra.mxu0 %v18320_v53  ;;  %13283 = vmatpush1.bf16.msra.mxu1 %v18323_v54  ;;  %v18408_v53 = vld [vmem:[%s20431_s3 + $0x1c08] ss:$16 sps:$4 sm:$0xff]   ;;  %v18413_v54 = vld [vmem:[%s20431_s3 + $0x1c24] ss:$16 sps:$4 sm:$0xff]  }
 0x44a   : > { %12136 = vmatprep.subr.bf16.mxu0 %v18328_v55  ;;  %13284 = vmatprep.subr.bf16.mxu1 %v18331_v56  ;;  %v18416_v55 = vld [vmem:[%s20431_s3 + $0x1c2c] ss:$16 sps:$4 sm:$0xff]   ;;  %v818_v56 = vpack.c.bf16 %v629_v51, %v629_v51  ;;  %v18489_v51 = vld [vmem:[%s20431_s3 + $0x1dc0] ss:$16 sps:$4 sm:$0xff]  }
 0x44d   : > { %12137 = vmatpush1.bf16.msra.mxu0 %v18326_v43  ;;  %13285 = vmatpush1.bf16.msra.mxu1 %v18329_v58  ;;  %v18414_v43 = vld [vmem:[%s20431_s3 + $0x1c28] ss:$16 sps:$4 sm:$0xff]   ;;  %v18419_v58 = vld [vmem:[%s20431_s3 + $0x1c44] ss:$16 sps:$4 sm:$0xff]  }
 0x44e   : > { %12138 = vmatprep.subr.bf16.mxu0 %v18334_v41  ;;  %13286 = vmatprep.subr.bf16.mxu1 %v18337_v60  ;;  %v18422_v41 = vld [vmem:[%s20431_s3 + $0x1c4c] ss:$16 sps:$4 sm:$0xff]   ;;  %v18417_v60 = vld [vmem:[%s20431_s3 + $0x1c40] ss:$16 sps:$4 sm:$0xff]  }
 0x451   : > { %12139 = vmatpush1.bf16.msra.mxu0 %v18332_v61  ;;  %13287 = vmatpush1.bf16.msra.mxu1 %v18335_v62  ;;  %v18420_v61 = vld [vmem:[%s20431_s3 + $0x1c48] ss:$16 sps:$4 sm:$0xff]   ;;  %v18425_v62 = vld [vmem:[%s20431_s3 + $0x1c64] ss:$16 sps:$4 sm:$0xff]  }
 0x452   : > { %12140 = vmatprep.subr.bf16.mxu0 %v18340_v0  ;;  %13288 = vmatprep.subr.bf16.mxu1 %v18343_v1  ;;  %v18428_v0 = vld [vmem:[%s20431_s3 + $0x1c6c] ss:$16 sps:$4 sm:$0xff]   ;;  %v18423_v1 = vld [vmem:[%s20431_s3 + $0x1c60] ss:$16 sps:$4 sm:$0xff]  }
 0x455   : > { %12141 = vmatpush1.bf16.msra.mxu0 %v18338_v2  ;;  %13289 = vmatpush1.bf16.msra.mxu1 %v18341_v48  ;;  %v18426_v2 = vld [vmem:[%s20431_s3 + $0x1c68] ss:$16 sps:$4 sm:$0xff]   ;;  %v18431_v48 = vld [vmem:[%s20431_s3 + $0x1c84] ss:$16 sps:$4 sm:$0xff]  }
 0x456   : > { %12142 = vmatprep.subr.bf16.mxu0 %v18346_v3  ;;  %13290 = vmatprep.subr.bf16.mxu1 %v18349_v4  ;;  %v18434_v3 = vld [vmem:[%s20431_s3 + $0x1c8c] ss:$16 sps:$4 sm:$0xff]   ;;  %v18429_v4 = vld [vmem:[%s20431_s3 + $0x1c80] ss:$16 sps:$4 sm:$0xff]  }
 0x459   : > { %12143 = vmatpush1.bf16.msra.mxu0 %v18344_v5  ;;  %13291 = vmatpush1.bf16.msra.mxu1 %v18347_v6  ;;  %v18432_v5 = vld [vmem:[%s20431_s3 + $0x1c88] ss:$16 sps:$4 sm:$0xff]   ;;  %v18437_v6 = vld [vmem:[%s20431_s3 + $0x1ca4] ss:$16 sps:$4 sm:$0xff]  }
 0x45a   : > { %12144 = vmatprep.subr.bf16.mxu0 %v18352_v59  ;;  %13292 = vmatprep.subr.bf16.mxu1 %v18355_v8  ;;  %v18440_v59 = vld [vmem:[%s20431_s3 + $0x1cac] ss:$16 sps:$4 sm:$0xff]   ;;  %v18435_v8 = vld [vmem:[%s20431_s3 + $0x1ca0] ss:$16 sps:$4 sm:$0xff]  }
 0x45d   : > { %12145 = vmatpush1.bf16.msra.mxu0 %v18350_v57  ;;  %13293 = vmatpush1.bf16.msra.mxu1 %v18353_v11  ;;  %v18438_v57 = vld [vmem:[%s20431_s3 + $0x1ca8] ss:$16 sps:$4 sm:$0xff]   ;;  %v18443_v11 = vld [vmem:[%s20431_s3 + $0x1cc4] ss:$16 sps:$4 sm:$0xff]  }
 0x45e   : > { %12146 = vmatprep.subr.bf16.mxu0 %v18358_v12  ;;  %13294 = vmatprep.subr.bf16.mxu1 %v18361_v13  ;;  %v18446_v12 = vld [vmem:[%s20431_s3 + $0x1ccc] ss:$16 sps:$4 sm:$0xff]   ;;  %v18441_v13 = vld [vmem:[%s20431_s3 + $0x1cc0] ss:$16 sps:$4 sm:$0xff]  }
 0x461   : > { %12147 = vmatpush1.bf16.msra.mxu0 %v18356_v15  ;;  %13295 = vmatpush1.bf16.msra.mxu1 %v18359_v16  ;;  %v18444_v15 = vld [vmem:[%s20431_s3 + $0x1cc8] ss:$16 sps:$4 sm:$0xff]   ;;  %v18449_v16 = vld [vmem:[%s20431_s3 + $0x1ce4] ss:$16 sps:$4 sm:$0xff]  }
 0x462   : > { %12148 = vmatprep.subr.bf16.mxu0 %v18364_v17  ;;  %13296 = vmatprep.subr.bf16.mxu1 %v18367_v63  ;;  %v18452_v17 = vld [vmem:[%s20431_s3 + $0x1cec] ss:$16 sps:$4 sm:$0xff]   ;;  %v18447_v63 = vld [vmem:[%s20431_s3 + $0x1ce0] ss:$16 sps:$4 sm:$0xff]  }
 0x465   : > { %12149 = vmatpush1.bf16.msra.mxu0 %v18362_v18  ;;  %13297 = vmatpush1.bf16.msra.mxu1 %v18365_v19  ;;  %v18450_v18 = vld [vmem:[%s20431_s3 + $0x1ce8] ss:$16 sps:$4 sm:$0xff]   ;;  %v18455_v19 = vld [vmem:[%s20431_s3 + $0x1d04] ss:$16 sps:$4 sm:$0xff]  }
 0x466   : > { %12150 = vmatprep.subr.bf16.mxu0 %v18370_v20  ;;  %13298 = vmatprep.subr.bf16.mxu1 %v18373_v21  ;;  %v18458_v20 = vld [vmem:[%s20431_s3 + $0x1d0c] ss:$16 sps:$4 sm:$0xff]   ;;  %v18453_v21 = vld [vmem:[%s20431_s3 + $0x1d00] ss:$16 sps:$4 sm:$0xff]  }
 0x469   : > { %12151 = vmatpush1.bf16.msra.mxu0 %v18368_v9  ;;  %13299 = vmatpush1.bf16.msra.mxu1 %v18371_v23  ;;  %v18456_v9 = vld [vmem:[%s20431_s3 + $0x1d08] ss:$16 sps:$4 sm:$0xff]   ;;  %v18461_v23 = vld [vmem:[%s20431_s3 + $0x1d24] ss:$16 sps:$4 sm:$0xff]  }
 0x46a   : > { %12152 = vmatprep.subr.bf16.mxu0 %v18376_v7  ;;  %13300 = vmatprep.subr.bf16.mxu1 %v18379_v24  ;;  %v18464_v7 = vld [vmem:[%s20431_s3 + $0x1d2c] ss:$16 sps:$4 sm:$0xff]   ;;  %v18459_v24 = vld [vmem:[%s20431_s3 + $0x1d20] ss:$16 sps:$4 sm:$0xff]  }
 0x46d   : > { %12153 = vmatpush1.bf16.msra.mxu0 %v18374_v10  ;;  %13301 = vmatpush1.bf16.msra.mxu1 %v18377_v28  ;;  %v18462_v10 = vld [vmem:[%s20431_s3 + $0x1d28] ss:$16 sps:$4 sm:$0xff]   ;;  %v18467_v28 = vld [vmem:[%s20431_s3 + $0x1d44] ss:$16 sps:$4 sm:$0xff]  }
 0x46e   : > { %12154 = vmatprep.subr.bf16.mxu0 %v18382_v31  ;;  %13302 = vmatprep.subr.bf16.mxu1 %v18385_v32  ;;  %v18470_v31 = vld [vmem:[%s20431_s3 + $0x1d4c] ss:$16 sps:$4 sm:$0xff]   ;;  %v18465_v32 = vld [vmem:[%s20431_s3 + $0x1d40] ss:$16 sps:$4 sm:$0xff]  }
 0x471   : > { %12155 = vmatpush1.bf16.msra.mxu0 %v18380_v34  ;;  %13303 = vmatpush1.bf16.msra.mxu1 %v18383_v14  ;;  %v18468_v34 = vld [vmem:[%s20431_s3 + $0x1d48] ss:$16 sps:$4 sm:$0xff]   ;;  %v18473_v14 = vld [vmem:[%s20431_s3 + $0x1d64] ss:$16 sps:$4 sm:$0xff]  }
 0x472   : > { %12156 = vmatprep.subr.bf16.mxu0 %v18388_v35  ;;  %13304 = vmatprep.subr.bf16.mxu1 %v18391_v36  ;;  %v18476_v35 = vld [vmem:[%s20431_s3 + $0x1d6c] ss:$16 sps:$4 sm:$0xff]   ;;  %v18471_v36 = vld [vmem:[%s20431_s3 + $0x1d60] ss:$16 sps:$4 sm:$0xff]  }
 0x475   : > { %12157 = vmatpush1.bf16.msra.mxu0 %v18386_v27  ;;  %13305 = vmatpush1.bf16.msra.mxu1 %v18389_v37  ;;  %v18474_v27 = vld [vmem:[%s20431_s3 + $0x1d68] ss:$16 sps:$4 sm:$0xff]   ;;  %v18479_v37 = vld [vmem:[%s20431_s3 + $0x1d84] ss:$16 sps:$4 sm:$0xff]  }
 0x476   : > { %12158 = vmatprep.subr.bf16.mxu0 %v18394_v25  ;;  %13306 = vmatprep.subr.bf16.mxu1 %v18397_v39  ;;  %v18482_v25 = vld [vmem:[%s20431_s3 + $0x1d8c] ss:$16 sps:$4 sm:$0xff]   ;;  %v18477_v39 = vld [vmem:[%s20431_s3 + $0x1d80] ss:$16 sps:$4 sm:$0xff]  }
 0x479   : > { %12159 = vmatpush1.bf16.msra.mxu0 %v18392_v22  ;;  %13307 = vmatpush1.bf16.msra.mxu1 %v18395_v29  ;;  %v18480_v22 = vld [vmem:[%s20431_s3 + $0x1d88] ss:$16 sps:$4 sm:$0xff]   ;;  %v18485_v29 = vld [vmem:[%s20431_s3 + $0x1da4] ss:$16 sps:$4 sm:$0xff]  }
 0x47a   : > { %12160 = vmatprep.subr.bf16.mxu0 %v18400_v42  ;;  %13308 = vmatprep.subr.bf16.mxu1 %v18403_v45  ;;  %v18488_v42 = vld [vmem:[%s20431_s3 + $0x1dac] ss:$16 sps:$4 sm:$0xff]   ;;  %v18483_v45 = vld [vmem:[%s20431_s3 + $0x1da0] ss:$16 sps:$4 sm:$0xff]  }
 0x47d   : > { %12161 = vmatpush1.bf16.msra.mxu0 %v18398_v26  ;;  %13309 = vmatpush1.bf16.msra.mxu1 %v18401_v47  ;;  %v18486_v26 = vld [vmem:[%s20431_s3 + $0x1da8] ss:$16 sps:$4 sm:$0xff]   ;;  %v18491_v47 = vld [vmem:[%s20431_s3 + $0x1dc4] ss:$16 sps:$4 sm:$0xff]  }
 0x47e   : > { %12171 = vmatprep.subr.bf16.mxu0 %v18407_v49  ;;  %13319 = vmatprep.subr.bf16.mxu1 %v18410_v30  ;;  %v18494_v49 = vld [vmem:[%s20431_s3 + $0x1dcc] ss:$16 sps:$4 sm:$0xff]   ;;  %v614_v30 = vcombine.high %v21478_v40, %v21478_v40  ;;  %v18495_v40 = vld [vmem:[%s20431_s3 + $0x1de0] ss:$16 sps:$4 sm:$0xff]  }
 0x480   : > { %12163 = vmatmul.mubr.bf16.vlgmr.msra.gmra.mrb[0].mxu0 %v815_v52  ;;  %13311 = vmatmul.mubr.bf16.vlgmr.msra.gmra.mrb[0].mxu1 %v815_v52  ;;  %v18492_v52 = vld [vmem:[%s20431_s3 + $0x1dc8] ss:$16 sps:$4 sm:$0xff]  }
 0x481   : > { %12172 = vmatpush1.bf16.msra.mxu0 %v18405_v33  ;;  %13320 = vmatpush1.bf16.msra.mxu1 %v18408_v53  ;;  %v18497_v33 = vld [vmem:[%s20431_s3 + $0x1de4] ss:$16 sps:$4 sm:$0xff]   ;;  %v18500_v53 = vld [vmem:[%s20431_s3 + $0x1dec] ss:$16 sps:$4 sm:$0xff]  }
 0x482   : > { %12173 = vmatprep.subr.bf16.mxu0 %v18413_v54  ;;  %13321 = vmatprep.subr.bf16.mxu1 %v18416_v55  ;;  %v21559_v54 = vrot.slane %v614_v30, %v20502_v50  ;;  %v18498_v55 = vld [vmem:[%s20431_s3 + $0x1de8] ss:$16 sps:$4 sm:$0xff]  }
 0x483   : > { %12203 = vmatprep.mubr.bf16.mxu0 %v818_v56  ;;  %13351 = vmatprep.mubr.bf16.mxu1 %v818_v56  ;;  %v18503_v56 = vld [vmem:[%s20431_s3 + $0x1e04] ss:$16 sps:$4 sm:$0xff]   ;;  %v18576_v30 = vld [vmem:[%s20431_s3 + $0x1f88] ss:$16 sps:$4 sm:$0xff]  }
 0x485   : > { %12174 = vmatpush1.bf16.msra.mxu0 %v18411_v38  ;;  %13322 = vmatpush1.bf16.msra.mxu1 %v18414_v43  ;;  %v18506_v38 = vld [vmem:[%s20431_s3 + $0x1e0c] ss:$16 sps:$4 sm:$0xff]   ;;  %v630_v43 = vcombine.high %v21559_v54, %v21559_v54 }
 0x486   : > { %12175 = vmatprep.subr.bf16.mxu0 %v18419_v58  ;;  %13323 = vmatprep.subr.bf16.mxu1 %v18422_v41  ;;  %v817_v58 = vpack.c.bf16 %v21486_v46, %v21486_v46  ;;  %v18501_v41 = vld [vmem:[%s20431_s3 + $0x1e00] ss:$16 sps:$4 sm:$0xff]  }
 0x487   : > { %v18507_v46 = vld [vmem:[%s20431_s3 + $0x1e20] ss:$16 sps:$4 sm:$0xff]  }
 0x489   : > { %12176 = vmatpush1.bf16.msra.mxu0 %v18417_v60  ;;  %13324 = vmatpush1.bf16.msra.mxu1 %v18420_v61  ;;  %v18504_v60 = vld [vmem:[%s20431_s3 + $0x1e08] ss:$16 sps:$4 sm:$0xff]   ;;  %v18509_v61 = vld [vmem:[%s20431_s3 + $0x1e24] ss:$16 sps:$4 sm:$0xff]  }
 0x48a   : > { %12177 = vmatprep.subr.bf16.mxu0 %v18425_v62  ;;  %13325 = vmatprep.subr.bf16.mxu1 %v18428_v0  ;;  %v18512_v62 = vld [vmem:[%s20431_s3 + $0x1e2c] ss:$16 sps:$4 sm:$0xff]   ;;  %v820_v0 = vpack.c.bf16 %v630_v43, %v630_v43  ;;  %v18588_v43 = vld [vmem:[%s20431_s3 + $0x1fc8] ss:$16 sps:$4 sm:$0xff]  }
 0x48d   : > { %12178 = vmatpush1.bf16.msra.mxu0 %v18423_v1  ;;  %13326 = vmatpush1.bf16.msra.mxu1 %v18426_v2  ;;  %v18510_v1 = vld [vmem:[%s20431_s3 + $0x1e28] ss:$16 sps:$4 sm:$0xff]   ;;  %v18515_v2 = vld [vmem:[%s20431_s3 + $0x1e44] ss:$16 sps:$4 sm:$0xff]  }
 0x48e   : > { %12179 = vmatprep.subr.bf16.mxu0 %v18431_v48  ;;  %13327 = vmatprep.subr.bf16.mxu1 %v18434_v3  ;;  %v18518_v48 = vld [vmem:[%s20431_s3 + $0x1e4c] ss:$16 sps:$4 sm:$0xff]   ;;  %v18513_v3 = vld [vmem:[%s20431_s3 + $0x1e40] ss:$16 sps:$4 sm:$0xff]  }
 0x491   : > { %12180 = vmatpush1.bf16.msra.mxu0 %v18429_v4  ;;  %13328 = vmatpush1.bf16.msra.mxu1 %v18432_v5  ;;  %v18516_v4 = vld [vmem:[%s20431_s3 + $0x1e48] ss:$16 sps:$4 sm:$0xff]   ;;  %v18521_v5 = vld [vmem:[%s20431_s3 + $0x1e64] ss:$16 sps:$4 sm:$0xff]  }
 0x492   : > { %12181 = vmatprep.subr.bf16.mxu0 %v18437_v6  ;;  %13329 = vmatprep.subr.bf16.mxu1 %v18440_v59  ;;  %v18524_v6 = vld [vmem:[%s20431_s3 + $0x1e6c] ss:$16 sps:$4 sm:$0xff]   ;;  %v18519_v59 = vld [vmem:[%s20431_s3 + $0x1e60] ss:$16 sps:$4 sm:$0xff]  }
 0x495   : > { %12182 = vmatpush1.bf16.msra.mxu0 %v18435_v8  ;;  %13330 = vmatpush1.bf16.msra.mxu1 %v18438_v57  ;;  %v18522_v8 = vld [vmem:[%s20431_s3 + $0x1e68] ss:$16 sps:$4 sm:$0xff]   ;;  %v18527_v57 = vld [vmem:[%s20431_s3 + $0x1e84] ss:$16 sps:$4 sm:$0xff]  }
 0x496   : > { %12183 = vmatprep.subr.bf16.mxu0 %v18443_v11  ;;  %13331 = vmatprep.subr.bf16.mxu1 %v18446_v12  ;;  %v18530_v11 = vld [vmem:[%s20431_s3 + $0x1e8c] ss:$16 sps:$4 sm:$0xff]   ;;  %v18525_v12 = vld [vmem:[%s20431_s3 + $0x1e80] ss:$16 sps:$4 sm:$0xff]  }
 0x499   : > { %12184 = vmatpush1.bf16.msra.mxu0 %v18441_v13  ;;  %13332 = vmatpush1.bf16.msra.mxu1 %v18444_v15  ;;  %v18528_v13 = vld [vmem:[%s20431_s3 + $0x1e88] ss:$16 sps:$4 sm:$0xff]   ;;  %v18533_v15 = vld [vmem:[%s20431_s3 + $0x1ea4] ss:$16 sps:$4 sm:$0xff]  }
 0x49a   : > { %12185 = vmatprep.subr.bf16.mxu0 %v18449_v16  ;;  %13333 = vmatprep.subr.bf16.mxu1 %v18452_v17  ;;  %v18536_v16 = vld [vmem:[%s20431_s3 + $0x1eac] ss:$16 sps:$4 sm:$0xff]   ;;  %v18531_v17 = vld [vmem:[%s20431_s3 + $0x1ea0] ss:$16 sps:$4 sm:$0xff]  }
 0x49d   : > { %12186 = vmatpush1.bf16.msra.mxu0 %v18447_v63  ;;  %13334 = vmatpush1.bf16.msra.mxu1 %v18450_v18  ;;  %v18534_v63 = vld [vmem:[%s20431_s3 + $0x1ea8] ss:$16 sps:$4 sm:$0xff]   ;;  %v18539_v18 = vld [vmem:[%s20431_s3 + $0x1ec4] ss:$16 sps:$4 sm:$0xff]  }
 0x49e   : > { %12187 = vmatprep.subr.bf16.mxu0 %v18455_v19  ;;  %13335 = vmatprep.subr.bf16.mxu1 %v18458_v20  ;;  %v18542_v19 = vld [vmem:[%s20431_s3 + $0x1ecc] ss:$16 sps:$4 sm:$0xff]   ;;  %v18537_v20 = vld [vmem:[%s20431_s3 + $0x1ec0] ss:$16 sps:$4 sm:$0xff]  }
 0x4a1   : > { %12188 = vmatpush1.bf16.msra.mxu0 %v18453_v21  ;;  %13336 = vmatpush1.bf16.msra.mxu1 %v18456_v9  ;;  %v18540_v21 = vld [vmem:[%s20431_s3 + $0x1ec8] ss:$16 sps:$4 sm:$0xff]   ;;  %v18545_v9 = vld [vmem:[%s20431_s3 + $0x1ee4] ss:$16 sps:$4 sm:$0xff]  }
 0x4a2   : > { %12189 = vmatprep.subr.bf16.mxu0 %v18461_v23  ;;  %13337 = vmatprep.subr.bf16.mxu1 %v18464_v7  ;;  %v18548_v23 = vld [vmem:[%s20431_s3 + $0x1eec] ss:$16 sps:$4 sm:$0xff]   ;;  %v18543_v7 = vld [vmem:[%s20431_s3 + $0x1ee0] ss:$16 sps:$4 sm:$0xff]  }
 0x4a5   : > { %12190 = vmatpush1.bf16.msra.mxu0 %v18459_v24  ;;  %13338 = vmatpush1.bf16.msra.mxu1 %v18462_v10  ;;  %v18546_v24 = vld [vmem:[%s20431_s3 + $0x1ee8] ss:$16 sps:$4 sm:$0xff]   ;;  %v18551_v10 = vld [vmem:[%s20431_s3 + $0x1f04] ss:$16 sps:$4 sm:$0xff]  }
 0x4a6   : > { %12191 = vmatprep.subr.bf16.mxu0 %v18467_v28  ;;  %13339 = vmatprep.subr.bf16.mxu1 %v18470_v31  ;;  %v18554_v28 = vld [vmem:[%s20431_s3 + $0x1f0c] ss:$16 sps:$4 sm:$0xff]   ;;  %v18549_v31 = vld [vmem:[%s20431_s3 + $0x1f00] ss:$16 sps:$4 sm:$0xff]  }
 0x4a9   : > { %12192 = vmatpush1.bf16.msra.mxu0 %v18465_v32  ;;  %13340 = vmatpush1.bf16.msra.mxu1 %v18468_v34  ;;  %v18552_v32 = vld [vmem:[%s20431_s3 + $0x1f08] ss:$16 sps:$4 sm:$0xff]   ;;  %v18557_v34 = vld [vmem:[%s20431_s3 + $0x1f24] ss:$16 sps:$4 sm:$0xff]  }
 0x4aa   : > { %12193 = vmatprep.subr.bf16.mxu0 %v18473_v14  ;;  %13341 = vmatprep.subr.bf16.mxu1 %v18476_v35  ;;  %v18560_v14 = vld [vmem:[%s20431_s3 + $0x1f2c] ss:$16 sps:$4 sm:$0xff]   ;;  %v18555_v35 = vld [vmem:[%s20431_s3 + $0x1f20] ss:$16 sps:$4 sm:$0xff]  }
 0x4ad   : > { %12194 = vmatpush1.bf16.msra.mxu0 %v18471_v36  ;;  %13342 = vmatpush1.bf16.msra.mxu1 %v18474_v27  ;;  %v18558_v36 = vld [vmem:[%s20431_s3 + $0x1f28] ss:$16 sps:$4 sm:$0xff]   ;;  %v18563_v27 = vld [vmem:[%s20431_s3 + $0x1f44] ss:$16 sps:$4 sm:$0xff]  }
 0x4ae   : > { %12195 = vmatprep.subr.bf16.mxu0 %v18479_v37  ;;  %13343 = vmatprep.subr.bf16.mxu1 %v18482_v25  ;;  %v18566_v37 = vld [vmem:[%s20431_s3 + $0x1f4c] ss:$16 sps:$4 sm:$0xff]   ;;  %v18561_v25 = vld [vmem:[%s20431_s3 + $0x1f40] ss:$16 sps:$4 sm:$0xff]  }
 0x4b1   : > { %12196 = vmatpush1.bf16.msra.mxu0 %v18477_v39  ;;  %13344 = vmatpush1.bf16.msra.mxu1 %v18480_v22  ;;  %v18564_v39 = vld [vmem:[%s20431_s3 + $0x1f48] ss:$16 sps:$4 sm:$0xff]   ;;  %v18569_v22 = vld [vmem:[%s20431_s3 + $0x1f64] ss:$16 sps:$4 sm:$0xff]  }
 0x4b2   : > { %12197 = vmatprep.subr.bf16.mxu0 %v18485_v29  ;;  %13345 = vmatprep.subr.bf16.mxu1 %v18488_v42  ;;  %v18572_v29 = vld [vmem:[%s20431_s3 + $0x1f6c] ss:$16 sps:$4 sm:$0xff]   ;;  %v18567_v42 = vld [vmem:[%s20431_s3 + $0x1f60] ss:$16 sps:$4 sm:$0xff]  }
 0x4b5   : > { %12198 = vmatpush1.bf16.msra.mxu0 %v18483_v45  ;;  %13346 = vmatpush1.bf16.msra.mxu1 %v18486_v26  ;;  %v18570_v45 = vld [vmem:[%s20431_s3 + $0x1f68] ss:$16 sps:$4 sm:$0xff]   ;;  %v18575_v26 = vld [vmem:[%s20431_s3 + $0x1f84] ss:$16 sps:$4 sm:$0xff]  }
 0x4b6   : > { %12199 = vmatprep.subr.bf16.mxu0 %v18491_v47  ;;  %13347 = vmatprep.subr.bf16.mxu1 %v18494_v49  ;;  %v18578_v47 = vld [vmem:[%s20431_s3 + $0x1f8c] ss:$16 sps:$4 sm:$0xff]   ;;  %v18573_v49 = vld [vmem:[%s20431_s3 + $0x1f80] ss:$16 sps:$4 sm:$0xff]  }
 0x4b9   : > { %12200 = vmatpush1.bf16.msra.mxu0 %v18489_v51  ;;  %13348 = vmatpush1.bf16.msra.mxu1 %v18492_v52  ;;  %v18581_v51 = vld [vmem:[%s20431_s3 + $0x1fa4] ss:$16 sps:$4 sm:$0xff]   ;;  %v18584_v52 = vld [vmem:[%s20431_s3 + $0x1fac] ss:$16 sps:$4 sm:$0xff]  }
 0x4ba   : > { %12201 = vmatprep.subr.bf16.mxu0 %v18497_v33  ;;  %13349 = vmatprep.subr.bf16.mxu1 %v18500_v53  ;;  %v18579_v33 = vld [vmem:[%s20431_s3 + $0x1fa0] ss:$16 sps:$4 sm:$0xff]   ;;  %v18582_v53 = vld [vmem:[%s20431_s3 + $0x1fa8] ss:$16 sps:$4 sm:$0xff]  }
 0x4bd   : > { %12202 = vmatpush1.bf16.msra.mxu0 %v18495_v40  ;;  %13350 = vmatpush1.bf16.msra.mxu1 %v18498_v55  ;;  %v18587_v40 = vld [vmem:[%s20431_s3 + $0x1fc4] ss:$16 sps:$4 sm:$0xff]   ;;  %v18590_v55 = vld [vmem:[%s20431_s3 + $0x1fcc] ss:$16 sps:$4 sm:$0xff]  }
 0x4be   : > { %12212 = vmatprep.subr.bf16.mxu0 %v18503_v56  ;;  %13360 = vmatprep.subr.bf16.mxu1 %v18506_v38  ;;  %v21626_v56 = vld [vmem:[%s20424_s12 + $0x40] sm:$0xff] }
 0x4bf   : > { %v18585_v38 = vld [vmem:[%s20431_s3 + $0x1fc0] ss:$16 sps:$4 sm:$0xff]  }
 0x4c0   : > { %12204 = vmatmul.mubr.bf16.vlgmr.msra.gmra.mrb[0].mxu0 %v817_v58  ;;  %13352 = vmatmul.mubr.bf16.vlgmr.msra.gmra.mrb[0].mxu1 %v817_v58  ;;  %v18593_v58 = vld [vmem:[%s20431_s3 + $0x1fe4] ss:$16 sps:$4 sm:$0xff]  }
 0x4c1   : > { %12213 = vmatpush1.bf16.msra.mxu0 %v18501_v41  ;;  %13361 = vmatpush1.bf16.msra.mxu1 %v18504_v60  ;;  %v18596_v41 = vld [vmem:[%s20431_s3 + $0x1fec] ss:$16 sps:$4 sm:$0xff]   ;;  %v21634_v60 = vrot.slane %v21626_v56, %v20502_v50 }
 0x4c2   : > { %12214 = vmatprep.subr.bf16.mxu0 %v18509_v61  ;;  %13362 = vmatprep.subr.bf16.mxu1 %v18512_v62  ;;  %v18591_v61 = vld [vmem:[%s20431_s3 + $0x1fe0] ss:$16 sps:$4 sm:$0xff]   ;;  %v18594_v62 = vld [vmem:[%s20431_s3 + $0x1fe8] ss:$16 sps:$4 sm:$0xff]  }
 0x4c3   : > { %12244 = vmatprep.mubr.bf16.mxu0 %v820_v0  ;;  %13392 = vmatprep.mubr.bf16.mxu1 %v820_v0  ;;  %v18600_v0 = vld [vmem:[%s20431_s3 + $0x2004] ss:$16 sps:$4 sm:$0xff]  }
 0x4c5   : > { %12215 = vmatpush1.bf16.msra.mxu0 %v18507_v46  ;;  %13363 = vmatpush1.bf16.msra.mxu1 %v18510_v1  ;;  %v18603_v46 = vld [vmem:[%s20431_s3 + $0x200c] ss:$16 sps:$4 sm:$0xff]   ;;  %v646_v1 = vcombine.high %v21634_v60, %v21634_v60 }
 0x4c6   : > { %12216 = vmatprep.subr.bf16.mxu0 %v18515_v2  ;;  %13364 = vmatprep.subr.bf16.mxu1 %v18518_v48  ;;  %v819_v2 = vpack.c.bf16 %v21559_v54, %v21559_v54  ;;  %v18598_v48 = vld [vmem:[%s20431_s3 + $0x2000] ss:$16 sps:$4 sm:$0xff]  }
 0x4c7   : > { %v18604_v54 = vld [vmem:[%s20431_s3 + $0x2020] ss:$16 sps:$4 sm:$0xff]  }
 0x4c9   : > { %12217 = vmatpush1.bf16.msra.mxu0 %v18513_v3  ;;  %13365 = vmatpush1.bf16.msra.mxu1 %v18516_v4  ;;  %v18601_v3 = vld [vmem:[%s20431_s3 + $0x2008] ss:$16 sps:$4 sm:$0xff]   ;;  %v18606_v4 = vld [vmem:[%s20431_s3 + $0x2024] ss:$16 sps:$4 sm:$0xff]  }
 0x4ca   : > { %12218 = vmatprep.subr.bf16.mxu0 %v18521_v5  ;;  %13366 = vmatprep.subr.bf16.mxu1 %v18524_v6  ;;  %v18609_v5 = vld [vmem:[%s20431_s3 + $0x202c] ss:$16 sps:$4 sm:$0xff]   ;;  %v822_v6 = vpack.c.bf16 %v646_v1, %v646_v1  ;;  %v18682_v1 = vld [vmem:[%s20431_s3 + $0x21c0] ss:$16 sps:$4 sm:$0xff]  }
 0x4cd   : > { %12219 = vmatpush1.bf16.msra.mxu0 %v18519_v59  ;;  %13367 = vmatpush1.bf16.msra.mxu1 %v18522_v8  ;;  %v18607_v59 = vld [vmem:[%s20431_s3 + $0x2028] ss:$16 sps:$4 sm:$0xff]   ;;  %v18612_v8 = vld [vmem:[%s20431_s3 + $0x2044] ss:$16 sps:$4 sm:$0xff]  }
 0x4ce   : > { %12220 = vmatprep.subr.bf16.mxu0 %v18527_v57  ;;  %13368 = vmatprep.subr.bf16.mxu1 %v18530_v11  ;;  %v18615_v57 = vld [vmem:[%s20431_s3 + $0x204c] ss:$16 sps:$4 sm:$0xff]   ;;  %v18610_v11 = vld [vmem:[%s20431_s3 + $0x2040] ss:$16 sps:$4 sm:$0xff]  }
 0x4d1   : > { %12221 = vmatpush1.bf16.msra.mxu0 %v18525_v12  ;;  %13369 = vmatpush1.bf16.msra.mxu1 %v18528_v13  ;;  %v18613_v12 = vld [vmem:[%s20431_s3 + $0x2048] ss:$16 sps:$4 sm:$0xff]   ;;  %v18618_v13 = vld [vmem:[%s20431_s3 + $0x2064] ss:$16 sps:$4 sm:$0xff]  }
 0x4d2   : > { %12222 = vmatprep.subr.bf16.mxu0 %v18533_v15  ;;  %13370 = vmatprep.subr.bf16.mxu1 %v18536_v16  ;;  %v18621_v15 = vld [vmem:[%s20431_s3 + $0x206c] ss:$16 sps:$4 sm:$0xff]   ;;  %v18616_v16 = vld [vmem:[%s20431_s3 + $0x2060] ss:$16 sps:$4 sm:$0xff]  }
 0x4d5   : > { %12223 = vmatpush1.bf16.msra.mxu0 %v18531_v17  ;;  %13371 = vmatpush1.bf16.msra.mxu1 %v18534_v63  ;;  %v18619_v17 = vld [vmem:[%s20431_s3 + $0x2068] ss:$16 sps:$4 sm:$0xff]   ;;  %v18624_v63 = vld [vmem:[%s20431_s3 + $0x2084] ss:$16 sps:$4 sm:$0xff]  }
 0x4d6   : > { %12224 = vmatprep.subr.bf16.mxu0 %v18539_v18  ;;  %13372 = vmatprep.subr.bf16.mxu1 %v18542_v19  ;;  %v18627_v18 = vld [vmem:[%s20431_s3 + $0x208c] ss:$16 sps:$4 sm:$0xff]   ;;  %v18622_v19 = vld [vmem:[%s20431_s3 + $0x2080] ss:$16 sps:$4 sm:$0xff]  }
 0x4d9   : > { %12225 = vmatpush1.bf16.msra.mxu0 %v18537_v20  ;;  %13373 = vmatpush1.bf16.msra.mxu1 %v18540_v21  ;;  %v18625_v20 = vld [vmem:[%s20431_s3 + $0x2088] ss:$16 sps:$4 sm:$0xff]   ;;  %v18630_v21 = vld [vmem:[%s20431_s3 + $0x20a4] ss:$16 sps:$4 sm:$0xff]  }
 0x4da   : > { %12226 = vmatprep.subr.bf16.mxu0 %v18545_v9  ;;  %13374 = vmatprep.subr.bf16.mxu1 %v18548_v23  ;;  %v18633_v9 = vld [vmem:[%s20431_s3 + $0x20ac] ss:$16 sps:$4 sm:$0xff]   ;;  %v18628_v23 = vld [vmem:[%s20431_s3 + $0x20a0] ss:$16 sps:$4 sm:$0xff]  }
 0x4dd   : > { %12227 = vmatpush1.bf16.msra.mxu0 %v18543_v7  ;;  %13375 = vmatpush1.bf16.msra.mxu1 %v18546_v24  ;;  %v18631_v7 = vld [vmem:[%s20431_s3 + $0x20a8] ss:$16 sps:$4 sm:$0xff]   ;;  %v18636_v24 = vld [vmem:[%s20431_s3 + $0x20c4] ss:$16 sps:$4 sm:$0xff]  }
 0x4de   : > { %12228 = vmatprep.subr.bf16.mxu0 %v18551_v10  ;;  %13376 = vmatprep.subr.bf16.mxu1 %v18554_v28  ;;  %v18639_v10 = vld [vmem:[%s20431_s3 + $0x20cc] ss:$16 sps:$4 sm:$0xff]   ;;  %v18634_v28 = vld [vmem:[%s20431_s3 + $0x20c0] ss:$16 sps:$4 sm:$0xff]  }
 0x4e1   : > { %12229 = vmatpush1.bf16.msra.mxu0 %v18549_v31  ;;  %13377 = vmatpush1.bf16.msra.mxu1 %v18552_v32  ;;  %v18637_v31 = vld [vmem:[%s20431_s3 + $0x20c8] ss:$16 sps:$4 sm:$0xff]   ;;  %v18642_v32 = vld [vmem:[%s20431_s3 + $0x20e4] ss:$16 sps:$4 sm:$0xff]  }
 0x4e2   : > { %12230 = vmatprep.subr.bf16.mxu0 %v18557_v34  ;;  %13378 = vmatprep.subr.bf16.mxu1 %v18560_v14  ;;  %v18645_v34 = vld [vmem:[%s20431_s3 + $0x20ec] ss:$16 sps:$4 sm:$0xff]   ;;  %v18640_v14 = vld [vmem:[%s20431_s3 + $0x20e0] ss:$16 sps:$4 sm:$0xff]  }
 0x4e5   : > { %12231 = vmatpush1.bf16.msra.mxu0 %v18555_v35  ;;  %13379 = vmatpush1.bf16.msra.mxu1 %v18558_v36  ;;  %v18643_v35 = vld [vmem:[%s20431_s3 + $0x20e8] ss:$16 sps:$4 sm:$0xff]   ;;  %v18648_v36 = vld [vmem:[%s20431_s3 + $0x2104] ss:$16 sps:$4 sm:$0xff]  }
 0x4e6   : > { %12232 = vmatprep.subr.bf16.mxu0 %v18563_v27  ;;  %13380 = vmatprep.subr.bf16.mxu1 %v18566_v37  ;;  %v18651_v27 = vld [vmem:[%s20431_s3 + $0x210c] ss:$16 sps:$4 sm:$0xff]   ;;  %v18646_v37 = vld [vmem:[%s20431_s3 + $0x2100] ss:$16 sps:$4 sm:$0xff]  }
 0x4e9   : > { %12233 = vmatpush1.bf16.msra.mxu0 %v18561_v25  ;;  %13381 = vmatpush1.bf16.msra.mxu1 %v18564_v39  ;;  %v18649_v25 = vld [vmem:[%s20431_s3 + $0x2108] ss:$16 sps:$4 sm:$0xff]   ;;  %v18654_v39 = vld [vmem:[%s20431_s3 + $0x2124] ss:$16 sps:$4 sm:$0xff]  }
 0x4ea   : > { %12234 = vmatprep.subr.bf16.mxu0 %v18569_v22  ;;  %13382 = vmatprep.subr.bf16.mxu1 %v18572_v29  ;;  %v18657_v22 = vld [vmem:[%s20431_s3 + $0x212c] ss:$16 sps:$4 sm:$0xff]   ;;  %v18652_v29 = vld [vmem:[%s20431_s3 + $0x2120] ss:$16 sps:$4 sm:$0xff]  }
 0x4ed   : > { %12235 = vmatpush1.bf16.msra.mxu0 %v18567_v42  ;;  %13383 = vmatpush1.bf16.msra.mxu1 %v18570_v45  ;;  %v18655_v42 = vld [vmem:[%s20431_s3 + $0x2128] ss:$16 sps:$4 sm:$0xff]   ;;  %v18660_v45 = vld [vmem:[%s20431_s3 + $0x2144] ss:$16 sps:$4 sm:$0xff]  }
 0x4ee   : > { %12236 = vmatprep.subr.bf16.mxu0 %v18575_v26  ;;  %13384 = vmatprep.subr.bf16.mxu1 %v18578_v47  ;;  %v18663_v26 = vld [vmem:[%s20431_s3 + $0x214c] ss:$16 sps:$4 sm:$0xff]   ;;  %v18658_v47 = vld [vmem:[%s20431_s3 + $0x2140] ss:$16 sps:$4 sm:$0xff]  }
 0x4f1   : > { %12237 = vmatpush1.bf16.msra.mxu0 %v18573_v49  ;;  %13385 = vmatpush1.bf16.msra.mxu1 %v18576_v30  ;;  %v18661_v49 = vld [vmem:[%s20431_s3 + $0x2148] ss:$16 sps:$4 sm:$0xff]   ;;  %v18666_v30 = vld [vmem:[%s20431_s3 + $0x2164] ss:$16 sps:$4 sm:$0xff]  }
 0x4f2   : > { %12238 = vmatprep.subr.bf16.mxu0 %v18581_v51  ;;  %13386 = vmatprep.subr.bf16.mxu1 %v18584_v52  ;;  %v18669_v51 = vld [vmem:[%s20431_s3 + $0x216c] ss:$16 sps:$4 sm:$0xff]   ;;  %v18664_v52 = vld [vmem:[%s20431_s3 + $0x2160] ss:$16 sps:$4 sm:$0xff]  }
 0x4f5   : > { %12239 = vmatpush1.bf16.msra.mxu0 %v18579_v33  ;;  %13387 = vmatpush1.bf16.msra.mxu1 %v18582_v53  ;;  %v18667_v33 = vld [vmem:[%s20431_s3 + $0x2168] ss:$16 sps:$4 sm:$0xff]   ;;  %v18672_v53 = vld [vmem:[%s20431_s3 + $0x2184] ss:$16 sps:$4 sm:$0xff]  }
 0x4f6   : > { %12240 = vmatprep.subr.bf16.mxu0 %v18587_v40  ;;  %13388 = vmatprep.subr.bf16.mxu1 %v18590_v55  ;;  %v18675_v40 = vld [vmem:[%s20431_s3 + $0x218c] ss:$16 sps:$4 sm:$0xff]   ;;  %v18670_v55 = vld [vmem:[%s20431_s3 + $0x2180] ss:$16 sps:$4 sm:$0xff]  }
 0x4f9   : > { %12241 = vmatpush1.bf16.msra.mxu0 %v18585_v38  ;;  %13389 = vmatpush1.bf16.msra.mxu1 %v18588_v43  ;;  %v18673_v38 = vld [vmem:[%s20431_s3 + $0x2188] ss:$16 sps:$4 sm:$0xff]   ;;  %v18678_v43 = vld [vmem:[%s20431_s3 + $0x21a4] ss:$16 sps:$4 sm:$0xff]  }
 0x4fa   : > { %12242 = vmatprep.subr.bf16.mxu0 %v18593_v58  ;;  %13390 = vmatprep.subr.bf16.mxu1 %v18596_v41  ;;  %v18681_v58 = vld [vmem:[%s20431_s3 + $0x21ac] ss:$16 sps:$4 sm:$0xff]   ;;  %v18676_v41 = vld [vmem:[%s20431_s3 + $0x21a0] ss:$16 sps:$4 sm:$0xff]  }
 0x4fd   : > { %12243 = vmatpush1.bf16.msra.mxu0 %v18591_v61  ;;  %13391 = vmatpush1.bf16.msra.mxu1 %v18594_v62  ;;  %v18679_v61 = vld [vmem:[%s20431_s3 + $0x21a8] ss:$16 sps:$4 sm:$0xff]   ;;  %v18684_v62 = vld [vmem:[%s20431_s3 + $0x21c4] ss:$16 sps:$4 sm:$0xff]  }
 0x4fe   : > { %12253 = vmatprep.subr.bf16.mxu0 %v18600_v0  ;;  %13401 = vmatprep.subr.bf16.mxu1 %v18603_v46  ;;  %v18687_v0 = vld [vmem:[%s20431_s3 + $0x21cc] ss:$16 sps:$4 sm:$0xff]   ;;  %v631_v46 = vcombine.high %v21626_v56, %v21626_v56  ;;  %v18688_v56 = vld [vmem:[%s20431_s3 + $0x21e0] ss:$16 sps:$4 sm:$0xff]  }
 0x500   : > { %12245 = vmatmul.mubr.bf16.vlgmr.msra.gmra.mrb[0].mxu0 %v819_v2  ;;  %13393 = vmatmul.mubr.bf16.vlgmr.msra.gmra.mrb[0].mxu1 %v819_v2  ;;  %v18685_v2 = vld [vmem:[%s20431_s3 + $0x21c8] ss:$16 sps:$4 sm:$0xff]  }
 0x501   : > { %12254 = vmatpush1.bf16.msra.mxu0 %v18598_v48  ;;  %13402 = vmatpush1.bf16.msra.mxu1 %v18601_v3  ;;  %v18690_v48 = vld [vmem:[%s20431_s3 + $0x21e4] ss:$16 sps:$4 sm:$0xff]   ;;  %v18693_v3 = vld [vmem:[%s20431_s3 + $0x21ec] ss:$16 sps:$4 sm:$0xff]  }
 0x502   : > { %12255 = vmatprep.subr.bf16.mxu0 %v18606_v4  ;;  %13403 = vmatprep.subr.bf16.mxu1 %v18609_v5  ;;  %v21707_v4 = vrot.slane %v631_v46, %v20502_v50  ;;  %v18691_v5 = vld [vmem:[%s20431_s3 + $0x21e8] ss:$16 sps:$4 sm:$0xff]  }
 0x503   : > { %12285 = vmatprep.mubr.bf16.mxu0 %v822_v6  ;;  %13433 = vmatprep.mubr.bf16.mxu1 %v822_v6  ;;  %v18696_v6 = vld [vmem:[%s20431_s3 + $0x2204] ss:$16 sps:$4 sm:$0xff]   ;;  %v18769_v46 = vld [vmem:[%s20431_s3 + $0x2388] ss:$16 sps:$4 sm:$0xff]  }
 0x505   : > { %12256 = vmatpush1.bf16.msra.mxu0 %v18604_v54  ;;  %13404 = vmatpush1.bf16.msra.mxu1 %v18607_v59  ;;  %v18699_v54 = vld [vmem:[%s20431_s3 + $0x220c] ss:$16 sps:$4 sm:$0xff]   ;;  %v647_v59 = vcombine.high %v21707_v4, %v21707_v4 }
 0x506   : > { %12257 = vmatprep.subr.bf16.mxu0 %v18612_v8  ;;  %13405 = vmatprep.subr.bf16.mxu1 %v18615_v57  ;;  %v821_v8 = vpack.c.bf16 %v21634_v60, %v21634_v60  ;;  %v18694_v57 = vld [vmem:[%s20431_s3 + $0x2200] ss:$16 sps:$4 sm:$0xff]  }
 0x507   : > { %v18700_v60 = vld [vmem:[%s20431_s3 + $0x2220] ss:$16 sps:$4 sm:$0xff]  }
 0x509   : > { %12258 = vmatpush1.bf16.msra.mxu0 %v18610_v11  ;;  %13406 = vmatpush1.bf16.msra.mxu1 %v18613_v12  ;;  %v18697_v11 = vld [vmem:[%s20431_s3 + $0x2208] ss:$16 sps:$4 sm:$0xff]   ;;  %v18702_v12 = vld [vmem:[%s20431_s3 + $0x2224] ss:$16 sps:$4 sm:$0xff]  }
 0x50a   : > { %12259 = vmatprep.subr.bf16.mxu0 %v18618_v13  ;;  %13407 = vmatprep.subr.bf16.mxu1 %v18621_v15  ;;  %v18705_v13 = vld [vmem:[%s20431_s3 + $0x222c] ss:$16 sps:$4 sm:$0xff]   ;;  %v824_v15 = vpack.c.bf16 %v647_v59, %v647_v59  ;;  %v18781_v59 = vld [vmem:[%s20431_s3 + $0x23c8] ss:$16 sps:$4 sm:$0xff]  }
 0x50d   : > { %12260 = vmatpush1.bf16.msra.mxu0 %v18616_v16  ;;  %13408 = vmatpush1.bf16.msra.mxu1 %v18619_v17  ;;  %v18703_v16 = vld [vmem:[%s20431_s3 + $0x2228] ss:$16 sps:$4 sm:$0xff]   ;;  %v18708_v17 = vld [vmem:[%s20431_s3 + $0x2244] ss:$16 sps:$4 sm:$0xff]  }
 0x50e   : > { %12261 = vmatprep.subr.bf16.mxu0 %v18624_v63  ;;  %13409 = vmatprep.subr.bf16.mxu1 %v18627_v18  ;;  %v18711_v63 = vld [vmem:[%s20431_s3 + $0x224c] ss:$16 sps:$4 sm:$0xff]   ;;  %v18706_v18 = vld [vmem:[%s20431_s3 + $0x2240] ss:$16 sps:$4 sm:$0xff]  }
 0x511   : > { %12262 = vmatpush1.bf16.msra.mxu0 %v18622_v19  ;;  %13410 = vmatpush1.bf16.msra.mxu1 %v18625_v20  ;;  %v18709_v19 = vld [vmem:[%s20431_s3 + $0x2248] ss:$16 sps:$4 sm:$0xff]   ;;  %v18714_v20 = vld [vmem:[%s20431_s3 + $0x2264] ss:$16 sps:$4 sm:$0xff]  }
 0x512   : > { %12263 = vmatprep.subr.bf16.mxu0 %v18630_v21  ;;  %13411 = vmatprep.subr.bf16.mxu1 %v18633_v9  ;;  %v18717_v21 = vld [vmem:[%s20431_s3 + $0x226c] ss:$16 sps:$4 sm:$0xff]   ;;  %v18712_v9 = vld [vmem:[%s20431_s3 + $0x2260] ss:$16 sps:$4 sm:$0xff]  }
 0x515   : > { %12264 = vmatpush1.bf16.msra.mxu0 %v18628_v23  ;;  %13412 = vmatpush1.bf16.msra.mxu1 %v18631_v7  ;;  %v18715_v23 = vld [vmem:[%s20431_s3 + $0x2268] ss:$16 sps:$4 sm:$0xff]   ;;  %v18720_v7 = vld [vmem:[%s20431_s3 + $0x2284] ss:$16 sps:$4 sm:$0xff]  }
 0x516   : > { %12265 = vmatprep.subr.bf16.mxu0 %v18636_v24  ;;  %13413 = vmatprep.subr.bf16.mxu1 %v18639_v10  ;;  %v18723_v24 = vld [vmem:[%s20431_s3 + $0x228c] ss:$16 sps:$4 sm:$0xff]   ;;  %v18718_v10 = vld [vmem:[%s20431_s3 + $0x2280] ss:$16 sps:$4 sm:$0xff]  }
 0x519   : > { %12266 = vmatpush1.bf16.msra.mxu0 %v18634_v28  ;;  %13414 = vmatpush1.bf16.msra.mxu1 %v18637_v31  ;;  %v18721_v28 = vld [vmem:[%s20431_s3 + $0x2288] ss:$16 sps:$4 sm:$0xff]   ;;  %v18726_v31 = vld [vmem:[%s20431_s3 + $0x22a4] ss:$16 sps:$4 sm:$0xff]  }
 0x51a   : > { %12267 = vmatprep.subr.bf16.mxu0 %v18642_v32  ;;  %13415 = vmatprep.subr.bf16.mxu1 %v18645_v34  ;;  %v18729_v32 = vld [vmem:[%s20431_s3 + $0x22ac] ss:$16 sps:$4 sm:$0xff]   ;;  %v18724_v34 = vld [vmem:[%s20431_s3 + $0x22a0] ss:$16 sps:$4 sm:$0xff]  }
 0x51d   : > { %12268 = vmatpush1.bf16.msra.mxu0 %v18640_v14  ;;  %13416 = vmatpush1.bf16.msra.mxu1 %v18643_v35  ;;  %v18727_v14 = vld [vmem:[%s20431_s3 + $0x22a8] ss:$16 sps:$4 sm:$0xff]   ;;  %v18732_v35 = vld [vmem:[%s20431_s3 + $0x22c4] ss:$16 sps:$4 sm:$0xff]  }
 0x51e   : > { %12269 = vmatprep.subr.bf16.mxu0 %v18648_v36  ;;  %13417 = vmatprep.subr.bf16.mxu1 %v18651_v27  ;;  %v18735_v36 = vld [vmem:[%s20431_s3 + $0x22cc] ss:$16 sps:$4 sm:$0xff]   ;;  %v18730_v27 = vld [vmem:[%s20431_s3 + $0x22c0] ss:$16 sps:$4 sm:$0xff]  }
 0x521   : > { %12270 = vmatpush1.bf16.msra.mxu0 %v18646_v37  ;;  %13418 = vmatpush1.bf16.msra.mxu1 %v18649_v25  ;;  %v18733_v37 = vld [vmem:[%s20431_s3 + $0x22c8] ss:$16 sps:$4 sm:$0xff]   ;;  %v18738_v25 = vld [vmem:[%s20431_s3 + $0x22e4] ss:$16 sps:$4 sm:$0xff]  }
 0x522   : > { %12271 = vmatprep.subr.bf16.mxu0 %v18654_v39  ;;  %13419 = vmatprep.subr.bf16.mxu1 %v18657_v22  ;;  %v18741_v39 = vld [vmem:[%s20431_s3 + $0x22ec] ss:$16 sps:$4 sm:$0xff]   ;;  %v18736_v22 = vld [vmem:[%s20431_s3 + $0x22e0] ss:$16 sps:$4 sm:$0xff]  }
 0x525   : > { %12272 = vmatpush1.bf16.msra.mxu0 %v18652_v29  ;;  %13420 = vmatpush1.bf16.msra.mxu1 %v18655_v42  ;;  %v18739_v29 = vld [vmem:[%s20431_s3 + $0x22e8] ss:$16 sps:$4 sm:$0xff]   ;;  %v18744_v42 = vld [vmem:[%s20431_s3 + $0x2304] ss:$16 sps:$4 sm:$0xff]  }
 0x526   : > { %12273 = vmatprep.subr.bf16.mxu0 %v18660_v45  ;;  %13421 = vmatprep.subr.bf16.mxu1 %v18663_v26  ;;  %v18747_v45 = vld [vmem:[%s20431_s3 + $0x230c] ss:$16 sps:$4 sm:$0xff]   ;;  %v18742_v26 = vld [vmem:[%s20431_s3 + $0x2300] ss:$16 sps:$4 sm:$0xff]  }
 0x529   : > { %12274 = vmatpush1.bf16.msra.mxu0 %v18658_v47  ;;  %13422 = vmatpush1.bf16.msra.mxu1 %v18661_v49  ;;  %v18745_v47 = vld [vmem:[%s20431_s3 + $0x2308] ss:$16 sps:$4 sm:$0xff]   ;;  %v18750_v49 = vld [vmem:[%s20431_s3 + $0x2324] ss:$16 sps:$4 sm:$0xff]  }
 0x52a   : > { %12275 = vmatprep.subr.bf16.mxu0 %v18666_v30  ;;  %13423 = vmatprep.subr.bf16.mxu1 %v18669_v51  ;;  %v18753_v30 = vld [vmem:[%s20431_s3 + $0x232c] ss:$16 sps:$4 sm:$0xff]   ;;  %v18748_v51 = vld [vmem:[%s20431_s3 + $0x2320] ss:$16 sps:$4 sm:$0xff]  }
 0x52d   : > { %12276 = vmatpush1.bf16.msra.mxu0 %v18664_v52  ;;  %13424 = vmatpush1.bf16.msra.mxu1 %v18667_v33  ;;  %v18751_v52 = vld [vmem:[%s20431_s3 + $0x2328] ss:$16 sps:$4 sm:$0xff]   ;;  %v18756_v33 = vld [vmem:[%s20431_s3 + $0x2344] ss:$16 sps:$4 sm:$0xff]  }
 0x52e   : > { %12277 = vmatprep.subr.bf16.mxu0 %v18672_v53  ;;  %13425 = vmatprep.subr.bf16.mxu1 %v18675_v40  ;;  %v18759_v53 = vld [vmem:[%s20431_s3 + $0x234c] ss:$16 sps:$4 sm:$0xff]   ;;  %v18754_v40 = vld [vmem:[%s20431_s3 + $0x2340] ss:$16 sps:$4 sm:$0xff]  }
 0x531   : > { %12278 = vmatpush1.bf16.msra.mxu0 %v18670_v55  ;;  %13426 = vmatpush1.bf16.msra.mxu1 %v18673_v38  ;;  %v18757_v55 = vld [vmem:[%s20431_s3 + $0x2348] ss:$16 sps:$4 sm:$0xff]   ;;  %v18762_v38 = vld [vmem:[%s20431_s3 + $0x2364] ss:$16 sps:$4 sm:$0xff]  }
 0x532   : > { %12279 = vmatprep.subr.bf16.mxu0 %v18678_v43  ;;  %13427 = vmatprep.subr.bf16.mxu1 %v18681_v58  ;;  %v18765_v43 = vld [vmem:[%s20431_s3 + $0x236c] ss:$16 sps:$4 sm:$0xff]   ;;  %v18760_v58 = vld [vmem:[%s20431_s3 + $0x2360] ss:$16 sps:$4 sm:$0xff]  }
 0x535   : > { %12280 = vmatpush1.bf16.msra.mxu0 %v18676_v41  ;;  %13428 = vmatpush1.bf16.msra.mxu1 %v18679_v61  ;;  %v18763_v41 = vld [vmem:[%s20431_s3 + $0x2368] ss:$16 sps:$4 sm:$0xff]   ;;  %v18768_v61 = vld [vmem:[%s20431_s3 + $0x2384] ss:$16 sps:$4 sm:$0xff]  }
 0x536   : > { %12281 = vmatprep.subr.bf16.mxu0 %v18684_v62  ;;  %13429 = vmatprep.subr.bf16.mxu1 %v18687_v0  ;;  %v18771_v62 = vld [vmem:[%s20431_s3 + $0x238c] ss:$16 sps:$4 sm:$0xff]   ;;  %v18766_v0 = vld [vmem:[%s20431_s3 + $0x2380] ss:$16 sps:$4 sm:$0xff]  }
 0x539   : > { %12282 = vmatpush1.bf16.msra.mxu0 %v18682_v1  ;;  %13430 = vmatpush1.bf16.msra.mxu1 %v18685_v2  ;;  %v18774_v1 = vld [vmem:[%s20431_s3 + $0x23a4] ss:$16 sps:$4 sm:$0xff]   ;;  %v18777_v2 = vld [vmem:[%s20431_s3 + $0x23ac] ss:$16 sps:$4 sm:$0xff]  }
 0x53a   : > { %12283 = vmatprep.subr.bf16.mxu0 %v18690_v48  ;;  %13431 = vmatprep.subr.bf16.mxu1 %v18693_v3  ;;  %v18772_v48 = vld [vmem:[%s20431_s3 + $0x23a0] ss:$16 sps:$4 sm:$0xff]   ;;  %v18775_v3 = vld [vmem:[%s20431_s3 + $0x23a8] ss:$16 sps:$4 sm:$0xff]  }
 0x53d   : > { %12284 = vmatpush1.bf16.msra.mxu0 %v18688_v56  ;;  %13432 = vmatpush1.bf16.msra.mxu1 %v18691_v5  ;;  %v18780_v56 = vld [vmem:[%s20431_s3 + $0x23c4] ss:$16 sps:$4 sm:$0xff]   ;;  %v18783_v5 = vld [vmem:[%s20431_s3 + $0x23cc] ss:$16 sps:$4 sm:$0xff]  }
 0x53e   : > { %12294 = vmatprep.subr.bf16.mxu0 %v18696_v6  ;;  %13442 = vmatprep.subr.bf16.mxu1 %v18699_v54  ;;  %v21774_v6 = vld [vmem:[%s20424_s12 + $0x48] sm:$0xff]  ;;  %v18778_v54 = vld [vmem:[%s20431_s3 + $0x23c0] ss:$16 sps:$4 sm:$0xff]  }
 0x540   : > { %12286 = vmatmul.mubr.bf16.vlgmr.msra.gmra.mrb[0].mxu0 %v821_v8  ;;  %13434 = vmatmul.mubr.bf16.vlgmr.msra.gmra.mrb[0].mxu1 %v821_v8  ;;  %v18786_v8 = vld [vmem:[%s20431_s3 + $0x23e4] ss:$16 sps:$4 sm:$0xff]  }
 0x541   : > { %12295 = vmatpush1.bf16.msra.mxu0 %v18694_v57  ;;  %13443 = vmatpush1.bf16.msra.mxu1 %v18697_v11  ;;  %v18789_v57 = vld [vmem:[%s20431_s3 + $0x23ec] ss:$16 sps:$4 sm:$0xff]   ;;  %v21782_v11 = vrot.slane %v21774_v6, %v20502_v50 }
 0x542   : > { %12296 = vmatprep.subr.bf16.mxu0 %v18702_v12  ;;  %13444 = vmatprep.subr.bf16.mxu1 %v18705_v13  ;;  %v18784_v12 = vld [vmem:[%s20431_s3 + $0x23e0] ss:$16 sps:$4 sm:$0xff]   ;;  %v18787_v13 = vld [vmem:[%s20431_s3 + $0x23e8] ss:$16 sps:$4 sm:$0xff]  }
 0x543   : > { %12326 = vmatprep.mubr.bf16.mxu0 %v824_v15  ;;  %13474 = vmatprep.mubr.bf16.mxu1 %v824_v15  ;;  %v18793_v15 = vld [vmem:[%s20431_s3 + $0x2404] ss:$16 sps:$4 sm:$0xff]  }
 0x545   : > { %12297 = vmatpush1.bf16.msra.mxu0 %v18700_v60  ;;  %13445 = vmatpush1.bf16.msra.mxu1 %v18703_v16  ;;  %v18796_v60 = vld [vmem:[%s20431_s3 + $0x240c] ss:$16 sps:$4 sm:$0xff]   ;;  %v663_v16 = vcombine.high %v21782_v11, %v21782_v11 }
 0x546   : > { %12298 = vmatprep.subr.bf16.mxu0 %v18708_v17  ;;  %13446 = vmatprep.subr.bf16.mxu1 %v18711_v63  ;;  %v823_v17 = vpack.c.bf16 %v21707_v4, %v21707_v4  ;;  %v18791_v63 = vld [vmem:[%s20431_s3 + $0x2400] ss:$16 sps:$4 sm:$0xff]  }
 0x547   : > { %v18797_v4 = vld [vmem:[%s20431_s3 + $0x2420] ss:$16 sps:$4 sm:$0xff]  }
 0x549   : > { %12299 = vmatpush1.bf16.msra.mxu0 %v18706_v18  ;;  %13447 = vmatpush1.bf16.msra.mxu1 %v18709_v19  ;;  %v18794_v18 = vld [vmem:[%s20431_s3 + $0x2408] ss:$16 sps:$4 sm:$0xff]   ;;  %v18799_v19 = vld [vmem:[%s20431_s3 + $0x2424] ss:$16 sps:$4 sm:$0xff]  }
 0x54a   : > { %12300 = vmatprep.subr.bf16.mxu0 %v18714_v20  ;;  %13448 = vmatprep.subr.bf16.mxu1 %v18717_v21  ;;  %v18802_v20 = vld [vmem:[%s20431_s3 + $0x242c] ss:$16 sps:$4 sm:$0xff]   ;;  %v826_v21 = vpack.c.bf16 %v663_v16, %v663_v16  ;;  %v18875_v16 = vld [vmem:[%s20431_s3 + $0x25c0] ss:$16 sps:$4 sm:$0xff]  }
 0x54d   : > { %12301 = vmatpush1.bf16.msra.mxu0 %v18712_v9  ;;  %13449 = vmatpush1.bf16.msra.mxu1 %v18715_v23  ;;  %v18800_v9 = vld [vmem:[%s20431_s3 + $0x2428] ss:$16 sps:$4 sm:$0xff]   ;;  %v18805_v23 = vld [vmem:[%s20431_s3 + $0x2444] ss:$16 sps:$4 sm:$0xff]  }
 0x54e   : > { %12302 = vmatprep.subr.bf16.mxu0 %v18720_v7  ;;  %13450 = vmatprep.subr.bf16.mxu1 %v18723_v24  ;;  %v18808_v7 = vld [vmem:[%s20431_s3 + $0x244c] ss:$16 sps:$4 sm:$0xff]   ;;  %v18803_v24 = vld [vmem:[%s20431_s3 + $0x2440] ss:$16 sps:$4 sm:$0xff]  }
 0x551   : > { %12303 = vmatpush1.bf16.msra.mxu0 %v18718_v10  ;;  %13451 = vmatpush1.bf16.msra.mxu1 %v18721_v28  ;;  %v18806_v10 = vld [vmem:[%s20431_s3 + $0x2448] ss:$16 sps:$4 sm:$0xff]   ;;  %v18811_v28 = vld [vmem:[%s20431_s3 + $0x2464] ss:$16 sps:$4 sm:$0xff]  }
 0x552   : > { %12304 = vmatprep.subr.bf16.mxu0 %v18726_v31  ;;  %13452 = vmatprep.subr.bf16.mxu1 %v18729_v32  ;;  %v18814_v31 = vld [vmem:[%s20431_s3 + $0x246c] ss:$16 sps:$4 sm:$0xff]   ;;  %v18809_v32 = vld [vmem:[%s20431_s3 + $0x2460] ss:$16 sps:$4 sm:$0xff]  }
 0x555   : > { %12305 = vmatpush1.bf16.msra.mxu0 %v18724_v34  ;;  %13453 = vmatpush1.bf16.msra.mxu1 %v18727_v14  ;;  %v18812_v34 = vld [vmem:[%s20431_s3 + $0x2468] ss:$16 sps:$4 sm:$0xff]   ;;  %v18817_v14 = vld [vmem:[%s20431_s3 + $0x2484] ss:$16 sps:$4 sm:$0xff]  }
 0x556   : > { %12306 = vmatprep.subr.bf16.mxu0 %v18732_v35  ;;  %13454 = vmatprep.subr.bf16.mxu1 %v18735_v36  ;;  %v18820_v35 = vld [vmem:[%s20431_s3 + $0x248c] ss:$16 sps:$4 sm:$0xff]   ;;  %v18815_v36 = vld [vmem:[%s20431_s3 + $0x2480] ss:$16 sps:$4 sm:$0xff]  }
 0x559   : > { %12307 = vmatpush1.bf16.msra.mxu0 %v18730_v27  ;;  %13455 = vmatpush1.bf16.msra.mxu1 %v18733_v37  ;;  %v18818_v27 = vld [vmem:[%s20431_s3 + $0x2488] ss:$16 sps:$4 sm:$0xff]   ;;  %v18823_v37 = vld [vmem:[%s20431_s3 + $0x24a4] ss:$16 sps:$4 sm:$0xff]  }
 0x55a   : > { %12308 = vmatprep.subr.bf16.mxu0 %v18738_v25  ;;  %13456 = vmatprep.subr.bf16.mxu1 %v18741_v39  ;;  %v18826_v25 = vld [vmem:[%s20431_s3 + $0x24ac] ss:$16 sps:$4 sm:$0xff]   ;;  %v18821_v39 = vld [vmem:[%s20431_s3 + $0x24a0] ss:$16 sps:$4 sm:$0xff]  }
 0x55d   : > { %12309 = vmatpush1.bf16.msra.mxu0 %v18736_v22  ;;  %13457 = vmatpush1.bf16.msra.mxu1 %v18739_v29  ;;  %v18824_v22 = vld [vmem:[%s20431_s3 + $0x24a8] ss:$16 sps:$4 sm:$0xff]   ;;  %v18829_v29 = vld [vmem:[%s20431_s3 + $0x24c4] ss:$16 sps:$4 sm:$0xff]  }
 0x55e   : > { %12310 = vmatprep.subr.bf16.mxu0 %v18744_v42  ;;  %13458 = vmatprep.subr.bf16.mxu1 %v18747_v45  ;;  %v18832_v42 = vld [vmem:[%s20431_s3 + $0x24cc] ss:$16 sps:$4 sm:$0xff]   ;;  %v18827_v45 = vld [vmem:[%s20431_s3 + $0x24c0] ss:$16 sps:$4 sm:$0xff]  }
 0x561   : > { %12311 = vmatpush1.bf16.msra.mxu0 %v18742_v26  ;;  %13459 = vmatpush1.bf16.msra.mxu1 %v18745_v47  ;;  %v18830_v26 = vld [vmem:[%s20431_s3 + $0x24c8] ss:$16 sps:$4 sm:$0xff]   ;;  %v18835_v47 = vld [vmem:[%s20431_s3 + $0x24e4] ss:$16 sps:$4 sm:$0xff]  }
 0x562   : > { %12312 = vmatprep.subr.bf16.mxu0 %v18750_v49  ;;  %13460 = vmatprep.subr.bf16.mxu1 %v18753_v30  ;;  %v18838_v49 = vld [vmem:[%s20431_s3 + $0x24ec] ss:$16 sps:$4 sm:$0xff]   ;;  %v18833_v30 = vld [vmem:[%s20431_s3 + $0x24e0] ss:$16 sps:$4 sm:$0xff]  }
 0x565   : > { %12313 = vmatpush1.bf16.msra.mxu0 %v18748_v51  ;;  %13461 = vmatpush1.bf16.msra.mxu1 %v18751_v52  ;;  %v18836_v51 = vld [vmem:[%s20431_s3 + $0x24e8] ss:$16 sps:$4 sm:$0xff]   ;;  %v18841_v52 = vld [vmem:[%s20431_s3 + $0x2504] ss:$16 sps:$4 sm:$0xff]  }
 0x566   : > { %12314 = vmatprep.subr.bf16.mxu0 %v18756_v33  ;;  %13462 = vmatprep.subr.bf16.mxu1 %v18759_v53  ;;  %v18844_v33 = vld [vmem:[%s20431_s3 + $0x250c] ss:$16 sps:$4 sm:$0xff]   ;;  %v18839_v53 = vld [vmem:[%s20431_s3 + $0x2500] ss:$16 sps:$4 sm:$0xff]  }
 0x569   : > { %12315 = vmatpush1.bf16.msra.mxu0 %v18754_v40  ;;  %13463 = vmatpush1.bf16.msra.mxu1 %v18757_v55  ;;  %v18842_v40 = vld [vmem:[%s20431_s3 + $0x2508] ss:$16 sps:$4 sm:$0xff]   ;;  %v18847_v55 = vld [vmem:[%s20431_s3 + $0x2524] ss:$16 sps:$4 sm:$0xff]  }
 0x56a   : > { %12316 = vmatprep.subr.bf16.mxu0 %v18762_v38  ;;  %13464 = vmatprep.subr.bf16.mxu1 %v18765_v43  ;;  %v18850_v38 = vld [vmem:[%s20431_s3 + $0x252c] ss:$16 sps:$4 sm:$0xff]   ;;  %v18845_v43 = vld [vmem:[%s20431_s3 + $0x2520] ss:$16 sps:$4 sm:$0xff]  }
 0x56d   : > { %12317 = vmatpush1.bf16.msra.mxu0 %v18760_v58  ;;  %13465 = vmatpush1.bf16.msra.mxu1 %v18763_v41  ;;  %v18848_v58 = vld [vmem:[%s20431_s3 + $0x2528] ss:$16 sps:$4 sm:$0xff]   ;;  %v18853_v41 = vld [vmem:[%s20431_s3 + $0x2544] ss:$16 sps:$4 sm:$0xff]  }
 0x56e   : > { %12318 = vmatprep.subr.bf16.mxu0 %v18768_v61  ;;  %13466 = vmatprep.subr.bf16.mxu1 %v18771_v62  ;;  %v18856_v61 = vld [vmem:[%s20431_s3 + $0x254c] ss:$16 sps:$4 sm:$0xff]   ;;  %v18851_v62 = vld [vmem:[%s20431_s3 + $0x2540] ss:$16 sps:$4 sm:$0xff]  }
 0x571   : > { %12319 = vmatpush1.bf16.msra.mxu0 %v18766_v0  ;;  %13467 = vmatpush1.bf16.msra.mxu1 %v18769_v46  ;;  %v18854_v0 = vld [vmem:[%s20431_s3 + $0x2548] ss:$16 sps:$4 sm:$0xff]   ;;  %v18859_v46 = vld [vmem:[%s20431_s3 + $0x2564] ss:$16 sps:$4 sm:$0xff]  }
 0x572   : > { %12320 = vmatprep.subr.bf16.mxu0 %v18774_v1  ;;  %13468 = vmatprep.subr.bf16.mxu1 %v18777_v2  ;;  %v18862_v1 = vld [vmem:[%s20431_s3 + $0x256c] ss:$16 sps:$4 sm:$0xff]   ;;  %v18857_v2 = vld [vmem:[%s20431_s3 + $0x2560] ss:$16 sps:$4 sm:$0xff]  }
 0x575   : > { %12321 = vmatpush1.bf16.msra.mxu0 %v18772_v48  ;;  %13469 = vmatpush1.bf16.msra.mxu1 %v18775_v3  ;;  %v18860_v48 = vld [vmem:[%s20431_s3 + $0x2568] ss:$16 sps:$4 sm:$0xff]   ;;  %v18865_v3 = vld [vmem:[%s20431_s3 + $0x2584] ss:$16 sps:$4 sm:$0xff]  }
 0x576   : > { %12322 = vmatprep.subr.bf16.mxu0 %v18780_v56  ;;  %13470 = vmatprep.subr.bf16.mxu1 %v18783_v5  ;;  %v18868_v56 = vld [vmem:[%s20431_s3 + $0x258c] ss:$16 sps:$4 sm:$0xff]   ;;  %v18863_v5 = vld [vmem:[%s20431_s3 + $0x2580] ss:$16 sps:$4 sm:$0xff]  }
 0x579   : > { %12323 = vmatpush1.bf16.msra.mxu0 %v18778_v54  ;;  %13471 = vmatpush1.bf16.msra.mxu1 %v18781_v59  ;;  %v18866_v54 = vld [vmem:[%s20431_s3 + $0x2588] ss:$16 sps:$4 sm:$0xff]   ;;  %v18871_v59 = vld [vmem:[%s20431_s3 + $0x25a4] ss:$16 sps:$4 sm:$0xff]  }
 0x57a   : > { %12324 = vmatprep.subr.bf16.mxu0 %v18786_v8  ;;  %13472 = vmatprep.subr.bf16.mxu1 %v18789_v57  ;;  %v18874_v8 = vld [vmem:[%s20431_s3 + $0x25ac] ss:$16 sps:$4 sm:$0xff]   ;;  %v18869_v57 = vld [vmem:[%s20431_s3 + $0x25a0] ss:$16 sps:$4 sm:$0xff]  }
 0x57d   : > { %12325 = vmatpush1.bf16.msra.mxu0 %v18784_v12  ;;  %13473 = vmatpush1.bf16.msra.mxu1 %v18787_v13  ;;  %v18872_v12 = vld [vmem:[%s20431_s3 + $0x25a8] ss:$16 sps:$4 sm:$0xff]   ;;  %v18877_v13 = vld [vmem:[%s20431_s3 + $0x25c4] ss:$16 sps:$4 sm:$0xff]  }
 0x57e   : > { %12335 = vmatprep.subr.bf16.mxu0 %v18793_v15  ;;  %13483 = vmatprep.subr.bf16.mxu1 %v18796_v60  ;;  %v18880_v15 = vld [vmem:[%s20431_s3 + $0x25cc] ss:$16 sps:$4 sm:$0xff]   ;;  %v648_v60 = vcombine.high %v21774_v6, %v21774_v6  ;;  %v18881_v6 = vld [vmem:[%s20431_s3 + $0x25e0] ss:$16 sps:$4 sm:$0xff]  }
 0x580   : > { %12327 = vmatmul.mubr.bf16.vlgmr.msra.gmra.mrb[0].mxu0 %v823_v17  ;;  %13475 = vmatmul.mubr.bf16.vlgmr.msra.gmra.mrb[0].mxu1 %v823_v17  ;;  %v18878_v17 = vld [vmem:[%s20431_s3 + $0x25c8] ss:$16 sps:$4 sm:$0xff]  }
 0x581   : > { %12336 = vmatpush1.bf16.msra.mxu0 %v18791_v63  ;;  %13484 = vmatpush1.bf16.msra.mxu1 %v18794_v18  ;;  %v18883_v63 = vld [vmem:[%s20431_s3 + $0x25e4] ss:$16 sps:$4 sm:$0xff]   ;;  %v18886_v18 = vld [vmem:[%s20431_s3 + $0x25ec] ss:$16 sps:$4 sm:$0xff]  }
 0x582   : > { %12337 = vmatprep.subr.bf16.mxu0 %v18799_v19  ;;  %13485 = vmatprep.subr.bf16.mxu1 %v18802_v20  ;;  %v21855_v19 = vrot.slane %v648_v60, %v20502_v50  ;;  %v18884_v20 = vld [vmem:[%s20431_s3 + $0x25e8] ss:$16 sps:$4 sm:$0xff]  }
 0x583   : > { %12367 = vmatprep.mubr.bf16.mxu0 %v826_v21  ;;  %13515 = vmatprep.mubr.bf16.mxu1 %v826_v21  ;;  %v18889_v21 = vld [vmem:[%s20431_s3 + $0x2604] ss:$16 sps:$4 sm:$0xff]   ;;  %v18962_v60 = vld [vmem:[%s20431_s3 + $0x2788] ss:$16 sps:$4 sm:$0xff]  }
 0x585   : > { %12338 = vmatpush1.bf16.msra.mxu0 %v18797_v4  ;;  %13486 = vmatpush1.bf16.msra.mxu1 %v18800_v9  ;;  %v18892_v4 = vld [vmem:[%s20431_s3 + $0x260c] ss:$16 sps:$4 sm:$0xff]   ;;  %v664_v9 = vcombine.high %v21855_v19, %v21855_v19 }
 0x586   : > { %12339 = vmatprep.subr.bf16.mxu0 %v18805_v23  ;;  %13487 = vmatprep.subr.bf16.mxu1 %v18808_v7  ;;  %v825_v23 = vpack.c.bf16 %v21782_v11, %v21782_v11  ;;  %v18887_v7 = vld [vmem:[%s20431_s3 + $0x2600] ss:$16 sps:$4 sm:$0xff]  }
 0x587   : > { %v18893_v11 = vld [vmem:[%s20431_s3 + $0x2620] ss:$16 sps:$4 sm:$0xff]  }
 0x589   : > { %12340 = vmatpush1.bf16.msra.mxu0 %v18803_v24  ;;  %13488 = vmatpush1.bf16.msra.mxu1 %v18806_v10  ;;  %v18890_v24 = vld [vmem:[%s20431_s3 + $0x2608] ss:$16 sps:$4 sm:$0xff]   ;;  %v18895_v10 = vld [vmem:[%s20431_s3 + $0x2624] ss:$16 sps:$4 sm:$0xff]  }
 0x58a   : > { %12341 = vmatprep.subr.bf16.mxu0 %v18811_v28  ;;  %13489 = vmatprep.subr.bf16.mxu1 %v18814_v31  ;;  %v18898_v28 = vld [vmem:[%s20431_s3 + $0x262c] ss:$16 sps:$4 sm:$0xff]   ;;  %v828_v31 = vpack.c.bf16 %v664_v9, %v664_v9  ;;  %v18974_v9 = vld [vmem:[%s20431_s3 + $0x27c8] ss:$16 sps:$4 sm:$0xff]  }
 0x58d   : > { %12342 = vmatpush1.bf16.msra.mxu0 %v18809_v32  ;;  %13490 = vmatpush1.bf16.msra.mxu1 %v18812_v34  ;;  %v18896_v32 = vld [vmem:[%s20431_s3 + $0x2628] ss:$16 sps:$4 sm:$0xff]   ;;  %v18901_v34 = vld [vmem:[%s20431_s3 + $0x2644] ss:$16 sps:$4 sm:$0xff]  }
 0x58e   : > { %12343 = vmatprep.subr.bf16.mxu0 %v18817_v14  ;;  %13491 = vmatprep.subr.bf16.mxu1 %v18820_v35  ;;  %v18904_v14 = vld [vmem:[%s20431_s3 + $0x264c] ss:$16 sps:$4 sm:$0xff]   ;;  %v18899_v35 = vld [vmem:[%s20431_s3 + $0x2640] ss:$16 sps:$4 sm:$0xff]  }
 0x591   : > { %12344 = vmatpush1.bf16.msra.mxu0 %v18815_v36  ;;  %13492 = vmatpush1.bf16.msra.mxu1 %v18818_v27  ;;  %v18902_v36 = vld [vmem:[%s20431_s3 + $0x2648] ss:$16 sps:$4 sm:$0xff]   ;;  %v18907_v27 = vld [vmem:[%s20431_s3 + $0x2664] ss:$16 sps:$4 sm:$0xff]  }
 0x592   : > { %12345 = vmatprep.subr.bf16.mxu0 %v18823_v37  ;;  %13493 = vmatprep.subr.bf16.mxu1 %v18826_v25  ;;  %v18910_v37 = vld [vmem:[%s20431_s3 + $0x266c] ss:$16 sps:$4 sm:$0xff]   ;;  %v18905_v25 = vld [vmem:[%s20431_s3 + $0x2660] ss:$16 sps:$4 sm:$0xff]  }
 0x595   : > { %12346 = vmatpush1.bf16.msra.mxu0 %v18821_v39  ;;  %13494 = vmatpush1.bf16.msra.mxu1 %v18824_v22  ;;  %v18908_v39 = vld [vmem:[%s20431_s3 + $0x2668] ss:$16 sps:$4 sm:$0xff]   ;;  %v18913_v22 = vld [vmem:[%s20431_s3 + $0x2684] ss:$16 sps:$4 sm:$0xff]  }
 0x596   : > { %12347 = vmatprep.subr.bf16.mxu0 %v18829_v29  ;;  %13495 = vmatprep.subr.bf16.mxu1 %v18832_v42  ;;  %v18916_v29 = vld [vmem:[%s20431_s3 + $0x268c] ss:$16 sps:$4 sm:$0xff]   ;;  %v18911_v42 = vld [vmem:[%s20431_s3 + $0x2680] ss:$16 sps:$4 sm:$0xff]  }
 0x599   : > { %12348 = vmatpush1.bf16.msra.mxu0 %v18827_v45  ;;  %13496 = vmatpush1.bf16.msra.mxu1 %v18830_v26  ;;  %v18914_v45 = vld [vmem:[%s20431_s3 + $0x2688] ss:$16 sps:$4 sm:$0xff]   ;;  %v18919_v26 = vld [vmem:[%s20431_s3 + $0x26a4] ss:$16 sps:$4 sm:$0xff]  }
 0x59a   : > { %12349 = vmatprep.subr.bf16.mxu0 %v18835_v47  ;;  %13497 = vmatprep.subr.bf16.mxu1 %v18838_v49  ;;  %v18922_v47 = vld [vmem:[%s20431_s3 + $0x26ac] ss:$16 sps:$4 sm:$0xff]   ;;  %v18917_v49 = vld [vmem:[%s20431_s3 + $0x26a0] ss:$16 sps:$4 sm:$0xff]  }
 0x59d   : > { %12350 = vmatpush1.bf16.msra.mxu0 %v18833_v30  ;;  %13498 = vmatpush1.bf16.msra.mxu1 %v18836_v51  ;;  %v18920_v30 = vld [vmem:[%s20431_s3 + $0x26a8] ss:$16 sps:$4 sm:$0xff]   ;;  %v18925_v51 = vld [vmem:[%s20431_s3 + $0x26c4] ss:$16 sps:$4 sm:$0xff]  }
 0x59e   : > { %12351 = vmatprep.subr.bf16.mxu0 %v18841_v52  ;;  %13499 = vmatprep.subr.bf16.mxu1 %v18844_v33  ;;  %v18928_v52 = vld [vmem:[%s20431_s3 + $0x26cc] ss:$16 sps:$4 sm:$0xff]   ;;  %v18923_v33 = vld [vmem:[%s20431_s3 + $0x26c0] ss:$16 sps:$4 sm:$0xff]  }
 0x5a1   : > { %12352 = vmatpush1.bf16.msra.mxu0 %v18839_v53  ;;  %13500 = vmatpush1.bf16.msra.mxu1 %v18842_v40  ;;  %v18926_v53 = vld [vmem:[%s20431_s3 + $0x26c8] ss:$16 sps:$4 sm:$0xff]   ;;  %v18931_v40 = vld [vmem:[%s20431_s3 + $0x26e4] ss:$16 sps:$4 sm:$0xff]  }
 0x5a2   : > { %12353 = vmatprep.subr.bf16.mxu0 %v18847_v55  ;;  %13501 = vmatprep.subr.bf16.mxu1 %v18850_v38  ;;  %v18934_v55 = vld [vmem:[%s20431_s3 + $0x26ec] ss:$16 sps:$4 sm:$0xff]   ;;  %v18929_v38 = vld [vmem:[%s20431_s3 + $0x26e0] ss:$16 sps:$4 sm:$0xff]  }
 0x5a5   : > { %12354 = vmatpush1.bf16.msra.mxu0 %v18845_v43  ;;  %13502 = vmatpush1.bf16.msra.mxu1 %v18848_v58  ;;  %v18932_v43 = vld [vmem:[%s20431_s3 + $0x26e8] ss:$16 sps:$4 sm:$0xff]   ;;  %v18937_v58 = vld [vmem:[%s20431_s3 + $0x2704] ss:$16 sps:$4 sm:$0xff]  }
 0x5a6   : > { %12355 = vmatprep.subr.bf16.mxu0 %v18853_v41  ;;  %13503 = vmatprep.subr.bf16.mxu1 %v18856_v61  ;;  %v18940_v41 = vld [vmem:[%s20431_s3 + $0x270c] ss:$16 sps:$4 sm:$0xff]   ;;  %v18935_v61 = vld [vmem:[%s20431_s3 + $0x2700] ss:$16 sps:$4 sm:$0xff]  }
 0x5a9   : > { %12356 = vmatpush1.bf16.msra.mxu0 %v18851_v62  ;;  %13504 = vmatpush1.bf16.msra.mxu1 %v18854_v0  ;;  %v18938_v62 = vld [vmem:[%s20431_s3 + $0x2708] ss:$16 sps:$4 sm:$0xff]   ;;  %v18943_v0 = vld [vmem:[%s20431_s3 + $0x2724] ss:$16 sps:$4 sm:$0xff]  }
 0x5aa   : > { %12357 = vmatprep.subr.bf16.mxu0 %v18859_v46  ;;  %13505 = vmatprep.subr.bf16.mxu1 %v18862_v1  ;;  %v18946_v46 = vld [vmem:[%s20431_s3 + $0x272c] ss:$16 sps:$4 sm:$0xff]   ;;  %v18941_v1 = vld [vmem:[%s20431_s3 + $0x2720] ss:$16 sps:$4 sm:$0xff]  }
 0x5ad   : > { %12358 = vmatpush1.bf16.msra.mxu0 %v18857_v2  ;;  %13506 = vmatpush1.bf16.msra.mxu1 %v18860_v48  ;;  %v18944_v2 = vld [vmem:[%s20431_s3 + $0x2728] ss:$16 sps:$4 sm:$0xff]   ;;  %v18949_v48 = vld [vmem:[%s20431_s3 + $0x2744] ss:$16 sps:$4 sm:$0xff]  }
 0x5ae   : > { %12359 = vmatprep.subr.bf16.mxu0 %v18865_v3  ;;  %13507 = vmatprep.subr.bf16.mxu1 %v18868_v56  ;;  %v18952_v3 = vld [vmem:[%s20431_s3 + $0x274c] ss:$16 sps:$4 sm:$0xff]   ;;  %v18947_v56 = vld [vmem:[%s20431_s3 + $0x2740] ss:$16 sps:$4 sm:$0xff]  }
 0x5b1   : > { %12360 = vmatpush1.bf16.msra.mxu0 %v18863_v5  ;;  %13508 = vmatpush1.bf16.msra.mxu1 %v18866_v54  ;;  %v18950_v5 = vld [vmem:[%s20431_s3 + $0x2748] ss:$16 sps:$4 sm:$0xff]   ;;  %v18955_v54 = vld [vmem:[%s20431_s3 + $0x2764] ss:$16 sps:$4 sm:$0xff]  }
 0x5b2   : > { %12361 = vmatprep.subr.bf16.mxu0 %v18871_v59  ;;  %13509 = vmatprep.subr.bf16.mxu1 %v18874_v8  ;;  %v18958_v59 = vld [vmem:[%s20431_s3 + $0x276c] ss:$16 sps:$4 sm:$0xff]   ;;  %v18953_v8 = vld [vmem:[%s20431_s3 + $0x2760] ss:$16 sps:$4 sm:$0xff]  }
 0x5b5   : > { %12362 = vmatpush1.bf16.msra.mxu0 %v18869_v57  ;;  %13510 = vmatpush1.bf16.msra.mxu1 %v18872_v12  ;;  %v18956_v57 = vld [vmem:[%s20431_s3 + $0x2768] ss:$16 sps:$4 sm:$0xff]   ;;  %v18961_v12 = vld [vmem:[%s20431_s3 + $0x2784] ss:$16 sps:$4 sm:$0xff]  }
 0x5b6   : > { %12363 = vmatprep.subr.bf16.mxu0 %v18877_v13  ;;  %13511 = vmatprep.subr.bf16.mxu1 %v18880_v15  ;;  %v18964_v13 = vld [vmem:[%s20431_s3 + $0x278c] ss:$16 sps:$4 sm:$0xff]   ;;  %v18959_v15 = vld [vmem:[%s20431_s3 + $0x2780] ss:$16 sps:$4 sm:$0xff]  }
 0x5b9   : > { %12364 = vmatpush1.bf16.msra.mxu0 %v18875_v16  ;;  %13512 = vmatpush1.bf16.msra.mxu1 %v18878_v17  ;;  %v18967_v16 = vld [vmem:[%s20431_s3 + $0x27a4] ss:$16 sps:$4 sm:$0xff]   ;;  %v18970_v17 = vld [vmem:[%s20431_s3 + $0x27ac] ss:$16 sps:$4 sm:$0xff]  }
 0x5ba   : > { %12365 = vmatprep.subr.bf16.mxu0 %v18883_v63  ;;  %13513 = vmatprep.subr.bf16.mxu1 %v18886_v18  ;;  %v18965_v63 = vld [vmem:[%s20431_s3 + $0x27a0] ss:$16 sps:$4 sm:$0xff]   ;;  %v18968_v18 = vld [vmem:[%s20431_s3 + $0x27a8] ss:$16 sps:$4 sm:$0xff]  }
 0x5bd   : > { %12366 = vmatpush1.bf16.msra.mxu0 %v18881_v6  ;;  %13514 = vmatpush1.bf16.msra.mxu1 %v18884_v20  ;;  %v18973_v6 = vld [vmem:[%s20431_s3 + $0x27c4] ss:$16 sps:$4 sm:$0xff]   ;;  %v18976_v20 = vld [vmem:[%s20431_s3 + $0x27cc] ss:$16 sps:$4 sm:$0xff]  }
 0x5be   : > { %12376 = vmatprep.subr.bf16.mxu0 %v18889_v21  ;;  %13524 = vmatprep.subr.bf16.mxu1 %v18892_v4  ;;  %v21922_v21 = vld [vmem:[%s20424_s12 + $0x50] sm:$0xff] }
 0x5bf   : > { %v18971_v4 = vld [vmem:[%s20431_s3 + $0x27c0] ss:$16 sps:$4 sm:$0xff]  }
 0x5c0   : > { %12368 = vmatmul.mubr.bf16.vlgmr.msra.gmra.mrb[0].mxu0 %v825_v23  ;;  %13516 = vmatmul.mubr.bf16.vlgmr.msra.gmra.mrb[0].mxu1 %v825_v23  ;;  %v18979_v23 = vld [vmem:[%s20431_s3 + $0x27e4] ss:$16 sps:$4 sm:$0xff]  }
 0x5c1   : > { %12377 = vmatpush1.bf16.msra.mxu0 %v18887_v7  ;;  %13525 = vmatpush1.bf16.msra.mxu1 %v18890_v24  ;;  %v18982_v7 = vld [vmem:[%s20431_s3 + $0x27ec] ss:$16 sps:$4 sm:$0xff]   ;;  %v21930_v24 = vrot.slane %v21922_v21, %v20502_v50 }
 0x5c2   : > { %12378 = vmatprep.subr.bf16.mxu0 %v18895_v10  ;;  %13526 = vmatprep.subr.bf16.mxu1 %v18898_v28  ;;  %v18977_v10 = vld [vmem:[%s20431_s3 + $0x27e0] ss:$16 sps:$4 sm:$0xff]   ;;  %v18980_v28 = vld [vmem:[%s20431_s3 + $0x27e8] ss:$16 sps:$4 sm:$0xff]  }
 0x5c3   : > { %12408 = vmatprep.mubr.bf16.mxu0 %v828_v31  ;;  %13556 = vmatprep.mubr.bf16.mxu1 %v828_v31  ;;  %v18986_v31 = vld [vmem:[%s20431_s3 + $0x2804] ss:$16 sps:$4 sm:$0xff]  }
 0x5c5   : > { %12379 = vmatpush1.bf16.msra.mxu0 %v18893_v11  ;;  %13527 = vmatpush1.bf16.msra.mxu1 %v18896_v32  ;;  %v18989_v11 = vld [vmem:[%s20431_s3 + $0x280c] ss:$16 sps:$4 sm:$0xff]   ;;  %v680_v32 = vcombine.high %v21930_v24, %v21930_v24 }
 0x5c6   : > { %12380 = vmatprep.subr.bf16.mxu0 %v18901_v34  ;;  %13528 = vmatprep.subr.bf16.mxu1 %v18904_v14  ;;  %v827_v34 = vpack.c.bf16 %v21855_v19, %v21855_v19  ;;  %v18984_v14 = vld [vmem:[%s20431_s3 + $0x2800] ss:$16 sps:$4 sm:$0xff]  }
 0x5c7   : > { %v18990_v19 = vld [vmem:[%s20431_s3 + $0x2820] ss:$16 sps:$4 sm:$0xff]  }
 0x5c9   : > { %12381 = vmatpush1.bf16.msra.mxu0 %v18899_v35  ;;  %13529 = vmatpush1.bf16.msra.mxu1 %v18902_v36  ;;  %v18987_v35 = vld [vmem:[%s20431_s3 + $0x2808] ss:$16 sps:$4 sm:$0xff]   ;;  %v18992_v36 = vld [vmem:[%s20431_s3 + $0x2824] ss:$16 sps:$4 sm:$0xff]  }
 0x5ca   : > { %12382 = vmatprep.subr.bf16.mxu0 %v18907_v27  ;;  %13530 = vmatprep.subr.bf16.mxu1 %v18910_v37  ;;  %v18995_v27 = vld [vmem:[%s20431_s3 + $0x282c] ss:$16 sps:$4 sm:$0xff]   ;;  %v830_v37 = vpack.c.bf16 %v680_v32, %v680_v32  ;;  %v19068_v32 = vld [vmem:[%s20431_s3 + $0x29c0] ss:$16 sps:$4 sm:$0xff]  }
 0x5cd   : > { %12383 = vmatpush1.bf16.msra.mxu0 %v18905_v25  ;;  %13531 = vmatpush1.bf16.msra.mxu1 %v18908_v39  ;;  %v18993_v25 = vld [vmem:[%s20431_s3 + $0x2828] ss:$16 sps:$4 sm:$0xff]   ;;  %v18998_v39 = vld [vmem:[%s20431_s3 + $0x2844] ss:$16 sps:$4 sm:$0xff]  }
 0x5ce   : > { %12384 = vmatprep.subr.bf16.mxu0 %v18913_v22  ;;  %13532 = vmatprep.subr.bf16.mxu1 %v18916_v29  ;;  %v19001_v22 = vld [vmem:[%s20431_s3 + $0x284c] ss:$16 sps:$4 sm:$0xff]   ;;  %v18996_v29 = vld [vmem:[%s20431_s3 + $0x2840] ss:$16 sps:$4 sm:$0xff]  }
 0x5d1   : > { %12385 = vmatpush1.bf16.msra.mxu0 %v18911_v42  ;;  %13533 = vmatpush1.bf16.msra.mxu1 %v18914_v45  ;;  %v18999_v42 = vld [vmem:[%s20431_s3 + $0x2848] ss:$16 sps:$4 sm:$0xff]   ;;  %v19004_v45 = vld [vmem:[%s20431_s3 + $0x2864] ss:$16 sps:$4 sm:$0xff]  }
 0x5d2   : > { %12386 = vmatprep.subr.bf16.mxu0 %v18919_v26  ;;  %13534 = vmatprep.subr.bf16.mxu1 %v18922_v47  ;;  %v19007_v26 = vld [vmem:[%s20431_s3 + $0x286c] ss:$16 sps:$4 sm:$0xff]   ;;  %v19002_v47 = vld [vmem:[%s20431_s3 + $0x2860] ss:$16 sps:$4 sm:$0xff]  }
 0x5d5   : > { %12387 = vmatpush1.bf16.msra.mxu0 %v18917_v49  ;;  %13535 = vmatpush1.bf16.msra.mxu1 %v18920_v30  ;;  %v19005_v49 = vld [vmem:[%s20431_s3 + $0x2868] ss:$16 sps:$4 sm:$0xff]   ;;  %v19010_v30 = vld [vmem:[%s20431_s3 + $0x2884] ss:$16 sps:$4 sm:$0xff]  }
 0x5d6   : > { %12388 = vmatprep.subr.bf16.mxu0 %v18925_v51  ;;  %13536 = vmatprep.subr.bf16.mxu1 %v18928_v52  ;;  %v19013_v51 = vld [vmem:[%s20431_s3 + $0x288c] ss:$16 sps:$4 sm:$0xff]   ;;  %v19008_v52 = vld [vmem:[%s20431_s3 + $0x2880] ss:$16 sps:$4 sm:$0xff]  }
 0x5d9   : > { %12389 = vmatpush1.bf16.msra.mxu0 %v18923_v33  ;;  %13537 = vmatpush1.bf16.msra.mxu1 %v18926_v53  ;;  %v19011_v33 = vld [vmem:[%s20431_s3 + $0x2888] ss:$16 sps:$4 sm:$0xff]   ;;  %v19016_v53 = vld [vmem:[%s20431_s3 + $0x28a4] ss:$16 sps:$4 sm:$0xff]  }
 0x5da   : > { %12390 = vmatprep.subr.bf16.mxu0 %v18931_v40  ;;  %13538 = vmatprep.subr.bf16.mxu1 %v18934_v55  ;;  %v19019_v40 = vld [vmem:[%s20431_s3 + $0x28ac] ss:$16 sps:$4 sm:$0xff]   ;;  %v19014_v55 = vld [vmem:[%s20431_s3 + $0x28a0] ss:$16 sps:$4 sm:$0xff]  }
 0x5dd   : > { %12391 = vmatpush1.bf16.msra.mxu0 %v18929_v38  ;;  %13539 = vmatpush1.bf16.msra.mxu1 %v18932_v43  ;;  %v19017_v38 = vld [vmem:[%s20431_s3 + $0x28a8] ss:$16 sps:$4 sm:$0xff]   ;;  %v19022_v43 = vld [vmem:[%s20431_s3 + $0x28c4] ss:$16 sps:$4 sm:$0xff]  }
 0x5de   : > { %12392 = vmatprep.subr.bf16.mxu0 %v18937_v58  ;;  %13540 = vmatprep.subr.bf16.mxu1 %v18940_v41  ;;  %v19025_v58 = vld [vmem:[%s20431_s3 + $0x28cc] ss:$16 sps:$4 sm:$0xff]   ;;  %v19020_v41 = vld [vmem:[%s20431_s3 + $0x28c0] ss:$16 sps:$4 sm:$0xff]  }
 0x5e1   : > { %12393 = vmatpush1.bf16.msra.mxu0 %v18935_v61  ;;  %13541 = vmatpush1.bf16.msra.mxu1 %v18938_v62  ;;  %v19023_v61 = vld [vmem:[%s20431_s3 + $0x28c8] ss:$16 sps:$4 sm:$0xff]   ;;  %v19028_v62 = vld [vmem:[%s20431_s3 + $0x28e4] ss:$16 sps:$4 sm:$0xff]  }
 0x5e2   : > { %12394 = vmatprep.subr.bf16.mxu0 %v18943_v0  ;;  %13542 = vmatprep.subr.bf16.mxu1 %v18946_v46  ;;  %v19031_v0 = vld [vmem:[%s20431_s3 + $0x28ec] ss:$16 sps:$4 sm:$0xff]   ;;  %v19026_v46 = vld [vmem:[%s20431_s3 + $0x28e0] ss:$16 sps:$4 sm:$0xff]  }
 0x5e5   : > { %12395 = vmatpush1.bf16.msra.mxu0 %v18941_v1  ;;  %13543 = vmatpush1.bf16.msra.mxu1 %v18944_v2  ;;  %v19029_v1 = vld [vmem:[%s20431_s3 + $0x28e8] ss:$16 sps:$4 sm:$0xff]   ;;  %v19034_v2 = vld [vmem:[%s20431_s3 + $0x2904] ss:$16 sps:$4 sm:$0xff]  }
 0x5e6   : > { %12396 = vmatprep.subr.bf16.mxu0 %v18949_v48  ;;  %13544 = vmatprep.subr.bf16.mxu1 %v18952_v3  ;;  %v19037_v48 = vld [vmem:[%s20431_s3 + $0x290c] ss:$16 sps:$4 sm:$0xff]   ;;  %v19032_v3 = vld [vmem:[%s20431_s3 + $0x2900] ss:$16 sps:$4 sm:$0xff]  }
 0x5e9   : > { %12397 = vmatpush1.bf16.msra.mxu0 %v18947_v56  ;;  %13545 = vmatpush1.bf16.msra.mxu1 %v18950_v5  ;;  %v19035_v56 = vld [vmem:[%s20431_s3 + $0x2908] ss:$16 sps:$4 sm:$0xff]   ;;  %v19040_v5 = vld [vmem:[%s20431_s3 + $0x2924] ss:$16 sps:$4 sm:$0xff]  }
 0x5ea   : > { %12398 = vmatprep.subr.bf16.mxu0 %v18955_v54  ;;  %13546 = vmatprep.subr.bf16.mxu1 %v18958_v59  ;;  %v19043_v54 = vld [vmem:[%s20431_s3 + $0x292c] ss:$16 sps:$4 sm:$0xff]   ;;  %v19038_v59 = vld [vmem:[%s20431_s3 + $0x2920] ss:$16 sps:$4 sm:$0xff]  }
 0x5ed   : > { %12399 = vmatpush1.bf16.msra.mxu0 %v18953_v8  ;;  %13547 = vmatpush1.bf16.msra.mxu1 %v18956_v57  ;;  %v19041_v8 = vld [vmem:[%s20431_s3 + $0x2928] ss:$16 sps:$4 sm:$0xff]   ;;  %v19046_v57 = vld [vmem:[%s20431_s3 + $0x2944] ss:$16 sps:$4 sm:$0xff]  }
 0x5ee   : > { %12400 = vmatprep.subr.bf16.mxu0 %v18961_v12  ;;  %13548 = vmatprep.subr.bf16.mxu1 %v18964_v13  ;;  %v19049_v12 = vld [vmem:[%s20431_s3 + $0x294c] ss:$16 sps:$4 sm:$0xff]   ;;  %v19044_v13 = vld [vmem:[%s20431_s3 + $0x2940] ss:$16 sps:$4 sm:$0xff]  }
 0x5f1   : > { %12401 = vmatpush1.bf16.msra.mxu0 %v18959_v15  ;;  %13549 = vmatpush1.bf16.msra.mxu1 %v18962_v60  ;;  %v19047_v15 = vld [vmem:[%s20431_s3 + $0x2948] ss:$16 sps:$4 sm:$0xff]   ;;  %v19052_v60 = vld [vmem:[%s20431_s3 + $0x2964] ss:$16 sps:$4 sm:$0xff]  }
 0x5f2   : > { %12402 = vmatprep.subr.bf16.mxu0 %v18967_v16  ;;  %13550 = vmatprep.subr.bf16.mxu1 %v18970_v17  ;;  %v19055_v16 = vld [vmem:[%s20431_s3 + $0x296c] ss:$16 sps:$4 sm:$0xff]   ;;  %v19050_v17 = vld [vmem:[%s20431_s3 + $0x2960] ss:$16 sps:$4 sm:$0xff]  }
 0x5f5   : > { %12403 = vmatpush1.bf16.msra.mxu0 %v18965_v63  ;;  %13551 = vmatpush1.bf16.msra.mxu1 %v18968_v18  ;;  %v19053_v63 = vld [vmem:[%s20431_s3 + $0x2968] ss:$16 sps:$4 sm:$0xff]   ;;  %v19058_v18 = vld [vmem:[%s20431_s3 + $0x2984] ss:$16 sps:$4 sm:$0xff]  }
 0x5f6   : > { %12404 = vmatprep.subr.bf16.mxu0 %v18973_v6  ;;  %13552 = vmatprep.subr.bf16.mxu1 %v18976_v20  ;;  %v19061_v6 = vld [vmem:[%s20431_s3 + $0x298c] ss:$16 sps:$4 sm:$0xff]   ;;  %v19056_v20 = vld [vmem:[%s20431_s3 + $0x2980] ss:$16 sps:$4 sm:$0xff]  }
 0x5f9   : > { %12405 = vmatpush1.bf16.msra.mxu0 %v18971_v4  ;;  %13553 = vmatpush1.bf16.msra.mxu1 %v18974_v9  ;;  %v19059_v4 = vld [vmem:[%s20431_s3 + $0x2988] ss:$16 sps:$4 sm:$0xff]   ;;  %v19064_v9 = vld [vmem:[%s20431_s3 + $0x29a4] ss:$16 sps:$4 sm:$0xff]  }
 0x5fa   : > { %12406 = vmatprep.subr.bf16.mxu0 %v18979_v23  ;;  %13554 = vmatprep.subr.bf16.mxu1 %v18982_v7  ;;  %v19067_v23 = vld [vmem:[%s20431_s3 + $0x29ac] ss:$16 sps:$4 sm:$0xff]   ;;  %v19062_v7 = vld [vmem:[%s20431_s3 + $0x29a0] ss:$16 sps:$4 sm:$0xff]  }
 0x5fd   : > { %12407 = vmatpush1.bf16.msra.mxu0 %v18977_v10  ;;  %13555 = vmatpush1.bf16.msra.mxu1 %v18980_v28  ;;  %v19065_v10 = vld [vmem:[%s20431_s3 + $0x29a8] ss:$16 sps:$4 sm:$0xff]   ;;  %v19070_v28 = vld [vmem:[%s20431_s3 + $0x29c4] ss:$16 sps:$4 sm:$0xff]  }
 0x5fe   : > { %12417 = vmatprep.subr.bf16.mxu0 %v18986_v31  ;;  %13565 = vmatprep.subr.bf16.mxu1 %v18989_v11  ;;  %v19073_v31 = vld [vmem:[%s20431_s3 + $0x29cc] ss:$16 sps:$4 sm:$0xff]   ;;  %v665_v11 = vcombine.high %v21922_v21, %v21922_v21  ;;  %v19074_v21 = vld [vmem:[%s20431_s3 + $0x29e0] ss:$16 sps:$4 sm:$0xff]  }
 0x600   : > { %12409 = vmatmul.mubr.bf16.vlgmr.msra.gmra.mrb[0].mxu0 %v827_v34  ;;  %13557 = vmatmul.mubr.bf16.vlgmr.msra.gmra.mrb[0].mxu1 %v827_v34  ;;  %v19071_v34 = vld [vmem:[%s20431_s3 + $0x29c8] ss:$16 sps:$4 sm:$0xff]  }
 0x601   : > { %12418 = vmatpush1.bf16.msra.mxu0 %v18984_v14  ;;  %13566 = vmatpush1.bf16.msra.mxu1 %v18987_v35  ;;  %v19076_v14 = vld [vmem:[%s20431_s3 + $0x29e4] ss:$16 sps:$4 sm:$0xff]   ;;  %v19079_v35 = vld [vmem:[%s20431_s3 + $0x29ec] ss:$16 sps:$4 sm:$0xff]  }
 0x602   : > { %12419 = vmatprep.subr.bf16.mxu0 %v18992_v36  ;;  %13567 = vmatprep.subr.bf16.mxu1 %v18995_v27  ;;  %v22003_v36 = vrot.slane %v665_v11, %v20502_v50  ;;  %v19077_v27 = vld [vmem:[%s20431_s3 + $0x29e8] ss:$16 sps:$4 sm:$0xff]  }
 0x603   : > { %12449 = vmatprep.mubr.bf16.mxu0 %v830_v37  ;;  %13597 = vmatprep.mubr.bf16.mxu1 %v830_v37  ;;  %v19082_v37 = vld [vmem:[%s20431_s3 + $0x2a04] ss:$16 sps:$4 sm:$0xff]   ;;  %v19155_v11 = vld [vmem:[%s20431_s3 + $0x2b88] ss:$16 sps:$4 sm:$0xff]  }
 0x605   : > { %12420 = vmatpush1.bf16.msra.mxu0 %v18990_v19  ;;  %13568 = vmatpush1.bf16.msra.mxu1 %v18993_v25  ;;  %v19085_v19 = vld [vmem:[%s20431_s3 + $0x2a0c] ss:$16 sps:$4 sm:$0xff]   ;;  %v681_v25 = vcombine.high %v22003_v36, %v22003_v36 }
 0x606   : > { %12421 = vmatprep.subr.bf16.mxu0 %v18998_v39  ;;  %13569 = vmatprep.subr.bf16.mxu1 %v19001_v22  ;;  %v829_v39 = vpack.c.bf16 %v21930_v24, %v21930_v24  ;;  %v19080_v22 = vld [vmem:[%s20431_s3 + $0x2a00] ss:$16 sps:$4 sm:$0xff]  }
 0x607   : > { %v19086_v24 = vld [vmem:[%s20431_s3 + $0x2a20] ss:$16 sps:$4 sm:$0xff]  }
 0x609   : > { %12422 = vmatpush1.bf16.msra.mxu0 %v18996_v29  ;;  %13570 = vmatpush1.bf16.msra.mxu1 %v18999_v42  ;;  %v19083_v29 = vld [vmem:[%s20431_s3 + $0x2a08] ss:$16 sps:$4 sm:$0xff]   ;;  %v19088_v42 = vld [vmem:[%s20431_s3 + $0x2a24] ss:$16 sps:$4 sm:$0xff]  }
 0x60a   : > { %12423 = vmatprep.subr.bf16.mxu0 %v19004_v45  ;;  %13571 = vmatprep.subr.bf16.mxu1 %v19007_v26  ;;  %v19091_v45 = vld [vmem:[%s20431_s3 + $0x2a2c] ss:$16 sps:$4 sm:$0xff]   ;;  %v832_v26 = vpack.c.bf16 %v681_v25, %v681_v25  ;;  %v19167_v25 = vld [vmem:[%s20431_s3 + $0x2bc8] ss:$16 sps:$4 sm:$0xff]  }
 0x60d   : > { %12424 = vmatpush1.bf16.msra.mxu0 %v19002_v47  ;;  %13572 = vmatpush1.bf16.msra.mxu1 %v19005_v49  ;;  %v19089_v47 = vld [vmem:[%s20431_s3 + $0x2a28] ss:$16 sps:$4 sm:$0xff]   ;;  %v19094_v49 = vld [vmem:[%s20431_s3 + $0x2a44] ss:$16 sps:$4 sm:$0xff]  }
 0x60e   : > { %12425 = vmatprep.subr.bf16.mxu0 %v19010_v30  ;;  %13573 = vmatprep.subr.bf16.mxu1 %v19013_v51  ;;  %v19097_v30 = vld [vmem:[%s20431_s3 + $0x2a4c] ss:$16 sps:$4 sm:$0xff]   ;;  %v19092_v51 = vld [vmem:[%s20431_s3 + $0x2a40] ss:$16 sps:$4 sm:$0xff]  }
 0x611   : > { %12426 = vmatpush1.bf16.msra.mxu0 %v19008_v52  ;;  %13574 = vmatpush1.bf16.msra.mxu1 %v19011_v33  ;;  %v19095_v52 = vld [vmem:[%s20431_s3 + $0x2a48] ss:$16 sps:$4 sm:$0xff]   ;;  %v19100_v33 = vld [vmem:[%s20431_s3 + $0x2a64] ss:$16 sps:$4 sm:$0xff]  }
 0x612   : > { %12427 = vmatprep.subr.bf16.mxu0 %v19016_v53  ;;  %13575 = vmatprep.subr.bf16.mxu1 %v19019_v40  ;;  %v19103_v53 = vld [vmem:[%s20431_s3 + $0x2a6c] ss:$16 sps:$4 sm:$0xff]   ;;  %v19098_v40 = vld [vmem:[%s20431_s3 + $0x2a60] ss:$16 sps:$4 sm:$0xff]  }
 0x615   : > { %12428 = vmatpush1.bf16.msra.mxu0 %v19014_v55  ;;  %13576 = vmatpush1.bf16.msra.mxu1 %v19017_v38  ;;  %v19101_v55 = vld [vmem:[%s20431_s3 + $0x2a68] ss:$16 sps:$4 sm:$0xff]   ;;  %v19106_v38 = vld [vmem:[%s20431_s3 + $0x2a84] ss:$16 sps:$4 sm:$0xff]  }
 0x616   : > { %12429 = vmatprep.subr.bf16.mxu0 %v19022_v43  ;;  %13577 = vmatprep.subr.bf16.mxu1 %v19025_v58  ;;  %v19109_v43 = vld [vmem:[%s20431_s3 + $0x2a8c] ss:$16 sps:$4 sm:$0xff]   ;;  %v19104_v58 = vld [vmem:[%s20431_s3 + $0x2a80] ss:$16 sps:$4 sm:$0xff]  }
 0x619   : > { %12430 = vmatpush1.bf16.msra.mxu0 %v19020_v41  ;;  %13578 = vmatpush1.bf16.msra.mxu1 %v19023_v61  ;;  %v19107_v41 = vld [vmem:[%s20431_s3 + $0x2a88] ss:$16 sps:$4 sm:$0xff]   ;;  %v19112_v61 = vld [vmem:[%s20431_s3 + $0x2aa4] ss:$16 sps:$4 sm:$0xff]  }
 0x61a   : > { %12431 = vmatprep.subr.bf16.mxu0 %v19028_v62  ;;  %13579 = vmatprep.subr.bf16.mxu1 %v19031_v0  ;;  %v19115_v62 = vld [vmem:[%s20431_s3 + $0x2aac] ss:$16 sps:$4 sm:$0xff]   ;;  %v19110_v0 = vld [vmem:[%s20431_s3 + $0x2aa0] ss:$16 sps:$4 sm:$0xff]  }
 0x61d   : > { %12432 = vmatpush1.bf16.msra.mxu0 %v19026_v46  ;;  %13580 = vmatpush1.bf16.msra.mxu1 %v19029_v1  ;;  %v19113_v46 = vld [vmem:[%s20431_s3 + $0x2aa8] ss:$16 sps:$4 sm:$0xff]   ;;  %v19118_v1 = vld [vmem:[%s20431_s3 + $0x2ac4] ss:$16 sps:$4 sm:$0xff]  }
 0x61e   : > { %12433 = vmatprep.subr.bf16.mxu0 %v19034_v2  ;;  %13581 = vmatprep.subr.bf16.mxu1 %v19037_v48  ;;  %v19121_v2 = vld [vmem:[%s20431_s3 + $0x2acc] ss:$16 sps:$4 sm:$0xff]   ;;  %v19116_v48 = vld [vmem:[%s20431_s3 + $0x2ac0] ss:$16 sps:$4 sm:$0xff]  }
 0x621   : > { %12434 = vmatpush1.bf16.msra.mxu0 %v19032_v3  ;;  %13582 = vmatpush1.bf16.msra.mxu1 %v19035_v56  ;;  %v19119_v3 = vld [vmem:[%s20431_s3 + $0x2ac8] ss:$16 sps:$4 sm:$0xff]   ;;  %v19124_v56 = vld [vmem:[%s20431_s3 + $0x2ae4] ss:$16 sps:$4 sm:$0xff]  }
 0x622   : > { %12435 = vmatprep.subr.bf16.mxu0 %v19040_v5  ;;  %13583 = vmatprep.subr.bf16.mxu1 %v19043_v54  ;;  %v19127_v5 = vld [vmem:[%s20431_s3 + $0x2aec] ss:$16 sps:$4 sm:$0xff]   ;;  %v19122_v54 = vld [vmem:[%s20431_s3 + $0x2ae0] ss:$16 sps:$4 sm:$0xff]  }
 0x625   : > { %12436 = vmatpush1.bf16.msra.mxu0 %v19038_v59  ;;  %13584 = vmatpush1.bf16.msra.mxu1 %v19041_v8  ;;  %v19125_v59 = vld [vmem:[%s20431_s3 + $0x2ae8] ss:$16 sps:$4 sm:$0xff]   ;;  %v19130_v8 = vld [vmem:[%s20431_s3 + $0x2b04] ss:$16 sps:$4 sm:$0xff]  }
 0x626   : > { %12437 = vmatprep.subr.bf16.mxu0 %v19046_v57  ;;  %13585 = vmatprep.subr.bf16.mxu1 %v19049_v12  ;;  %v19133_v57 = vld [vmem:[%s20431_s3 + $0x2b0c] ss:$16 sps:$4 sm:$0xff]   ;;  %v19128_v12 = vld [vmem:[%s20431_s3 + $0x2b00] ss:$16 sps:$4 sm:$0xff]  }
 0x629   : > { %12438 = vmatpush1.bf16.msra.mxu0 %v19044_v13  ;;  %13586 = vmatpush1.bf16.msra.mxu1 %v19047_v15  ;;  %v19131_v13 = vld [vmem:[%s20431_s3 + $0x2b08] ss:$16 sps:$4 sm:$0xff]   ;;  %v19136_v15 = vld [vmem:[%s20431_s3 + $0x2b24] ss:$16 sps:$4 sm:$0xff]  }
 0x62a   : > { %12439 = vmatprep.subr.bf16.mxu0 %v19052_v60  ;;  %13587 = vmatprep.subr.bf16.mxu1 %v19055_v16  ;;  %v19139_v60 = vld [vmem:[%s20431_s3 + $0x2b2c] ss:$16 sps:$4 sm:$0xff]   ;;  %v19134_v16 = vld [vmem:[%s20431_s3 + $0x2b20] ss:$16 sps:$4 sm:$0xff]  }
 0x62d   : > { %12440 = vmatpush1.bf16.msra.mxu0 %v19050_v17  ;;  %13588 = vmatpush1.bf16.msra.mxu1 %v19053_v63  ;;  %v19137_v17 = vld [vmem:[%s20431_s3 + $0x2b28] ss:$16 sps:$4 sm:$0xff]   ;;  %v19142_v63 = vld [vmem:[%s20431_s3 + $0x2b44] ss:$16 sps:$4 sm:$0xff]  }
 0x62e   : > { %12441 = vmatprep.subr.bf16.mxu0 %v19058_v18  ;;  %13589 = vmatprep.subr.bf16.mxu1 %v19061_v6  ;;  %v19145_v18 = vld [vmem:[%s20431_s3 + $0x2b4c] ss:$16 sps:$4 sm:$0xff]   ;;  %v19140_v6 = vld [vmem:[%s20431_s3 + $0x2b40] ss:$16 sps:$4 sm:$0xff]  }
 0x631   : > { %12442 = vmatpush1.bf16.msra.mxu0 %v19056_v20  ;;  %13590 = vmatpush1.bf16.msra.mxu1 %v19059_v4  ;;  %v19143_v20 = vld [vmem:[%s20431_s3 + $0x2b48] ss:$16 sps:$4 sm:$0xff]   ;;  %v19148_v4 = vld [vmem:[%s20431_s3 + $0x2b64] ss:$16 sps:$4 sm:$0xff]  }
 0x632   : > { %12443 = vmatprep.subr.bf16.mxu0 %v19064_v9  ;;  %13591 = vmatprep.subr.bf16.mxu1 %v19067_v23  ;;  %v19151_v9 = vld [vmem:[%s20431_s3 + $0x2b6c] ss:$16 sps:$4 sm:$0xff]   ;;  %v19146_v23 = vld [vmem:[%s20431_s3 + $0x2b60] ss:$16 sps:$4 sm:$0xff]  }
 0x635   : > { %12444 = vmatpush1.bf16.msra.mxu0 %v19062_v7  ;;  %13592 = vmatpush1.bf16.msra.mxu1 %v19065_v10  ;;  %v19149_v7 = vld [vmem:[%s20431_s3 + $0x2b68] ss:$16 sps:$4 sm:$0xff]   ;;  %v19154_v10 = vld [vmem:[%s20431_s3 + $0x2b84] ss:$16 sps:$4 sm:$0xff]  }
 0x636   : > { %12445 = vmatprep.subr.bf16.mxu0 %v19070_v28  ;;  %13593 = vmatprep.subr.bf16.mxu1 %v19073_v31  ;;  %v19157_v28 = vld [vmem:[%s20431_s3 + $0x2b8c] ss:$16 sps:$4 sm:$0xff]   ;;  %v19152_v31 = vld [vmem:[%s20431_s3 + $0x2b80] ss:$16 sps:$4 sm:$0xff]  }
 0x639   : > { %12446 = vmatpush1.bf16.msra.mxu0 %v19068_v32  ;;  %13594 = vmatpush1.bf16.msra.mxu1 %v19071_v34  ;;  %v19160_v32 = vld [vmem:[%s20431_s3 + $0x2ba4] ss:$16 sps:$4 sm:$0xff]   ;;  %v19163_v34 = vld [vmem:[%s20431_s3 + $0x2bac] ss:$16 sps:$4 sm:$0xff]  }
 0x63a   : > { %12447 = vmatprep.subr.bf16.mxu0 %v19076_v14  ;;  %13595 = vmatprep.subr.bf16.mxu1 %v19079_v35  ;;  %v19158_v14 = vld [vmem:[%s20431_s3 + $0x2ba0] ss:$16 sps:$4 sm:$0xff]   ;;  %v19161_v35 = vld [vmem:[%s20431_s3 + $0x2ba8] ss:$16 sps:$4 sm:$0xff]  }
 0x63d   : > { %12448 = vmatpush1.bf16.msra.mxu0 %v19074_v21  ;;  %13596 = vmatpush1.bf16.msra.mxu1 %v19077_v27  ;;  %v19166_v21 = vld [vmem:[%s20431_s3 + $0x2bc4] ss:$16 sps:$4 sm:$0xff]   ;;  %v19169_v27 = vld [vmem:[%s20431_s3 + $0x2bcc] ss:$16 sps:$4 sm:$0xff]  }
 0x63e   : > { %12458 = vmatprep.subr.bf16.mxu0 %v19082_v37  ;;  %13606 = vmatprep.subr.bf16.mxu1 %v19085_v19  ;;  %v22070_v37 = vld [vmem:[%s20424_s12 + $0x58] sm:$0xff]  ;;  %v19164_v19 = vld [vmem:[%s20431_s3 + $0x2bc0] ss:$16 sps:$4 sm:$0xff]  }
 0x640   : > { %12450 = vmatmul.mubr.bf16.vlgmr.msra.gmra.mrb[0].mxu0 %v829_v39  ;;  %13598 = vmatmul.mubr.bf16.vlgmr.msra.gmra.mrb[0].mxu1 %v829_v39  ;;  %v19172_v39 = vld [vmem:[%s20431_s3 + $0x2be4] ss:$16 sps:$4 sm:$0xff]  }
 0x641   : > { %12459 = vmatpush1.bf16.msra.mxu0 %v19080_v22  ;;  %13607 = vmatpush1.bf16.msra.mxu1 %v19083_v29  ;;  %v19175_v22 = vld [vmem:[%s20431_s3 + $0x2bec] ss:$16 sps:$4 sm:$0xff]   ;;  %v22078_v29 = vrot.slane %v22070_v37, %v20502_v50 }
 0x642   : > { %12460 = vmatprep.subr.bf16.mxu0 %v19088_v42  ;;  %13608 = vmatprep.subr.bf16.mxu1 %v19091_v45  ;;  %v19170_v42 = vld [vmem:[%s20431_s3 + $0x2be0] ss:$16 sps:$4 sm:$0xff]   ;;  %v19173_v45 = vld [vmem:[%s20431_s3 + $0x2be8] ss:$16 sps:$4 sm:$0xff]  }
 0x643   : > { %12490 = vmatprep.mubr.bf16.mxu0 %v832_v26  ;;  %13638 = vmatprep.mubr.bf16.mxu1 %v832_v26  ;;  %v19179_v26 = vld [vmem:[%s20431_s3 + $0x2c04] ss:$16 sps:$4 sm:$0xff]  }
 0x645   : > { %12461 = vmatpush1.bf16.msra.mxu0 %v19086_v24  ;;  %13609 = vmatpush1.bf16.msra.mxu1 %v19089_v47  ;;  %v19182_v24 = vld [vmem:[%s20431_s3 + $0x2c0c] ss:$16 sps:$4 sm:$0xff]   ;;  %v697_v47 = vcombine.high %v22078_v29, %v22078_v29 }
 0x646   : > { %12462 = vmatprep.subr.bf16.mxu0 %v19094_v49  ;;  %13610 = vmatprep.subr.bf16.mxu1 %v19097_v30  ;;  %v831_v49 = vpack.c.bf16 %v22003_v36, %v22003_v36  ;;  %v19177_v30 = vld [vmem:[%s20431_s3 + $0x2c00] ss:$16 sps:$4 sm:$0xff]  }
 0x647   : > { %v19183_v36 = vld [vmem:[%s20431_s3 + $0x2c20] ss:$16 sps:$4 sm:$0xff]  }
 0x649   : > { %12463 = vmatpush1.bf16.msra.mxu0 %v19092_v51  ;;  %13611 = vmatpush1.bf16.msra.mxu1 %v19095_v52  ;;  %v19180_v51 = vld [vmem:[%s20431_s3 + $0x2c08] ss:$16 sps:$4 sm:$0xff]   ;;  %v19185_v52 = vld [vmem:[%s20431_s3 + $0x2c24] ss:$16 sps:$4 sm:$0xff]  }
 0x64a   : > { %12464 = vmatprep.subr.bf16.mxu0 %v19100_v33  ;;  %13612 = vmatprep.subr.bf16.mxu1 %v19103_v53  ;;  %v19188_v33 = vld [vmem:[%s20431_s3 + $0x2c2c] ss:$16 sps:$4 sm:$0xff]   ;;  %v834_v53 = vpack.c.bf16 %v697_v47, %v697_v47  ;;  %v19261_v47 = vld [vmem:[%s20431_s3 + $0x2dc0] ss:$16 sps:$4 sm:$0xff]  }
 0x64d   : > { %12465 = vmatpush1.bf16.msra.mxu0 %v19098_v40  ;;  %13613 = vmatpush1.bf16.msra.mxu1 %v19101_v55  ;;  %v19186_v40 = vld [vmem:[%s20431_s3 + $0x2c28] ss:$16 sps:$4 sm:$0xff]   ;;  %v19191_v55 = vld [vmem:[%s20431_s3 + $0x2c44] ss:$16 sps:$4 sm:$0xff]  }
 0x64e   : > { %12466 = vmatprep.subr.bf16.mxu0 %v19106_v38  ;;  %13614 = vmatprep.subr.bf16.mxu1 %v19109_v43  ;;  %v19194_v38 = vld [vmem:[%s20431_s3 + $0x2c4c] ss:$16 sps:$4 sm:$0xff]   ;;  %v19189_v43 = vld [vmem:[%s20431_s3 + $0x2c40] ss:$16 sps:$4 sm:$0xff]  }
 0x651   : > { %12467 = vmatpush1.bf16.msra.mxu0 %v19104_v58  ;;  %13615 = vmatpush1.bf16.msra.mxu1 %v19107_v41  ;;  %v19192_v58 = vld [vmem:[%s20431_s3 + $0x2c48] ss:$16 sps:$4 sm:$0xff]   ;;  %v19197_v41 = vld [vmem:[%s20431_s3 + $0x2c64] ss:$16 sps:$4 sm:$0xff]  }
 0x652   : > { %12468 = vmatprep.subr.bf16.mxu0 %v19112_v61  ;;  %13616 = vmatprep.subr.bf16.mxu1 %v19115_v62  ;;  %v19200_v61 = vld [vmem:[%s20431_s3 + $0x2c6c] ss:$16 sps:$4 sm:$0xff]   ;;  %v19195_v62 = vld [vmem:[%s20431_s3 + $0x2c60] ss:$16 sps:$4 sm:$0xff]  }
 0x655   : > { %12469 = vmatpush1.bf16.msra.mxu0 %v19110_v0  ;;  %13617 = vmatpush1.bf16.msra.mxu1 %v19113_v46  ;;  %v19198_v0 = vld [vmem:[%s20431_s3 + $0x2c68] ss:$16 sps:$4 sm:$0xff]   ;;  %v19203_v46 = vld [vmem:[%s20431_s3 + $0x2c84] ss:$16 sps:$4 sm:$0xff]  }
 0x656   : > { %12470 = vmatprep.subr.bf16.mxu0 %v19118_v1  ;;  %13618 = vmatprep.subr.bf16.mxu1 %v19121_v2  ;;  %v19206_v1 = vld [vmem:[%s20431_s3 + $0x2c8c] ss:$16 sps:$4 sm:$0xff]   ;;  %v19201_v2 = vld [vmem:[%s20431_s3 + $0x2c80] ss:$16 sps:$4 sm:$0xff]  }
 0x659   : > { %12471 = vmatpush1.bf16.msra.mxu0 %v19116_v48  ;;  %13619 = vmatpush1.bf16.msra.mxu1 %v19119_v3  ;;  %v19204_v48 = vld [vmem:[%s20431_s3 + $0x2c88] ss:$16 sps:$4 sm:$0xff]   ;;  %v19209_v3 = vld [vmem:[%s20431_s3 + $0x2ca4] ss:$16 sps:$4 sm:$0xff]  }
 0x65a   : > { %12472 = vmatprep.subr.bf16.mxu0 %v19124_v56  ;;  %13620 = vmatprep.subr.bf16.mxu1 %v19127_v5  ;;  %v19212_v56 = vld [vmem:[%s20431_s3 + $0x2cac] ss:$16 sps:$4 sm:$0xff]   ;;  %v19207_v5 = vld [vmem:[%s20431_s3 + $0x2ca0] ss:$16 sps:$4 sm:$0xff]  }
 0x65d   : > { %12473 = vmatpush1.bf16.msra.mxu0 %v19122_v54  ;;  %13621 = vmatpush1.bf16.msra.mxu1 %v19125_v59  ;;  %v19210_v54 = vld [vmem:[%s20431_s3 + $0x2ca8] ss:$16 sps:$4 sm:$0xff]   ;;  %v19215_v59 = vld [vmem:[%s20431_s3 + $0x2cc4] ss:$16 sps:$4 sm:$0xff]  }
 0x65e   : > { %12474 = vmatprep.subr.bf16.mxu0 %v19130_v8  ;;  %13622 = vmatprep.subr.bf16.mxu1 %v19133_v57  ;;  %v19218_v8 = vld [vmem:[%s20431_s3 + $0x2ccc] ss:$16 sps:$4 sm:$0xff]   ;;  %v19213_v57 = vld [vmem:[%s20431_s3 + $0x2cc0] ss:$16 sps:$4 sm:$0xff]  }
 0x661   : > { %12475 = vmatpush1.bf16.msra.mxu0 %v19128_v12  ;;  %13623 = vmatpush1.bf16.msra.mxu1 %v19131_v13  ;;  %v19216_v12 = vld [vmem:[%s20431_s3 + $0x2cc8] ss:$16 sps:$4 sm:$0xff]   ;;  %v19221_v13 = vld [vmem:[%s20431_s3 + $0x2ce4] ss:$16 sps:$4 sm:$0xff]  }
 0x662   : > { %12476 = vmatprep.subr.bf16.mxu0 %v19136_v15  ;;  %13624 = vmatprep.subr.bf16.mxu1 %v19139_v60  ;;  %v19224_v15 = vld [vmem:[%s20431_s3 + $0x2cec] ss:$16 sps:$4 sm:$0xff]   ;;  %v19219_v60 = vld [vmem:[%s20431_s3 + $0x2ce0] ss:$16 sps:$4 sm:$0xff]  }
 0x665   : > { %12477 = vmatpush1.bf16.msra.mxu0 %v19134_v16  ;;  %13625 = vmatpush1.bf16.msra.mxu1 %v19137_v17  ;;  %v19222_v16 = vld [vmem:[%s20431_s3 + $0x2ce8] ss:$16 sps:$4 sm:$0xff]   ;;  %v19227_v17 = vld [vmem:[%s20431_s3 + $0x2d04] ss:$16 sps:$4 sm:$0xff]  }
 0x666   : > { %12478 = vmatprep.subr.bf16.mxu0 %v19142_v63  ;;  %13626 = vmatprep.subr.bf16.mxu1 %v19145_v18  ;;  %v19230_v63 = vld [vmem:[%s20431_s3 + $0x2d0c] ss:$16 sps:$4 sm:$0xff]   ;;  %v19225_v18 = vld [vmem:[%s20431_s3 + $0x2d00] ss:$16 sps:$4 sm:$0xff]  }
 0x669   : > { %12479 = vmatpush1.bf16.msra.mxu0 %v19140_v6  ;;  %13627 = vmatpush1.bf16.msra.mxu1 %v19143_v20  ;;  %v19228_v6 = vld [vmem:[%s20431_s3 + $0x2d08] ss:$16 sps:$4 sm:$0xff]   ;;  %v19233_v20 = vld [vmem:[%s20431_s3 + $0x2d24] ss:$16 sps:$4 sm:$0xff]  }
 0x66a   : > { %12480 = vmatprep.subr.bf16.mxu0 %v19148_v4  ;;  %13628 = vmatprep.subr.bf16.mxu1 %v19151_v9  ;;  %v19236_v4 = vld [vmem:[%s20431_s3 + $0x2d2c] ss:$16 sps:$4 sm:$0xff]   ;;  %v19231_v9 = vld [vmem:[%s20431_s3 + $0x2d20] ss:$16 sps:$4 sm:$0xff]  }
 0x66d   : > { %12481 = vmatpush1.bf16.msra.mxu0 %v19146_v23  ;;  %13629 = vmatpush1.bf16.msra.mxu1 %v19149_v7  ;;  %v19234_v23 = vld [vmem:[%s20431_s3 + $0x2d28] ss:$16 sps:$4 sm:$0xff]   ;;  %v19239_v7 = vld [vmem:[%s20431_s3 + $0x2d44] ss:$16 sps:$4 sm:$0xff]  }
 0x66e   : > { %12482 = vmatprep.subr.bf16.mxu0 %v19154_v10  ;;  %13630 = vmatprep.subr.bf16.mxu1 %v19157_v28  ;;  %v19242_v10 = vld [vmem:[%s20431_s3 + $0x2d4c] ss:$16 sps:$4 sm:$0xff]   ;;  %v19237_v28 = vld [vmem:[%s20431_s3 + $0x2d40] ss:$16 sps:$4 sm:$0xff]  }
 0x671   : > { %12483 = vmatpush1.bf16.msra.mxu0 %v19152_v31  ;;  %13631 = vmatpush1.bf16.msra.mxu1 %v19155_v11  ;;  %v19240_v31 = vld [vmem:[%s20431_s3 + $0x2d48] ss:$16 sps:$4 sm:$0xff]   ;;  %v19245_v11 = vld [vmem:[%s20431_s3 + $0x2d64] ss:$16 sps:$4 sm:$0xff]  }
 0x672   : > { %12484 = vmatprep.subr.bf16.mxu0 %v19160_v32  ;;  %13632 = vmatprep.subr.bf16.mxu1 %v19163_v34  ;;  %v19248_v32 = vld [vmem:[%s20431_s3 + $0x2d6c] ss:$16 sps:$4 sm:$0xff]   ;;  %v19243_v34 = vld [vmem:[%s20431_s3 + $0x2d60] ss:$16 sps:$4 sm:$0xff]  }
 0x675   : > { %12485 = vmatpush1.bf16.msra.mxu0 %v19158_v14  ;;  %13633 = vmatpush1.bf16.msra.mxu1 %v19161_v35  ;;  %v19246_v14 = vld [vmem:[%s20431_s3 + $0x2d68] ss:$16 sps:$4 sm:$0xff]   ;;  %v19251_v35 = vld [vmem:[%s20431_s3 + $0x2d84] ss:$16 sps:$4 sm:$0xff]  }
 0x676   : > { %12486 = vmatprep.subr.bf16.mxu0 %v19166_v21  ;;  %13634 = vmatprep.subr.bf16.mxu1 %v19169_v27  ;;  %v19254_v21 = vld [vmem:[%s20431_s3 + $0x2d8c] ss:$16 sps:$4 sm:$0xff]   ;;  %v19249_v27 = vld [vmem:[%s20431_s3 + $0x2d80] ss:$16 sps:$4 sm:$0xff]  }
 0x679   : > { %12487 = vmatpush1.bf16.msra.mxu0 %v19164_v19  ;;  %13635 = vmatpush1.bf16.msra.mxu1 %v19167_v25  ;;  %v19252_v19 = vld [vmem:[%s20431_s3 + $0x2d88] ss:$16 sps:$4 sm:$0xff]   ;;  %v19257_v25 = vld [vmem:[%s20431_s3 + $0x2da4] ss:$16 sps:$4 sm:$0xff]  }
 0x67a   : > { %12488 = vmatprep.subr.bf16.mxu0 %v19172_v39  ;;  %13636 = vmatprep.subr.bf16.mxu1 %v19175_v22  ;;  %v19260_v39 = vld [vmem:[%s20431_s3 + $0x2dac] ss:$16 sps:$4 sm:$0xff]   ;;  %v19255_v22 = vld [vmem:[%s20431_s3 + $0x2da0] ss:$16 sps:$4 sm:$0xff]  }
 0x67d   : > { %12489 = vmatpush1.bf16.msra.mxu0 %v19170_v42  ;;  %13637 = vmatpush1.bf16.msra.mxu1 %v19173_v45  ;;  %v19258_v42 = vld [vmem:[%s20431_s3 + $0x2da8] ss:$16 sps:$4 sm:$0xff]   ;;  %v19263_v45 = vld [vmem:[%s20431_s3 + $0x2dc4] ss:$16 sps:$4 sm:$0xff]  }
 0x67e   : > { %12499 = vmatprep.subr.bf16.mxu0 %v19179_v26  ;;  %13647 = vmatprep.subr.bf16.mxu1 %v19182_v24  ;;  %v19266_v26 = vld [vmem:[%s20431_s3 + $0x2dcc] ss:$16 sps:$4 sm:$0xff]   ;;  %v682_v24 = vcombine.high %v22070_v37, %v22070_v37  ;;  %v19267_v37 = vld [vmem:[%s20431_s3 + $0x2de0] ss:$16 sps:$4 sm:$0xff]  }
 0x680   : > { %12491 = vmatmul.mubr.bf16.vlgmr.msra.gmra.mrb[0].mxu0 %v831_v49  ;;  %13639 = vmatmul.mubr.bf16.vlgmr.msra.gmra.mrb[0].mxu1 %v831_v49  ;;  %v19264_v49 = vld [vmem:[%s20431_s3 + $0x2dc8] ss:$16 sps:$4 sm:$0xff]  }
 0x681   : > { %12500 = vmatpush1.bf16.msra.mxu0 %v19177_v30  ;;  %13648 = vmatpush1.bf16.msra.mxu1 %v19180_v51  ;;  %v19269_v30 = vld [vmem:[%s20431_s3 + $0x2de4] ss:$16 sps:$4 sm:$0xff]   ;;  %v19272_v51 = vld [vmem:[%s20431_s3 + $0x2dec] ss:$16 sps:$4 sm:$0xff]  }
 0x682   : > { %12501 = vmatprep.subr.bf16.mxu0 %v19185_v52  ;;  %13649 = vmatprep.subr.bf16.mxu1 %v19188_v33  ;;  %v22151_v52 = vrot.slane %v682_v24, %v20502_v50  ;;  %v19270_v33 = vld [vmem:[%s20431_s3 + $0x2de8] ss:$16 sps:$4 sm:$0xff]  }
 0x683   : > { %12531 = vmatprep.mubr.bf16.mxu0 %v834_v53  ;;  %13679 = vmatprep.mubr.bf16.mxu1 %v834_v53  ;;  %v19275_v53 = vld [vmem:[%s20431_s3 + $0x2e04] ss:$16 sps:$4 sm:$0xff]   ;;  %v19348_v24 = vld [vmem:[%s20431_s3 + $0x2f88] ss:$16 sps:$4 sm:$0xff]  }
 0x685   : > { %12502 = vmatpush1.bf16.msra.mxu0 %v19183_v36  ;;  %13650 = vmatpush1.bf16.msra.mxu1 %v19186_v40  ;;  %v19278_v36 = vld [vmem:[%s20431_s3 + $0x2e0c] ss:$16 sps:$4 sm:$0xff]   ;;  %v698_v40 = vcombine.high %v22151_v52, %v22151_v52 }
 0x686   : > { %12503 = vmatprep.subr.bf16.mxu0 %v19191_v55  ;;  %13651 = vmatprep.subr.bf16.mxu1 %v19194_v38  ;;  %v833_v55 = vpack.c.bf16 %v22078_v29, %v22078_v29  ;;  %v19273_v38 = vld [vmem:[%s20431_s3 + $0x2e00] ss:$16 sps:$4 sm:$0xff]  }
 0x687   : > { %v19279_v29 = vld [vmem:[%s20431_s3 + $0x2e20] ss:$16 sps:$4 sm:$0xff]  }
 0x689   : > { %12504 = vmatpush1.bf16.msra.mxu0 %v19189_v43  ;;  %13652 = vmatpush1.bf16.msra.mxu1 %v19192_v58  ;;  %v19276_v43 = vld [vmem:[%s20431_s3 + $0x2e08] ss:$16 sps:$4 sm:$0xff]   ;;  %v19281_v58 = vld [vmem:[%s20431_s3 + $0x2e24] ss:$16 sps:$4 sm:$0xff]  }
 0x68a   : > { %12505 = vmatprep.subr.bf16.mxu0 %v19197_v41  ;;  %13653 = vmatprep.subr.bf16.mxu1 %v19200_v61  ;;  %v19284_v41 = vld [vmem:[%s20431_s3 + $0x2e2c] ss:$16 sps:$4 sm:$0xff]   ;;  %v836_v61 = vpack.c.bf16 %v698_v40, %v698_v40  ;;  %v19360_v40 = vld [vmem:[%s20431_s3 + $0x2fc8] ss:$16 sps:$4 sm:$0xff]  }
 0x68d   : > { %12506 = vmatpush1.bf16.msra.mxu0 %v19195_v62  ;;  %13654 = vmatpush1.bf16.msra.mxu1 %v19198_v0  ;;  %v19282_v62 = vld [vmem:[%s20431_s3 + $0x2e28] ss:$16 sps:$4 sm:$0xff]   ;;  %v19287_v0 = vld [vmem:[%s20431_s3 + $0x2e44] ss:$16 sps:$4 sm:$0xff]  }
 0x68e   : > { %12507 = vmatprep.subr.bf16.mxu0 %v19203_v46  ;;  %13655 = vmatprep.subr.bf16.mxu1 %v19206_v1  ;;  %v19290_v46 = vld [vmem:[%s20431_s3 + $0x2e4c] ss:$16 sps:$4 sm:$0xff]   ;;  %v19285_v1 = vld [vmem:[%s20431_s3 + $0x2e40] ss:$16 sps:$4 sm:$0xff]  }
 0x691   : > { %12508 = vmatpush1.bf16.msra.mxu0 %v19201_v2  ;;  %13656 = vmatpush1.bf16.msra.mxu1 %v19204_v48  ;;  %v19288_v2 = vld [vmem:[%s20431_s3 + $0x2e48] ss:$16 sps:$4 sm:$0xff]   ;;  %v19293_v48 = vld [vmem:[%s20431_s3 + $0x2e64] ss:$16 sps:$4 sm:$0xff]  }
 0x692   : > { %12509 = vmatprep.subr.bf16.mxu0 %v19209_v3  ;;  %13657 = vmatprep.subr.bf16.mxu1 %v19212_v56  ;;  %v19296_v3 = vld [vmem:[%s20431_s3 + $0x2e6c] ss:$16 sps:$4 sm:$0xff]   ;;  %v19291_v56 = vld [vmem:[%s20431_s3 + $0x2e60] ss:$16 sps:$4 sm:$0xff]  }
 0x695   : > { %12510 = vmatpush1.bf16.msra.mxu0 %v19207_v5  ;;  %13658 = vmatpush1.bf16.msra.mxu1 %v19210_v54  ;;  %v19294_v5 = vld [vmem:[%s20431_s3 + $0x2e68] ss:$16 sps:$4 sm:$0xff]   ;;  %v19299_v54 = vld [vmem:[%s20431_s3 + $0x2e84] ss:$16 sps:$4 sm:$0xff]  }
 0x696   : > { %12511 = vmatprep.subr.bf16.mxu0 %v19215_v59  ;;  %13659 = vmatprep.subr.bf16.mxu1 %v19218_v8  ;;  %v19302_v59 = vld [vmem:[%s20431_s3 + $0x2e8c] ss:$16 sps:$4 sm:$0xff]   ;;  %v19297_v8 = vld [vmem:[%s20431_s3 + $0x2e80] ss:$16 sps:$4 sm:$0xff]  }
 0x699   : > { %12512 = vmatpush1.bf16.msra.mxu0 %v19213_v57  ;;  %13660 = vmatpush1.bf16.msra.mxu1 %v19216_v12  ;;  %v19300_v57 = vld [vmem:[%s20431_s3 + $0x2e88] ss:$16 sps:$4 sm:$0xff]   ;;  %v19305_v12 = vld [vmem:[%s20431_s3 + $0x2ea4] ss:$16 sps:$4 sm:$0xff]  }
 0x69a   : > { %12513 = vmatprep.subr.bf16.mxu0 %v19221_v13  ;;  %13661 = vmatprep.subr.bf16.mxu1 %v19224_v15  ;;  %v19308_v13 = vld [vmem:[%s20431_s3 + $0x2eac] ss:$16 sps:$4 sm:$0xff]   ;;  %v19303_v15 = vld [vmem:[%s20431_s3 + $0x2ea0] ss:$16 sps:$4 sm:$0xff]  }
 0x69d   : > { %12514 = vmatpush1.bf16.msra.mxu0 %v19219_v60  ;;  %13662 = vmatpush1.bf16.msra.mxu1 %v19222_v16  ;;  %v19306_v60 = vld [vmem:[%s20431_s3 + $0x2ea8] ss:$16 sps:$4 sm:$0xff]   ;;  %v19311_v16 = vld [vmem:[%s20431_s3 + $0x2ec4] ss:$16 sps:$4 sm:$0xff]  }
 0x69e   : > { %12515 = vmatprep.subr.bf16.mxu0 %v19227_v17  ;;  %13663 = vmatprep.subr.bf16.mxu1 %v19230_v63  ;;  %v19314_v17 = vld [vmem:[%s20431_s3 + $0x2ecc] ss:$16 sps:$4 sm:$0xff]   ;;  %v19309_v63 = vld [vmem:[%s20431_s3 + $0x2ec0] ss:$16 sps:$4 sm:$0xff]  }
 0x6a1   : > { %12516 = vmatpush1.bf16.msra.mxu0 %v19225_v18  ;;  %13664 = vmatpush1.bf16.msra.mxu1 %v19228_v6  ;;  %v19312_v18 = vld [vmem:[%s20431_s3 + $0x2ec8] ss:$16 sps:$4 sm:$0xff]   ;;  %v19317_v6 = vld [vmem:[%s20431_s3 + $0x2ee4] ss:$16 sps:$4 sm:$0xff]  }
 0x6a2   : > { %12517 = vmatprep.subr.bf16.mxu0 %v19233_v20  ;;  %13665 = vmatprep.subr.bf16.mxu1 %v19236_v4  ;;  %v19320_v20 = vld [vmem:[%s20431_s3 + $0x2eec] ss:$16 sps:$4 sm:$0xff]   ;;  %v19315_v4 = vld [vmem:[%s20431_s3 + $0x2ee0] ss:$16 sps:$4 sm:$0xff]  }
 0x6a5   : > { %12518 = vmatpush1.bf16.msra.mxu0 %v19231_v9  ;;  %13666 = vmatpush1.bf16.msra.mxu1 %v19234_v23  ;;  %v19318_v9 = vld [vmem:[%s20431_s3 + $0x2ee8] ss:$16 sps:$4 sm:$0xff]   ;;  %v19323_v23 = vld [vmem:[%s20431_s3 + $0x2f04] ss:$16 sps:$4 sm:$0xff]  }
 0x6a6   : > { %12519 = vmatprep.subr.bf16.mxu0 %v19239_v7  ;;  %13667 = vmatprep.subr.bf16.mxu1 %v19242_v10  ;;  %v19326_v7 = vld [vmem:[%s20431_s3 + $0x2f0c] ss:$16 sps:$4 sm:$0xff]   ;;  %v19321_v10 = vld [vmem:[%s20431_s3 + $0x2f00] ss:$16 sps:$4 sm:$0xff]  }
 0x6a9   : > { %12520 = vmatpush1.bf16.msra.mxu0 %v19237_v28  ;;  %13668 = vmatpush1.bf16.msra.mxu1 %v19240_v31  ;;  %v19324_v28 = vld [vmem:[%s20431_s3 + $0x2f08] ss:$16 sps:$4 sm:$0xff]   ;;  %v19329_v31 = vld [vmem:[%s20431_s3 + $0x2f24] ss:$16 sps:$4 sm:$0xff]  }
 0x6aa   : > { %12521 = vmatprep.subr.bf16.mxu0 %v19245_v11  ;;  %13669 = vmatprep.subr.bf16.mxu1 %v19248_v32  ;;  %v19332_v11 = vld [vmem:[%s20431_s3 + $0x2f2c] ss:$16 sps:$4 sm:$0xff]   ;;  %v19327_v32 = vld [vmem:[%s20431_s3 + $0x2f20] ss:$16 sps:$4 sm:$0xff]  }
 0x6ad   : > { %12522 = vmatpush1.bf16.msra.mxu0 %v19243_v34  ;;  %13670 = vmatpush1.bf16.msra.mxu1 %v19246_v14  ;;  %v19330_v34 = vld [vmem:[%s20431_s3 + $0x2f28] ss:$16 sps:$4 sm:$0xff]   ;;  %v19335_v14 = vld [vmem:[%s20431_s3 + $0x2f44] ss:$16 sps:$4 sm:$0xff]  }
 0x6ae   : > { %12523 = vmatprep.subr.bf16.mxu0 %v19251_v35  ;;  %13671 = vmatprep.subr.bf16.mxu1 %v19254_v21  ;;  %v19338_v35 = vld [vmem:[%s20431_s3 + $0x2f4c] ss:$16 sps:$4 sm:$0xff]   ;;  %v19333_v21 = vld [vmem:[%s20431_s3 + $0x2f40] ss:$16 sps:$4 sm:$0xff]  }
 0x6b1   : > { %12524 = vmatpush1.bf16.msra.mxu0 %v19249_v27  ;;  %13672 = vmatpush1.bf16.msra.mxu1 %v19252_v19  ;;  %v19336_v27 = vld [vmem:[%s20431_s3 + $0x2f48] ss:$16 sps:$4 sm:$0xff]   ;;  %v19341_v19 = vld [vmem:[%s20431_s3 + $0x2f64] ss:$16 sps:$4 sm:$0xff]  }
 0x6b2   : > { %12525 = vmatprep.subr.bf16.mxu0 %v19257_v25  ;;  %13673 = vmatprep.subr.bf16.mxu1 %v19260_v39  ;;  %v19344_v25 = vld [vmem:[%s20431_s3 + $0x2f6c] ss:$16 sps:$4 sm:$0xff]   ;;  %v19339_v39 = vld [vmem:[%s20431_s3 + $0x2f60] ss:$16 sps:$4 sm:$0xff]  }
 0x6b5   : > { %12526 = vmatpush1.bf16.msra.mxu0 %v19255_v22  ;;  %13674 = vmatpush1.bf16.msra.mxu1 %v19258_v42  ;;  %v19342_v22 = vld [vmem:[%s20431_s3 + $0x2f68] ss:$16 sps:$4 sm:$0xff]   ;;  %v19347_v42 = vld [vmem:[%s20431_s3 + $0x2f84] ss:$16 sps:$4 sm:$0xff]  }
 0x6b6   : > { %12527 = vmatprep.subr.bf16.mxu0 %v19263_v45  ;;  %13675 = vmatprep.subr.bf16.mxu1 %v19266_v26  ;;  %v19350_v45 = vld [vmem:[%s20431_s3 + $0x2f8c] ss:$16 sps:$4 sm:$0xff]   ;;  %v19345_v26 = vld [vmem:[%s20431_s3 + $0x2f80] ss:$16 sps:$4 sm:$0xff]  }
 0x6b9   : > { %12528 = vmatpush1.bf16.msra.mxu0 %v19261_v47  ;;  %13676 = vmatpush1.bf16.msra.mxu1 %v19264_v49  ;;  %v19353_v47 = vld [vmem:[%s20431_s3 + $0x2fa4] ss:$16 sps:$4 sm:$0xff]   ;;  %v19356_v49 = vld [vmem:[%s20431_s3 + $0x2fac] ss:$16 sps:$4 sm:$0xff]  }
 0x6ba   : > { %12529 = vmatprep.subr.bf16.mxu0 %v19269_v30  ;;  %13677 = vmatprep.subr.bf16.mxu1 %v19272_v51  ;;  %v19351_v30 = vld [vmem:[%s20431_s3 + $0x2fa0] ss:$16 sps:$4 sm:$0xff]   ;;  %v19354_v51 = vld [vmem:[%s20431_s3 + $0x2fa8] ss:$16 sps:$4 sm:$0xff]  }
 0x6bd   : > { %12530 = vmatpush1.bf16.msra.mxu0 %v19267_v37  ;;  %13678 = vmatpush1.bf16.msra.mxu1 %v19270_v33  ;;  %v19359_v37 = vld [vmem:[%s20431_s3 + $0x2fc4] ss:$16 sps:$4 sm:$0xff]   ;;  %v19362_v33 = vld [vmem:[%s20431_s3 + $0x2fcc] ss:$16 sps:$4 sm:$0xff]  }
 0x6be   : > { %12540 = vmatprep.subr.bf16.mxu0 %v19275_v53  ;;  %13688 = vmatprep.subr.bf16.mxu1 %v19278_v36  ;;  %v22218_v53 = vld [vmem:[%s20424_s12 + $0x60] sm:$0xff] }
 0x6bf   : > { %v19357_v36 = vld [vmem:[%s20431_s3 + $0x2fc0] ss:$16 sps:$4 sm:$0xff]  }
 0x6c0   : > { %12532 = vmatmul.mubr.bf16.vlgmr.msra.gmra.mrb[0].mxu0 %v833_v55  ;;  %13680 = vmatmul.mubr.bf16.vlgmr.msra.gmra.mrb[0].mxu1 %v833_v55  ;;  %v19365_v55 = vld [vmem:[%s20431_s3 + $0x2fe4] ss:$16 sps:$4 sm:$0xff]  }
 0x6c1   : > { %12541 = vmatpush1.bf16.msra.mxu0 %v19273_v38  ;;  %13689 = vmatpush1.bf16.msra.mxu1 %v19276_v43  ;;  %v19368_v38 = vld [vmem:[%s20431_s3 + $0x2fec] ss:$16 sps:$4 sm:$0xff]   ;;  %v22226_v43 = vrot.slane %v22218_v53, %v20502_v50 }
 0x6c2   : > { %12542 = vmatprep.subr.bf16.mxu0 %v19281_v58  ;;  %13690 = vmatprep.subr.bf16.mxu1 %v19284_v41  ;;  %v19363_v58 = vld [vmem:[%s20431_s3 + $0x2fe0] ss:$16 sps:$4 sm:$0xff]   ;;  %v19366_v41 = vld [vmem:[%s20431_s3 + $0x2fe8] ss:$16 sps:$4 sm:$0xff]  }
 0x6c3   : > { %12572 = vmatprep.mubr.bf16.mxu0 %v836_v61  ;;  %13720 = vmatprep.mubr.bf16.mxu1 %v836_v61  ;;  %v19372_v61 = vld [vmem:[%s20431_s3 + $0x3004] ss:$16 sps:$4 sm:$0xff]  }
 0x6c5   : > { %12543 = vmatpush1.bf16.msra.mxu0 %v19279_v29  ;;  %13691 = vmatpush1.bf16.msra.mxu1 %v19282_v62  ;;  %v19375_v29 = vld [vmem:[%s20431_s3 + $0x300c] ss:$16 sps:$4 sm:$0xff]   ;;  %v714_v62 = vcombine.high %v22226_v43, %v22226_v43 }
 0x6c6   : > { %12544 = vmatprep.subr.bf16.mxu0 %v19287_v0  ;;  %13692 = vmatprep.subr.bf16.mxu1 %v19290_v46  ;;  %v835_v0 = vpack.c.bf16 %v22151_v52, %v22151_v52  ;;  %v19370_v46 = vld [vmem:[%s20431_s3 + $0x3000] ss:$16 sps:$4 sm:$0xff]  }
 0x6c7   : > { %v19376_v52 = vld [vmem:[%s20431_s3 + $0x3020] ss:$16 sps:$4 sm:$0xff]  }
 0x6c9   : > { %12545 = vmatpush1.bf16.msra.mxu0 %v19285_v1  ;;  %13693 = vmatpush1.bf16.msra.mxu1 %v19288_v2  ;;  %v19373_v1 = vld [vmem:[%s20431_s3 + $0x3008] ss:$16 sps:$4 sm:$0xff]   ;;  %v19378_v2 = vld [vmem:[%s20431_s3 + $0x3024] ss:$16 sps:$4 sm:$0xff]  }
 0x6ca   : > { %12546 = vmatprep.subr.bf16.mxu0 %v19293_v48  ;;  %13694 = vmatprep.subr.bf16.mxu1 %v19296_v3  ;;  %v19381_v48 = vld [vmem:[%s20431_s3 + $0x302c] ss:$16 sps:$4 sm:$0xff]   ;;  %v838_v3 = vpack.c.bf16 %v714_v62, %v714_v62  ;;  %v19454_v62 = vld [vmem:[%s20431_s3 + $0x31c0] ss:$16 sps:$4 sm:$0xff]  }
 0x6cd   : > { %12547 = vmatpush1.bf16.msra.mxu0 %v19291_v56  ;;  %13695 = vmatpush1.bf16.msra.mxu1 %v19294_v5  ;;  %v19379_v56 = vld [vmem:[%s20431_s3 + $0x3028] ss:$16 sps:$4 sm:$0xff]   ;;  %v19384_v5 = vld [vmem:[%s20431_s3 + $0x3044] ss:$16 sps:$4 sm:$0xff]  }
 0x6ce   : > { %12548 = vmatprep.subr.bf16.mxu0 %v19299_v54  ;;  %13696 = vmatprep.subr.bf16.mxu1 %v19302_v59  ;;  %v19387_v54 = vld [vmem:[%s20431_s3 + $0x304c] ss:$16 sps:$4 sm:$0xff]   ;;  %v19382_v59 = vld [vmem:[%s20431_s3 + $0x3040] ss:$16 sps:$4 sm:$0xff]  }
 0x6d1   : > { %12549 = vmatpush1.bf16.msra.mxu0 %v19297_v8  ;;  %13697 = vmatpush1.bf16.msra.mxu1 %v19300_v57  ;;  %v19385_v8 = vld [vmem:[%s20431_s3 + $0x3048] ss:$16 sps:$4 sm:$0xff]   ;;  %v19390_v57 = vld [vmem:[%s20431_s3 + $0x3064] ss:$16 sps:$4 sm:$0xff]  }
 0x6d2   : > { %12550 = vmatprep.subr.bf16.mxu0 %v19305_v12  ;;  %13698 = vmatprep.subr.bf16.mxu1 %v19308_v13  ;;  %v19393_v12 = vld [vmem:[%s20431_s3 + $0x306c] ss:$16 sps:$4 sm:$0xff]   ;;  %v19388_v13 = vld [vmem:[%s20431_s3 + $0x3060] ss:$16 sps:$4 sm:$0xff]  }
 0x6d5   : > { %12551 = vmatpush1.bf16.msra.mxu0 %v19303_v15  ;;  %13699 = vmatpush1.bf16.msra.mxu1 %v19306_v60  ;;  %v19391_v15 = vld [vmem:[%s20431_s3 + $0x3068] ss:$16 sps:$4 sm:$0xff]   ;;  %v19396_v60 = vld [vmem:[%s20431_s3 + $0x3084] ss:$16 sps:$4 sm:$0xff]  }
 0x6d6   : > { %12552 = vmatprep.subr.bf16.mxu0 %v19311_v16  ;;  %13700 = vmatprep.subr.bf16.mxu1 %v19314_v17  ;;  %v19399_v16 = vld [vmem:[%s20431_s3 + $0x308c] ss:$16 sps:$4 sm:$0xff]   ;;  %v19394_v17 = vld [vmem:[%s20431_s3 + $0x3080] ss:$16 sps:$4 sm:$0xff]  }
 0x6d9   : > { %12553 = vmatpush1.bf16.msra.mxu0 %v19309_v63  ;;  %13701 = vmatpush1.bf16.msra.mxu1 %v19312_v18  ;;  %v19397_v63 = vld [vmem:[%s20431_s3 + $0x3088] ss:$16 sps:$4 sm:$0xff]   ;;  %v19402_v18 = vld [vmem:[%s20431_s3 + $0x30a4] ss:$16 sps:$4 sm:$0xff]  }
 0x6da   : > { %12554 = vmatprep.subr.bf16.mxu0 %v19317_v6  ;;  %13702 = vmatprep.subr.bf16.mxu1 %v19320_v20  ;;  %v19405_v6 = vld [vmem:[%s20431_s3 + $0x30ac] ss:$16 sps:$4 sm:$0xff]   ;;  %v19400_v20 = vld [vmem:[%s20431_s3 + $0x30a0] ss:$16 sps:$4 sm:$0xff]  }
 0x6dd   : > { %12555 = vmatpush1.bf16.msra.mxu0 %v19315_v4  ;;  %13703 = vmatpush1.bf16.msra.mxu1 %v19318_v9  ;;  %v19403_v4 = vld [vmem:[%s20431_s3 + $0x30a8] ss:$16 sps:$4 sm:$0xff]   ;;  %v19408_v9 = vld [vmem:[%s20431_s3 + $0x30c4] ss:$16 sps:$4 sm:$0xff]  }
 0x6de   : > { %12556 = vmatprep.subr.bf16.mxu0 %v19323_v23  ;;  %13704 = vmatprep.subr.bf16.mxu1 %v19326_v7  ;;  %v19411_v23 = vld [vmem:[%s20431_s3 + $0x30cc] ss:$16 sps:$4 sm:$0xff]   ;;  %v19406_v7 = vld [vmem:[%s20431_s3 + $0x30c0] ss:$16 sps:$4 sm:$0xff]  }
 0x6e1   : > { %12557 = vmatpush1.bf16.msra.mxu0 %v19321_v10  ;;  %13705 = vmatpush1.bf16.msra.mxu1 %v19324_v28  ;;  %v19409_v10 = vld [vmem:[%s20431_s3 + $0x30c8] ss:$16 sps:$4 sm:$0xff]   ;;  %v19414_v28 = vld [vmem:[%s20431_s3 + $0x30e4] ss:$16 sps:$4 sm:$0xff]  }
 0x6e2   : > { %12558 = vmatprep.subr.bf16.mxu0 %v19329_v31  ;;  %13706 = vmatprep.subr.bf16.mxu1 %v19332_v11  ;;  %v19417_v31 = vld [vmem:[%s20431_s3 + $0x30ec] ss:$16 sps:$4 sm:$0xff]   ;;  %v19412_v11 = vld [vmem:[%s20431_s3 + $0x30e0] ss:$16 sps:$4 sm:$0xff]  }
 0x6e5   : > { %12559 = vmatpush1.bf16.msra.mxu0 %v19327_v32  ;;  %13707 = vmatpush1.bf16.msra.mxu1 %v19330_v34  ;;  %v19415_v32 = vld [vmem:[%s20431_s3 + $0x30e8] ss:$16 sps:$4 sm:$0xff]   ;;  %v19420_v34 = vld [vmem:[%s20431_s3 + $0x3104] ss:$16 sps:$4 sm:$0xff]  }
 0x6e6   : > { %12560 = vmatprep.subr.bf16.mxu0 %v19335_v14  ;;  %13708 = vmatprep.subr.bf16.mxu1 %v19338_v35  ;;  %v19423_v14 = vld [vmem:[%s20431_s3 + $0x310c] ss:$16 sps:$4 sm:$0xff]   ;;  %v19418_v35 = vld [vmem:[%s20431_s3 + $0x3100] ss:$16 sps:$4 sm:$0xff]  }
 0x6e9   : > { %12561 = vmatpush1.bf16.msra.mxu0 %v19333_v21  ;;  %13709 = vmatpush1.bf16.msra.mxu1 %v19336_v27  ;;  %v19421_v21 = vld [vmem:[%s20431_s3 + $0x3108] ss:$16 sps:$4 sm:$0xff]   ;;  %v19426_v27 = vld [vmem:[%s20431_s3 + $0x3124] ss:$16 sps:$4 sm:$0xff]  }
 0x6ea   : > { %12562 = vmatprep.subr.bf16.mxu0 %v19341_v19  ;;  %13710 = vmatprep.subr.bf16.mxu1 %v19344_v25  ;;  %v19429_v19 = vld [vmem:[%s20431_s3 + $0x312c] ss:$16 sps:$4 sm:$0xff]   ;;  %v19424_v25 = vld [vmem:[%s20431_s3 + $0x3120] ss:$16 sps:$4 sm:$0xff]  }
 0x6ed   : > { %12563 = vmatpush1.bf16.msra.mxu0 %v19339_v39  ;;  %13711 = vmatpush1.bf16.msra.mxu1 %v19342_v22  ;;  %v19427_v39 = vld [vmem:[%s20431_s3 + $0x3128] ss:$16 sps:$4 sm:$0xff]   ;;  %v19432_v22 = vld [vmem:[%s20431_s3 + $0x3144] ss:$16 sps:$4 sm:$0xff]  }
 0x6ee   : > { %12564 = vmatprep.subr.bf16.mxu0 %v19347_v42  ;;  %13712 = vmatprep.subr.bf16.mxu1 %v19350_v45  ;;  %v19435_v42 = vld [vmem:[%s20431_s3 + $0x314c] ss:$16 sps:$4 sm:$0xff]   ;;  %v19430_v45 = vld [vmem:[%s20431_s3 + $0x3140] ss:$16 sps:$4 sm:$0xff]  }
 0x6f1   : > { %12565 = vmatpush1.bf16.msra.mxu0 %v19345_v26  ;;  %13713 = vmatpush1.bf16.msra.mxu1 %v19348_v24  ;;  %v19433_v26 = vld [vmem:[%s20431_s3 + $0x3148] ss:$16 sps:$4 sm:$0xff]   ;;  %v19438_v24 = vld [vmem:[%s20431_s3 + $0x3164] ss:$16 sps:$4 sm:$0xff]  }
 0x6f2   : > { %12566 = vmatprep.subr.bf16.mxu0 %v19353_v47  ;;  %13714 = vmatprep.subr.bf16.mxu1 %v19356_v49  ;;  %v19441_v47 = vld [vmem:[%s20431_s3 + $0x316c] ss:$16 sps:$4 sm:$0xff]   ;;  %v19436_v49 = vld [vmem:[%s20431_s3 + $0x3160] ss:$16 sps:$4 sm:$0xff]  }
 0x6f5   : > { %12567 = vmatpush1.bf16.msra.mxu0 %v19351_v30  ;;  %13715 = vmatpush1.bf16.msra.mxu1 %v19354_v51  ;;  %v19439_v30 = vld [vmem:[%s20431_s3 + $0x3168] ss:$16 sps:$4 sm:$0xff]   ;;  %v19444_v51 = vld [vmem:[%s20431_s3 + $0x3184] ss:$16 sps:$4 sm:$0xff]  }
 0x6f6   : > { %12568 = vmatprep.subr.bf16.mxu0 %v19359_v37  ;;  %13716 = vmatprep.subr.bf16.mxu1 %v19362_v33  ;;  %v19447_v37 = vld [vmem:[%s20431_s3 + $0x318c] ss:$16 sps:$4 sm:$0xff]   ;;  %v19442_v33 = vld [vmem:[%s20431_s3 + $0x3180] ss:$16 sps:$4 sm:$0xff]  }
 0x6f9   : > { %12569 = vmatpush1.bf16.msra.mxu0 %v19357_v36  ;;  %13717 = vmatpush1.bf16.msra.mxu1 %v19360_v40  ;;  %v19445_v36 = vld [vmem:[%s20431_s3 + $0x3188] ss:$16 sps:$4 sm:$0xff]   ;;  %v19450_v40 = vld [vmem:[%s20431_s3 + $0x31a4] ss:$16 sps:$4 sm:$0xff]  }
 0x6fa   : > { %12570 = vmatprep.subr.bf16.mxu0 %v19365_v55  ;;  %13718 = vmatprep.subr.bf16.mxu1 %v19368_v38  ;;  %v19453_v55 = vld [vmem:[%s20431_s3 + $0x31ac] ss:$16 sps:$4 sm:$0xff]   ;;  %v19448_v38 = vld [vmem:[%s20431_s3 + $0x31a0] ss:$16 sps:$4 sm:$0xff]  }
 0x6fd   : > { %12571 = vmatpush1.bf16.msra.mxu0 %v19363_v58  ;;  %13719 = vmatpush1.bf16.msra.mxu1 %v19366_v41  ;;  %v19451_v58 = vld [vmem:[%s20431_s3 + $0x31a8] ss:$16 sps:$4 sm:$0xff]   ;;  %v19456_v41 = vld [vmem:[%s20431_s3 + $0x31c4] ss:$16 sps:$4 sm:$0xff]  }
 0x6fe   : > { %12581 = vmatprep.subr.bf16.mxu0 %v19372_v61  ;;  %13729 = vmatprep.subr.bf16.mxu1 %v19375_v29  ;;  %v19459_v61 = vld [vmem:[%s20431_s3 + $0x31cc] ss:$16 sps:$4 sm:$0xff]   ;;  %v699_v29 = vcombine.high %v22218_v53, %v22218_v53  ;;  %v19460_v53 = vld [vmem:[%s20431_s3 + $0x31e0] ss:$16 sps:$4 sm:$0xff]  }
 0x700   : > { %12573 = vmatmul.mubr.bf16.vlgmr.msra.gmra.mrb[0].mxu0 %v835_v0  ;;  %13721 = vmatmul.mubr.bf16.vlgmr.msra.gmra.mrb[0].mxu1 %v835_v0  ;;  %v19457_v0 = vld [vmem:[%s20431_s3 + $0x31c8] ss:$16 sps:$4 sm:$0xff]  }
 0x701   : > { %12582 = vmatpush1.bf16.msra.mxu0 %v19370_v46  ;;  %13730 = vmatpush1.bf16.msra.mxu1 %v19373_v1  ;;  %v19462_v46 = vld [vmem:[%s20431_s3 + $0x31e4] ss:$16 sps:$4 sm:$0xff]   ;;  %v19465_v1 = vld [vmem:[%s20431_s3 + $0x31ec] ss:$16 sps:$4 sm:$0xff]  }
 0x702   : > { %12583 = vmatprep.subr.bf16.mxu0 %v19378_v2  ;;  %13731 = vmatprep.subr.bf16.mxu1 %v19381_v48  ;;  %v22299_v2 = vrot.slane %v699_v29, %v20502_v50  ;;  %v19463_v48 = vld [vmem:[%s20431_s3 + $0x31e8] ss:$16 sps:$4 sm:$0xff]  }
 0x703   : > { %12613 = vmatprep.mubr.bf16.mxu0 %v838_v3  ;;  %13761 = vmatprep.mubr.bf16.mxu1 %v838_v3  ;;  %v19468_v3 = vld [vmem:[%s20431_s3 + $0x3204] ss:$16 sps:$4 sm:$0xff]   ;;  %v19541_v29 = vld [vmem:[%s20431_s3 + $0x3388] ss:$16 sps:$4 sm:$0xff]  }
 0x705   : > { %12584 = vmatpush1.bf16.msra.mxu0 %v19376_v52  ;;  %13732 = vmatpush1.bf16.msra.mxu1 %v19379_v56  ;;  %v19471_v52 = vld [vmem:[%s20431_s3 + $0x320c] ss:$16 sps:$4 sm:$0xff]   ;;  %v715_v56 = vcombine.high %v22299_v2, %v22299_v2 }
 0x706   : > { %12585 = vmatprep.subr.bf16.mxu0 %v19384_v5  ;;  %13733 = vmatprep.subr.bf16.mxu1 %v19387_v54  ;;  %v837_v5 = vpack.c.bf16 %v22226_v43, %v22226_v43  ;;  %v19466_v54 = vld [vmem:[%s20431_s3 + $0x3200] ss:$16 sps:$4 sm:$0xff]  }
 0x707   : > { %v19472_v43 = vld [vmem:[%s20431_s3 + $0x3220] ss:$16 sps:$4 sm:$0xff]  }
 0x709   : > { %12586 = vmatpush1.bf16.msra.mxu0 %v19382_v59  ;;  %13734 = vmatpush1.bf16.msra.mxu1 %v19385_v8  ;;  %v19469_v59 = vld [vmem:[%s20431_s3 + $0x3208] ss:$16 sps:$4 sm:$0xff]   ;;  %v19474_v8 = vld [vmem:[%s20431_s3 + $0x3224] ss:$16 sps:$4 sm:$0xff]  }
 0x70a   : > { %12587 = vmatprep.subr.bf16.mxu0 %v19390_v57  ;;  %13735 = vmatprep.subr.bf16.mxu1 %v19393_v12  ;;  %v19477_v57 = vld [vmem:[%s20431_s3 + $0x322c] ss:$16 sps:$4 sm:$0xff]   ;;  %v840_v12 = vpack.c.bf16 %v715_v56, %v715_v56  ;;  %v19553_v56 = vld [vmem:[%s20431_s3 + $0x33c8] ss:$16 sps:$4 sm:$0xff]  }
 0x70d   : > { %12588 = vmatpush1.bf16.msra.mxu0 %v19388_v13  ;;  %13736 = vmatpush1.bf16.msra.mxu1 %v19391_v15  ;;  %v19475_v13 = vld [vmem:[%s20431_s3 + $0x3228] ss:$16 sps:$4 sm:$0xff]   ;;  %v19480_v15 = vld [vmem:[%s20431_s3 + $0x3244] ss:$16 sps:$4 sm:$0xff]  }
 0x70e   : > { %12589 = vmatprep.subr.bf16.mxu0 %v19396_v60  ;;  %13737 = vmatprep.subr.bf16.mxu1 %v19399_v16  ;;  %v19483_v60 = vld [vmem:[%s20431_s3 + $0x324c] ss:$16 sps:$4 sm:$0xff]   ;;  %v19478_v16 = vld [vmem:[%s20431_s3 + $0x3240] ss:$16 sps:$4 sm:$0xff]  }
 0x711   : > { %12590 = vmatpush1.bf16.msra.mxu0 %v19394_v17  ;;  %13738 = vmatpush1.bf16.msra.mxu1 %v19397_v63  ;;  %v19481_v17 = vld [vmem:[%s20431_s3 + $0x3248] ss:$16 sps:$4 sm:$0xff]   ;;  %v19486_v63 = vld [vmem:[%s20431_s3 + $0x3264] ss:$16 sps:$4 sm:$0xff]  }
 0x712   : > { %12591 = vmatprep.subr.bf16.mxu0 %v19402_v18  ;;  %13739 = vmatprep.subr.bf16.mxu1 %v19405_v6  ;;  %v19489_v18 = vld [vmem:[%s20431_s3 + $0x326c] ss:$16 sps:$4 sm:$0xff]   ;;  %v19484_v6 = vld [vmem:[%s20431_s3 + $0x3260] ss:$16 sps:$4 sm:$0xff]  }
 0x715   : > { %12592 = vmatpush1.bf16.msra.mxu0 %v19400_v20  ;;  %13740 = vmatpush1.bf16.msra.mxu1 %v19403_v4  ;;  %v19487_v20 = vld [vmem:[%s20431_s3 + $0x3268] ss:$16 sps:$4 sm:$0xff]   ;;  %v19492_v4 = vld [vmem:[%s20431_s3 + $0x3284] ss:$16 sps:$4 sm:$0xff]  }
 0x716   : > { %12593 = vmatprep.subr.bf16.mxu0 %v19408_v9  ;;  %13741 = vmatprep.subr.bf16.mxu1 %v19411_v23  ;;  %v19495_v9 = vld [vmem:[%s20431_s3 + $0x328c] ss:$16 sps:$4 sm:$0xff]   ;;  %v19490_v23 = vld [vmem:[%s20431_s3 + $0x3280] ss:$16 sps:$4 sm:$0xff]  }
 0x719   : > { %12594 = vmatpush1.bf16.msra.mxu0 %v19406_v7  ;;  %13742 = vmatpush1.bf16.msra.mxu1 %v19409_v10  ;;  %v19493_v7 = vld [vmem:[%s20431_s3 + $0x3288] ss:$16 sps:$4 sm:$0xff]   ;;  %v19498_v10 = vld [vmem:[%s20431_s3 + $0x32a4] ss:$16 sps:$4 sm:$0xff]  }
 0x71a   : > { %12595 = vmatprep.subr.bf16.mxu0 %v19414_v28  ;;  %13743 = vmatprep.subr.bf16.mxu1 %v19417_v31  ;;  %v19501_v28 = vld [vmem:[%s20431_s3 + $0x32ac] ss:$16 sps:$4 sm:$0xff]   ;;  %v19496_v31 = vld [vmem:[%s20431_s3 + $0x32a0] ss:$16 sps:$4 sm:$0xff]  }
 0x71d   : > { %12596 = vmatpush1.bf16.msra.mxu0 %v19412_v11  ;;  %13744 = vmatpush1.bf16.msra.mxu1 %v19415_v32  ;;  %v19499_v11 = vld [vmem:[%s20431_s3 + $0x32a8] ss:$16 sps:$4 sm:$0xff]   ;;  %v19504_v32 = vld [vmem:[%s20431_s3 + $0x32c4] ss:$16 sps:$4 sm:$0xff]  }
 0x71e   : > { %12597 = vmatprep.subr.bf16.mxu0 %v19420_v34  ;;  %13745 = vmatprep.subr.bf16.mxu1 %v19423_v14  ;;  %v19507_v34 = vld [vmem:[%s20431_s3 + $0x32cc] ss:$16 sps:$4 sm:$0xff]   ;;  %v19502_v14 = vld [vmem:[%s20431_s3 + $0x32c0] ss:$16 sps:$4 sm:$0xff]  }
 0x721   : > { %12598 = vmatpush1.bf16.msra.mxu0 %v19418_v35  ;;  %13746 = vmatpush1.bf16.msra.mxu1 %v19421_v21  ;;  %v19505_v35 = vld [vmem:[%s20431_s3 + $0x32c8] ss:$16 sps:$4 sm:$0xff]   ;;  %v19510_v21 = vld [vmem:[%s20431_s3 + $0x32e4] ss:$16 sps:$4 sm:$0xff]  }
 0x722   : > { %12599 = vmatprep.subr.bf16.mxu0 %v19426_v27  ;;  %13747 = vmatprep.subr.bf16.mxu1 %v19429_v19  ;;  %v19513_v27 = vld [vmem:[%s20431_s3 + $0x32ec] ss:$16 sps:$4 sm:$0xff]   ;;  %v19508_v19 = vld [vmem:[%s20431_s3 + $0x32e0] ss:$16 sps:$4 sm:$0xff]  }
 0x725   : > { %12600 = vmatpush1.bf16.msra.mxu0 %v19424_v25  ;;  %13748 = vmatpush1.bf16.msra.mxu1 %v19427_v39  ;;  %v19511_v25 = vld [vmem:[%s20431_s3 + $0x32e8] ss:$16 sps:$4 sm:$0xff]   ;;  %v19516_v39 = vld [vmem:[%s20431_s3 + $0x3304] ss:$16 sps:$4 sm:$0xff]  }
 0x726   : > { %12601 = vmatprep.subr.bf16.mxu0 %v19432_v22  ;;  %13749 = vmatprep.subr.bf16.mxu1 %v19435_v42  ;;  %v19519_v22 = vld [vmem:[%s20431_s3 + $0x330c] ss:$16 sps:$4 sm:$0xff]   ;;  %v19514_v42 = vld [vmem:[%s20431_s3 + $0x3300] ss:$16 sps:$4 sm:$0xff]  }
 0x729   : > { %12602 = vmatpush1.bf16.msra.mxu0 %v19430_v45  ;;  %13750 = vmatpush1.bf16.msra.mxu1 %v19433_v26  ;;  %v19517_v45 = vld [vmem:[%s20431_s3 + $0x3308] ss:$16 sps:$4 sm:$0xff]   ;;  %v19522_v26 = vld [vmem:[%s20431_s3 + $0x3324] ss:$16 sps:$4 sm:$0xff]  }
 0x72a   : > { %12603 = vmatprep.subr.bf16.mxu0 %v19438_v24  ;;  %13751 = vmatprep.subr.bf16.mxu1 %v19441_v47  ;;  %v19525_v24 = vld [vmem:[%s20431_s3 + $0x332c] ss:$16 sps:$4 sm:$0xff]   ;;  %v19520_v47 = vld [vmem:[%s20431_s3 + $0x3320] ss:$16 sps:$4 sm:$0xff]  }
 0x72d   : > { %12604 = vmatpush1.bf16.msra.mxu0 %v19436_v49  ;;  %13752 = vmatpush1.bf16.msra.mxu1 %v19439_v30  ;;  %v19523_v49 = vld [vmem:[%s20431_s3 + $0x3328] ss:$16 sps:$4 sm:$0xff]   ;;  %v19528_v30 = vld [vmem:[%s20431_s3 + $0x3344] ss:$16 sps:$4 sm:$0xff]  }
 0x72e   : > { %12605 = vmatprep.subr.bf16.mxu0 %v19444_v51  ;;  %13753 = vmatprep.subr.bf16.mxu1 %v19447_v37  ;;  %v19531_v51 = vld [vmem:[%s20431_s3 + $0x334c] ss:$16 sps:$4 sm:$0xff]   ;;  %v19526_v37 = vld [vmem:[%s20431_s3 + $0x3340] ss:$16 sps:$4 sm:$0xff]  }
 0x731   : > { %12606 = vmatpush1.bf16.msra.mxu0 %v19442_v33  ;;  %13754 = vmatpush1.bf16.msra.mxu1 %v19445_v36  ;;  %v19529_v33 = vld [vmem:[%s20431_s3 + $0x3348] ss:$16 sps:$4 sm:$0xff]   ;;  %v19534_v36 = vld [vmem:[%s20431_s3 + $0x3364] ss:$16 sps:$4 sm:$0xff]  }
 0x732   : > { %12607 = vmatprep.subr.bf16.mxu0 %v19450_v40  ;;  %13755 = vmatprep.subr.bf16.mxu1 %v19453_v55  ;;  %v19537_v40 = vld [vmem:[%s20431_s3 + $0x336c] ss:$16 sps:$4 sm:$0xff]   ;;  %v19532_v55 = vld [vmem:[%s20431_s3 + $0x3360] ss:$16 sps:$4 sm:$0xff]  }
 0x735   : > { %12608 = vmatpush1.bf16.msra.mxu0 %v19448_v38  ;;  %13756 = vmatpush1.bf16.msra.mxu1 %v19451_v58  ;;  %v19535_v38 = vld [vmem:[%s20431_s3 + $0x3368] ss:$16 sps:$4 sm:$0xff]   ;;  %v19540_v58 = vld [vmem:[%s20431_s3 + $0x3384] ss:$16 sps:$4 sm:$0xff]  }
 0x736   : > { %12609 = vmatprep.subr.bf16.mxu0 %v19456_v41  ;;  %13757 = vmatprep.subr.bf16.mxu1 %v19459_v61  ;;  %v19543_v41 = vld [vmem:[%s20431_s3 + $0x338c] ss:$16 sps:$4 sm:$0xff]   ;;  %v19538_v61 = vld [vmem:[%s20431_s3 + $0x3380] ss:$16 sps:$4 sm:$0xff]  }
 0x739   : > { %12610 = vmatpush1.bf16.msra.mxu0 %v19454_v62  ;;  %13758 = vmatpush1.bf16.msra.mxu1 %v19457_v0  ;;  %v19546_v62 = vld [vmem:[%s20431_s3 + $0x33a4] ss:$16 sps:$4 sm:$0xff]   ;;  %v19549_v0 = vld [vmem:[%s20431_s3 + $0x33ac] ss:$16 sps:$4 sm:$0xff]  }
 0x73a   : > { %12611 = vmatprep.subr.bf16.mxu0 %v19462_v46  ;;  %13759 = vmatprep.subr.bf16.mxu1 %v19465_v1  ;;  %v19544_v46 = vld [vmem:[%s20431_s3 + $0x33a0] ss:$16 sps:$4 sm:$0xff]   ;;  %v19547_v1 = vld [vmem:[%s20431_s3 + $0x33a8] ss:$16 sps:$4 sm:$0xff]  }
 0x73d   : > { %12612 = vmatpush1.bf16.msra.mxu0 %v19460_v53  ;;  %13760 = vmatpush1.bf16.msra.mxu1 %v19463_v48  ;;  %v19552_v53 = vld [vmem:[%s20431_s3 + $0x33c4] ss:$16 sps:$4 sm:$0xff]   ;;  %v19555_v48 = vld [vmem:[%s20431_s3 + $0x33cc] ss:$16 sps:$4 sm:$0xff]  }
 0x73e   : > { %12622 = vmatprep.subr.bf16.mxu0 %v19468_v3  ;;  %13770 = vmatprep.subr.bf16.mxu1 %v19471_v52  ;;  %v22366_v3 = vld [vmem:[%s20424_s12 + $0x68] sm:$0xff]  ;;  %v19550_v52 = vld [vmem:[%s20431_s3 + $0x33c0] ss:$16 sps:$4 sm:$0xff]  }
 0x740   : > { %12614 = vmatmul.mubr.bf16.vlgmr.msra.gmra.mrb[0].mxu0 %v837_v5  ;;  %13762 = vmatmul.mubr.bf16.vlgmr.msra.gmra.mrb[0].mxu1 %v837_v5  ;;  %v19558_v5 = vld [vmem:[%s20431_s3 + $0x33e4] ss:$16 sps:$4 sm:$0xff]  }
 0x741   : > { %12623 = vmatpush1.bf16.msra.mxu0 %v19466_v54  ;;  %13771 = vmatpush1.bf16.msra.mxu1 %v19469_v59  ;;  %v19561_v54 = vld [vmem:[%s20431_s3 + $0x33ec] ss:$16 sps:$4 sm:$0xff]   ;;  %v22374_v59 = vrot.slane %v22366_v3, %v20502_v50 }
 0x742   : > { %12624 = vmatprep.subr.bf16.mxu0 %v19474_v8  ;;  %13772 = vmatprep.subr.bf16.mxu1 %v19477_v57  ;;  %v19556_v8 = vld [vmem:[%s20431_s3 + $0x33e0] ss:$16 sps:$4 sm:$0xff]   ;;  %v19559_v57 = vld [vmem:[%s20431_s3 + $0x33e8] ss:$16 sps:$4 sm:$0xff]  }
 0x743   : > { %12654 = vmatprep.mubr.bf16.mxu0 %v840_v12  ;;  %13802 = vmatprep.mubr.bf16.mxu1 %v840_v12  ;;  %v19565_v12 = vld [vmem:[%s20431_s3 + $0x3404] ss:$16 sps:$4 sm:$0xff]  }
 0x745   : > { %12625 = vmatpush1.bf16.msra.mxu0 %v19472_v43  ;;  %13773 = vmatpush1.bf16.msra.mxu1 %v19475_v13  ;;  %v19568_v43 = vld [vmem:[%s20431_s3 + $0x340c] ss:$16 sps:$4 sm:$0xff]   ;;  %v731_v13 = vcombine.high %v22374_v59, %v22374_v59 }
 0x746   : > { %12626 = vmatprep.subr.bf16.mxu0 %v19480_v15  ;;  %13774 = vmatprep.subr.bf16.mxu1 %v19483_v60  ;;  %v839_v15 = vpack.c.bf16 %v22299_v2, %v22299_v2  ;;  %v19563_v60 = vld [vmem:[%s20431_s3 + $0x3400] ss:$16 sps:$4 sm:$0xff]  }
 0x747   : > { %v19569_v2 = vld [vmem:[%s20431_s3 + $0x3420] ss:$16 sps:$4 sm:$0xff]  }
 0x749   : > { %12627 = vmatpush1.bf16.msra.mxu0 %v19478_v16  ;;  %13775 = vmatpush1.bf16.msra.mxu1 %v19481_v17  ;;  %v19566_v16 = vld [vmem:[%s20431_s3 + $0x3408] ss:$16 sps:$4 sm:$0xff]   ;;  %v19571_v17 = vld [vmem:[%s20431_s3 + $0x3424] ss:$16 sps:$4 sm:$0xff]  }
 0x74a   : > { %12628 = vmatprep.subr.bf16.mxu0 %v19486_v63  ;;  %13776 = vmatprep.subr.bf16.mxu1 %v19489_v18  ;;  %v19574_v63 = vld [vmem:[%s20431_s3 + $0x342c] ss:$16 sps:$4 sm:$0xff]   ;;  %v842_v18 = vpack.c.bf16 %v731_v13, %v731_v13  ;;  %v19647_v13 = vld [vmem:[%s20431_s3 + $0x35c0] ss:$16 sps:$4 sm:$0xff]  }
 0x74d   : > { %12629 = vmatpush1.bf16.msra.mxu0 %v19484_v6  ;;  %13777 = vmatpush1.bf16.msra.mxu1 %v19487_v20  ;;  %v19572_v6 = vld [vmem:[%s20431_s3 + $0x3428] ss:$16 sps:$4 sm:$0xff]   ;;  %v19577_v20 = vld [vmem:[%s20431_s3 + $0x3444] ss:$16 sps:$4 sm:$0xff]  }
 0x74e   : > { %12630 = vmatprep.subr.bf16.mxu0 %v19492_v4  ;;  %13778 = vmatprep.subr.bf16.mxu1 %v19495_v9  ;;  %v19580_v4 = vld [vmem:[%s20431_s3 + $0x344c] ss:$16 sps:$4 sm:$0xff]   ;;  %v19575_v9 = vld [vmem:[%s20431_s3 + $0x3440] ss:$16 sps:$4 sm:$0xff]  }
 0x751   : > { %12631 = vmatpush1.bf16.msra.mxu0 %v19490_v23  ;;  %13779 = vmatpush1.bf16.msra.mxu1 %v19493_v7  ;;  %v19578_v23 = vld [vmem:[%s20431_s3 + $0x3448] ss:$16 sps:$4 sm:$0xff]   ;;  %v19583_v7 = vld [vmem:[%s20431_s3 + $0x3464] ss:$16 sps:$4 sm:$0xff]  }
 0x752   : > { %12632 = vmatprep.subr.bf16.mxu0 %v19498_v10  ;;  %13780 = vmatprep.subr.bf16.mxu1 %v19501_v28  ;;  %v19586_v10 = vld [vmem:[%s20431_s3 + $0x346c] ss:$16 sps:$4 sm:$0xff]   ;;  %v19581_v28 = vld [vmem:[%s20431_s3 + $0x3460] ss:$16 sps:$4 sm:$0xff]  }
 0x755   : > { %12633 = vmatpush1.bf16.msra.mxu0 %v19496_v31  ;;  %13781 = vmatpush1.bf16.msra.mxu1 %v19499_v11  ;;  %v19584_v31 = vld [vmem:[%s20431_s3 + $0x3468] ss:$16 sps:$4 sm:$0xff]   ;;  %v19589_v11 = vld [vmem:[%s20431_s3 + $0x3484] ss:$16 sps:$4 sm:$0xff]  }
 0x756   : > { %12634 = vmatprep.subr.bf16.mxu0 %v19504_v32  ;;  %13782 = vmatprep.subr.bf16.mxu1 %v19507_v34  ;;  %v19592_v32 = vld [vmem:[%s20431_s3 + $0x348c] ss:$16 sps:$4 sm:$0xff]   ;;  %v19587_v34 = vld [vmem:[%s20431_s3 + $0x3480] ss:$16 sps:$4 sm:$0xff]  }
 0x759   : > { %12635 = vmatpush1.bf16.msra.mxu0 %v19502_v14  ;;  %13783 = vmatpush1.bf16.msra.mxu1 %v19505_v35  ;;  %v19590_v14 = vld [vmem:[%s20431_s3 + $0x3488] ss:$16 sps:$4 sm:$0xff]   ;;  %v19595_v35 = vld [vmem:[%s20431_s3 + $0x34a4] ss:$16 sps:$4 sm:$0xff]  }
 0x75a   : > { %12636 = vmatprep.subr.bf16.mxu0 %v19510_v21  ;;  %13784 = vmatprep.subr.bf16.mxu1 %v19513_v27  ;;  %v19598_v21 = vld [vmem:[%s20431_s3 + $0x34ac] ss:$16 sps:$4 sm:$0xff]   ;;  %v19593_v27 = vld [vmem:[%s20431_s3 + $0x34a0] ss:$16 sps:$4 sm:$0xff]  }
 0x75d   : > { %12637 = vmatpush1.bf16.msra.mxu0 %v19508_v19  ;;  %13785 = vmatpush1.bf16.msra.mxu1 %v19511_v25  ;;  %v19596_v19 = vld [vmem:[%s20431_s3 + $0x34a8] ss:$16 sps:$4 sm:$0xff]   ;;  %v19601_v25 = vld [vmem:[%s20431_s3 + $0x34c4] ss:$16 sps:$4 sm:$0xff]  }
 0x75e   : > { %12638 = vmatprep.subr.bf16.mxu0 %v19516_v39  ;;  %13786 = vmatprep.subr.bf16.mxu1 %v19519_v22  ;;  %v19604_v39 = vld [vmem:[%s20431_s3 + $0x34cc] ss:$16 sps:$4 sm:$0xff]   ;;  %v19599_v22 = vld [vmem:[%s20431_s3 + $0x34c0] ss:$16 sps:$4 sm:$0xff]  }
 0x761   : > { %12639 = vmatpush1.bf16.msra.mxu0 %v19514_v42  ;;  %13787 = vmatpush1.bf16.msra.mxu1 %v19517_v45  ;;  %v19602_v42 = vld [vmem:[%s20431_s3 + $0x34c8] ss:$16 sps:$4 sm:$0xff]   ;;  %v19607_v45 = vld [vmem:[%s20431_s3 + $0x34e4] ss:$16 sps:$4 sm:$0xff]  }
 0x762   : > { %12640 = vmatprep.subr.bf16.mxu0 %v19522_v26  ;;  %13788 = vmatprep.subr.bf16.mxu1 %v19525_v24  ;;  %v19610_v26 = vld [vmem:[%s20431_s3 + $0x34ec] ss:$16 sps:$4 sm:$0xff]   ;;  %v19605_v24 = vld [vmem:[%s20431_s3 + $0x34e0] ss:$16 sps:$4 sm:$0xff]  }
 0x765   : > { %12641 = vmatpush1.bf16.msra.mxu0 %v19520_v47  ;;  %13789 = vmatpush1.bf16.msra.mxu1 %v19523_v49  ;;  %v19608_v47 = vld [vmem:[%s20431_s3 + $0x34e8] ss:$16 sps:$4 sm:$0xff]   ;;  %v19613_v49 = vld [vmem:[%s20431_s3 + $0x3504] ss:$16 sps:$4 sm:$0xff]  }
 0x766   : > { %12642 = vmatprep.subr.bf16.mxu0 %v19528_v30  ;;  %13790 = vmatprep.subr.bf16.mxu1 %v19531_v51  ;;  %v19616_v30 = vld [vmem:[%s20431_s3 + $0x350c] ss:$16 sps:$4 sm:$0xff]   ;;  %v19611_v51 = vld [vmem:[%s20431_s3 + $0x3500] ss:$16 sps:$4 sm:$0xff]  }
 0x769   : > { %12643 = vmatpush1.bf16.msra.mxu0 %v19526_v37  ;;  %13791 = vmatpush1.bf16.msra.mxu1 %v19529_v33  ;;  %v19614_v37 = vld [vmem:[%s20431_s3 + $0x3508] ss:$16 sps:$4 sm:$0xff]   ;;  %v19619_v33 = vld [vmem:[%s20431_s3 + $0x3524] ss:$16 sps:$4 sm:$0xff]  }
 0x76a   : > { %12644 = vmatprep.subr.bf16.mxu0 %v19534_v36  ;;  %13792 = vmatprep.subr.bf16.mxu1 %v19537_v40  ;;  %v19622_v36 = vld [vmem:[%s20431_s3 + $0x352c] ss:$16 sps:$4 sm:$0xff]   ;;  %v19617_v40 = vld [vmem:[%s20431_s3 + $0x3520] ss:$16 sps:$4 sm:$0xff]  }
 0x76d   : > { %12645 = vmatpush1.bf16.msra.mxu0 %v19532_v55  ;;  %13793 = vmatpush1.bf16.msra.mxu1 %v19535_v38  ;;  %v19620_v55 = vld [vmem:[%s20431_s3 + $0x3528] ss:$16 sps:$4 sm:$0xff]   ;;  %v19625_v38 = vld [vmem:[%s20431_s3 + $0x3544] ss:$16 sps:$4 sm:$0xff]  }
 0x76e   : > { %12646 = vmatprep.subr.bf16.mxu0 %v19540_v58  ;;  %13794 = vmatprep.subr.bf16.mxu1 %v19543_v41  ;;  %v19628_v58 = vld [vmem:[%s20431_s3 + $0x354c] ss:$16 sps:$4 sm:$0xff]   ;;  %v19623_v41 = vld [vmem:[%s20431_s3 + $0x3540] ss:$16 sps:$4 sm:$0xff]  }
 0x771   : > { %12647 = vmatpush1.bf16.msra.mxu0 %v19538_v61  ;;  %13795 = vmatpush1.bf16.msra.mxu1 %v19541_v29  ;;  %v19626_v61 = vld [vmem:[%s20431_s3 + $0x3548] ss:$16 sps:$4 sm:$0xff]   ;;  %v19631_v29 = vld [vmem:[%s20431_s3 + $0x3564] ss:$16 sps:$4 sm:$0xff]  }
 0x772   : > { %12648 = vmatprep.subr.bf16.mxu0 %v19546_v62  ;;  %13796 = vmatprep.subr.bf16.mxu1 %v19549_v0  ;;  %v19634_v62 = vld [vmem:[%s20431_s3 + $0x356c] ss:$16 sps:$4 sm:$0xff]   ;;  %v19629_v0 = vld [vmem:[%s20431_s3 + $0x3560] ss:$16 sps:$4 sm:$0xff]  }
 0x775   : > { %12649 = vmatpush1.bf16.msra.mxu0 %v19544_v46  ;;  %13797 = vmatpush1.bf16.msra.mxu1 %v19547_v1  ;;  %v19632_v46 = vld [vmem:[%s20431_s3 + $0x3568] ss:$16 sps:$4 sm:$0xff]   ;;  %v19637_v1 = vld [vmem:[%s20431_s3 + $0x3584] ss:$16 sps:$4 sm:$0xff]  }
 0x776   : > { %12650 = vmatprep.subr.bf16.mxu0 %v19552_v53  ;;  %13798 = vmatprep.subr.bf16.mxu1 %v19555_v48  ;;  %v19640_v53 = vld [vmem:[%s20431_s3 + $0x358c] ss:$16 sps:$4 sm:$0xff]   ;;  %v19635_v48 = vld [vmem:[%s20431_s3 + $0x3580] ss:$16 sps:$4 sm:$0xff]  }
 0x779   : > { %12651 = vmatpush1.bf16.msra.mxu0 %v19550_v52  ;;  %13799 = vmatpush1.bf16.msra.mxu1 %v19553_v56  ;;  %v19638_v52 = vld [vmem:[%s20431_s3 + $0x3588] ss:$16 sps:$4 sm:$0xff]   ;;  %v19643_v56 = vld [vmem:[%s20431_s3 + $0x35a4] ss:$16 sps:$4 sm:$0xff]  }
 0x77a   : > { %12652 = vmatprep.subr.bf16.mxu0 %v19558_v5  ;;  %13800 = vmatprep.subr.bf16.mxu1 %v19561_v54  ;;  %v19646_v5 = vld [vmem:[%s20431_s3 + $0x35ac] ss:$16 sps:$4 sm:$0xff]   ;;  %v19641_v54 = vld [vmem:[%s20431_s3 + $0x35a0] ss:$16 sps:$4 sm:$0xff]  }
 0x77d   : > { %12653 = vmatpush1.bf16.msra.mxu0 %v19556_v8  ;;  %13801 = vmatpush1.bf16.msra.mxu1 %v19559_v57  ;;  %v19644_v8 = vld [vmem:[%s20431_s3 + $0x35a8] ss:$16 sps:$4 sm:$0xff]   ;;  %v19649_v57 = vld [vmem:[%s20431_s3 + $0x35c4] ss:$16 sps:$4 sm:$0xff]  }
 0x77e   : > { %12663 = vmatprep.subr.bf16.mxu0 %v19565_v12  ;;  %13811 = vmatprep.subr.bf16.mxu1 %v19568_v43  ;;  %v19652_v12 = vld [vmem:[%s20431_s3 + $0x35cc] ss:$16 sps:$4 sm:$0xff]   ;;  %v716_v43 = vcombine.high %v22366_v3, %v22366_v3  ;;  %v19653_v3 = vld [vmem:[%s20431_s3 + $0x35e0] ss:$16 sps:$4 sm:$0xff]  }
 0x780   : > { %12655 = vmatmul.mubr.bf16.vlgmr.msra.gmra.mrb[0].mxu0 %v839_v15  ;;  %13803 = vmatmul.mubr.bf16.vlgmr.msra.gmra.mrb[0].mxu1 %v839_v15  ;;  %v19650_v15 = vld [vmem:[%s20431_s3 + $0x35c8] ss:$16 sps:$4 sm:$0xff]  }
 0x781   : > { %12664 = vmatpush1.bf16.msra.mxu0 %v19563_v60  ;;  %13812 = vmatpush1.bf16.msra.mxu1 %v19566_v16  ;;  %v19655_v60 = vld [vmem:[%s20431_s3 + $0x35e4] ss:$16 sps:$4 sm:$0xff]   ;;  %v19658_v16 = vld [vmem:[%s20431_s3 + $0x35ec] ss:$16 sps:$4 sm:$0xff]  }
 0x782   : > { %12665 = vmatprep.subr.bf16.mxu0 %v19571_v17  ;;  %13813 = vmatprep.subr.bf16.mxu1 %v19574_v63  ;;  %v22447_v17 = vrot.slane %v716_v43, %v20502_v50  ;;  %v19656_v63 = vld [vmem:[%s20431_s3 + $0x35e8] ss:$16 sps:$4 sm:$0xff]  }
 0x783   : > { %12695 = vmatprep.mubr.bf16.mxu0 %v842_v18  ;;  %13843 = vmatprep.mubr.bf16.mxu1 %v842_v18  ;;  %v19661_v18 = vld [vmem:[%s20431_s3 + $0x3604] ss:$16 sps:$4 sm:$0xff]   ;;  %v19734_v43 = vld [vmem:[%s20431_s3 + $0x3788] ss:$16 sps:$4 sm:$0xff]  }
 0x785   : > { %12666 = vmatpush1.bf16.msra.mxu0 %v19569_v2  ;;  %13814 = vmatpush1.bf16.msra.mxu1 %v19572_v6  ;;  %v19664_v2 = vld [vmem:[%s20431_s3 + $0x360c] ss:$16 sps:$4 sm:$0xff]   ;;  %v732_v6 = vcombine.high %v22447_v17, %v22447_v17 }
 0x786   : > { %12667 = vmatprep.subr.bf16.mxu0 %v19577_v20  ;;  %13815 = vmatprep.subr.bf16.mxu1 %v19580_v4  ;;  %v841_v20 = vpack.c.bf16 %v22374_v59, %v22374_v59  ;;  %v19659_v4 = vld [vmem:[%s20431_s3 + $0x3600] ss:$16 sps:$4 sm:$0xff]  }
 0x787   : > { %v19665_v59 = vld [vmem:[%s20431_s3 + $0x3620] ss:$16 sps:$4 sm:$0xff]  }
 0x789   : > { %12668 = vmatpush1.bf16.msra.mxu0 %v19575_v9  ;;  %13816 = vmatpush1.bf16.msra.mxu1 %v19578_v23  ;;  %v19662_v9 = vld [vmem:[%s20431_s3 + $0x3608] ss:$16 sps:$4 sm:$0xff]   ;;  %v19667_v23 = vld [vmem:[%s20431_s3 + $0x3624] ss:$16 sps:$4 sm:$0xff]  }
 0x78a   : > { %12669 = vmatprep.subr.bf16.mxu0 %v19583_v7  ;;  %13817 = vmatprep.subr.bf16.mxu1 %v19586_v10  ;;  %v19670_v7 = vld [vmem:[%s20431_s3 + $0x362c] ss:$16 sps:$4 sm:$0xff]   ;;  %v844_v10 = vpack.c.bf16 %v732_v6, %v732_v6  ;;  %v19751_v6 = vld [vmem:[%s20431_s3 + $0x37e4] ss:$16 sps:$4 sm:$0xff]  }
 0x78d   : > { %12670 = vmatpush1.bf16.msra.mxu0 %v19581_v28  ;;  %13818 = vmatpush1.bf16.msra.mxu1 %v19584_v31  ;;  %v19668_v28 = vld [vmem:[%s20431_s3 + $0x3628] ss:$16 sps:$4 sm:$0xff]   ;;  %v19673_v31 = vld [vmem:[%s20431_s3 + $0x3644] ss:$16 sps:$4 sm:$0xff]  }
 0x78e   : > { %12671 = vmatprep.subr.bf16.mxu0 %v19589_v11  ;;  %13819 = vmatprep.subr.bf16.mxu1 %v19592_v32  ;;  %v19676_v11 = vld [vmem:[%s20431_s3 + $0x364c] ss:$16 sps:$4 sm:$0xff]   ;;  %v19671_v32 = vld [vmem:[%s20431_s3 + $0x3640] ss:$16 sps:$4 sm:$0xff]  }
 0x791   : > { %12672 = vmatpush1.bf16.msra.mxu0 %v19587_v34  ;;  %13820 = vmatpush1.bf16.msra.mxu1 %v19590_v14  ;;  %v19674_v34 = vld [vmem:[%s20431_s3 + $0x3648] ss:$16 sps:$4 sm:$0xff]   ;;  %v19679_v14 = vld [vmem:[%s20431_s3 + $0x3664] ss:$16 sps:$4 sm:$0xff]  }
 0x792   : > { %12673 = vmatprep.subr.bf16.mxu0 %v19595_v35  ;;  %13821 = vmatprep.subr.bf16.mxu1 %v19598_v21  ;;  %v19682_v35 = vld [vmem:[%s20431_s3 + $0x366c] ss:$16 sps:$4 sm:$0xff]   ;;  %v19677_v21 = vld [vmem:[%s20431_s3 + $0x3660] ss:$16 sps:$4 sm:$0xff]  }
 0x795   : > { %12674 = vmatpush1.bf16.msra.mxu0 %v19593_v27  ;;  %13822 = vmatpush1.bf16.msra.mxu1 %v19596_v19  ;;  %v19680_v27 = vld [vmem:[%s20431_s3 + $0x3668] ss:$16 sps:$4 sm:$0xff]   ;;  %v19685_v19 = vld [vmem:[%s20431_s3 + $0x3684] ss:$16 sps:$4 sm:$0xff]  }
 0x796   : > { %12675 = vmatprep.subr.bf16.mxu0 %v19601_v25  ;;  %13823 = vmatprep.subr.bf16.mxu1 %v19604_v39  ;;  %v19688_v25 = vld [vmem:[%s20431_s3 + $0x368c] ss:$16 sps:$4 sm:$0xff]   ;;  %v19683_v39 = vld [vmem:[%s20431_s3 + $0x3680] ss:$16 sps:$4 sm:$0xff]  }
 0x799   : > { %12676 = vmatpush1.bf16.msra.mxu0 %v19599_v22  ;;  %13824 = vmatpush1.bf16.msra.mxu1 %v19602_v42  ;;  %v19686_v22 = vld [vmem:[%s20431_s3 + $0x3688] ss:$16 sps:$4 sm:$0xff]   ;;  %v19691_v42 = vld [vmem:[%s20431_s3 + $0x36a4] ss:$16 sps:$4 sm:$0xff]  }
 0x79a   : > { %12677 = vmatprep.subr.bf16.mxu0 %v19607_v45  ;;  %13825 = vmatprep.subr.bf16.mxu1 %v19610_v26  ;;  %v19694_v45 = vld [vmem:[%s20431_s3 + $0x36ac] ss:$16 sps:$4 sm:$0xff]   ;;  %v19689_v26 = vld [vmem:[%s20431_s3 + $0x36a0] ss:$16 sps:$4 sm:$0xff]  }
 0x79d   : > { %12678 = vmatpush1.bf16.msra.mxu0 %v19605_v24  ;;  %13826 = vmatpush1.bf16.msra.mxu1 %v19608_v47  ;;  %v19692_v24 = vld [vmem:[%s20431_s3 + $0x36a8] ss:$16 sps:$4 sm:$0xff]   ;;  %v19697_v47 = vld [vmem:[%s20431_s3 + $0x36c4] ss:$16 sps:$4 sm:$0xff]  }
 0x79e   : > { %12679 = vmatprep.subr.bf16.mxu0 %v19613_v49  ;;  %13827 = vmatprep.subr.bf16.mxu1 %v19616_v30  ;;  %v19700_v49 = vld [vmem:[%s20431_s3 + $0x36cc] ss:$16 sps:$4 sm:$0xff]   ;;  %v19695_v30 = vld [vmem:[%s20431_s3 + $0x36c0] ss:$16 sps:$4 sm:$0xff]  }
 0x7a1   : > { %12680 = vmatpush1.bf16.msra.mxu0 %v19611_v51  ;;  %13828 = vmatpush1.bf16.msra.mxu1 %v19614_v37  ;;  %v19698_v51 = vld [vmem:[%s20431_s3 + $0x36c8] ss:$16 sps:$4 sm:$0xff]   ;;  %v19703_v37 = vld [vmem:[%s20431_s3 + $0x36e4] ss:$16 sps:$4 sm:$0xff]  }
 0x7a2   : > { %12681 = vmatprep.subr.bf16.mxu0 %v19619_v33  ;;  %13829 = vmatprep.subr.bf16.mxu1 %v19622_v36  ;;  %v19706_v33 = vld [vmem:[%s20431_s3 + $0x36ec] ss:$16 sps:$4 sm:$0xff]   ;;  %v19701_v36 = vld [vmem:[%s20431_s3 + $0x36e0] ss:$16 sps:$4 sm:$0xff]  }
 0x7a5   : > { %12682 = vmatpush1.bf16.msra.mxu0 %v19617_v40  ;;  %13830 = vmatpush1.bf16.msra.mxu1 %v19620_v55  ;;  %v19704_v40 = vld [vmem:[%s20431_s3 + $0x36e8] ss:$16 sps:$4 sm:$0xff]   ;;  %v19709_v55 = vld [vmem:[%s20431_s3 + $0x3704] ss:$16 sps:$4 sm:$0xff]  }
 0x7a6   : > { %12683 = vmatprep.subr.bf16.mxu0 %v19625_v38  ;;  %13831 = vmatprep.subr.bf16.mxu1 %v19628_v58  ;;  %v19712_v38 = vld [vmem:[%s20431_s3 + $0x370c] ss:$16 sps:$4 sm:$0xff]   ;;  %v19707_v58 = vld [vmem:[%s20431_s3 + $0x3700] ss:$16 sps:$4 sm:$0xff]  }
 0x7a9   : > { %12684 = vmatpush1.bf16.msra.mxu0 %v19623_v41  ;;  %13832 = vmatpush1.bf16.msra.mxu1 %v19626_v61  ;;  %v19710_v41 = vld [vmem:[%s20431_s3 + $0x3708] ss:$16 sps:$4 sm:$0xff]   ;;  %v19715_v61 = vld [vmem:[%s20431_s3 + $0x3724] ss:$16 sps:$4 sm:$0xff]  }
 0x7aa   : > { %12685 = vmatprep.subr.bf16.mxu0 %v19631_v29  ;;  %13833 = vmatprep.subr.bf16.mxu1 %v19634_v62  ;;  %v19718_v29 = vld [vmem:[%s20431_s3 + $0x372c] ss:$16 sps:$4 sm:$0xff]   ;;  %v19713_v62 = vld [vmem:[%s20431_s3 + $0x3720] ss:$16 sps:$4 sm:$0xff]  }
 0x7ad   : > { %12686 = vmatpush1.bf16.msra.mxu0 %v19629_v0  ;;  %13834 = vmatpush1.bf16.msra.mxu1 %v19632_v46  ;;  %v19716_v0 = vld [vmem:[%s20431_s3 + $0x3728] ss:$16 sps:$4 sm:$0xff]   ;;  %v19721_v46 = vld [vmem:[%s20431_s3 + $0x3744] ss:$16 sps:$4 sm:$0xff]  }
 0x7ae   : > { %12687 = vmatprep.subr.bf16.mxu0 %v19637_v1  ;;  %13835 = vmatprep.subr.bf16.mxu1 %v19640_v53  ;;  %v19724_v1 = vld [vmem:[%s20431_s3 + $0x374c] ss:$16 sps:$4 sm:$0xff]   ;;  %v19719_v53 = vld [vmem:[%s20431_s3 + $0x3740] ss:$16 sps:$4 sm:$0xff]  }
 0x7b1   : > { %12688 = vmatpush1.bf16.msra.mxu0 %v19635_v48  ;;  %13836 = vmatpush1.bf16.msra.mxu1 %v19638_v52  ;;  %v19722_v48 = vld [vmem:[%s20431_s3 + $0x3748] ss:$16 sps:$4 sm:$0xff]   ;;  %v19727_v52 = vld [vmem:[%s20431_s3 + $0x3764] ss:$16 sps:$4 sm:$0xff]  }
 0x7b2   : > { %12689 = vmatprep.subr.bf16.mxu0 %v19643_v56  ;;  %13837 = vmatprep.subr.bf16.mxu1 %v19646_v5  ;;  %v19730_v56 = vld [vmem:[%s20431_s3 + $0x376c] ss:$16 sps:$4 sm:$0xff]   ;;  %v19725_v5 = vld [vmem:[%s20431_s3 + $0x3760] ss:$16 sps:$4 sm:$0xff]  }
 0x7b5   : > { %12690 = vmatpush1.bf16.msra.mxu0 %v19641_v54  ;;  %13838 = vmatpush1.bf16.msra.mxu1 %v19644_v8  ;;  %v19728_v54 = vld [vmem:[%s20431_s3 + $0x3768] ss:$16 sps:$4 sm:$0xff]   ;;  %v19733_v8 = vld [vmem:[%s20431_s3 + $0x3784] ss:$16 sps:$4 sm:$0xff]  }
 0x7b6   : > { %12691 = vmatprep.subr.bf16.mxu0 %v19649_v57  ;;  %13839 = vmatprep.subr.bf16.mxu1 %v19652_v12  ;;  %v19736_v57 = vld [vmem:[%s20431_s3 + $0x378c] ss:$16 sps:$4 sm:$0xff]   ;;  %v19731_v12 = vld [vmem:[%s20431_s3 + $0x3780] ss:$16 sps:$4 sm:$0xff]  }
 0x7b9   : > { %12692 = vmatpush1.bf16.msra.mxu0 %v19647_v13  ;;  %13840 = vmatpush1.bf16.msra.mxu1 %v19650_v15  ;;  %v19739_v13 = vld [vmem:[%s20431_s3 + $0x37a4] ss:$16 sps:$4 sm:$0xff]   ;;  %v19742_v15 = vld [vmem:[%s20431_s3 + $0x37ac] ss:$16 sps:$4 sm:$0xff]  }
 0x7ba   : > { %12693 = vmatprep.subr.bf16.mxu0 %v19655_v60  ;;  %13841 = vmatprep.subr.bf16.mxu1 %v19658_v16  ;;  %v19737_v60 = vld [vmem:[%s20431_s3 + $0x37a0] ss:$16 sps:$4 sm:$0xff]   ;;  %v19740_v16 = vld [vmem:[%s20431_s3 + $0x37a8] ss:$16 sps:$4 sm:$0xff]  }
 0x7bd   : > { %12694 = vmatpush1.bf16.msra.mxu0 %v19653_v3  ;;  %13842 = vmatpush1.bf16.msra.mxu1 %v19656_v63  ;;  %v19745_v3 = vld [vmem:[%s20431_s3 + $0x37c4] ss:$16 sps:$4 sm:$0xff]   ;;  %v19748_v63 = vld [vmem:[%s20431_s3 + $0x37cc] ss:$16 sps:$4 sm:$0xff]  }
 0x7be   : > { %12704 = vmatprep.subr.bf16.mxu0 %v19661_v18  ;;  %13852 = vmatprep.subr.bf16.mxu1 %v19664_v2  ;;  %v19743_v18 = vld [vmem:[%s20431_s3 + $0x37c0] ss:$16 sps:$4 sm:$0xff]   ;;  %v19746_v2 = vld [vmem:[%s20431_s3 + $0x37c8] ss:$16 sps:$4 sm:$0xff]  }
 0x7c0   : > { %12696 = vmatmul.mubr.bf16.vlgmr.msra.gmra.mrb[0].mxu0 %v841_v20  ;;  %13844 = vmatmul.mubr.bf16.vlgmr.msra.gmra.mrb[0].mxu1 %v841_v20  ;;  %v19754_v20 = vld [vmem:[%s20431_s3 + $0x37ec] ss:$16 sps:$4 sm:$0xff]  }
 0x7c1   : > { %12705 = vmatpush1.bf16.msra.mxu0 %v19659_v4  ;;  %13853 = vmatpush1.bf16.msra.mxu1 %v19662_v9  ;;  %v19749_v4 = vld [vmem:[%s20431_s3 + $0x37e0] ss:$16 sps:$4 sm:$0xff]   ;;  %v19752_v9 = vld [vmem:[%s20431_s3 + $0x37e8] ss:$16 sps:$4 sm:$0xff]  }
 0x7c2   : > { %12706 = vmatprep.subr.bf16.mxu0 %v19667_v23  ;;  %13854 = vmatprep.subr.bf16.mxu1 %v19670_v7  ;;  %v843_v23 = vpack.c.bf16 %v22447_v17, %v22447_v17 }
 0x7c3   : > { %12736 = vmatprep.mubr.bf16.mxu0 %v844_v10  ;;  %13884 = vmatprep.mubr.bf16.mxu1 %v844_v10 }
 0x7c5   : > { %12707 = vmatpush1.bf16.msra.mxu0 %v19665_v59  ;;  %13855 = vmatpush1.bf16.msra.mxu1 %v19668_v28 }
 0x7c6   : > { %12708 = vmatprep.subr.bf16.mxu0 %v19673_v31  ;;  %13856 = vmatprep.subr.bf16.mxu1 %v19676_v11 }
 0x7c9   : > { %12709 = vmatpush1.bf16.msra.mxu0 %v19671_v32  ;;  %13857 = vmatpush1.bf16.msra.mxu1 %v19674_v34 }
 0x7ca   : > { %12710 = vmatprep.subr.bf16.mxu0 %v19679_v14  ;;  %13858 = vmatprep.subr.bf16.mxu1 %v19682_v35 }
 0x7cd   : > { %12711 = vmatpush1.bf16.msra.mxu0 %v19677_v21  ;;  %13859 = vmatpush1.bf16.msra.mxu1 %v19680_v27 }
 0x7ce   : > { %12712 = vmatprep.subr.bf16.mxu0 %v19685_v19  ;;  %13860 = vmatprep.subr.bf16.mxu1 %v19688_v25  ;;  %v466_v19 = vld [vmem:[#allocation2] sm:$0xff] }
 0x7d1   : > { %12713 = vmatpush1.bf16.msra.mxu0 %v19683_v39  ;;  %13861 = vmatpush1.bf16.msra.mxu1 %v19686_v22  ;;  %v13961_v39 = vld [vmem:[#allocation11 + $0x8] sm:$0xff] (!%p16426_p9)  ;;  %v13963_v22 = vld [vmem:[#allocation11 + $0x18] sm:$0xff] (!%p16426_p9) }
 0x7d2   : > { %12714 = vmatprep.subr.bf16.mxu0 %v19691_v42  ;;  %13862 = vmatprep.subr.bf16.mxu1 %v19694_v45  ;;  %v13960_v42 = vld [vmem:[#allocation11] sm:$0xff] (!%p16426_p9)  ;;  %v16525_v45 = vpack.c.bf16 (!%p16426_p9), %v13963_v22, %v13961_v39 }
 0x7d5   : > { %12715 = vmatpush1.bf16.msra.mxu0 %v19689_v26  ;;  %13863 = vmatpush1.bf16.msra.mxu1 %v19692_v24  ;;  %v13962_v26 = vld [vmem:[#allocation11 + $0x10] sm:$0xff] (!%p16426_p9)  ;;  %v13965_v24 = vld [vmem:[#allocation11 + $0x28] sm:$0xff] (!%p16426_p9) }
 0x7d6   : > { %12716 = vmatprep.subr.bf16.mxu0 %v19697_v47  ;;  %13864 = vmatprep.subr.bf16.mxu1 %v19700_v49  ;;  %v13967_v47 = vld [vmem:[#allocation11 + $0x38] sm:$0xff] (!%p16426_p9)  ;;  %v16527_v49 = vpack.c.bf16 (!%p16426_p9), %v13962_v26, %v13960_v42  ;;  %v13994_v26 = vld [vmem:[#allocation11 + $0x110] sm:$0xff] (!%p16426_p9) }
 0x7d9   : > { %12717 = vmatpush1.bf16.msra.mxu0 %v19695_v30  ;;  %13865 = vmatpush1.bf16.msra.mxu1 %v19698_v51  ;;  %v16529_v30 = vpack.c.bf16 (!%p16426_p9), %v13967_v47, %v13965_v24  ;;  %v13964_v51 = vld [vmem:[#allocation11 + $0x20] sm:$0xff] (!%p16426_p9)  ;;  %v13997_v47 = vld [vmem:[#allocation11 + $0x128] sm:$0xff] (!%p16426_p9) }
 0x7da   : > { %12718 = vmatprep.subr.bf16.mxu0 %v19703_v37  ;;  %13866 = vmatprep.subr.bf16.mxu1 %v19706_v33  ;;  %v13966_v37 = vld [vmem:[#allocation11 + $0x30] sm:$0xff] (!%p16426_p9)  ;;  %v13969_v33 = vld [vmem:[#allocation11 + $0x48] sm:$0xff] (!%p16426_p9) }
 0x7dd   : > { %12719 = vmatpush1.bf16.msra.mxu0 %v19701_v36  ;;  %13867 = vmatpush1.bf16.msra.mxu1 %v19704_v40  ;;  %v13971_v36 = vld [vmem:[#allocation11 + $0x58] sm:$0xff] (!%p16426_p9)  ;;  %v16531_v40 = vpack.c.bf16 (!%p16426_p9), %v13966_v37, %v13964_v51 }
 0x7de   : > { %12720 = vmatprep.subr.bf16.mxu0 %v19709_v55  ;;  %13868 = vmatprep.subr.bf16.mxu1 %v19712_v38  ;;  %v16533_v55 = vpack.c.bf16 (!%p16426_p9), %v13971_v36, %v13969_v33  ;;  %v13968_v38 = vld [vmem:[#allocation11 + $0x40] sm:$0xff] (!%p16426_p9)  ;;  %v13998_v36 = vld [vmem:[#allocation11 + $0x130] sm:$0xff] (!%p16426_p9) }
 0x7df   : > { %v13996_v33 = vld [vmem:[#allocation11 + $0x120] sm:$0xff] (!%p16426_p9) }
 0x7e1   : > { %12721 = vmatpush1.bf16.msra.mxu0 %v19707_v58  ;;  %13869 = vmatpush1.bf16.msra.mxu1 %v19710_v41  ;;  %v13970_v58 = vld [vmem:[#allocation11 + $0x50] sm:$0xff] (!%p16426_p9)  ;;  %v13973_v41 = vld [vmem:[#allocation11 + $0x68] sm:$0xff] (!%p16426_p9) }
 0x7e2   : > { %12722 = vmatprep.subr.bf16.mxu0 %v19715_v61  ;;  %13870 = vmatprep.subr.bf16.mxu1 %v19718_v29  ;;  %v13975_v61 = vld [vmem:[#allocation11 + $0x78] sm:$0xff] (!%p16426_p9)  ;;  %v16535_v29 = vpack.c.bf16 (!%p16426_p9), %v13970_v58, %v13968_v38 }
 0x7e3   : > { %v14003_v38 = vld [vmem:[#allocation11 + $0x158] sm:$0xff] (!%p16426_p9) }
 0x7e5   : > { %12723 = vmatpush1.bf16.msra.mxu0 %v19713_v62  ;;  %13871 = vmatpush1.bf16.msra.mxu1 %v19716_v0  ;;  %v16537_v62 = vpack.c.bf16 (!%p16426_p9), %v13975_v61, %v13973_v41  ;;  %v13972_v0 = vld [vmem:[#allocation11 + $0x60] sm:$0xff] (!%p16426_p9)  ;;  %v16563_v41 = vpack.c.bf16 (!%p16426_p9), %v13998_v36, %v13996_v33  ;;  %v14021_v33 = vld [vmem:[#allocation11 + $0x1e8] sm:$0xff] (!%p16426_p9)  ;;  %v14023_v36 = vld [vmem:[#allocation11 + $0x1f8] sm:$0xff] (!%p16426_p9) }
 0x7e6   : > { %12724 = vmatprep.subr.bf16.mxu0 %v19721_v46  ;;  %13872 = vmatprep.subr.bf16.mxu1 %v19724_v1  ;;  %v13974_v46 = vld [vmem:[#allocation11 + $0x70] sm:$0xff] (!%p16426_p9)  ;;  %v13977_v1 = vld [vmem:[#allocation11 + $0x88] sm:$0xff] (!%p16426_p9) }
 0x7e9   : > { %12725 = vmatpush1.bf16.msra.mxu0 %v19719_v53  ;;  %13873 = vmatpush1.bf16.msra.mxu1 %v19722_v48  ;;  %v13979_v53 = vld [vmem:[#allocation11 + $0x98] sm:$0xff] (!%p16426_p9)  ;;  %v16539_v48 = vpack.c.bf16 (!%p16426_p9), %v13974_v46, %v13972_v0  ;;  %v14005_v46 = vld [vmem:[#allocation11 + $0x168] sm:$0xff] (!%p16426_p9) }
 0x7ea   : > { %12726 = vmatprep.subr.bf16.mxu0 %v19727_v52  ;;  %13874 = vmatprep.subr.bf16.mxu1 %v19730_v56  ;;  %v16541_v52 = vpack.c.bf16 (!%p16426_p9), %v13979_v53, %v13977_v1  ;;  %v13976_v56 = vld [vmem:[#allocation11 + $0x80] sm:$0xff] (!%p16426_p9)  ;;  %v14007_v1 = vld [vmem:[#allocation11 + $0x178] sm:$0xff] (!%p16426_p9) }
 0x7ed   : > { %12727 = vmatpush1.bf16.msra.mxu0 %v19725_v5  ;;  %13875 = vmatpush1.bf16.msra.mxu1 %v19728_v54  ;;  %v13978_v5 = vld [vmem:[#allocation11 + $0x90] sm:$0xff] (!%p16426_p9)  ;;  %v13981_v54 = vld [vmem:[#allocation11 + $0xa8] sm:$0xff] (!%p16426_p9) }
 0x7ee   : > { %12728 = vmatprep.subr.bf16.mxu0 %v19733_v8  ;;  %13876 = vmatprep.subr.bf16.mxu1 %v19736_v57  ;;  %v13983_v8 = vld [vmem:[#allocation11 + $0xb8] sm:$0xff] (!%p16426_p9)  ;;  %v16543_v57 = vpack.c.bf16 (!%p16426_p9), %v13978_v5, %v13976_v56  ;;  %v14006_v56 = vld [vmem:[#allocation11 + $0x170] sm:$0xff] (!%p16426_p9)  ;;  %v14009_v5 = vld [vmem:[#allocation11 + $0x188] sm:$0xff] (!%p16426_p9) }
 0x7f1   : > { %12729 = vmatpush1.bf16.msra.mxu0 %v19731_v12  ;;  %13877 = vmatpush1.bf16.msra.mxu1 %v19734_v43  ;;  %v16545_v12 = vpack.c.bf16 (!%p16426_p9), %v13983_v8, %v13981_v54  ;;  %v13980_v43 = vld [vmem:[#allocation11 + $0xa0] sm:$0xff] (!%p16426_p9)  ;;  %v14011_v54 = vld [vmem:[#allocation11 + $0x198] sm:$0xff] (!%p16426_p9) }
 0x7f2   : > { %12730 = vmatprep.subr.bf16.mxu0 %v19739_v13  ;;  %13878 = vmatprep.subr.bf16.mxu1 %v19742_v15  ;;  %v13982_v13 = vld [vmem:[#allocation11 + $0xb0] sm:$0xff] (!%p16426_p9)  ;;  %v13985_v15 = vld [vmem:[#allocation11 + $0xc8] sm:$0xff] (!%p16426_p9)  ;;  %v14008_v8 = vld [vmem:[#allocation11 + $0x180] sm:$0xff] (!%p16426_p9) }
 0x7f5   : > { %12731 = vmatpush1.bf16.msra.mxu0 %v19737_v60  ;;  %13879 = vmatpush1.bf16.msra.mxu1 %v19740_v16  ;;  %v13987_v60 = vld [vmem:[#allocation11 + $0xd8] sm:$0xff] (!%p16426_p9)  ;;  %v13926_v16 = vsub.s32 (!%p16426_p9), 0, %v20494_v44 }
 0x7f6   : > { %12732 = vmatprep.subr.bf16.mxu0 %v19745_v3  ;;  %13880 = vmatprep.subr.bf16.mxu1 %v19748_v63  ;;  %v13930_v3 = vsub.s32 (!%p16426_p9), 1, %v20494_v44  ;;  %v13934_v63 = vsub.s32 (!%p16426_p9), 2, %v20494_v44 }
 0x7f9   : > { %12733 = vmatpush1.bf16.msra.mxu0 %v19743_v18  ;;  %13881 = vmatpush1.bf16.msra.mxu1 %v19746_v2  ;;  %v13938_v18 = vsub.s32 (!%p16426_p9), 3, %v20494_v44  ;;  %v16547_v2 = vpack.c.bf16 (!%p16426_p9), %v13982_v13, %v13980_v43  ;;  %v14283_v43 = vld [vmem:[#allocation14 + $0x88] sm:$0xff] (!%p16426_p9) }
 0x7fa   : > { %12734 = vmatprep.subr.bf16.mxu0 %v19751_v6  ;;  %13882 = vmatprep.subr.bf16.mxu1 %v19754_v20  ;;  %v16549_v6 = vpack.c.bf16 (!%p16426_p9), %v13987_v60, %v13985_v15  ;;  %v13984_v20 = vld [vmem:[#allocation11 + $0xc0] sm:$0xff] (!%p16426_p9)  ;;  %v14013_v15 = vld [vmem:[#allocation11 + $0x1a8] sm:$0xff] (!%p16426_p9) }
 0x7fb   : > { %v14378_v44 = vld [vmem:[%s22647_s8 + $0x10] sm:$0xff] (!%p16426_p9) }
 0x7fd   : > { %12735 = vmatpush1.bf16.msra.mxu0 %v19749_v4  ;;  %13883 = vmatpush1.bf16.msra.mxu1 %v19752_v9  ;;  %v13986_v4 = vld [vmem:[#allocation11 + $0xd0] sm:$0xff] (!%p16426_p9)  ;;  %v13922_v9 = vld [vmem:[#allocation10] sm:$0xf] (!%p16426_p9) }
 0x7fe   : > { %16526 = vmatprep.subr.bf16.mxu0 (!%p16426_p9), %v16525_v45  ;;  %v13992_v45 = vld [vmem:[#allocation11 + $0x100] sm:$0xff] (!%p16426_p9) }
 0x7ff   : > { %v16559_v51 = vpack.c.bf16 (!%p16426_p9), %v13994_v26, %v13992_v45  ;;  %v14016_v45 = vld [vmem:[#allocation11 + $0x1c0] sm:$0xff] (!%p16426_p9) }
 0x800   : > { %12737 = vmatmul.mubr.bf16.vlgmr.msra.gmra.mrb[0].mxu0 %v843_v23  ;;  %13885 = vmatmul.mubr.bf16.vlgmr.msra.gmra.mrb[0].mxu1 %v843_v23  ;;  %v13989_v23 = vld [vmem:[#allocation11 + $0xe8] sm:$0xff] (!%p16426_p9) }
 0x801   : > { %16528 = vmatpush1.bf16.msra.mxu0 (!%p16426_p9), %v16527_v49  ;;  %v13999_v49 = vld [vmem:[#allocation11 + $0x138] sm:$0xff] (!%p16426_p9) }
 0x802   : > { %16530 = vmatprep.subr.bf16.mxu0 (!%p16426_p9), %v16529_v30  ;;  %v16561_v37 = vpack.c.bf16 (!%p16426_p9), %v13999_v49, %v13997_v47  ;;  %v14273_v47 = vld [vmem:[#allocation14 + $0x38] sm:$0xff] (!%p16426_p9) }
 0x805   : > { %16532 = vmatpush1.bf16.msra.mxu0 (!%p16426_p9), %v16531_v40 }
 0x806   : > { %16534 = vmatprep.subr.bf16.mxu0 (!%p16426_p9), %v16533_v55  ;;  %v14001_v55 = vld [vmem:[#allocation11 + $0x148] sm:$0xff] (!%p16426_p9) }
 0x807   : > { %v16565_v61 = vpack.c.bf16 (!%p16426_p9), %v14003_v38, %v14001_v55 }
 0x809   : > { %16536 = vmatpush1.bf16.msra.mxu0 (!%p16426_p9), %v16535_v29  ;;  %v14000_v29 = vld [vmem:[#allocation11 + $0x140] sm:$0xff] (!%p16426_p9) }
 0x80a   : > { %16538 = vmatprep.subr.bf16.mxu0 (!%p16426_p9), %v16537_v62  ;;  %v14002_v62 = vld [vmem:[#allocation11 + $0x150] sm:$0xff] (!%p16426_p9) }
 0x80b   : > { %v16567_v53 = vpack.c.bf16 (!%p16426_p9), %v14002_v62, %v14000_v29  ;;  %v14274_v62 = vld [vmem:[#allocation14 + $0x40] sm:$0xff] (!%p16426_p9) }
 0x80d   : > { %16540 = vmatpush1.bf16.msra.mxu0 (!%p16426_p9), %v16539_v48  ;;  %v16569_v48 = vpack.c.bf16 (!%p16426_p9), %v14007_v1, %v14005_v46  ;;  %v16585_v46 = vpack.c.bf16 (!%p16426_p9), %v14023_v36, %v14021_v33  ;;  %v14022_v1 = vld [vmem:[#allocation11 + $0x1f0] sm:$0xff] (!%p16426_p9) }
 0x80e   : > { %16542 = vmatprep.subr.bf16.mxu0 (!%p16426_p9), %v16541_v52  ;;  %v14004_v52 = vld [vmem:[#allocation11 + $0x160] sm:$0xff] (!%p16426_p9) }
 0x80f   : > { %v16571_v13 = vpack.c.bf16 (!%p16426_p9), %v14006_v56, %v14004_v52  ;;  %v14025_v52 = vld [vmem:[#allocation11 + $0x208] sm:$0xff] (!%p16426_p9)  ;;  %v14027_v56 = vld [vmem:[#allocation11 + $0x218] sm:$0xff] (!%p16426_p9) }
 0x811   : > { %16544 = vmatpush1.bf16.msra.mxu0 (!%p16426_p9), %v16543_v57  ;;  %v14010_v57 = vld [vmem:[#allocation11 + $0x190] sm:$0xff] (!%p16426_p9) }
 0x812   : > { %16546 = vmatprep.subr.bf16.mxu0 (!%p16426_p9), %v16545_v12  ;;  %v14282_v12 = vld [vmem:[#allocation14 + $0x80] sm:$0xff] (!%p16426_p9) }
 0x813   : > { %v16653_v60 = vpack.c.bf16 (!%p16426_p9), %v14283_v43, %v14282_v12  ;;  %v14277_v12 = vld [vmem:[#allocation14 + $0x58] sm:$0xff] (!%p16426_p9)  ;;  %v16589_v43 = vpack.c.bf16 (!%p16426_p9), %v14027_v56, %v14025_v52 }
 0x814   : > { %v14056_v56 = vld [vmem:[#allocation11 + $0x300] sm:$0xff] (!%p16426_p9) }
 0x815   : > { %16548 = vmatpush1.bf16.msra.mxu0 (!%p16426_p9), %v16547_v2  ;;  %v14284_v2 = vld [vmem:[#allocation14 + $0x90] sm:$0xff] (!%p16426_p9)  ;;  %16654 = vmatprep.subr.bf16.mxu1 (!%p16426_p9), %v16653_v60  ;;  %v14029_v60 = vld [vmem:[#allocation11 + $0x228] sm:$0xff] (!%p16426_p9) }
 0x816   : > { %16550 = vmatprep.subr.bf16.mxu0 (!%p16426_p9), %v16549_v6  ;;  %v16573_v6 = vpack.c.bf16 (!%p16426_p9), %v14011_v54, %v14009_v5 }
 0x8d3   : > { %v12738_v7 = vpop.f32.mrb[0].mxu0  ;;  %v13886_v10 = vpop.f32.mrb[0].mxu1 }
 0x8d4   : > { %v12740_v59 = vpop.f32.mrb[1].mxu0  ;;  %v13888_v28 = vpop.f32.mrb[1].mxu1 }
 0x8d5   : > { %v13897_v31 = vcombine.low %v12738_v7, %v12740_v59  ;;  %v13898_v11 = vcombine.low %v13886_v10, %v13888_v28  ;;  %v12742_v32 = vpop.f32.mrb[2].mxu0  ;;  %v13890_v34 = vpop.f32.mrb[2].mxu1  ;;  %v13991_v7 = vld [vmem:[#allocation11 + $0xf8] sm:$0xff] (!%p16426_p9)  ;;  %v13927_v10 = vrot.slane (!%p16426_p9), %v13922_v9, %v13926_v16  ;;  %v13931_v59 = vrot.slane (!%p16426_p9), %v13922_v9, %v13930_v3 }
 0x8d6   : > { %v12743_v14 = vpop.f32.mrb[3].mxu0  ;;  %v13891_v35 = vpop.f32.mrb[3].mxu1  ;;  %v13935_v28 = vrot.slane (!%p16426_p9), %v13922_v9, %v13934_v63  ;;  %v16553_v34 = vpack.c.bf16 (!%p16426_p9), %v13991_v7, %v13989_v23  ;;  %v14266_v63 = vld [vmem:[#allocation14] sm:$0xff] (!%p16426_p9)  ;;  %v14269_v23 = vld [vmem:[#allocation14 + $0x18] sm:$0xff] (!%p16426_p9) }
 0x8d7   : > { %v13905_v21 = vrot.slane %v13897_v31, %v20502_v50  ;;  %v13912_v27 = vrot.slane %v13898_v11, %v20502_v50  ;;  %13920 = sbr.rel (%p16426_p9) target bundleno = 3046 (0xbe6), region = 96  ;;  %v13939_v31 = vrot.slane (!%p16426_p9), %v13922_v9, %v13938_v18  ;;  %v16551_v11 = vpack.c.bf16 (!%p16426_p9), %v13986_v4, %v13984_v20  ;;  %v13988_v14 = vld [vmem:[#allocation11 + $0xe0] sm:$0xff] (!%p16426_p9)  ;;  %v13990_v35 = vld [vmem:[#allocation11 + $0xf0] sm:$0xff] (!%p16426_p9)  ;;  %v14015_v7 = vld [vmem:[#allocation11 + $0x1b8] sm:$0xff] (!%p16426_p9) }
 0x8d8   : > { %v13940_v32 = vcombine.low (!%p16426_p9), %v13927_v10, %v13931_v59  ;;  %v16555_v39 = vpack.c.bf16 (!%p16426_p9), %v13990_v35, %v13988_v14  ;;  %v14267_v18 = vld [vmem:[#allocation14 + $0x8] sm:$0xff] (!%p16426_p9)  ;;  %v14285_v4 = vld [vmem:[#allocation14 + $0x98] sm:$0xff] (!%p16426_p9)  ;;  %v14268_v9 = vld [vmem:[#allocation14 + $0x10] sm:$0xff] (!%p16426_p9) }
 0x8d9   : > { %v13913_v17 = vcombine.low %v13905_v21, %v13912_v27  ;;  %v13941_v21 = vcombine.low (!%p16426_p9), %v13935_v28, %v13939_v31  ;;  %v13993_v27 = vld [vmem:[#allocation11 + $0x108] sm:$0xff] (!%p16426_p9)  ;;  %16552 = vmatpush1.bf16.msra.mxu0 (!%p16426_p9), %v16551_v11  ;;  %v16655_v20 = vpack.c.bf16 (!%p16426_p9), %v14267_v18, %v14266_v63  ;;  %v16657_v10 = vpack.c.bf16 (!%p16426_p9), %v14285_v4, %v14284_v2  ;;  %v14031_v63 = vld [vmem:[#allocation11 + $0x238] sm:$0xff] (!%p16426_p9) }
 0x8da   : > { %16554 = vmatprep.subr.bf16.mxu0 (!%p16426_p9), %v16553_v34  ;;  %v14286_v59 = vld [vmem:[#allocation14 + $0xa0] sm:$0xff] (!%p16426_p9)  ;;  %v14287_v28 = vld [vmem:[#allocation14 + $0xa8] sm:$0xff] (!%p16426_p9)  ;;  %v16659_v31 = vpack.c.bf16 (!%p16426_p9), %v14269_v23, %v14268_v9  ;;  %v16575_v11 = vpack.c.bf16 (!%p16426_p9), %v14010_v57, %v14008_v8  ;;  %v14276_v57 = vld [vmem:[#allocation14 + $0x50] sm:$0xff] (!%p16426_p9)  ;;  %v16593_v4 = vpack.c.bf16 (!%p16426_p9), %v14031_v63, %v14029_v60 }
 0x8db   : > { %v13915_v25 = vadd.f32 %v13913_v17, %v466_v19  ;;  %v13995_v19 = vld [vmem:[#allocation11 + $0x118] sm:$0xff] (!%p16426_p9)  ;;  %v13948_v17 = vrot.slane (!%p16426_p9), %v13940_v32, %v20502_v50  ;;  %16656 = vmatpush3.bf16.msra.mxu1 (!%p16426_p9), %v16655_v20  ;;  %v14012_v32 = vld [vmem:[#allocation11 + $0x1a0] sm:$0xff] (!%p16426_p9)  ;;  %v16661_v34 = vpack.c.bf16 (!%p16426_p9), %v14287_v28, %v14286_v59  ;;  %v14271_v35 = vld [vmem:[#allocation14 + $0x28] sm:$0xff] (!%p16426_p9) }
 0x8dc   : > { %v16557_v42 = vpack.c.bf16 (!%p16426_p9), %v13995_v19, %v13993_v27  ;;  %16658 = vmatprep.subr.bf16.mxu1 (!%p16426_p9), %v16657_v10  ;;  %v14270_v14 = vld [vmem:[#allocation14 + $0x20] sm:$0xff] (!%p16426_p9)  ;;  %v14014_v27 = vld [vmem:[#allocation11 + $0x1b0] sm:$0xff] (!%p16426_p9)  ;;  %v14035_v59 = vld [vmem:[#allocation11 + $0x258] sm:$0xff] (!%p16426_p9) }
 0x8dd   : > { %13916 = vst [vmem:[#allocation2] sm:$0xff] %v13915_v25  ;;  %v13955_v25 = vrot.slane (!%p16426_p9), %v13941_v21, %v20502_v50  ;;  %16556 = vmatpush1.bf16.msra.mxu0 (!%p16426_p9), %v16555_v39  ;;  %v16577_v21 = vpack.c.bf16 (!%p16426_p9), %v14015_v7, %v14013_v15  ;;  %v14288_v19 = vld [vmem:[#allocation14 + $0xb0] sm:$0xff] (!%p16426_p9)  ;;  %v14294_v18 = vld [vmem:[#allocation14 + $0xe0] sm:$0xff] (!%p16426_p9)  ;;  %v14295_v2 = vld [vmem:[#allocation14 + $0xe8] sm:$0xff] (!%p16426_p9) }
 0x8de   : > { %16558 = vmatprep.subr.bf16.mxu0 %v16557_v42  ;;  %v14019_v39 = vld [vmem:[#allocation11 + $0x1d8] sm:$0xff]  ;;  %v16579_v42 = vpack.c.bf16 %v14014_v27, %v14012_v32  ;;  %v14026_v15 = vld [vmem:[#allocation11 + $0x210] sm:$0xff]  ;;  %v14028_v9 = vld [vmem:[#allocation11 + $0x220] sm:$0xff]  ;;  %v16677_v7 = vpack.c.bf16 %v14295_v2, %v14294_v18 }
 0x8df   : > { %v13956_v24 = vcombine.low %v13948_v17, %v13955_v25  ;;  %v14289_v17 = vld [vmem:[#allocation14 + $0xb8] sm:$0xff]  ;;  %v14017_v25 = vld [vmem:[#allocation11 + $0x1c8] sm:$0xff]  ;;  %16660 = vmatpush3.bf16.msra.mxu1 %v16659_v31  ;;  %v14030_v23 = vld [vmem:[#allocation11 + $0x230] sm:$0xff] }
 0x8e0   : > { %16662 = vmatprep.subr.bf16.mxu1 %v16661_v34  ;;  %v16665_v26 = vpack.c.bf16 %v14289_v17, %v14288_v19  ;;  %v16581_v49 = vpack.c.bf16 %v14019_v39, %v14017_v25  ;;  %v14033_v10 = vld [vmem:[#allocation11 + $0x248] sm:$0xff]  ;;  %v16595_v28 = vpack.c.bf16 %v14030_v23, %v14028_v9  ;;  %v14034_v32 = vld [vmem:[#allocation11 + $0x250] sm:$0xff]  ;;  %v14036_v27 = vld [vmem:[#allocation11 + $0x260] sm:$0xff] }
 0x8e1   : > { %16560 = vmatpush1.bf16.msra.mxu0 %v16559_v51  ;;  %v14290_v51 = vld [vmem:[#allocation14 + $0xc0] sm:$0xff]  ;;  %v16597_v31 = vpack.c.bf16 %v14035_v59, %v14033_v10  ;;  %v14038_v19 = vld [vmem:[#allocation11 + $0x270] sm:$0xff]  ;;  %v14043_v25 = vld [vmem:[#allocation11 + $0x298] sm:$0xff] }
 0x8e2   : > { %16562 = vmatprep.subr.bf16.mxu0 %v16561_v37  ;;  %v14291_v37 = vld [vmem:[#allocation14 + $0xc8] sm:$0xff]  ;;  %v14067_v60 = vld [vmem:[#allocation11 + $0x358] sm:$0xff]  ;;  %v14064_v2 = vld [vmem:[#allocation11 + $0x340] sm:$0xff] }
 0x8e3   : > { %v16669_v29 = vpack.c.bf16 %v14291_v37, %v14290_v51  ;;  %v14037_v34 = vld [vmem:[#allocation11 + $0x268] sm:$0xff]  ;;  %v14051_v37 = vld [vmem:[#allocation11 + $0x2d8] sm:$0xff]  ;;  %v14068_v23 = vld [vmem:[#allocation11 + $0x360] sm:$0xff] }
 0x8e4   : > { %v13921_v22 = vld [vmem:[#allocation2] sm:$0xff]  ;;  %v14041_v17 = vld [vmem:[#allocation11 + $0x288] sm:$0xff] }
 0x8e5   : > { %v13958_v30 = vadd.f32 %v13956_v24, %v13921_v22  ;;  %16564 = vmatpush1.bf16.msra.mxu0 %v16563_v41  ;;  %v16663_v22 = vpack.c.bf16 %v14271_v35, %v14270_v14  ;;  %v14272_v24 = vld [vmem:[#allocation14 + $0x30] sm:$0xff]  ;;  %v14020_v41 = vld [vmem:[#allocation11 + $0x1e0] sm:$0xff]  ;;  %v16605_v39 = vpack.c.bf16 %v14043_v25, %v14041_v17  ;;  %v14049_v51 = vld [vmem:[#allocation11 + $0x2c8] sm:$0xff] }
 0x8e6   : > { %16566 = vmatprep.subr.bf16.mxu0 %v16565_v61  ;;  %v16667_v55 = vpack.c.bf16 %v14273_v47, %v14272_v24  ;;  %v16587_v54 = vpack.c.bf16 %v14022_v1, %v14020_v41  ;;  %v14039_v14 = vld [vmem:[#allocation11 + $0x278] sm:$0xff]  ;;  %v16613_v36 = vpack.c.bf16 %v14051_v37, %v14049_v51  ;;  %v14053_v41 = vld [vmem:[#allocation11 + $0x2e8] sm:$0xff] }
 0x8e7   : > { %v22534_v40 = vmax.f32 %v13958_v30, 0.0  ;;  %v14018_v30 = vld [vmem:[#allocation11 + $0x1d0] sm:$0xff]  ;;  %16664 = vmatpush3.bf16.msra.mxu1 %v16663_v22  ;;  %v14040_v22 = vld [vmem:[#allocation11 + $0x280] sm:$0xff]  ;;  %v14057_v1 = vld [vmem:[#allocation11 + $0x308] sm:$0xff] }
 0x8e8   : > { %v16583_v38 = vpack.c.bf16 %v14018_v30, %v14016_v45  ;;  %16666 = vmatprep.subr.bf16.mxu1 %v16665_v26  ;;  %v14045_v45 = vld [vmem:[#allocation11 + $0x2a8] sm:$0xff]  ;;  %v14047_v26 = vld [vmem:[#allocation11 + $0x2b8] sm:$0xff]  ;;  %v14046_v30 = vld [vmem:[#allocation11 + $0x2b0] sm:$0xff] }
 0x8e9   : > { %v22538_v58 = vrot.slane %v22534_v40, %v20502_v50  ;;  %16568 = vmatpush1.bf16.msra.mxu0 %v16567_v53  ;;  %v14101_v61 = vcombine.high %v22534_v40, %v22534_v40  ;;  %v14292_v53 = vld [vmem:[#allocation14 + $0xd0] sm:$0xff]  ;;  %v16609_v47 = vpack.c.bf16 %v14047_v26, %v14045_v45  ;;  %v14073_v10 = vld [vmem:[#allocation11 + $0x388] sm:$0xff] }
 0x8ea   : > { %16570 = vmatprep.subr.bf16.mxu0 %v16569_v48  ;;  %v14293_v48 = vld [vmem:[#allocation14 + $0xd8] sm:$0xff]  ;;  %v14081_v17 = vld [vmem:[#allocation11 + $0x3c8] sm:$0xff] }
 0x8eb   : > { %v14116_v0 = vcombine.high %v22538_v58, %v22538_v58  ;;  %16668 = vmatpush3.bf16.msra.mxu1 %v16667_v55  ;;  %v22545_v8 = vrot.slane %v14101_v61, %v20502_v50  ;;  %v16673_v40 = vpack.c.bf16 %v14293_v48, %v14292_v53  ;;  %v14048_v55 = vld [vmem:[#allocation11 + $0x2c0] sm:$0xff]  ;;  %v14055_v61 = vld [vmem:[#allocation11 + $0x2f8] sm:$0xff]  ;;  %v14085_v45 = vld [vmem:[#allocation11 + $0x3e8] sm:$0xff] }
 0x8ec   : > { %16670 = vmatprep.subr.bf16.mxu1 %v16669_v29  ;;  %v14059_v53 = vld [vmem:[#allocation11 + $0x318] sm:$0xff]  ;;  %v14278_v37 = vld [vmem:[#allocation14 + $0x60] sm:$0xff] }
 0x8ed   : > { %14186 = vmatprep.mubr.f32.mxu0 %v14116_v0  ;;  %16572 = vmatpush1.bf16.msra.mxu0 %v16571_v13  ;;  %v14275_v0 = vld [vmem:[#allocation14 + $0x48] sm:$0xff]  ;;  %v14024_v13 = vld [vmem:[#allocation11 + $0x200] sm:$0xff]  ;;  %v14117_v50 = vcombine.high %v22545_v8, %v22545_v8  ;;  %v16621_v52 = vpack.c.bf16 %v14059_v53, %v14057_v1  ;;  %v14075_v59 = vld [vmem:[#allocation11 + $0x398] sm:$0xff] }
 0x8ee   : > { %16574 = vmatprep.subr.bf16.mxu0 %v16573_v6  ;;  %v16671_v5 = vpack.c.bf16 %v14275_v0, %v14274_v62  ;;  %v16675_v6 = vpack.c.bf16 %v14277_v12, %v14276_v57  ;;  %v16591_v20 = vpack.c.bf16 %v14026_v15, %v14024_v13  ;;  %v16617_v62 = vpack.c.bf16 %v14055_v61, %v14053_v41  ;;  %v14052_v0 = vld [vmem:[#allocation11 + $0x2e0] sm:$0xff]  ;;  %v14062_v13 = vld [vmem:[#allocation11 + $0x330] sm:$0xff]  ;;  %v14065_v15 = vld [vmem:[#allocation11 + $0x348] sm:$0xff] }
 0x8ef   : > { %v16629_v18 = vpack.c.bf16 %v14067_v60, %v14065_v15  ;;  %v14083_v25 = vld [vmem:[#allocation11 + $0x3d8] sm:$0xff]  ;;  %v14382_v60 = vld [vmem:[%s22647_s8 + $0x30] sm:$0xff] }
 0x8f0   : > { %16672 = vmatpush3.bf16.msra.mxu1 %v16671_v5  ;;  %v14058_v5 = vld [vmem:[#allocation11 + $0x310] sm:$0xff]  ;;  %v14087_v26 = vld [vmem:[#allocation11 + $0x3f8] sm:$0xff] }
 0x8f1   : > { %16576 = vmatpush1.bf16.msra.mxu0 %v16575_v11  ;;  %16674 = vmatprep.subr.bf16.mxu1 %v16673_v40  ;;  %v14032_v11 = vld [vmem:[#allocation11 + $0x240] sm:$0xff]  ;;  %v14063_v40 = vld [vmem:[#allocation11 + $0x338] sm:$0xff]  ;;  %v16623_v57 = vpack.c.bf16 %v14058_v5, %v14056_v56 }
 0x8f2   : > { %16578 = vmatprep.subr.bf16.mxu0 %v16577_v21  ;;  %v16599_v35 = vpack.c.bf16 %v14034_v32, %v14032_v11  ;;  %v16601_v21 = vpack.c.bf16 %v14039_v14, %v14037_v34  ;;  %v14072_v11 = vld [vmem:[#allocation11 + $0x380] sm:$0xff]  ;;  %v14074_v32 = vld [vmem:[#allocation11 + $0x390] sm:$0xff]  ;;  %v14077_v34 = vld [vmem:[#allocation11 + $0x3a8] sm:$0xff] }
 0x8f3   : > { %v14079_v14 = vld [vmem:[#allocation11 + $0x3b8] sm:$0xff] }
 0x8f4   : > { %16676 = vmatpush3.bf16.msra.mxu1 %v16675_v6  ;;  %v14066_v6 = vld [vmem:[#allocation11 + $0x350] sm:$0xff]  ;;  %v14377_v5 = vld [vmem:[%s22647_s8 + $0x8] sm:$0xff] }
 0x8f5   : > { %16580 = vmatpush1.bf16.msra.mxu0 %v16579_v42  ;;  %16678 = vmatprep.subr.bf16.mxu1 %v16677_v7  ;;  %v14042_v42 = vld [vmem:[#allocation11 + $0x290] sm:$0xff] }
 0x8f6   : > { %16582 = vmatprep.subr.bf16.mxu0 %v16581_v49  ;;  %v16607_v24 = vpack.c.bf16 %v14042_v42, %v14040_v22  ;;  %v14044_v49 = vld [vmem:[#allocation11 + $0x2a0] sm:$0xff]  ;;  %v14070_v7 = vld [vmem:[#allocation11 + $0x370] sm:$0xff] }
 0x8f7   : > { %v16611_v33 = vpack.c.bf16 %v14046_v30, %v14044_v49  ;;  %v14080_v22 = vld [vmem:[#allocation11 + $0x3c0] sm:$0xff]  ;;  %v14082_v42 = vld [vmem:[#allocation11 + $0x3d0] sm:$0xff] }
 0x8f8   : > { %v14084_v49 = vld [vmem:[#allocation11 + $0x3e0] sm:$0xff]  ;;  %v14086_v30 = vld [vmem:[#allocation11 + $0x3f0] sm:$0xff] }
 0x8f9   : > { %16584 = vmatpush1.bf16.msra.mxu0 %v16583_v38  ;;  %v14050_v38 = vld [vmem:[#allocation11 + $0x2d0] sm:$0xff]  ;;  %v16651_v51 = vpack.c.bf16 %v14086_v30, %v14084_v49 }
 0x8fa   : > { %16586 = vmatprep.subr.bf16.mxu0 %v16585_v46  ;;  %v16615_v29 = vpack.c.bf16 %v14050_v38, %v14048_v55  ;;  %v14054_v46 = vld [vmem:[#allocation11 + $0x2f0] sm:$0xff]  ;;  %v14297_v38 = vld [vmem:[#allocation14 + $0xf8] sm:$0xff] }
 0x8fb   : > { %v16619_v48 = vpack.c.bf16 %v14054_v46, %v14052_v0  ;;  %v14296_v55 = vld [vmem:[#allocation14 + $0xf0] sm:$0xff]  ;;  %v20088_v0 = vmov 0.0|0.0   ;;  %v14088_v46 = vld [vmem:[#allocation13] sm:$0x3] }
 0x8fc   : > { %v16681_v41 = vpack.c.bf16 %v14297_v38, %v14296_v55  ;;  %v14280_v61 = vld [vmem:[#allocation14 + $0x70] sm:$0xff]  ;;  %v14093_v1 = vrot.slane %v14088_v46, %v13926_v16 }
 0x8fd   : > { %16588 = vmatpush1.bf16.msra.mxu0 %v16587_v54  ;;  %v14061_v54 = vld [vmem:[#allocation11 + $0x328] sm:$0xff]  ;;  %v14376_v56 = vld [vmem:[%s22647_s8] sm:$0xff] }
 0x8fe   : > { %16590 = vmatprep.subr.bf16.mxu0 %v16589_v43  ;;  %v16625_v12 = vpack.c.bf16 %v14063_v40, %v14061_v54  ;;  %v14060_v43 = vld [vmem:[#allocation11 + $0x320] sm:$0xff]  ;;  %v14379_v16 = vld [vmem:[%s22647_s8 + $0x18] sm:$0xff] }
 0x8ff   : > { %v16627_v63 = vpack.c.bf16 %v14062_v13, %v14060_v43  ;;  %v14380_v43 = vld [vmem:[%s22647_s8 + $0x20] sm:$0xff]  ;;  %v14381_v13 = vld [vmem:[%s22647_s8 + $0x28] sm:$0xff] }
 0x900   : > { %14187 = vmatmul.mubr.f32.vlgmr.msra.gmra.mrb[0].mxu0 %v22538_v58  ;;  %v16603_v58 = vpack.c.bf16 %v14038_v19, %v14036_v27  ;;  %v14076_v27 = vld [vmem:[#allocation11 + $0x3a0] sm:$0xff]  ;;  %v14078_v19 = vld [vmem:[#allocation11 + $0x3b0] sm:$0xff]  ;;  %v16692_v15 = vpack.c.bf16 %v14381_v13, %v14380_v43 }
 0x901   : > { %16592 = vmatpush1.bf16.msra.mxu0 %v16591_v20  ;;  %14257 = vmatprep.mubr.f32.mxu0 %v14117_v50  ;;  %v14069_v20 = vld [vmem:[#allocation11 + $0x368] sm:$0xff]  ;;  %v14071_v50 = vld [vmem:[#allocation11 + $0x378] sm:$0xff] }
 0x902   : > { %16594 = vmatprep.subr.bf16.mxu0 %v16593_v4  ;;  %v16631_v4 = vpack.c.bf16 %v14066_v6, %v14064_v2  ;;  %v16633_v9 = vpack.c.bf16 %v14071_v50, %v14069_v20  ;;  %v14384_v2 = vld [vmem:[%s22647_s8 + $0x40] sm:$0xff]  ;;  %v14385_v6 = vld [vmem:[%s22647_s8 + $0x48] sm:$0xff]  ;;  %v14386_v50 = vld [vmem:[%s22647_s8 + $0x50] sm:$0xff] }
 0x903   : > { %v16698_v20 = vpack.c.bf16 %v14385_v6, %v14384_v2 }
 0x905   : > { %16596 = vmatpush1.bf16.msra.mxu0 %v16595_v28  ;;  %v16635_v28 = vpack.c.bf16 %v14070_v7, %v14068_v23  ;;  %v14388_v23 = vld [vmem:[%s22647_s8 + $0x60] sm:$0xff]  ;;  %v14389_v7 = vld [vmem:[%s22647_s8 + $0x68] sm:$0xff] }
 0x906   : > { %16598 = vmatprep.subr.bf16.mxu0 %v16597_v31  ;;  %v16637_v31 = vpack.c.bf16 %v14075_v59, %v14073_v10  ;;  %v16704_v10 = vpack.c.bf16 %v14389_v7, %v14388_v23  ;;  %v14390_v59 = vld [vmem:[%s22647_s8 + $0x70] sm:$0xff] }
 0x909   : > { %16600 = vmatpush1.bf16.msra.mxu0 %v16599_v35  ;;  %v16639_v35 = vpack.c.bf16 %v14074_v32, %v14072_v11  ;;  %v20090_v11 = vmov 0.0  }
 0x90a   : > { %16602 = vmatprep.subr.bf16.mxu0 %v16601_v21  ;;  %v16641_v21 = vpack.c.bf16 %v14079_v14, %v14077_v34  ;;  %v16427_v34 = vld [vmem:[#allocation16] ss:$0 sm:$0xff] }
 0x90d   : > { %16604 = vmatpush1.bf16.msra.mxu0 %v16603_v58  ;;  %v16643_v58 = vpack.c.bf16 %v14078_v19, %v14076_v27  ;;  %v16428_v19 = vld [vmem:[#allocation17] ss:$0 sm:$0xff] }
 0x90e   : > { %16606 = vmatprep.subr.bf16.mxu0 %v16605_v39  ;;  %v16645_v39 = vpack.c.bf16 %v14083_v25, %v14081_v17 }
 0x911   : > { %16608 = vmatpush1.bf16.msra.mxu0 %v16607_v24  ;;  %v16647_v24 = vpack.c.bf16 %v14082_v42, %v14080_v22 }
 0x912   : > { %16610 = vmatprep.subr.bf16.mxu0 %v16609_v47  ;;  %v16649_v47 = vpack.c.bf16 %v14087_v26, %v14085_v45 }
 0x915   : > { %16612 = vmatpush1.bf16.msra.mxu0 %v16611_v33  ;;  %v14279_v33 = vld [vmem:[#allocation14 + $0x68] sm:$0xff] }
 0x916   : > { %16614 = vmatprep.subr.bf16.mxu0 %v16613_v36  ;;  %v16679_v36 = vpack.c.bf16 %v14279_v33, %v14278_v37 }
 0x918   : > { %16680 = vmatpush3.bf16.msra.mxu1 %v16679_v36 }
 0x919   : > { %16616 = vmatpush1.bf16.msra.mxu0 %v16615_v29  ;;  %v14281_v29 = vld [vmem:[#allocation14 + $0x78] sm:$0xff]  ;;  %16682 = vmatprep.subr.bf16.mxu1 %v16681_v41 }
 0x91a   : > { %16618 = vmatprep.subr.bf16.mxu0 %v16617_v62  ;;  %v16683_v62 = vpack.c.bf16 %v14281_v29, %v14280_v61 }
 0x91c   : > { %16684 = vmatpush3.bf16.msra.mxu1 %v16683_v62 }
 0x91d   : > { %16620 = vmatpush1.bf16.msra.mxu0 %v16619_v48  ;;  %16685 = vmatprep.subr.bf16.mxu1 %v20088_v0 }
 0x91e   : > { %16622 = vmatprep.subr.bf16.mxu0 %v16621_v52 }
 0x921   : > { %16624 = vmatpush1.bf16.msra.mxu0 %v16623_v57  ;;  %v16686_v57 = vpack.c.bf16 %v14377_v5, %v14376_v56 }
 0x922   : > { %16626 = vmatprep.subr.bf16.mxu0 %v16625_v12 }
 0x925   : > { %16628 = vmatpush1.bf16.msra.mxu0 %v16627_v63  ;;  %v14383_v63 = vld [vmem:[%s22647_s8 + $0x38] sm:$0xff] }
 0x926   : > { %16630 = vmatprep.subr.bf16.mxu0 %v16629_v18  ;;  %v16695_v18 = vpack.c.bf16 %v14383_v63, %v14382_v60 }
 0x929   : > { %16632 = vmatpush1.bf16.msra.mxu0 %v16631_v4  ;;  %v14387_v4 = vld [vmem:[%s22647_s8 + $0x58] sm:$0xff] }
 0x92a   : > { %16634 = vmatprep.subr.bf16.mxu0 %v16633_v9  ;;  %v16701_v9 = vpack.c.bf16 %v14387_v4, %v14386_v50 }
 0x92d   : > { %16636 = vmatpush1.bf16.msra.mxu0 %v16635_v28  ;;  %v14391_v28 = vld [vmem:[%s22647_s8 + $0x78] sm:$0xff] }
 0x92e   : > { %16638 = vmatprep.subr.bf16.mxu0 %v16637_v31  ;;  %v16707_v31 = vpack.c.bf16 %v14391_v28, %v14390_v59 }
 0x931   : > { %16640 = vmatpush1.bf16.msra.mxu0 %v16639_v35 }
 0x932   : > { %16642 = vmatprep.subr.bf16.mxu0 %v16641_v21 }
 0x935   : > { %16644 = vmatpush1.bf16.msra.mxu0 %v16643_v58 }
 0x936   : > { %16646 = vmatprep.subr.bf16.mxu0 %v16645_v39 }
 0x939   : > { %16648 = vmatpush1.bf16.msra.mxu0 %v16647_v24 }
 0x93a   : > { %16650 = vmatprep.subr.bf16.mxu0 %v16649_v47 }
 0x93d   : > { %16652 = vmatpush1.bf16.msra.mxu0 %v16651_v51 }
 0x940   : > { %14258 = vmatmul.mubr.f32.vlgmr.msra.gmra.mrb[0].mxu0 %v22545_v8  ;;  %v14097_v8 = vrot.slane %v14088_v46, %v13930_v3  ;;  %v16689_v3 = vpack.c.bf16 %v14379_v16, %v14378_v44 }
 0xa13   : > { %v14259_v53 = vpop.f32.mrb[0].mxu0 }
 0xa14   : > { %v16925_v48 = vadd.f32 %v14259_v53, %v14093_v1  ;;  %v14261_v52 = vpop.f32.mrb[1].mxu0 }
 0xa15   : > { %v16926_v54 = vadd.f32 %v14261_v52, %v14097_v8 }
 0xa16   : > { %v14264_v12 = vmax.f32 %v16925_v48, 0.0 }
 0xa17   : > { %v14265_v40 = vmax.f32 %v16926_v54, 0.0 }
 0xa19   : > { %14369 = vmatprep.mubr.f32.mxu1 %v14265_v40 }
 0xa1a   : > { %14370 = vmatmul.mubr.f32.vlgmr.msra.gmra.mrb[0].mxu1 %v14264_v12 }
 0xa1b   : > { %16687 = vmatpush3.bf16.msra.mxu1 %v16686_v57  ;;  %16522 = vmatprep.mubr.msk.f32.mxu1 %vm20089_vm0, %v20090_v11 }
 0xa1c   : > { %16688 = vmatprep.subr.bf16.mxu1 %v20088_v0 }
 0xa1f   : > { %16690 = vmatpush3.bf16.msra.mxu1 %v16689_v3 }
 0xa20   : > { %16691 = vmatprep.subr.bf16.mxu1 %v20088_v0 }
 0xa23   : > { %16693 = vmatpush3.bf16.msra.mxu1 %v16692_v15 }
 0xa24   : > { %16694 = vmatprep.subr.bf16.mxu1 %v20088_v0 }
 0xa27   : > { %16696 = vmatpush3.bf16.msra.mxu1 %v16695_v18 }
 0xa28   : > { %16697 = vmatprep.subr.bf16.mxu1 %v20088_v0 }
 0xa2b   : > { %16699 = vmatpush3.bf16.msra.mxu1 %v16698_v20 }
 0xa2c   : > { %16700 = vmatprep.subr.bf16.mxu1 %v20088_v0 }
 0xa2f   : > { %16702 = vmatpush3.bf16.msra.mxu1 %v16701_v9 }
 0xa30   : > { %16703 = vmatprep.subr.bf16.mxu1 %v20088_v0 }
 0xa33   : > { %16705 = vmatpush3.bf16.msra.mxu1 %v16704_v10 }
 0xa34   : > { %16706 = vmatprep.subr.bf16.mxu1 %v20088_v0 }
 0xa37   : > { %16708 = vmatpush3.bf16.msra.mxu1 %v16707_v31 }
 0xaed   : > { %v16470_v32 = vpop.f32.mrb[0].mxu1 }
 0xaee   : > { %v16471_v14 = vpop.f32.mrb[1].mxu1 }
 0xaef   : > { %v16472_v35 = vadd.f32 %v16471_v14, %v16470_v32 }
 0xaf1   : > { %v14372_v21 = vadd.f32 %v16472_v35, %v16427_v34 }
 0xaf3   : > { %v14375_v27 = vmax.f32 %v14372_v21, 0.0 }
 0xaf5   : > { %16523 = vmatmul.mubr.f32.vlgmr.msra.gmra.mrb[2].mxu1 %v14375_v27 }
 0xbc8   : > { %v14465_v17 = vpop.f32.mrb[2].mxu1 }
 0xbc9   : > { %v14466_v25 = vadd.f32 %v16428_v19, %v14465_v17  ;;  %v16524_v58 = vpop.f32.mrb[3].mxu1 }
 0xbcb   : > { %v16429_v39 = vmul.f32 -1.442695, %v14466_v25 }
 0xbcd   : > { %19756 = vpow2.f32 %v16429_v39 }
 0xbd7   : > { %v19757_v22 = vpop.eup %19756 }
 0xbd8   : > { %v14472_v42 = vadd.f32 1.0, %v19757_v22 }
 0xbda   : > { %19758 = vrcp.f32 %v14472_v42 }
 0xbe4   : > { %v19759_v45 = vpop.eup %19758 }
 0xbe5   : > { %14476 = vst.msk [vmem:[#allocation19] sm:$0x3] %vm14475_vm1, %v19759_v45 }
 0xbe6 PF: > { %p17004_p1 = scmp.eq.s32.totalorder %s20168_s18, 13  ;;  %s20091_s21 = smov [#allocation19]  }
 0xbe7   : > { %s14484_s12 = sshll.u32 %s20091_s21, 4  ;;  %s14485_s12 = int_to_ptr.vmem [resolvable:$true] %s14484_s12 }
 0xbe8   : > { %s19988_s10 = scalar_lea.vmem %s14485_s12, 32  ;;  %p19995_p6 = scmp.lt.s32.totalorder %s14485_s12, %s14485_s12 }
 0xbe9   : > { %p19989_p4 = scmp.ne.s32.totalorder %s14485_s12, %s19988_s10  ;;  %p19996_p3 = scmp.lt.s32.totalorder %s19988_s10, %s19988_s10 }
 0xbeb   : > { %p19990_p10 = pnand %p19989_p4, %p17004_p1  ;;  %p19997_p12 = por %p19996_p3, %p19995_p6 }
 0xbed   : > { %p19991_p13 = pneg %p19990_p10 }
 0xbef   : > { %p19998_p0 = pnand %p19997_p12, %p19991_p13 }
 0xbf1   : > { %20001 = shalt.err (!%p19998_p0)
}
 0xbf2   : > { %s22678_s3 = sld [smem:[#allocation29_spill]] }
 0xbf8   : > { %s20002_s19 = scalar_lea.hbm %s22678_s3, 32 }
 0xbf9   : > { %p20003_p5 = scmp.ne.s32.totalorder %s22678_s3, %s20002_s19  ;;  %p20008_p7 = scmp.lt.u32.totalorder %s20002_s19, %s22678_s3 }
 0xbfb   : > { %p20004_p8 = pnand %p20003_p5, %p17004_p1 }
 0xbfd   : > { %p20005_p11 = pneg %p20004_p8 }
 0xbff   : > { %p20010_p2 = pnand %p20008_p7, %p20005_p11 }
 0xc01   : > { %20013 = shalt.err (!%p20010_p2)
}
 0xc02   : > { %16962 = dma.vmem_to_hbm [thread:$0]  (%p17004_p1), %s14485_s12, 32, %s22678_s3, [#allocation7]  }
 0xc03   : > { %20055 = dma.done.wait (%p17004_p1), [#allocation7], 32  }
 0xc04   : > { %20057 = vsyncadd (%p17004_p1), [#allocation7], 4294967264 }
 0xc05 PF: > { %p28_p9 = scmp.ge.s32.totalorder %s20318_s29, 16   ;;  %s22679_s12 = smov %s20064_s13 }
 0xc06   : > { %s22680_s13 = smov %s20068_s14  ;;  %s22681_s14 = smov %s20330_s30 }
 0xc07   : > { %s22682_s15 = smov %s20318_s29  ;;  %30 = sbr.rel (!%p28_p9) target bundleno = 13 (0xd), region = 138 }
 0xc0e   :  { %14497 = vsyncpa [#allocation6], 1 }
 0xc0f   :  { %14499 = vsyncpa [#allocation6 + $0x1], 1 }
 0xc10   :  { %14500 = vsyncpa [#allocation9], 1 }
 0xc11   :  { %14502 = vsyncpa [#allocation9 + $0x1], 1 }
 0xc12   :  { %14503 = vsyncpa [#allocation12], 1 }
 0xc13   :  { %14504 = vsyncpa [#allocation15], 1 }
 0xc14   :  { %14505 = vsyncpa [#allocation18], 1 }
 0xc15   :  { %14506 = vsyncpa [#allocation7], 1 }
 0xc16   :  { %14508 = vsyncpa [#allocation7 + $0x1], 1 }

</bundles_post_ra>
